<compile_context>
chip_gen: v7x
topology: tpu7x:2x2x1
jax: 0.10.0
libtpu: 0.0.40
codegen_flags: <defaults>
</compile_context>

<pallas_src>
from functools import partial

import jax
import jax.numpy as jnp
from jax.experimental import pallas as pl
from jax.experimental.pallas import tpu as pltpu


# ----------------------------------------------------------------------------
# In-kernel helpers (operate on VMEM-resident jnp values, NHWC per batch elem)
# ----------------------------------------------------------------------------
def _zero_pad1(x):
    """(H, W, C) -> (H+2, W+2, C): zero padding of 1 on both spatial dims."""
    H, W, C = x.shape
    zr = jnp.zeros((1, W, C), x.dtype)
    x = jnp.concatenate([zr, x, zr], axis=0)
    zc = jnp.zeros((H + 2, 1, C), x.dtype)
    return jnp.concatenate([zc, x, zc], axis=1)


def _upsample2x_reflect_pad1(x):
    """(H, W, C) -> (2H+2, 2W+2, C): nearest-x2 upsample then reflect pad of 1.

    After nearest-x2 doubling, reflect padding of 1 equals edge replication
    (row 1 of the doubled map == row 0, etc.), so edge rows/cols are reused.
    """
    H, W, C = x.shape
    # double rows: (H, W, C) -> (H, 2, W, C) -> (2H, W, C)  (leading-dim reshape only)
    x = jnp.broadcast_to(x[:, None, :, :], (H, 2, W, C)).reshape(2 * H, W, C)
    # pad rows (replicate == reflect here)
    x = jnp.concatenate([x[:1], x, x[-1:]], axis=0)                 # (2H+2, W, C)
    Hp = 2 * H + 2
    # double cols: (Hp, W, C) -> (Hp, W, 2, C) -> (Hp, 2W, C)
    x = jnp.broadcast_to(x[:, :, None, :], (Hp, W, 2, C)).reshape(Hp, 2 * W, C)
    # pad cols
    x = jnp.concatenate([x[:, :1, :], x, x[:, -1:, :]], axis=1)     # (Hp, 2W+2, C)
    return x


def _im2col3x3(xp):
    """(H+2, W+2, Cin) padded input -> (H*W, 9*Cin) im2col patch matrix.

    Three column-shifted flattened views are built once and reused for the three
    row taps (which become contiguous sublane slices). Tap order is ky-major,
    kx-minor, matching w.reshape(9*Cin, Cout).
    """
    Hp, Wp, Cin = xp.shape
    H, W = Hp - 2, Wp - 2
    cols = [xp[:, kx:kx + W, :].reshape(Hp * W, Cin) for kx in range(3)]
    patches = [cols[kx][ky * W:(ky + H) * W, :] for ky in range(3) for kx in range(3)]
    return jnp.concatenate(patches, axis=1)                         # (H*W, 9*Cin)


def _instance_norm_relu(acc, axis):
    """InstanceNorm2d(affine=False, eps=1e-5, biased var) + ReLU in f32, one-pass stats."""
    mean = jnp.mean(acc, axis=axis, keepdims=True)
    mean_sq = jnp.mean(acc * acc, axis=axis, keepdims=True)
    var = jnp.maximum(mean_sq - mean * mean, 0.0)
    y = (acc - mean) * jax.lax.rsqrt(var + 1e-5)
    return jnp.maximum(y, 0.0)


# ----------------------------------------------------------------------------
# Fused generator kernel: one batch element per grid step, all layers in VMEM
# ----------------------------------------------------------------------------
def _generator_kernel(x_ref, *refs):
    """refs = (w0, ..., w_{L-1}, o_ref).

    x_ref:        (1, ls, ls, C0) f32 latent block (NHWC)
    w_l, l < L-1: (9*Cin_l, Cout_l) bf16 flattened conv weights
    w_{L-1}:      (Cout, 9*Cin) bf16 (pre-transposed -> lane-dense final accumulator)
    o_ref:        (1, Cout, H_out*W_out) f32 (lane-dense store)
    """
    w_refs, o_ref = refs[:-1], refs[-1]
    n_layers = len(w_refs)

    x = x_ref[0]                                                    # (ls, ls, C0) f32
    for li in range(n_layers):
        xp = _zero_pad1(x) if li == 0 else _upsample2x_reflect_pad1(x)
        Hp, Wp, _ = xp.shape
        H, W = Hp - 2, Wp - 2

        patches = _im2col3x3(xp).astype(jnp.bfloat16)               # (H*W, 9*Cin)
        w = w_refs[li][...]                                         # bf16

        if li < n_layers - 1:
            acc = jnp.dot(patches, w, preferred_element_type=jnp.float32)   # (H*W, Cout)
            y = _instance_norm_relu(acc, axis=0)
            # Re-expose row structure for the next layer's upsample/pad:
            # leading-dim concat of contiguous row blocks (no lane reshuffle).
            x = jnp.concatenate([y[r * W:(r + 1) * W][None] for r in range(H)], axis=0)
        else:
            # Final layer: accumulate transposed so the only HBM store is lane-dense.
            acc = jax.lax.dot_general(
                w, patches, dimension_numbers=(((1,), (1,)), ((), ())),
                preferred_element_type=jnp.float32)                 # (Cout, H*W)
            o_ref[0] = _instance_norm_relu(acc, axis=1)


# ----------------------------------------------------------------------------
# Forward wrapper (only tiny boundary glue in XLA: latent reshape, weight flatten)
# ----------------------------------------------------------------------------
def vanilla_generator_forward(x, params, latent_channels, latent_scale):
    """x: (B, latent_dim) f32.  Returns (B, Cout, H, W) NCHW like the PyTorch module."""
    B = x.shape[0]
    n_layers = len(params)

    # PyTorch: x.view(-1, latent_channels, latent_scale, latent_scale) (NCHW) -> NHWC.
    h = x.reshape(B, latent_channels, latent_scale, latent_scale)
    h = jnp.transpose(h, (0, 2, 3, 1)).astype(jnp.float32)          # (B, ls, ls, C0)

    # Flatten conv weights to (9*Cin, Cout) (tap-major), bf16 for the MXU. The last
    # layer's weight is pre-transposed for the lane-dense (Cout, H*W) accumulator.
    # Conv biases are intentionally unused: InstanceNorm(affine=False) cancels them.
    ws = []
    for li, p in enumerate(params):
        kh, kw, cin, cout = p["w"].shape
        wf = p["w"].reshape(kh * kw * cin, cout)
        if li == n_layers - 1:
            wf = wf.T
        ws.append(wf.astype(jnp.bfloat16))

    side = latent_scale * 2 ** (n_layers - 1)
    c_out = params[-1]["w"].shape[-1]
    n_out = side * side

    out_flat = pl.pallas_call(
        _generator_kernel,
        out_shape=jax.ShapeDtypeStruct((B, c_out, n_out), jnp.float32),
        grid=(B,),
        in_specs=[pl.BlockSpec((1, latent_scale, latent_scale, latent_channels),
                               lambda b: (b, 0, 0, 0))]
                 + [pl.BlockSpec(w.shape, lambda b: (0, 0)) for w in ws],
        out_specs=pl.BlockSpec((1, c_out, n_out), lambda b: (b, 0, 0)),
        compiler_params=pltpu.CompilerParams(dimension_semantics=("parallel",)),
    )(h, *ws)

    return out_flat.reshape(B, c_out, side, side)                   # NCHW


# ----------------------------------------------------------------------------
# Deterministic parameter init (Conv2d-style uniform bounds)
# ----------------------------------------------------------------------------
def init_conv(key, cin, cout):
    kw, kb = jax.random.split(key)
    bound = 1.0 / (cin * 9) ** 0.5
    w = jax.random.uniform(kw, (3, 3, cin, cout), jnp.float32, -bound, bound)
    # Bias kept for module fidelity but unused: InstanceNorm(affine=False) cancels it.
    b = jax.random.uniform(kb, (1, cout), jnp.float32, -bound, bound)
    return {"w": w, "b": b}


if __name__ == "__main__":
    # cfg: load_size=128, latent_dim=32, ngf=2
    load_size = 128
    latent_dim = 32
    ngf = 2
    latent_scale = load_size // 2 ** 6                    # = 2
    latent_channels = latent_dim // latent_scale ** 2     # = 8

    channels = [
        (latent_channels, ngf * 16),   # ConvBlock      8 -> 32  @ 2x2
        (ngf * 16, ngf * 16),          # UpsampleBlock 32 -> 32  @ 4x4
        (ngf * 16, ngf * 16),          # UpsampleBlock 32 -> 32  @ 8x8
        (ngf * 16, ngf * 16),          # UpsampleBlock 32 -> 32  @ 16x16
        (ngf * 16, ngf * 8),           # UpsampleBlock 32 -> 16  @ 32x32
    ]
    pkeys = jax.random.split(jax.random.PRNGKey(42), len(channels))
    params = [init_conv(k, cin, cout) for k, (cin, cout) in zip(pkeys, channels)]

    # Input latent: (batch, latent_dim)
    x = jax.random.normal(jax.random.PRNGKey(0), (2, latent_dim), jnp.float32)

    fwd = jax.jit(partial(vanilla_generator_forward,
                          latent_channels=latent_channels,
                          latent_scale=latent_scale))
    out = fwd(x, params)
    jax.block_until_ready(out)

    assert out.shape == (2, ngf * 8, 32, 32), out.shape
    assert jnp.all(jnp.isfinite(out))
    print("KERNEL_OK")
</pallas_src>

<mosaic_0001>
module attributes {stable_mosaic.version = 11 : i64} {
  func.func @_generator_kernel(%arg0: i32, %arg1: memref<1x2x2x8xf32, #tpu.memory_space<vmem>>, %arg2: memref<72x32xbf16, #tpu.memory_space<vmem>>, %arg3: memref<288x32xbf16, #tpu.memory_space<vmem>>, %arg4: memref<288x32xbf16, #tpu.memory_space<vmem>>, %arg5: memref<288x32xbf16, #tpu.memory_space<vmem>>, %arg6: memref<16x288xbf16, #tpu.memory_space<vmem>>, %arg7: memref<1x16x1024xf32, #tpu.memory_space<vmem>>) attributes {dimension_semantics = [#tpu.dimension_semantics<parallel>], iteration_bounds = array<i64: 2>, scalar_prefetch = 0 : i64, scratch_operands = 0 : i64, tpu.core_type = #tpu.core_type<tc>, window_params = [{transform_indices = @transform_0, window_bounds = array<i64: 1, 2, 2, 8>}, {pipeline_mode = #tpu.pipeline_mode<synchronous>, transform_indices = @transform_1, window_bounds = array<i64: 72, 32>}, {pipeline_mode = #tpu.pipeline_mode<synchronous>, transform_indices = @transform_2, window_bounds = array<i64: 288, 32>}, {pipeline_mode = #tpu.pipeline_mode<synchronous>, transform_indices = @transform_3, window_bounds = array<i64: 288, 32>}, {pipeline_mode = #tpu.pipeline_mode<synchronous>, transform_indices = @transform_4, window_bounds = array<i64: 288, 32>}, {pipeline_mode = #tpu.pipeline_mode<synchronous>, transform_indices = @transform_5, window_bounds = array<i64: 16, 288>}, {transform_indices = @transform_6, window_bounds = array<i64: 1, 16, 1024>}]} {
    %c0 = arith.constant 0 : index
    %c0_0 = arith.constant 0 : index
    %c0_1 = arith.constant 0 : index
    %c0_2 = arith.constant 0 : index
    %0 = vector.load %arg1[%c0, %c0_0, %c0_1, %c0_2] : memref<1x2x2x8xf32, #tpu.memory_space<vmem>>, vector<1x2x2x8xf32>
    %1 = vector.shape_cast %0 : vector<1x2x2x8xf32> to vector<2x2x8xf32>
    %cst = arith.constant 0.000000e+00 : f32
    %2 = vector.broadcast %cst : f32 to vector<1x2x8xf32>
    %3 = tpu.concatenate %2, %1, %2 in 0 : vector<1x2x8xf32>, vector<2x2x8xf32>, vector<1x2x8xf32> -> vector<4x2x8xf32>
    %cst_3 = arith.constant 0.000000e+00 : f32
    %4 = vector.broadcast %cst_3 : f32 to vector<4x1x8xf32>
    %5 = tpu.concatenate %4, %3, %4 in 1 : vector<4x1x8xf32>, vector<4x2x8xf32>, vector<4x1x8xf32> -> vector<4x4x8xf32>
    %6 = vector.extract_strided_slice %5 {offsets = [0, 0, 0], sizes = [4, 2, 8], strides = [1, 1, 1]} : vector<4x4x8xf32> to vector<4x2x8xf32>
    %7 = vector.shape_cast %6 : vector<4x2x8xf32> to vector<8x8xf32>
    %8 = vector.extract_strided_slice %5 {offsets = [0, 1, 0], sizes = [4, 2, 8], strides = [1, 1, 1]} : vector<4x4x8xf32> to vector<4x2x8xf32>
    %9 = vector.shape_cast %8 : vector<4x2x8xf32> to vector<8x8xf32>
    %10 = vector.extract_strided_slice %5 {offsets = [0, 2, 0], sizes = [4, 2, 8], strides = [1, 1, 1]} : vector<4x4x8xf32> to vector<4x2x8xf32>
    %11 = vector.shape_cast %10 : vector<4x2x8xf32> to vector<8x8xf32>
    %12 = vector.extract_strided_slice %7 {offsets = [0, 0], sizes = [4, 8], strides = [1, 1]} : vector<8x8xf32> to vector<4x8xf32>
    %13 = vector.extract_strided_slice %9 {offsets = [0, 0], sizes = [4, 8], strides = [1, 1]} : vector<8x8xf32> to vector<4x8xf32>
    %14 = vector.extract_strided_slice %11 {offsets = [0, 0], sizes = [4, 8], strides = [1, 1]} : vector<8x8xf32> to vector<4x8xf32>
    %15 = vector.extract_strided_slice %7 {offsets = [2, 0], sizes = [4, 8], strides = [1, 1]} : vector<8x8xf32> to vector<4x8xf32>
    %16 = vector.extract_strided_slice %9 {offsets = [2, 0], sizes = [4, 8], strides = [1, 1]} : vector<8x8xf32> to vector<4x8xf32>
    %17 = vector.extract_strided_slice %11 {offsets = [2, 0], sizes = [4, 8], strides = [1, 1]} : vector<8x8xf32> to vector<4x8xf32>
    %18 = vector.extract_strided_slice %7 {offsets = [4, 0], sizes = [4, 8], strides = [1, 1]} : vector<8x8xf32> to vector<4x8xf32>
    %19 = vector.extract_strided_slice %9 {offsets = [4, 0], sizes = [4, 8], strides = [1, 1]} : vector<8x8xf32> to vector<4x8xf32>
    %20 = vector.extract_strided_slice %11 {offsets = [4, 0], sizes = [4, 8], strides = [1, 1]} : vector<8x8xf32> to vector<4x8xf32>
    %21 = tpu.concatenate %12, %13, %14, %15, %16, %17, %18, %19, %20 in 1 : vector<4x8xf32>, vector<4x8xf32>, vector<4x8xf32>, vector<4x8xf32>, vector<4x8xf32>, vector<4x8xf32>, vector<4x8xf32>, vector<4x8xf32>, vector<4x8xf32> -> vector<4x72xf32>
    %22 = arith.truncf %21 : vector<4x72xf32> to vector<4x72xbf16>
    %c0_4 = arith.constant 0 : index
    %c0_5 = arith.constant 0 : index
    %23 = vector.load %arg2[%c0_4, %c0_5] : memref<72x32xbf16, #tpu.memory_space<vmem>>, vector<72x32xbf16>
    %cst_6 = arith.constant dense<0.000000e+00> : vector<4x32xf32>
    %24 = tpu.matmul %22, %23, %cst_6 {dimension_numbers = #tpu.dot_dimension_numbers<[1], [0], [0], [1], [0, 0, 1, 1], [], []>} : vector<4x72xbf16>, vector<72x32xbf16>, vector<4x32xf32> -> vector<4x32xf32>
    %cst_7 = arith.constant dense<0.000000e+00> : vector<32xf32>
    %25 = vector.multi_reduction <add>, %24, %cst_7 [0] : vector<4x32xf32> to vector<32xf32>
    %26 = vector.shape_cast %25 : vector<32xf32> to vector<1x32xf32>
    %cst_8 = arith.constant 4.000000e+00 : f32
    %27 = vector.broadcast %cst_8 : f32 to vector<1x32xf32>
    %28 = arith.divf %26, %27 : vector<1x32xf32>
    %29 = arith.mulf %24, %24 : vector<4x32xf32>
    %cst_9 = arith.constant dense<0.000000e+00> : vector<32xf32>
    %30 = vector.multi_reduction <add>, %29, %cst_9 [0] : vector<4x32xf32> to vector<32xf32>
    %31 = vector.shape_cast %30 : vector<32xf32> to vector<1x32xf32>
    %cst_10 = arith.constant 4.000000e+00 : f32
    %32 = vector.broadcast %cst_10 : f32 to vector<1x32xf32>
    %33 = arith.divf %31, %32 : vector<1x32xf32>
    %34 = arith.mulf %28, %28 : vector<1x32xf32>
    %35 = arith.subf %33, %34 : vector<1x32xf32>
    %cst_11 = arith.constant 0.000000e+00 : f32
    %36 = vector.broadcast %cst_11 : f32 to vector<1x32xf32>
    %37 = arith.maximumf %35, %36 : vector<1x32xf32>
    %38 = vector.broadcast %28 : vector<1x32xf32> to vector<4x32xf32>
    %39 = arith.subf %24, %38 : vector<4x32xf32>
    %cst_12 = arith.constant 9.99999974E-6 : f32
    %40 = vector.broadcast %cst_12 : f32 to vector<1x32xf32>
    %41 = arith.addf %37, %40 : vector<1x32xf32>
    %42 = math.rsqrt %41 : vector<1x32xf32>
    %43 = vector.broadcast %42 : vector<1x32xf32> to vector<4x32xf32>
    %44 = arith.mulf %39, %43 : vector<4x32xf32>
    %cst_13 = arith.constant 0.000000e+00 : f32
    %45 = vector.broadcast %cst_13 : f32 to vector<4x32xf32>
    %46 = arith.maximumf %44, %45 : vector<4x32xf32>
    %47 = vector.extract_strided_slice %46 {offsets = [0, 0], sizes = [2, 32], strides = [1, 1]} : vector<4x32xf32> to vector<2x32xf32>
    %48 = vector.shape_cast %47 : vector<2x32xf32> to vector<1x2x32xf32>
    %49 = vector.extract_strided_slice %46 {offsets = [2, 0], sizes = [2, 32], strides = [1, 1]} : vector<4x32xf32> to vector<2x32xf32>
    %50 = vector.shape_cast %49 : vector<2x32xf32> to vector<1x2x32xf32>
    %51 = tpu.concatenate %48, %50 in 0 : vector<1x2x32xf32>, vector<1x2x32xf32> -> vector<2x2x32xf32>
    %52 = vector.shape_cast %51 : vector<2x2x32xf32> to vector<2x1x2x32xf32>
    %53 = vector.shape_cast %52 : vector<2x1x2x32xf32> to vector<2x1x2x32xf32>
    %54 = vector.broadcast %53 : vector<2x1x2x32xf32> to vector<2x2x2x32xf32>
    %55 = vector.shape_cast %54 : vector<2x2x2x32xf32> to vector<4x2x32xf32>
    %56 = vector.extract_strided_slice %55 {offsets = [0, 0, 0], sizes = [1, 2, 32], strides = [1, 1, 1]} : vector<4x2x32xf32> to vector<1x2x32xf32>
    %57 = vector.extract_strided_slice %55 {offsets = [3, 0, 0], sizes = [1, 2, 32], strides = [1, 1, 1]} : vector<4x2x32xf32> to vector<1x2x32xf32>
    %58 = tpu.concatenate %56, %55, %57 in 0 : vector<1x2x32xf32>, vector<4x2x32xf32>, vector<1x2x32xf32> -> vector<6x2x32xf32>
    %59 = vector.shape_cast %58 : vector<6x2x32xf32> to vector<6x2x1x32xf32>
    %60 = vector.shape_cast %59 : vector<6x2x1x32xf32> to vector<6x2x1x32xf32>
    %61 = vector.broadcast %60 : vector<6x2x1x32xf32> to vector<6x2x2x32xf32>
    %62 = vector.shape_cast %61 : vector<6x2x2x32xf32> to vector<6x4x32xf32>
    %63 = vector.extract_strided_slice %62 {offsets = [0, 0, 0], sizes = [6, 1, 32], strides = [1, 1, 1]} : vector<6x4x32xf32> to vector<6x1x32xf32>
    %64 = vector.extract_strided_slice %62 {offsets = [0, 3, 0], sizes = [6, 1, 32], strides = [1, 1, 1]} : vector<6x4x32xf32> to vector<6x1x32xf32>
    %65 = tpu.concatenate %63, %62, %64 in 1 : vector<6x1x32xf32>, vector<6x4x32xf32>, vector<6x1x32xf32> -> vector<6x6x32xf32>
    %66 = vector.extract_strided_slice %65 {offsets = [0, 0, 0], sizes = [6, 4, 32], strides = [1, 1, 1]} : vector<6x6x32xf32> to vector<6x4x32xf32>
    %67 = vector.shape_cast %66 : vector<6x4x32xf32> to vector<24x32xf32>
    %68 = vector.extract_strided_slice %65 {offsets = [0, 1, 0], sizes = [6, 4, 32], strides = [1, 1, 1]} : vector<6x6x32xf32> to vector<6x4x32xf32>
    %69 = vector.shape_cast %68 : vector<6x4x32xf32> to vector<24x32xf32>
    %70 = vector.extract_strided_slice %65 {offsets = [0, 2, 0], sizes = [6, 4, 32], strides = [1, 1, 1]} : vector<6x6x32xf32> to vector<6x4x32xf32>
    %71 = vector.shape_cast %70 : vector<6x4x32xf32> to vector<24x32xf32>
    %72 = vector.extract_strided_slice %67 {offsets = [0, 0], sizes = [16, 32], strides = [1, 1]} : vector<24x32xf32> to vector<16x32xf32>
    %73 = vector.extract_strided_slice %69 {offsets = [0, 0], sizes = [16, 32], strides = [1, 1]} : vector<24x32xf32> to vector<16x32xf32>
    %74 = vector.extract_strided_slice %71 {offsets = [0, 0], sizes = [16, 32], strides = [1, 1]} : vector<24x32xf32> to vector<16x32xf32>
    %75 = vector.extract_strided_slice %67 {offsets = [4, 0], sizes = [16, 32], strides = [1, 1]} : vector<24x32xf32> to vector<16x32xf32>
    %76 = vector.extract_strided_slice %69 {offsets = [4, 0], sizes = [16, 32], strides = [1, 1]} : vector<24x32xf32> to vector<16x32xf32>
    %77 = vector.extract_strided_slice %71 {offsets = [4, 0], sizes = [16, 32], strides = [1, 1]} : vector<24x32xf32> to vector<16x32xf32>
    %78 = vector.extract_strided_slice %67 {offsets = [8, 0], sizes = [16, 32], strides = [1, 1]} : vector<24x32xf32> to vector<16x32xf32>
    %79 = vector.extract_strided_slice %69 {offsets = [8, 0], sizes = [16, 32], strides = [1, 1]} : vector<24x32xf32> to vector<16x32xf32>
    %80 = vector.extract_strided_slice %71 {offsets = [8, 0], sizes = [16, 32], strides = [1, 1]} : vector<24x32xf32> to vector<16x32xf32>
    %81 = tpu.concatenate %72, %73, %74, %75, %76, %77, %78, %79, %80 in 1 : vector<16x32xf32>, vector<16x32xf32>, vector<16x32xf32>, vector<16x32xf32>, vector<16x32xf32>, vector<16x32xf32>, vector<16x32xf32>, vector<16x32xf32>, vector<16x32xf32> -> vector<16x288xf32>
    %82 = arith.truncf %81 : vector<16x288xf32> to vector<16x288xbf16>
    %c0_14 = arith.constant 0 : index
    %c0_15 = arith.constant 0 : index
    %83 = vector.load %arg3[%c0_14, %c0_15] : memref<288x32xbf16, #tpu.memory_space<vmem>>, vector<288x32xbf16>
    %cst_16 = arith.constant dense<0.000000e+00> : vector<16x32xf32>
    %84 = tpu.matmul %82, %83, %cst_16 {dimension_numbers = #tpu.dot_dimension_numbers<[1], [0], [0], [1], [0, 0, 1, 1], [], []>} : vector<16x288xbf16>, vector<288x32xbf16>, vector<16x32xf32> -> vector<16x32xf32>
    %cst_17 = arith.constant dense<0.000000e+00> : vector<32xf32>
    %85 = vector.multi_reduction <add>, %84, %cst_17 [0] : vector<16x32xf32> to vector<32xf32>
    %86 = vector.shape_cast %85 : vector<32xf32> to vector<1x32xf32>
    %cst_18 = arith.constant 1.600000e+01 : f32
    %87 = vector.broadcast %cst_18 : f32 to vector<1x32xf32>
    %88 = arith.divf %86, %87 : vector<1x32xf32>
    %89 = arith.mulf %84, %84 : vector<16x32xf32>
    %cst_19 = arith.constant dense<0.000000e+00> : vector<32xf32>
    %90 = vector.multi_reduction <add>, %89, %cst_19 [0] : vector<16x32xf32> to vector<32xf32>
    %91 = vector.shape_cast %90 : vector<32xf32> to vector<1x32xf32>
    %cst_20 = arith.constant 1.600000e+01 : f32
    %92 = vector.broadcast %cst_20 : f32 to vector<1x32xf32>
    %93 = arith.divf %91, %92 : vector<1x32xf32>
    %94 = arith.mulf %88, %88 : vector<1x32xf32>
    %95 = arith.subf %93, %94 : vector<1x32xf32>
    %cst_21 = arith.constant 0.000000e+00 : f32
    %96 = vector.broadcast %cst_21 : f32 to vector<1x32xf32>
    %97 = arith.maximumf %95, %96 : vector<1x32xf32>
    %98 = vector.broadcast %88 : vector<1x32xf32> to vector<16x32xf32>
    %99 = arith.subf %84, %98 : vector<16x32xf32>
    %cst_22 = arith.constant 9.99999974E-6 : f32
    %100 = vector.broadcast %cst_22 : f32 to vector<1x32xf32>
    %101 = arith.addf %97, %100 : vector<1x32xf32>
    %102 = math.rsqrt %101 : vector<1x32xf32>
    %103 = vector.broadcast %102 : vector<1x32xf32> to vector<16x32xf32>
    %104 = arith.mulf %99, %103 : vector<16x32xf32>
    %cst_23 = arith.constant 0.000000e+00 : f32
    %105 = vector.broadcast %cst_23 : f32 to vector<16x32xf32>
    %106 = arith.maximumf %104, %105 : vector<16x32xf32>
    %107 = vector.extract_strided_slice %106 {offsets = [0, 0], sizes = [4, 32], strides = [1, 1]} : vector<16x32xf32> to vector<4x32xf32>
    %108 = vector.shape_cast %107 : vector<4x32xf32> to vector<1x4x32xf32>
    %109 = vector.extract_strided_slice %106 {offsets = [4, 0], sizes = [4, 32], strides = [1, 1]} : vector<16x32xf32> to vector<4x32xf32>
    %110 = vector.shape_cast %109 : vector<4x32xf32> to vector<1x4x32xf32>
    %111 = vector.extract_strided_slice %106 {offsets = [8, 0], sizes = [4, 32], strides = [1, 1]} : vector<16x32xf32> to vector<4x32xf32>
    %112 = vector.shape_cast %111 : vector<4x32xf32> to vector<1x4x32xf32>
    %113 = vector.extract_strided_slice %106 {offsets = [12, 0], sizes = [4, 32], strides = [1, 1]} : vector<16x32xf32> to vector<4x32xf32>
    %114 = vector.shape_cast %113 : vector<4x32xf32> to vector<1x4x32xf32>
    %115 = tpu.concatenate %108, %110, %112, %114 in 0 : vector<1x4x32xf32>, vector<1x4x32xf32>, vector<1x4x32xf32>, vector<1x4x32xf32> -> vector<4x4x32xf32>
    %116 = vector.shape_cast %115 : vector<4x4x32xf32> to vector<4x1x4x32xf32>
    %117 = vector.shape_cast %116 : vector<4x1x4x32xf32> to vector<4x1x4x32xf32>
    %118 = vector.broadcast %117 : vector<4x1x4x32xf32> to vector<4x2x4x32xf32>
    %119 = vector.shape_cast %118 : vector<4x2x4x32xf32> to vector<8x4x32xf32>
    %120 = vector.extract_strided_slice %119 {offsets = [0, 0, 0], sizes = [1, 4, 32], strides = [1, 1, 1]} : vector<8x4x32xf32> to vector<1x4x32xf32>
    %121 = vector.extract_strided_slice %119 {offsets = [7, 0, 0], sizes = [1, 4, 32], strides = [1, 1, 1]} : vector<8x4x32xf32> to vector<1x4x32xf32>
    %122 = tpu.concatenate %120, %119, %121 in 0 : vector<1x4x32xf32>, vector<8x4x32xf32>, vector<1x4x32xf32> -> vector<10x4x32xf32>
    %123 = vector.shape_cast %122 : vector<10x4x32xf32> to vector<10x4x1x32xf32>
    %124 = vector.shape_cast %123 : vector<10x4x1x32xf32> to vector<10x4x1x32xf32>
    %125 = vector.broadcast %124 : vector<10x4x1x32xf32> to vector<10x4x2x32xf32>
    %126 = vector.shape_cast %125 : vector<10x4x2x32xf32> to vector<10x8x32xf32>
    %127 = vector.extract_strided_slice %126 {offsets = [0, 0, 0], sizes = [10, 1, 32], strides = [1, 1, 1]} : vector<10x8x32xf32> to vector<10x1x32xf32>
    %128 = vector.extract_strided_slice %126 {offsets = [0, 7, 0], sizes = [10, 1, 32], strides = [1, 1, 1]} : vector<10x8x32xf32> to vector<10x1x32xf32>
    %129 = tpu.concatenate %127, %126, %128 in 1 : vector<10x1x32xf32>, vector<10x8x32xf32>, vector<10x1x32xf32> -> vector<10x10x32xf32>
    %130 = vector.extract_strided_slice %129 {offsets = [0, 0, 0], sizes = [10, 8, 32], strides = [1, 1, 1]} : vector<10x10x32xf32> to vector<10x8x32xf32>
    %131 = vector.shape_cast %130 : vector<10x8x32xf32> to vector<80x32xf32>
    %132 = vector.extract_strided_slice %129 {offsets = [0, 1, 0], sizes = [10, 8, 32], strides = [1, 1, 1]} : vector<10x10x32xf32> to vector<10x8x32xf32>
    %133 = vector.shape_cast %132 : vector<10x8x32xf32> to vector<80x32xf32>
    %134 = vector.extract_strided_slice %129 {offsets = [0, 2, 0], sizes = [10, 8, 32], strides = [1, 1, 1]} : vector<10x10x32xf32> to vector<10x8x32xf32>
    %135 = vector.shape_cast %134 : vector<10x8x32xf32> to vector<80x32xf32>
    %136 = vector.extract_strided_slice %131 {offsets = [0, 0], sizes = [64, 32], strides = [1, 1]} : vector<80x32xf32> to vector<64x32xf32>
    %137 = vector.extract_strided_slice %133 {offsets = [0, 0], sizes = [64, 32], strides = [1, 1]} : vector<80x32xf32> to vector<64x32xf32>
    %138 = vector.extract_strided_slice %135 {offsets = [0, 0], sizes = [64, 32], strides = [1, 1]} : vector<80x32xf32> to vector<64x32xf32>
    %139 = vector.extract_strided_slice %131 {offsets = [8, 0], sizes = [64, 32], strides = [1, 1]} : vector<80x32xf32> to vector<64x32xf32>
    %140 = vector.extract_strided_slice %133 {offsets = [8, 0], sizes = [64, 32], strides = [1, 1]} : vector<80x32xf32> to vector<64x32xf32>
    %141 = vector.extract_strided_slice %135 {offsets = [8, 0], sizes = [64, 32], strides = [1, 1]} : vector<80x32xf32> to vector<64x32xf32>
    %142 = vector.extract_strided_slice %131 {offsets = [16, 0], sizes = [64, 32], strides = [1, 1]} : vector<80x32xf32> to vector<64x32xf32>
    %143 = vector.extract_strided_slice %133 {offsets = [16, 0], sizes = [64, 32], strides = [1, 1]} : vector<80x32xf32> to vector<64x32xf32>
    %144 = vector.extract_strided_slice %135 {offsets = [16, 0], sizes = [64, 32], strides = [1, 1]} : vector<80x32xf32> to vector<64x32xf32>
    %145 = tpu.concatenate %136, %137, %138, %139, %140, %141, %142, %143, %144 in 1 : vector<64x32xf32>, vector<64x32xf32>, vector<64x32xf32>, vector<64x32xf32>, vector<64x32xf32>, vector<64x32xf32>, vector<64x32xf32>, vector<64x32xf32>, vector<64x32xf32> -> vector<64x288xf32>
    %146 = arith.truncf %145 : vector<64x288xf32> to vector<64x288xbf16>
    %c0_24 = arith.constant 0 : index
    %c0_25 = arith.constant 0 : index
    %147 = vector.load %arg4[%c0_24, %c0_25] : memref<288x32xbf16, #tpu.memory_space<vmem>>, vector<288x32xbf16>
    %cst_26 = arith.constant dense<0.000000e+00> : vector<64x32xf32>
    %148 = tpu.matmul %146, %147, %cst_26 {dimension_numbers = #tpu.dot_dimension_numbers<[1], [0], [0], [1], [0, 0, 1, 1], [], []>} : vector<64x288xbf16>, vector<288x32xbf16>, vector<64x32xf32> -> vector<64x32xf32>
    %cst_27 = arith.constant dense<0.000000e+00> : vector<32xf32>
    %149 = vector.multi_reduction <add>, %148, %cst_27 [0] : vector<64x32xf32> to vector<32xf32>
    %150 = vector.shape_cast %149 : vector<32xf32> to vector<1x32xf32>
    %cst_28 = arith.constant 6.400000e+01 : f32
    %151 = vector.broadcast %cst_28 : f32 to vector<1x32xf32>
    %152 = arith.divf %150, %151 : vector<1x32xf32>
    %153 = arith.mulf %148, %148 : vector<64x32xf32>
    %cst_29 = arith.constant dense<0.000000e+00> : vector<32xf32>
    %154 = vector.multi_reduction <add>, %153, %cst_29 [0] : vector<64x32xf32> to vector<32xf32>
    %155 = vector.shape_cast %154 : vector<32xf32> to vector<1x32xf32>
    %cst_30 = arith.constant 6.400000e+01 : f32
    %156 = vector.broadcast %cst_30 : f32 to vector<1x32xf32>
    %157 = arith.divf %155, %156 : vector<1x32xf32>
    %158 = arith.mulf %152, %152 : vector<1x32xf32>
    %159 = arith.subf %157, %158 : vector<1x32xf32>
    %cst_31 = arith.constant 0.000000e+00 : f32
    %160 = vector.broadcast %cst_31 : f32 to vector<1x32xf32>
    %161 = arith.maximumf %159, %160 : vector<1x32xf32>
    %162 = vector.broadcast %152 : vector<1x32xf32> to vector<64x32xf32>
    %163 = arith.subf %148, %162 : vector<64x32xf32>
    %cst_32 = arith.constant 9.99999974E-6 : f32
    %164 = vector.broadcast %cst_32 : f32 to vector<1x32xf32>
    %165 = arith.addf %161, %164 : vector<1x32xf32>
    %166 = math.rsqrt %165 : vector<1x32xf32>
    %167 = vector.broadcast %166 : vector<1x32xf32> to vector<64x32xf32>
    %168 = arith.mulf %163, %167 : vector<64x32xf32>
    %cst_33 = arith.constant 0.000000e+00 : f32
    %169 = vector.broadcast %cst_33 : f32 to vector<64x32xf32>
    %170 = arith.maximumf %168, %169 : vector<64x32xf32>
    %171 = vector.extract_strided_slice %170 {offsets = [0, 0], sizes = [8, 32], strides = [1, 1]} : vector<64x32xf32> to vector<8x32xf32>
    %172 = vector.shape_cast %171 : vector<8x32xf32> to vector<1x8x32xf32>
    %173 = vector.extract_strided_slice %170 {offsets = [8, 0], sizes = [8, 32], strides = [1, 1]} : vector<64x32xf32> to vector<8x32xf32>
    %174 = vector.shape_cast %173 : vector<8x32xf32> to vector<1x8x32xf32>
    %175 = vector.extract_strided_slice %170 {offsets = [16, 0], sizes = [8, 32], strides = [1, 1]} : vector<64x32xf32> to vector<8x32xf32>
    %176 = vector.shape_cast %175 : vector<8x32xf32> to vector<1x8x32xf32>
    %177 = vector.extract_strided_slice %170 {offsets = [24, 0], sizes = [8, 32], strides = [1, 1]} : vector<64x32xf32> to vector<8x32xf32>
    %178 = vector.shape_cast %177 : vector<8x32xf32> to vector<1x8x32xf32>
    %179 = vector.extract_strided_slice %170 {offsets = [32, 0], sizes = [8, 32], strides = [1, 1]} : vector<64x32xf32> to vector<8x32xf32>
    %180 = vector.shape_cast %179 : vector<8x32xf32> to vector<1x8x32xf32>
    %181 = vector.extract_strided_slice %170 {offsets = [40, 0], sizes = [8, 32], strides = [1, 1]} : vector<64x32xf32> to vector<8x32xf32>
    %182 = vector.shape_cast %181 : vector<8x32xf32> to vector<1x8x32xf32>
    %183 = vector.extract_strided_slice %170 {offsets = [48, 0], sizes = [8, 32], strides = [1, 1]} : vector<64x32xf32> to vector<8x32xf32>
    %184 = vector.shape_cast %183 : vector<8x32xf32> to vector<1x8x32xf32>
    %185 = vector.extract_strided_slice %170 {offsets = [56, 0], sizes = [8, 32], strides = [1, 1]} : vector<64x32xf32> to vector<8x32xf32>
    %186 = vector.shape_cast %185 : vector<8x32xf32> to vector<1x8x32xf32>
    %187 = tpu.concatenate %172, %174, %176, %178, %180, %182, %184, %186 in 0 : vector<1x8x32xf32>, vector<1x8x32xf32>, vector<1x8x32xf32>, vector<1x8x32xf32>, vector<1x8x32xf32>, vector<1x8x32xf32>, vector<1x8x32xf32>, vector<1x8x32xf32> -> vector<8x8x32xf32>
    %188 = vector.shape_cast %187 : vector<8x8x32xf32> to vector<8x1x8x32xf32>
    %189 = vector.shape_cast %188 : vector<8x1x8x32xf32> to vector<8x1x8x32xf32>
    %190 = vector.broadcast %189 : vector<8x1x8x32xf32> to vector<8x2x8x32xf32>
    %191 = vector.shape_cast %190 : vector<8x2x8x32xf32> to vector<16x8x32xf32>
    %192 = vector.extract_strided_slice %191 {offsets = [0, 0, 0], sizes = [1, 8, 32], strides = [1, 1, 1]} : vector<16x8x32xf32> to vector<1x8x32xf32>
    %193 = vector.extract_strided_slice %191 {offsets = [15, 0, 0], sizes = [1, 8, 32], strides = [1, 1, 1]} : vector<16x8x32xf32> to vector<1x8x32xf32>
    %194 = tpu.concatenate %192, %191, %193 in 0 : vector<1x8x32xf32>, vector<16x8x32xf32>, vector<1x8x32xf32> -> vector<18x8x32xf32>
    %195 = vector.shape_cast %194 : vector<18x8x32xf32> to vector<18x8x1x32xf32>
    %196 = vector.shape_cast %195 : vector<18x8x1x32xf32> to vector<18x8x1x32xf32>
    %197 = vector.broadcast %196 : vector<18x8x1x32xf32> to vector<18x8x2x32xf32>
    %198 = vector.shape_cast %197 : vector<18x8x2x32xf32> to vector<18x16x32xf32>
    %199 = vector.extract_strided_slice %198 {offsets = [0, 0, 0], sizes = [18, 1, 32], strides = [1, 1, 1]} : vector<18x16x32xf32> to vector<18x1x32xf32>
    %200 = vector.extract_strided_slice %198 {offsets = [0, 15, 0], sizes = [18, 1, 32], strides = [1, 1, 1]} : vector<18x16x32xf32> to vector<18x1x32xf32>
    %201 = tpu.concatenate %199, %198, %200 in 1 : vector<18x1x32xf32>, vector<18x16x32xf32>, vector<18x1x32xf32> -> vector<18x18x32xf32>
    %202 = vector.extract_strided_slice %201 {offsets = [0, 0, 0], sizes = [18, 16, 32], strides = [1, 1, 1]} : vector<18x18x32xf32> to vector<18x16x32xf32>
    %203 = vector.shape_cast %202 : vector<18x16x32xf32> to vector<288x32xf32>
    %204 = vector.extract_strided_slice %201 {offsets = [0, 1, 0], sizes = [18, 16, 32], strides = [1, 1, 1]} : vector<18x18x32xf32> to vector<18x16x32xf32>
    %205 = vector.shape_cast %204 : vector<18x16x32xf32> to vector<288x32xf32>
    %206 = vector.extract_strided_slice %201 {offsets = [0, 2, 0], sizes = [18, 16, 32], strides = [1, 1, 1]} : vector<18x18x32xf32> to vector<18x16x32xf32>
    %207 = vector.shape_cast %206 : vector<18x16x32xf32> to vector<288x32xf32>
    %208 = vector.extract_strided_slice %203 {offsets = [0, 0], sizes = [256, 32], strides = [1, 1]} : vector<288x32xf32> to vector<256x32xf32>
    %209 = vector.extract_strided_slice %205 {offsets = [0, 0], sizes = [256, 32], strides = [1, 1]} : vector<288x32xf32> to vector<256x32xf32>
    %210 = vector.extract_strided_slice %207 {offsets = [0, 0], sizes = [256, 32], strides = [1, 1]} : vector<288x32xf32> to vector<256x32xf32>
    %211 = vector.extract_strided_slice %203 {offsets = [16, 0], sizes = [256, 32], strides = [1, 1]} : vector<288x32xf32> to vector<256x32xf32>
    %212 = vector.extract_strided_slice %205 {offsets = [16, 0], sizes = [256, 32], strides = [1, 1]} : vector<288x32xf32> to vector<256x32xf32>
    %213 = vector.extract_strided_slice %207 {offsets = [16, 0], sizes = [256, 32], strides = [1, 1]} : vector<288x32xf32> to vector<256x32xf32>
    %214 = vector.extract_strided_slice %203 {offsets = [32, 0], sizes = [256, 32], strides = [1, 1]} : vector<288x32xf32> to vector<256x32xf32>
    %215 = vector.extract_strided_slice %205 {offsets = [32, 0], sizes = [256, 32], strides = [1, 1]} : vector<288x32xf32> to vector<256x32xf32>
    %216 = vector.extract_strided_slice %207 {offsets = [32, 0], sizes = [256, 32], strides = [1, 1]} : vector<288x32xf32> to vector<256x32xf32>
    %217 = tpu.concatenate %208, %209, %210, %211, %212, %213, %214, %215, %216 in 1 : vector<256x32xf32>, vector<256x32xf32>, vector<256x32xf32>, vector<256x32xf32>, vector<256x32xf32>, vector<256x32xf32>, vector<256x32xf32>, vector<256x32xf32>, vector<256x32xf32> -> vector<256x288xf32>
    %218 = arith.truncf %217 : vector<256x288xf32> to vector<256x288xbf16>
    %c0_34 = arith.constant 0 : index
    %c0_35 = arith.constant 0 : index
    %219 = vector.load %arg5[%c0_34, %c0_35] : memref<288x32xbf16, #tpu.memory_space<vmem>>, vector<288x32xbf16>
    %cst_36 = arith.constant dense<0.000000e+00> : vector<256x32xf32>
    %220 = tpu.matmul %218, %219, %cst_36 {dimension_numbers = #tpu.dot_dimension_numbers<[1], [0], [0], [1], [0, 0, 1, 1], [], []>} : vector<256x288xbf16>, vector<288x32xbf16>, vector<256x32xf32> -> vector<256x32xf32>
    %cst_37 = arith.constant dense<0.000000e+00> : vector<32xf32>
    %221 = vector.multi_reduction <add>, %220, %cst_37 [0] : vector<256x32xf32> to vector<32xf32>
    %222 = vector.shape_cast %221 : vector<32xf32> to vector<1x32xf32>
    %cst_38 = arith.constant 2.560000e+02 : f32
    %223 = vector.broadcast %cst_38 : f32 to vector<1x32xf32>
    %224 = arith.divf %222, %223 : vector<1x32xf32>
    %225 = arith.mulf %220, %220 : vector<256x32xf32>
    %cst_39 = arith.constant dense<0.000000e+00> : vector<32xf32>
    %226 = vector.multi_reduction <add>, %225, %cst_39 [0] : vector<256x32xf32> to vector<32xf32>
    %227 = vector.shape_cast %226 : vector<32xf32> to vector<1x32xf32>
    %cst_40 = arith.constant 2.560000e+02 : f32
    %228 = vector.broadcast %cst_40 : f32 to vector<1x32xf32>
    %229 = arith.divf %227, %228 : vector<1x32xf32>
    %230 = arith.mulf %224, %224 : vector<1x32xf32>
    %231 = arith.subf %229, %230 : vector<1x32xf32>
    %cst_41 = arith.constant 0.000000e+00 : f32
    %232 = vector.broadcast %cst_41 : f32 to vector<1x32xf32>
    %233 = arith.maximumf %231, %232 : vector<1x32xf32>
    %234 = vector.broadcast %224 : vector<1x32xf32> to vector<256x32xf32>
    %235 = arith.subf %220, %234 : vector<256x32xf32>
    %cst_42 = arith.constant 9.99999974E-6 : f32
    %236 = vector.broadcast %cst_42 : f32 to vector<1x32xf32>
    %237 = arith.addf %233, %236 : vector<1x32xf32>
    %238 = math.rsqrt %237 : vector<1x32xf32>
    %239 = vector.broadcast %238 : vector<1x32xf32> to vector<256x32xf32>
    %240 = arith.mulf %235, %239 : vector<256x32xf32>
    %cst_43 = arith.constant 0.000000e+00 : f32
    %241 = vector.broadcast %cst_43 : f32 to vector<256x32xf32>
    %242 = arith.maximumf %240, %241 : vector<256x32xf32>
    %243 = vector.extract_strided_slice %242 {offsets = [0, 0], sizes = [16, 32], strides = [1, 1]} : vector<256x32xf32> to vector<16x32xf32>
    %244 = vector.shape_cast %243 : vector<16x32xf32> to vector<1x16x32xf32>
    %245 = vector.extract_strided_slice %242 {offsets = [16, 0], sizes = [16, 32], strides = [1, 1]} : vector<256x32xf32> to vector<16x32xf32>
    %246 = vector.shape_cast %245 : vector<16x32xf32> to vector<1x16x32xf32>
    %247 = vector.extract_strided_slice %242 {offsets = [32, 0], sizes = [16, 32], strides = [1, 1]} : vector<256x32xf32> to vector<16x32xf32>
    %248 = vector.shape_cast %247 : vector<16x32xf32> to vector<1x16x32xf32>
    %249 = vector.extract_strided_slice %242 {offsets = [48, 0], sizes = [16, 32], strides = [1, 1]} : vector<256x32xf32> to vector<16x32xf32>
    %250 = vector.shape_cast %249 : vector<16x32xf32> to vector<1x16x32xf32>
    %251 = vector.extract_strided_slice %242 {offsets = [64, 0], sizes = [16, 32], strides = [1, 1]} : vector<256x32xf32> to vector<16x32xf32>
    %252 = vector.shape_cast %251 : vector<16x32xf32> to vector<1x16x32xf32>
    %253 = vector.extract_strided_slice %242 {offsets = [80, 0], sizes = [16, 32], strides = [1, 1]} : vector<256x32xf32> to vector<16x32xf32>
    %254 = vector.shape_cast %253 : vector<16x32xf32> to vector<1x16x32xf32>
    %255 = vector.extract_strided_slice %242 {offsets = [96, 0], sizes = [16, 32], strides = [1, 1]} : vector<256x32xf32> to vector<16x32xf32>
    %256 = vector.shape_cast %255 : vector<16x32xf32> to vector<1x16x32xf32>
    %257 = vector.extract_strided_slice %242 {offsets = [112, 0], sizes = [16, 32], strides = [1, 1]} : vector<256x32xf32> to vector<16x32xf32>
    %258 = vector.shape_cast %257 : vector<16x32xf32> to vector<1x16x32xf32>
    %259 = vector.extract_strided_slice %242 {offsets = [128, 0], sizes = [16, 32], strides = [1, 1]} : vector<256x32xf32> to vector<16x32xf32>
    %260 = vector.shape_cast %259 : vector<16x32xf32> to vector<1x16x32xf32>
    %261 = vector.extract_strided_slice %242 {offsets = [144, 0], sizes = [16, 32], strides = [1, 1]} : vector<256x32xf32> to vector<16x32xf32>
    %262 = vector.shape_cast %261 : vector<16x32xf32> to vector<1x16x32xf32>
    %263 = vector.extract_strided_slice %242 {offsets = [160, 0], sizes = [16, 32], strides = [1, 1]} : vector<256x32xf32> to vector<16x32xf32>
    %264 = vector.shape_cast %263 : vector<16x32xf32> to vector<1x16x32xf32>
    %265 = vector.extract_strided_slice %242 {offsets = [176, 0], sizes = [16, 32], strides = [1, 1]} : vector<256x32xf32> to vector<16x32xf32>
    %266 = vector.shape_cast %265 : vector<16x32xf32> to vector<1x16x32xf32>
    %267 = vector.extract_strided_slice %242 {offsets = [192, 0], sizes = [16, 32], strides = [1, 1]} : vector<256x32xf32> to vector<16x32xf32>
    %268 = vector.shape_cast %267 : vector<16x32xf32> to vector<1x16x32xf32>
    %269 = vector.extract_strided_slice %242 {offsets = [208, 0], sizes = [16, 32], strides = [1, 1]} : vector<256x32xf32> to vector<16x32xf32>
    %270 = vector.shape_cast %269 : vector<16x32xf32> to vector<1x16x32xf32>
    %271 = vector.extract_strided_slice %242 {offsets = [224, 0], sizes = [16, 32], strides = [1, 1]} : vector<256x32xf32> to vector<16x32xf32>
    %272 = vector.shape_cast %271 : vector<16x32xf32> to vector<1x16x32xf32>
    %273 = vector.extract_strided_slice %242 {offsets = [240, 0], sizes = [16, 32], strides = [1, 1]} : vector<256x32xf32> to vector<16x32xf32>
    %274 = vector.shape_cast %273 : vector<16x32xf32> to vector<1x16x32xf32>
    %275 = tpu.concatenate %244, %246, %248, %250, %252, %254, %256, %258, %260, %262, %264, %266, %268, %270, %272, %274 in 0 : vector<1x16x32xf32>, vector<1x16x32xf32>, vector<1x16x32xf32>, vector<1x16x32xf32>, vector<1x16x32xf32>, vector<1x16x32xf32>, vector<1x16x32xf32>, vector<1x16x32xf32>, vector<1x16x32xf32>, vector<1x16x32xf32>, vector<1x16x32xf32>, vector<1x16x32xf32>, vector<1x16x32xf32>, vector<1x16x32xf32>, vector<1x16x32xf32>, vector<1x16x32xf32> -> vector<16x16x32xf32>
    %276 = vector.shape_cast %275 : vector<16x16x32xf32> to vector<16x1x16x32xf32>
    %277 = vector.shape_cast %276 : vector<16x1x16x32xf32> to vector<16x1x16x32xf32>
    %278 = vector.broadcast %277 : vector<16x1x16x32xf32> to vector<16x2x16x32xf32>
    %279 = vector.shape_cast %278 : vector<16x2x16x32xf32> to vector<32x16x32xf32>
    %280 = vector.extract_strided_slice %279 {offsets = [0, 0, 0], sizes = [1, 16, 32], strides = [1, 1, 1]} : vector<32x16x32xf32> to vector<1x16x32xf32>
    %281 = vector.extract_strided_slice %279 {offsets = [31, 0, 0], sizes = [1, 16, 32], strides = [1, 1, 1]} : vector<32x16x32xf32> to vector<1x16x32xf32>
    %282 = tpu.concatenate %280, %279, %281 in 0 : vector<1x16x32xf32>, vector<32x16x32xf32>, vector<1x16x32xf32> -> vector<34x16x32xf32>
    %283 = vector.shape_cast %282 : vector<34x16x32xf32> to vector<34x16x1x32xf32>
    %284 = vector.shape_cast %283 : vector<34x16x1x32xf32> to vector<34x16x1x32xf32>
    %285 = vector.broadcast %284 : vector<34x16x1x32xf32> to vector<34x16x2x32xf32>
    %286 = vector.shape_cast %285 : vector<34x16x2x32xf32> to vector<34x32x32xf32>
    %287 = vector.extract_strided_slice %286 {offsets = [0, 0, 0], sizes = [34, 1, 32], strides = [1, 1, 1]} : vector<34x32x32xf32> to vector<34x1x32xf32>
    %288 = vector.extract_strided_slice %286 {offsets = [0, 31, 0], sizes = [34, 1, 32], strides = [1, 1, 1]} : vector<34x32x32xf32> to vector<34x1x32xf32>
    %289 = tpu.concatenate %287, %286, %288 in 1 : vector<34x1x32xf32>, vector<34x32x32xf32>, vector<34x1x32xf32> -> vector<34x34x32xf32>
    %290 = vector.extract_strided_slice %289 {offsets = [0, 0, 0], sizes = [34, 32, 32], strides = [1, 1, 1]} : vector<34x34x32xf32> to vector<34x32x32xf32>
    %291 = vector.shape_cast %290 : vector<34x32x32xf32> to vector<1088x32xf32>
    %292 = vector.extract_strided_slice %289 {offsets = [0, 1, 0], sizes = [34, 32, 32], strides = [1, 1, 1]} : vector<34x34x32xf32> to vector<34x32x32xf32>
    %293 = vector.shape_cast %292 : vector<34x32x32xf32> to vector<1088x32xf32>
    %294 = vector.extract_strided_slice %289 {offsets = [0, 2, 0], sizes = [34, 32, 32], strides = [1, 1, 1]} : vector<34x34x32xf32> to vector<34x32x32xf32>
    %295 = vector.shape_cast %294 : vector<34x32x32xf32> to vector<1088x32xf32>
    %296 = vector.extract_strided_slice %291 {offsets = [0, 0], sizes = [1024, 32], strides = [1, 1]} : vector<1088x32xf32> to vector<1024x32xf32>
    %297 = vector.extract_strided_slice %293 {offsets = [0, 0], sizes = [1024, 32], strides = [1, 1]} : vector<1088x32xf32> to vector<1024x32xf32>
    %298 = vector.extract_strided_slice %295 {offsets = [0, 0], sizes = [1024, 32], strides = [1, 1]} : vector<1088x32xf32> to vector<1024x32xf32>
    %299 = vector.extract_strided_slice %291 {offsets = [32, 0], sizes = [1024, 32], strides = [1, 1]} : vector<1088x32xf32> to vector<1024x32xf32>
    %300 = vector.extract_strided_slice %293 {offsets = [32, 0], sizes = [1024, 32], strides = [1, 1]} : vector<1088x32xf32> to vector<1024x32xf32>
    %301 = vector.extract_strided_slice %295 {offsets = [32, 0], sizes = [1024, 32], strides = [1, 1]} : vector<1088x32xf32> to vector<1024x32xf32>
    %302 = vector.extract_strided_slice %291 {offsets = [64, 0], sizes = [1024, 32], strides = [1, 1]} : vector<1088x32xf32> to vector<1024x32xf32>
    %303 = vector.extract_strided_slice %293 {offsets = [64, 0], sizes = [1024, 32], strides = [1, 1]} : vector<1088x32xf32> to vector<1024x32xf32>
    %304 = vector.extract_strided_slice %295 {offsets = [64, 0], sizes = [1024, 32], strides = [1, 1]} : vector<1088x32xf32> to vector<1024x32xf32>
    %305 = tpu.concatenate %296, %297, %298, %299, %300, %301, %302, %303, %304 in 1 : vector<1024x32xf32>, vector<1024x32xf32>, vector<1024x32xf32>, vector<1024x32xf32>, vector<1024x32xf32>, vector<1024x32xf32>, vector<1024x32xf32>, vector<1024x32xf32>, vector<1024x32xf32> -> vector<1024x288xf32>
    %306 = arith.truncf %305 : vector<1024x288xf32> to vector<1024x288xbf16>
    %c0_44 = arith.constant 0 : index
    %c0_45 = arith.constant 0 : index
    %307 = vector.load %arg6[%c0_44, %c0_45] : memref<16x288xbf16, #tpu.memory_space<vmem>>, vector<16x288xbf16>
    %cst_46 = arith.constant dense<0.000000e+00> : vector<16x1024xf32>
    %308 = tpu.matmul %307, %306, %cst_46 {dimension_numbers = #tpu.dot_dimension_numbers<[1], [1], [0], [0], [0, 0, 1, 0], [], []>} : vector<16x288xbf16>, vector<1024x288xbf16>, vector<16x1024xf32> -> vector<16x1024xf32>
    %cst_47 = arith.constant dense<0.000000e+00> : vector<16xf32>
    %309 = vector.multi_reduction <add>, %308, %cst_47 [1] : vector<16x1024xf32> to vector<16xf32>
    %310 = vector.shape_cast %309 : vector<16xf32> to vector<16x1xf32>
    %cst_48 = arith.constant 1.024000e+03 : f32
    %311 = vector.broadcast %cst_48 : f32 to vector<16x1xf32>
    %312 = arith.divf %310, %311 : vector<16x1xf32>
    %313 = arith.mulf %308, %308 : vector<16x1024xf32>
    %cst_49 = arith.constant dense<0.000000e+00> : vector<16xf32>
    %314 = vector.multi_reduction <add>, %313, %cst_49 [1] : vector<16x1024xf32> to vector<16xf32>
    %315 = vector.shape_cast %314 : vector<16xf32> to vector<16x1xf32>
    %cst_50 = arith.constant 1.024000e+03 : f32
    %316 = vector.broadcast %cst_50 : f32 to vector<16x1xf32>
    %317 = arith.divf %315, %316 : vector<16x1xf32>
    %318 = arith.mulf %312, %312 : vector<16x1xf32>
    %319 = arith.subf %317, %318 : vector<16x1xf32>
    %cst_51 = arith.constant 0.000000e+00 : f32
    %320 = vector.broadcast %cst_51 : f32 to vector<16x1xf32>
    %321 = arith.maximumf %319, %320 : vector<16x1xf32>
    %322 = vector.broadcast %312 : vector<16x1xf32> to vector<16x1024xf32>
    %323 = arith.subf %308, %322 : vector<16x1024xf32>
    %cst_52 = arith.constant 9.99999974E-6 : f32
    %324 = vector.broadcast %cst_52 : f32 to vector<16x1xf32>
    %325 = arith.addf %321, %324 : vector<16x1xf32>
    %326 = math.rsqrt %325 : vector<16x1xf32>
    %327 = vector.broadcast %326 : vector<16x1xf32> to vector<16x1024xf32>
    %328 = arith.mulf %323, %327 : vector<16x1024xf32>
    %cst_53 = arith.constant 0.000000e+00 : f32
    %329 = vector.broadcast %cst_53 : f32 to vector<16x1024xf32>
    %330 = arith.maximumf %328, %329 : vector<16x1024xf32>
    %c0_54 = arith.constant 0 : index
    %c0_55 = arith.constant 0 : index
    %c0_56 = arith.constant 0 : index
    %331 = vector.load %arg7[%c0_54, %c0_55, %c0_56] : memref<1x16x1024xf32, #tpu.memory_space<vmem>>, vector<1x16x1024xf32>
    %332 = vector.shape_cast %331 : vector<1x16x1024xf32> to vector<16x1024xf32>
    %333 = vector.shape_cast %330 : vector<16x1024xf32> to vector<1x16x1024xf32>
    tpu.vector_store %arg7[%c0_54, %c0_55, %c0_56], %333 {strides = array<i32>} : memref<1x16x1024xf32, #tpu.memory_space<vmem>>, vector<1x16x1024xf32>,
    return
  }
  func.func @transform_0(%arg0: i32) -> (i32, i32, i32, i32) {
    %c0_i32 = arith.constant 0 : i32
    %c0_i32_0 = arith.constant 0 : i32
    %c0_i32_1 = arith.constant 0 : i32
    %c0_i32_2 = arith.constant 0 : i32
    return %arg0, %c0_i32, %c0_i32_0, %c0_i32_1 : i32, i32, i32, i32
  }
  func.func @transform_1(%arg0: i32) -> (i32, i32) {
    %c0_i32 = arith.constant 0 : i32
    %c0_i32_0 = arith.constant 0 : i32
    %c0_i32_1 = arith.constant 0 : i32
    return %c0_i32, %c0_i32_0 : i32, i32
  }
  func.func @transform_2(%arg0: i32) -> (i32, i32) {
    %c0_i32 = arith.constant 0 : i32
    %c0_i32_0 = arith.constant 0 : i32
    %c0_i32_1 = arith.constant 0 : i32
    return %c0_i32, %c0_i32_0 : i32, i32
  }
  func.func @transform_3(%arg0: i32) -> (i32, i32) {
    %c0_i32 = arith.constant 0 : i32
    %c0_i32_0 = arith.constant 0 : i32
    %c0_i32_1 = arith.constant 0 : i32
    return %c0_i32, %c0_i32_0 : i32, i32
  }
  func.func @transform_4(%arg0: i32) -> (i32, i32) {
    %c0_i32 = arith.constant 0 : i32
    %c0_i32_0 = arith.constant 0 : i32
    %c0_i32_1 = arith.constant 0 : i32
    return %c0_i32, %c0_i32_0 : i32, i32
  }
  func.func @transform_5(%arg0: i32) -> (i32, i32) {
    %c0_i32 = arith.constant 0 : i32
    %c0_i32_0 = arith.constant 0 : i32
    %c0_i32_1 = arith.constant 0 : i32
    return %c0_i32, %c0_i32_0 : i32, i32
  }
  func.func @transform_6(%arg0: i32) -> (i32, i32, i32) {
    %c0_i32 = arith.constant 0 : i32
    %c0_i32_0 = arith.constant 0 : i32
    %c0_i32_1 = arith.constant 0 : i32
    return %arg0, %c0_i32, %c0_i32_0 : i32, i32, i32
  }
}

</mosaic_0001>

<bundles_post_ra>
// kernel: vanilla_generator_forward.1
= control target key start
LH: loop header
LB: loop body
LE: loop exit
PB: predicated region body
PF: predicated region fallthrough
CT: control target
= control target key end

     0   :  { %s13022_s21 = smov 0   ;;  %s22486_s0 = inlined_call_operand.vmem [shape: f32[2,2,2,8], index: 0, kind: input, shape index: {}]   ;;  %s22487_s1 = inlined_call_operand.vmem [shape: bf16[72,32], index: 1, kind: input, shape index: {}]   ;;  %s22488_s2 = inlined_call_operand.vmem [shape: bf16[288,32], index: 2, kind: input, shape index: {}]   ;;  %s22489_s3 = inlined_call_operand.vmem [shape: bf16[288,32], index: 3, kind: input, shape index: {}]   ;;  %s22490_s4 = inlined_call_operand.vmem [shape: bf16[288,32], index: 4, kind: input, shape index: {}]   ;;  %s22491_s5 = inlined_call_operand.vmem [shape: bf16[16,288], index: 5, kind: input, shape index: {}]   ;;  %s22492_s6 = inlined_call_operand.vmem [shape: f32[2,16,1024], index: 6, kind: output, shape index: {}]  }
   0x1 LB: > { %s11079_s22 = sadd.s32 4294967295, %s12972_s21   ;;  %p11083_p0 = scmp.ge.s32.totalorder %s12972_s21, 1  ;;  %s12972_s21 = sphi %s13022_s21, %s16_s21  }
   0x2   : > { %p212_p1 = scmp.lt.s32.totalorder %s12972_s21, 3 }
   0x4   : > { %p213_p2 = pnand %p11083_p0, %p212_p1 }
   0x6   : > { %216 = sbr.rel (%p213_p2) target bundleno = 3130 (0xc3a), region = 44 }
   0xd   : > { %p242_p3 = scmp.lt.s32.totalorder %s11079_s22, 1  ;;  %vm264_vm0 = vcmask 1040384   ;;  %v12974_v0 = vmov 0.0   ;;  %vm268_vm1 = vcmask 1042432   ;;  %v12975_v2 = vmov 1983009808  }
   0xe   : > { %v258_v1 = vrot.slane %v12974_v0, 7  ;;  %v276_v3 = vunpack.c.l.s4 %v12975_v2  ;;  %v278_v4 = vlaneseq  ;;  %11469 = vmatprep.subr.bf16.mxu0 %v12974_v0  ;;  %v12888_v5 = vld [vmem:[%s22487_s1] sm:$0xff]   ;;  %vm299_vm2 = vcmask 1042434   ;;  %v12889_v10 = vld [vmem:[%s22487_s1 + $0x8] sm:$0xff]   ;;  %v12890_v17 = vld [vmem:[%s22487_s1 + $0x10] sm:$0xff]   ;;  %s12976_s11 = smov 24  }
   0xf   : > { %s25153_s22 = smov (!%p242_p3, %s11079_s22), 1  ;;  %11470 = vmatpush3.bf16.msra.mxu0 %v12888_v5  ;;  %vm300_vm3 = vmor %vm264_vm0, %vm299_vm2  ;;  %vm301_vm4 = vcmask 1044484   ;;  %vm303_vm6 = vcmask 1046534   ;;  %v12891_v31 = vld [vmem:[%s22487_s1 + $0x18] sm:$0xff]   ;;  %v12892_v42 = vld [vmem:[%s22487_s1 + $0x20] ss:$0 sps:$4 sm:$0xff]  }
  0x10   : > { %v265_v6 = vsel %vm264_vm0, 0.0, %v258_v1  ;;  %v277_v7 = vunpack.c.0.s8 %v276_v3  ;;  %v13038_v8 = vshrl.u32 %v278_v4, 7  ;;  %s11188_s25 = sshll.u32 %s25153_s22, 2  ;;  %11471 = vmatprep.subr.bf16.mxu0 %v12974_v0  ;;  %vm302_vm5 = vmor %vm300_vm3, %vm301_vm4  ;;  %s12977_s14 = smov 16   ;;  %vm471_vm8 = vcmask 1043456  }
  0x11   : > { %v13042_v9 = vsel %vm268_vm1, %v265_v6, 0.0  ;;  %s246_s30 = scalar_lea.vmem %s22486_s0, %s11188_s25  ;;  %vm13074_vm7 = vmor %vm302_vm5, %vm303_vm6  ;;  %s12978_s15 = smov 48   ;;  %v473_v50 = vsel %vm471_vm8, %v12892_v42, 0  ;;  %vm12979_vm9 = vmmov 0   ;;  %vm414_vm10 = vcmask 64512  }
  0x12   : > { %v13052_v11 = vsub.s32 %v277_v7, %v13038_v8  ;;  %v253_v12 = vld [vmem:[%s246_s30] sm:$0x3]  ;;  %v254_v13 = vld [vmem:[%s246_s30 + $0x2] sm:$0x3]  ;;  %11479 = vmatprep.mubr.msk.bf16.mxu0 %vm12979_vm9, %v12974_v0  ;;  %s12980_s16 = smov 8   ;;  %s12981_s17 = smov 32  }
  0x13   : > { %v259_v14 = vrot.slane %v253_v12, 7  ;;  %v260_v15 = vrot.slane %v254_v13, 7  ;;  %11472 = vmatpush3.bf16.msra.mxu0 %v12889_v10  ;;  %s12982_s18 = smov 40   ;;  %s12983_s19 = smov 64   ;;  %vm416_vm11 = vcmask 130048   ;;  %vm418_vm12 = vcmask 195584  }
  0x14   : > { %23216 = vst [vmem:[#allocation2_spill] sm:$0xff] %v13052_v11  ;;  %v281_v16 = vrot.slane %v13042_v9, %v13052_v11  ;;  %11473 = vmatprep.subr.bf16.mxu0 %v12974_v0  ;;  %s12984_s20 = smov 56   ;;  %vm420_vm13 = vcmask 261120   ;;  %vm422_vm14 = vcmask 326656   ;;  %vm424_vm15 = vcmask 392192   ;;  %s11189_s25 = sshll.u32 %s25153_s22, 7 }
  0x15   : > { %v266_v18 = vsel %vm264_vm0, 0.0, %v259_v14  ;;  %v267_v19 = vsel %vm264_vm0, 0.0, %v260_v15  ;;  %vm426_vm2 = vcmask 457728   ;;  %vm428_vm3 = vcmask 523264   ;;  %v12893_v14 = vld [vmem:[%s22488_s2 + $0x40] sm:$0xff]   ;;  %s22465_s27 = scalar_lea.vmem %s22492_s6, %s11189_s25 }
  0x16   : > { %v282_v20 = vcombine.high %v281_v16, %v281_v16  ;;  %v13064_v21 = vsel %vm268_vm1, %v266_v18, 0.0  ;;  %v271_v22 = vsel %vm268_vm1, %v267_v19, 0.0  ;;  %v11088_v23 = vrot.slane %v281_v16, 9  ;;  %v12894_v15 = vld [vmem:[%s22488_s2] sm:$0xff]   ;;  %11196 = vmatprep.subr.bf16.mxu1 %v12893_v14  ;;  %v12897_v18 = vld [vmem:[%s22488_s2 + $0x50] sm:$0xff]  }
  0x17   : > { %v297_v24 = vrot.slane %v271_v22, %v13052_v11  ;;  %v348_v25 = vcombine.low %v13064_v21, %v271_v22  ;;  %v289_v26 = vrot.slane %v13064_v21, %v13052_v11  ;;  %v317_v27 = vcombine.low %v13042_v9, %v13064_v21  ;;  %11474 = vmatpush3.bf16.msra.mxu0 %v12890_v17  ;;  %v12896_v17 = vld [vmem:[%s22488_s2 + $0x8] sm:$0xff]   ;;  %v12898_v19 = vld [vmem:[%s22488_s2 + $0x10] sm:$0xff]   ;;  %v12900_v21 = vld [vmem:[%s22488_s2 + $0x18] sm:$0xff]  }
  0x18   : > { %v381_v28 = vcombine.low %v271_v22, %v13042_v9  ;;  %v307_v30 = vrot.slane %v282_v20, 7  ;;  %11475 = vmatprep.subr.bf16.mxu0 %v12974_v0  ;;  %vm467_vm4 = vcmask 588800   ;;  %11197 = vmatpush3.bf16.msra.mxu1 %v12894_v15  ;;  %v12899_v20 = vld [vmem:[%s22488_s2 + $0x58] sm:$0xff]   ;;  %vm515_vm5 = vcmask 257024  }
  0x19   : > { %v355_v32 = vrot.slane %v348_v25, %v13052_v11  ;;  %v11091_v33 = vcombine.high %v281_v16, %v289_v26  ;;  %v290_v34 = vcombine.high %v289_v26, %v289_v26  ;;  %v11089_v35 = vrot.slane %v289_v26, 9 }
  0x1a   : > { %v298_v36 = vcombine.high %v297_v24, %v297_v24  ;;  %v11090_v37 = vrot.slane %v297_v24, 9  ;;  %v388_v39 = vrot.slane %v381_v28, %v13052_v11  ;;  %v308_v40 = vsel %vm13074_vm7, %v11088_v23, %v307_v30 }
  0x1b   : > { %356 = vrot.lane.b32.xlu1 %v355_v32, %s12976_s11  ;;  %v344_v38 = vrot.slane %v11091_v33, %v13052_v11  ;;  %v311_v41 = vrot.slane %v290_v34, 7  ;;  %11476 = vmatpush3.bf16.msra.mxu0 %v12891_v31  ;;  %v11092_v47 = vcombine.high %v289_v26, %v297_v24  ;;  %v11093_v49 = vcombine.high %v297_v24, %v281_v16  ;;  %v12895_v16 = vld [vmem:[%s22488_s2 + $0x48] sm:$0xff]   ;;  %s12986_s11 = smov 96  }
  0x1c   : > { %v315_v43 = vrot.slane %v298_v36, 7  ;;  %11477 = vmatprep.subr.bf16.mxu0 %v12974_v0  ;;  %v324_v60 = vrot.slane %v317_v27, %v13052_v11  ;;  %11198 = vmatprep.subr.bf16.mxu1 %v12895_v16  ;;  %vm638_vm6 = vcmask 1044480   ;;  %vm656_vm8 = vcmask 1045508  }
  0x1d   : > { %345 = vrot.lane.b32.xlu0 %v344_v38, %s12977_s14  ;;  %v312_v44 = vsel %vm13074_vm7, %v11089_v35, %v311_v41  ;;  %v377_v53 = vrot.slane %v11092_v47, %v13052_v11  ;;  %v410_v55 = vrot.slane %v11093_v49, %v13052_v11  ;;  %11199 = vmatpush3.bf16.msra.mxu1 %v12896_v17  ;;  %v12985_v47 = vmov 1966171168  }
  0x1e   : > { %v326_v45 = vcombine.low %v308_v40, %v312_v44  ;;  %v316_v46 = vsel %vm13074_vm7, %v11090_v37, %v315_v43  ;;  %11200 = vmatprep.subr.bf16.mxu1 %v12897_v18  ;;  %vm655_vm7 = vcmask 1041408   ;;  %v12903_v18 = vld [vmem:[%s22488_s2 + $0x68] sm:$0xff]  }
  0x1f   : > { %389 = vrot.lane.b32.xlu1 %v388_v39, %s12978_s15  ;;  %v359_v48 = vcombine.low %v312_v44, %v316_v46  ;;  %11478 = vmatpush3.bf16.msra.mxu0 %v473_v50  ;;  %v392_v54 = vcombine.low %v316_v46, %v308_v40 }
  0x20   : > { %v333_v51 = vrot.slane %v326_v45, %v13052_v11 }
  0x21   : > { %v366_v52 = vrot.slane %v359_v48, %v13052_v11  ;;  %v399_v56 = vrot.slane %v392_v54, %v13052_v11  ;;  %11201 = vmatpush3.bf16.msra.mxu1 %v12898_v19  ;;  %v545_v48 = vunpack.c.l.s4 %v12985_v47  ;;  %v12908_v47 = vld [vmem:[%s22488_s2 + $0x38] sm:$0xff]  }
  0x22   : > { %334 = vrot.lane.b32.xlu0 %v333_v51, %s12980_s16  ;;  %11202 = vmatprep.subr.bf16.mxu1 %v12899_v20 }
  0x23   : > { %367 = vrot.lane.b32.xlu1 %v366_v52, %s12981_s17  ;;  %v546_v49 = vunpack.c.0.s8 %v545_v48 }
  0x25   : > { %11203 = vmatpush3.bf16.msra.mxu1 %v12900_v21  ;;  %v13132_v52 = vsub.s32 %v546_v49, %v13038_v8  ;;  %v12904_v21 = vld [vmem:[%s22488_s2 + $0x28] sm:$0xff]  }
  0x26   : > { %378 = vrot.lane.b32.xlu0 %v377_v53, %s12982_s18 }
  0x27   : > { %411 = vrot.lane.b32.xlu1 %v410_v55, %s12983_s19 }
  0x2a   : > { %400 = vrot.lane.b32.xlu0 %v399_v56, %s12984_s20 }
  0x8d   : > { %v357_v57 = vpop.permute.xlu1 %356 }
  0x8f   : > { %v346_v58 = vpop.permute.xlu0 %345 }
  0x91   : > { %v390_v59 = vpop.permute.xlu1 %389 }
  0x94   : > { %v335_v61 = vpop.permute.xlu0 %334 }
  0x95   : > { %v415_v62 = vsel %vm414_vm10, %v324_v60, %v335_v61  ;;  %v368_v63 = vpop.permute.xlu1 %367  ;;  %vm645_vm10 = vcmask 1046532  }
  0x96   : > { %v417_v1 = vsel %vm416_vm11, %v415_v62, %v346_v58  ;;  %vm13164_vm11 = vmor %vm655_vm7, %vm656_vm8 }
  0x97   : > { %v419_v2 = vsel %vm418_vm12, %v417_v1, %v357_v57  ;;  %v13136_v57 = vsub.s32 0, %v13038_v8  ;;  %vm13171_vm12 = vmor %vm268_vm1, %vm645_vm10  ;;  %vm721_vm1 = vcmask 785408  }
  0x98   : > { %v421_v3 = vsel %vm420_vm13, %v419_v2, %v368_v63  ;;  %v379_v4 = vpop.permute.xlu0 %378 }
  0x99   : > { %v423_v5 = vsel %vm422_vm14, %v421_v3, %v379_v4  ;;  %v412_v6 = vpop.permute.xlu1 %411  ;;  %23219 = vst [vmem:[#allocation3_spill] sm:$0xff] %v13136_v57  ;;  %vm1277_vm14 = vcmask 1045504  }
  0x9a   : > { %v425_v7 = vsel %vm424_vm15, %v423_v5, %v390_v59 }
  0x9c   : > { %v401_v9 = vpop.permute.xlu0 %400 }
  0x9d   : > { %v427_v10 = vsel %vm426_vm2, %v425_v7, %v401_v9  ;;  %v628_v7 = vsub.s32 1, %v13038_v8  ;;  %v12901_v9 = vld [vmem:[%s22488_s2 + $0x60] sm:$0xff]  }
  0x9e   : > { %v429_v12 = vsel %vm428_vm3, %v427_v10, %v412_v6  ;;  %v12902_v10 = vld [vmem:[%s22488_s2 + $0x20] sm:$0xff]   ;;  %11204 = vmatprep.subr.bf16.mxu1 %v12901_v9 }
  0x9f   : > { %v430_v13 = vpack.c.bf16 %v429_v12, %v429_v12  ;;  %11205 = vmatpush3.bf16.msra.mxu1 %v12902_v10 }
  0xa0   : > { %11206 = vmatprep.subr.bf16.mxu1 %v12903_v18 }
  0xa1   : > { %11480 = vmatmul.mubr.msk.bf16.vlgmr.msra.gmra.mrb[0].mxu0 %vm467_vm4, %v430_v13 }
  0xa3   : > { %11207 = vmatpush3.bf16.msra.mxu1 %v12904_v21 }
 0x174   : > { %v509_v22 = vpop.f32.mrb[0].mxu0 }
 0x175   : > { %v516_v23 = vsel %vm515_vm5, %v509_v22, 0.0  ;;  %v525_v24 = vmul.f32 %v509_v22, %v509_v22  ;;  %v11481_v25 = vpop.f32.mrb[1].mxu0 }
 0x176   : > { %v517_v26 = vrot.slane %v516_v23, 4  ;;  %v512_v27 = vpop.f32.mrb[2].mxu0 }
 0x177   : > { %v526_v28 = vsel %vm515_vm5, %v525_v24, 0.0  ;;  %v11482_v29 = vpop.f32.mrb[3].mxu0 }
 0x178   : > { %v518_v30 = vadd.f32 %v517_v26, %v516_v23  ;;  %v527_v31 = vrot.slane %v526_v28, 4 }
 0x17a   : > { %v519_v32 = vrot.slane %v518_v30, 2  ;;  %v528_v33 = vadd.f32 %v527_v31, %v526_v28 }
 0x17c   : > { %v520_v34 = vadd.f32 %v519_v32, %v518_v30  ;;  %v529_v35 = vrot.slane %v528_v33, 2  ;;  %v12905_v32 = vld [vmem:[%s22488_s2 + $0x70] sm:$0xff]  }
 0x17d   : > { %11208 = vmatprep.subr.bf16.mxu1 %v12905_v32  ;;  %v12909_v32 = vld [vmem:[%s22488_s2 + $0x80] sm:$0xff]  }
 0x17e   : > { %v521_v36 = vrot.slane %v520_v34, 1  ;;  %v530_v37 = vadd.f32 %v529_v35, %v528_v33  ;;  %v12906_v33 = vld [vmem:[%s22488_s2 + $0x30] sm:$0xff]  }
 0x17f   : > { %11209 = vmatpush3.bf16.msra.mxu1 %v12906_v33 }
 0x180   : > { %v522_v38 = vadd.f32 %v521_v36, %v520_v34  ;;  %v531_v39 = vrot.slane %v530_v37, 1 }
 0x182   : > { %v524_v40 = vmul.f32 0.25, %v522_v38  ;;  %v532_v41 = vadd.f32 %v531_v39, %v530_v37 }
 0x184   : > { %v533_v42 = vmul.f32 0.25, %v532_v41  ;;  %v534_v43 = vmul.f32 %v524_v40, %v524_v40  ;;  %v537_v50 = vsub.f32 %v509_v22, %v524_v40 }
 0x186   : > { %v535_v44 = vsub.f32 %v533_v42, %v534_v43 }
 0x188   : > { %v536_v45 = vmax.f32 %v535_v44, 0.0 }
 0x18a   : > { %v538_v46 = vadd.f32 1e-05, %v536_v45 }
 0x18c   : > { %12951 = vrsqrt.f32 %v538_v46  ;;  %v12907_v46 = vld [vmem:[%s22488_s2 + $0x78] sm:$0xff]  }
 0x18d   : > { %11210 = vmatprep.subr.bf16.mxu1 %v12907_v46 }
 0x18e   : > { %11211 = vmatpush3.bf16.msra.mxu1 %v12908_v47 }
 0x18f   : > { %11483 = vmatprep.subr.bf16.mxu1 %v12974_v0 }
 0x196   : > { %v12952_v51 = vpop.eup %12951 }
 0x197   : > { %v540_v53 = vmul.f32 %v12952_v51, %v537_v50 }
 0x199   : > { %v541_v54 = vmax.f32 %v540_v53, 0.0 }
 0x19b   : > { %v543_v55 = vrot.slane %v541_v54, 2  ;;  %v550_v56 = vrot.slane %v541_v54, %v13132_v52 }
 0x19d   : > { %v551_v58 = vcombine.high %v550_v56, %v550_v56  ;;  %v558_v59 = vrot.slane %v550_v56, %v13132_v52  ;;  %v572_v60 = vrot.slane %v543_v55, %v13132_v52 }
 0x19f   : > { %v565_v61 = vrot.slane %v551_v58, %v13132_v52  ;;  %v573_v62 = vcombine.high %v572_v60, %v572_v60  ;;  %v580_v63 = vrot.slane %v572_v60, %v13132_v52  ;;  %v591_v2 = vrot.slane %v558_v59, %v13136_v57 }
 0x1a1   : > { %v587_v1 = vrot.slane %v573_v62, %v13132_v52  ;;  %v595_v3 = vrot.slane %v565_v61, %v13136_v57  ;;  %v599_v4 = vrot.slane %v580_v63, %v13136_v57 }
 0x1a3   : > { %v603_v5 = vrot.slane %v587_v1, %v13136_v57  ;;  %v606_v6 = vcombine.low %v591_v2, %v595_v3  ;;  %v629_v16 = vrot.slane %v595_v3, %v628_v7 }
 0x1a5   : > { %v613_v12 = vrot.slane %v606_v6, %v13052_v11  ;;  %v614_v13 = vcombine.low %v599_v4, %v603_v5  ;;  %v633_v19 = vrot.slane %v603_v5, %v628_v7 }
 0x1a7   : > { %v621_v14 = vrot.slane %v614_v13, %v13052_v11  ;;  %v622_v15 = vrot.slane %v613_v12, 7 }
 0x1a9   : > { %v623_v17 = vrot.slane %v621_v14, 7  ;;  %v636_v8 = vsel %vm264_vm0, %v591_v2, %v622_v15 }
 0x1aa   : > { %v639_v20 = vsel %vm638_vm6, %v636_v8, %v629_v16 }
 0x1ab   : > { %v637_v22 = vsel %vm264_vm0, %v599_v4, %v623_v17  ;;  %v643_v23 = vcombine.high %v639_v20, %v639_v20  ;;  %v11102_v26 = vrot.slane %v639_v20, 10  ;;  %v11100_v35 = vrot.slane %v639_v20, 9 }
 0x1ac   : > { %v640_v24 = vsel %vm638_vm6, %v637_v22, %v633_v19  ;;  %v666_v60 = vcombine.low %v639_v20, %v639_v20 }
 0x1ad   : > { %v13168_v27 = vcombine.low %v639_v20, %v640_v24  ;;  %v686_v28 = vcombine.low %v640_v24, %v640_v24  ;;  %v644_v29 = vcombine.high %v640_v24, %v640_v24  ;;  %v660_v30 = vrot.slane %v643_v23, 6 }
 0x1ae   : > { %v11103_v34 = vrot.slane %v640_v24, 10  ;;  %v649_v36 = vrot.slane %v643_v23, 5  ;;  %v11101_v37 = vrot.slane %v640_v24, 9 }
 0x1af   : > { %v11608_v38 = vpack.i.bf16 %v686_v28, %v13168_v27  ;;  %v661_v39 = vsel %vm13164_vm11, %v11102_v26, %v660_v30  ;;  %v664_v40 = vrot.slane %v644_v29, 6  ;;  %v653_v41 = vrot.slane %v644_v29, 5 }
 0x1b0   : > { %v650_v42 = vsel %vm13171_vm12, %v11100_v35, %v649_v36  ;;  %v678_v44 = vcombine.low %v661_v39, %v661_v39  ;;  %v11633_v61 = vpack.i.bf16 %v686_v28, %v666_v60  ;;  %v12912_v35 = vld [vmem:[%s22489_s3 + $0x88] sm:$0xff]   ;;  %v12913_v36 = vld [vmem:[%s22489_s3 + $0x40] sm:$0xff]  }
 0x1b1   : > { %11609 = vrot.lane.b32.xlu0 %v11608_v38, %s12983_s19  ;;  %v665_v43 = vsel %vm13164_vm11, %v11103_v34, %v664_v40  ;;  %v654_v45 = vsel %vm13171_vm12, %v11101_v37, %v653_v41  ;;  %v670_v49 = vcombine.low %v650_v42, %v650_v42  ;;  %v12911_v34 = vld [vmem:[%s22489_s3 + $0x80] sm:$0xff]   ;;  %v12915_v37 = vld [vmem:[%s22489_s3 + $0x48] sm:$0xff]   ;;  %11221 = vmatprep.subr.bf16.mxu0 %v12913_v36  ;;  %v12918_v40 = vld [vmem:[%s22489_s3 + $0x10] sm:$0xff]  }
 0x1b2   : > { %v13197_v48 = vcombine.low %v665_v43, %v665_v43  ;;  %v671_v50 = vcombine.low %v650_v42, %v654_v45  ;;  %v679_v51 = vcombine.low %v661_v39, %v665_v43  ;;  %v693_v55 = vcombine.low %v654_v45, %v654_v45  ;;  %v12916_v38 = vld [vmem:[%s22489_s3 + $0x8] sm:$0xff]   ;;  %v12917_v39 = vld [vmem:[%s22489_s3 + $0x50] sm:$0xff]   ;;  %v12919_v41 = vld [vmem:[%s22489_s3 + $0x58] sm:$0xff]  }
 0x1b3   : > { %v12920_v42 = vld [vmem:[%s22489_s3 + $0x18] sm:$0xff]   ;;  %v12921_v43 = vld [vmem:[%s22489_s3 + $0x60] sm:$0xff]  }
 0x1b4   : > { %v11613_v53 = vpack.i.bf16 %v13197_v48, %v678_v44  ;;  %v11618_v54 = vpack.i.bf16 %v671_v50, %v670_v49  ;;  %v732_v56 = vpack.c.bf16 %v13197_v48, %v679_v51  ;;  %v11628_v58 = vpack.i.bf16 %v693_v55, %v671_v50 }
 0x1b5   : > { %v11623_v59 = vpack.i.bf16 %v679_v51, %v678_v44  ;;  %v12922_v44 = vld [vmem:[%s22489_s3 + $0x20] sm:$0xff]  }
 0x1b6   : > { %11614 = vrot.lane.b32.xlu0 %v11613_v53, %s12981_s17  ;;  %11619 = vrot.lane.b32.xlu1 %v11618_v54, %s12981_s17 }
 0x1ba   : > { %11629 = vrot.lane.b32.xlu0 %v11628_v58, %s12986_s11  ;;  %11624 = vrot.lane.b32.xlu1 %v11623_v59, %s12983_s19 }
 0x1be   : > { %11634 = vrot.lane.b32.xlu1 %v11633_v61, %s12986_s11 }
 0x223   : > { %v11610_v62 = vpop.permute.xlu0 %11609 }
 0x224   : > { %v11612_v6 = vunpack.i.h.bf16 %v11610_v62  ;;  %v11611_v7 = vunpack.i.l.bf16 %v11610_v62 }
 0x228   : > { %v11615_v63 = vpop.permute.xlu0 %11614  ;;  %v11620_v1 = vpop.permute.xlu1 %11619 }
 0x229   : > { %v11617_v2 = vunpack.i.h.bf16 %v11615_v63  ;;  %v11616_v3 = vunpack.i.l.bf16 %v11615_v63  ;;  %v11622_v12 = vunpack.i.h.bf16 %v11620_v1  ;;  %v11621_v13 = vunpack.i.l.bf16 %v11620_v1 }
 0x22b   : > { %v724_v4 = vsel %vm420_vm13, %v670_v49, %v11616_v3  ;;  %v725_v5 = vsel %vm420_vm13, %v693_v55, %v11617_v2  ;;  %v718_v23 = vsel %vm420_vm13, %v13168_v27, %v11622_v12  ;;  %v717_v24 = vsel %vm420_vm13, %v666_v60, %v11621_v13  ;;  %v12910_v27 = vld [vmem:[%s22488_s2 + $0x88] sm:$0xff]  }
 0x22c   : > { %v11630_v9 = vpop.permute.xlu0 %11629  ;;  %v11625_v10 = vpop.permute.xlu1 %11624  ;;  %v726_v8 = vsel %vm428_vm3, %v724_v4, %v11611_v7  ;;  %v727_v18 = vsel %vm428_vm3, %v725_v5, %v11612_v6 }
 0x22d   : > { %v11632_v14 = vunpack.i.h.bf16 %v11630_v9  ;;  %v11631_v15 = vunpack.i.l.bf16 %v11630_v9  ;;  %v11627_v16 = vunpack.i.h.bf16 %v11625_v10  ;;  %v11626_v17 = vunpack.i.l.bf16 %v11625_v10 }
 0x22f   : > { %v728_v19 = vsel %vm721_vm1, %v726_v8, %v11631_v15  ;;  %v729_v20 = vsel %vm721_vm1, %v727_v18, %v11632_v14  ;;  %v719_v28 = vsel %vm428_vm3, %v717_v24, %v11626_v17  ;;  %v720_v29 = vsel %vm428_vm3, %v718_v23, %v11627_v16 }
 0x230   : > { %v11635_v21 = vpop.permute.xlu1 %11634  ;;  %v731_v22 = vpack.c.bf16 %v729_v20, %v728_v19 }
 0x231   : > { %v11637_v25 = vunpack.i.h.bf16 %v11635_v21  ;;  %v11636_v26 = vunpack.i.l.bf16 %v11635_v21 }
 0x232   : > { %912 = vmatprep.mubr.bf16.mxu1 %v731_v22 }
 0x233   : > { %v722_v30 = vsel %vm721_vm1, %v719_v28, %v11636_v26  ;;  %v723_v31 = vsel %vm721_vm1, %v720_v29, %v11637_v25 }
 0x234   : > { %v730_v33 = vpack.c.bf16 %v723_v31, %v722_v30 }
 0x236   : > { %913 = vmatmul.mubr.bf16.vlgmr.msra.gmra.mrb[0].mxu1 %v730_v33 }
 0x237   : > { %11484 = vmatpush3.bf16.msra.mxu1 %v12909_v32  ;;  %11487 = vmatprep.mubr.msk.bf16.mxu1 %vm12979_vm9, %v12974_v0  ;;  %vm1260_vm9 = vcmask 1046528  }
 0x238   : > { %11485 = vmatprep.subr.bf16.mxu1 %v12974_v0  ;;  %v12914_v0 = vld [vmem:[%s22489_s3] sm:$0xff]  }
 0x239   : > { %11222 = vmatpush3.bf16.msra.mxu0 %v12914_v0 }
 0x23a   : > { %11223 = vmatprep.subr.bf16.mxu0 %v12915_v37 }
 0x23b   : > { %11486 = vmatpush3.bf16.msra.mxu1 %v12910_v27 }
 0x23c   : > { %11491 = vmatprep.subr.bf16.mxu1 %v12911_v34 }
 0x23d   : > { %11224 = vmatpush3.bf16.msra.mxu0 %v12916_v38 }
 0x23e   : > { %11488 = vmatmul.mubr.msk.bf16.vlgmr.msra.gmra.mrb[4].mxu1 %vm420_vm13, %v732_v56  ;;  %11225 = vmatprep.subr.bf16.mxu0 %v12917_v39 }
 0x23f   : > { %11492 = vmatpush3.bf16.msra.mxu1 %v12911_v34 }
 0x240   : > { %11493 = vmatprep.subr.bf16.mxu1 %v12912_v35 }
 0x241   : > { %11226 = vmatpush3.bf16.msra.mxu0 %v12918_v40 }
 0x242   : > { %11227 = vmatprep.subr.bf16.mxu0 %v12919_v41 }
 0x243   : > { %11494 = vmatpush3.bf16.msra.mxu1 %v12912_v35 }
 0x245   : > { %11228 = vmatpush3.bf16.msra.mxu0 %v12920_v42 }
 0x246   : > { %11229 = vmatprep.subr.bf16.mxu0 %v12921_v43 }
 0x249   : > { %11230 = vmatpush3.bf16.msra.mxu0 %v12922_v44 }
 0x309   : > { %v11212_v45 = vpop.f32.mrb[0].mxu1 }
 0x30a   : > { %v11213_v46 = vpop.f32.mrb[1].mxu1 }
 0x30b   : > { %v11214_v47 = vadd.f32 %v11213_v46, %v11212_v45  ;;  %v11215_v48 = vpop.f32.mrb[2].mxu1 }
 0x30c   : > { %v11216_v49 = vpop.f32.mrb[3].mxu1 }
 0x30d   : > { %v11217_v50 = vadd.f32 %v11216_v49, %v11215_v48 }
 0x311   : > { %v955_v51 = vpop.f32.mrb[4].mxu1 }
 0x312   : > { %v956_v53 = vadd.f32 %v11214_v47, %v955_v51  ;;  %v11489_v54 = vpop.f32.mrb[5].mxu1 }
 0x313   : > { %v958_v55 = vpop.f32.mrb[6].mxu1 }
 0x314   : > { %v973_v56 = vmul.f32 %v956_v53, %v956_v53  ;;  %v959_v58 = vadd.f32 %v11217_v50, %v958_v55  ;;  %v11490_v59 = vpop.f32.mrb[7].mxu1  ;;  %v962_v60 = vsel %vm420_vm13, %v956_v53, 0.0 }
 0x316   : > { %v963_v61 = vsel %vm420_vm13, %v959_v58, 0.0  ;;  %v974_v62 = vmul.f32 %v959_v58, %v959_v58  ;;  %v975_v1 = vsel %vm420_vm13, %v973_v56, 0.0 }
 0x317   : > { %v964_v63 = vadd.f32 %v963_v61, %v962_v60 }
 0x318   : > { %v976_v2 = vsel %vm420_vm13, %v974_v62, 0.0 }
 0x319   : > { %v965_v3 = vrot.slane %v964_v63, 4  ;;  %v977_v4 = vadd.f32 %v976_v2, %v975_v1 }
 0x31b   : > { %v966_v5 = vadd.f32 %v965_v3, %v964_v63  ;;  %v978_v6 = vrot.slane %v977_v4, 4 }
 0x31d   : > { %v967_v7 = vrot.slane %v966_v5, 2  ;;  %v979_v9 = vadd.f32 %v978_v6, %v977_v4 }
 0x31f   : > { %v968_v10 = vadd.f32 %v967_v7, %v966_v5  ;;  %v980_v12 = vrot.slane %v979_v9, 2 }
 0x321   : > { %v969_v13 = vrot.slane %v968_v10, 1  ;;  %v981_v14 = vadd.f32 %v980_v12, %v979_v9 }
 0x323   : > { %v970_v15 = vadd.f32 %v969_v13, %v968_v10  ;;  %v982_v16 = vrot.slane %v981_v14, 1 }
 0x325   : > { %v972_v17 = vmul.f32 0.0625, %v970_v15  ;;  %v983_v8 = vadd.f32 %v982_v16, %v981_v14 }
 0x327   : > { %v984_v18 = vmul.f32 0.0625, %v983_v8  ;;  %v985_v19 = vmul.f32 %v972_v17, %v972_v17  ;;  %v988_v20 = vsub.f32 %v956_v53, %v972_v17  ;;  %v989_v21 = vsub.f32 %v959_v58, %v972_v17 }
 0x329   : > { %v986_v22 = vsub.f32 %v984_v18, %v985_v19  ;;  %v12923_v18 = vld [vmem:[%s22489_s3 + $0x68] sm:$0xff]  }
 0x32a   : > { %11231 = vmatprep.subr.bf16.mxu0 %v12923_v18 }
 0x32b   : > { %v987_v23 = vmax.f32 %v986_v22, 0.0 }
 0x32d   : > { %v990_v24 = vadd.f32 1e-05, %v987_v23 }
 0x32f   : > { %12953 = vrsqrt.f32 %v990_v24 }
 0x339   : > { %v12954_v25 = vpop.eup %12953 }
 0x33a   : > { %v992_v26 = vmul.f32 %v12954_v25, %v988_v20  ;;  %v993_v28 = vmul.f32 %v12954_v25, %v989_v21 }
 0x33c   : > { %v994_v29 = vmax.f32 %v992_v26, 0.0  ;;  %v995_v30 = vmax.f32 %v993_v28, 0.0 }
 0x33e   : > { %v997_v31 = vrot.slane %v994_v29, 4  ;;  %v999_v32 = vrot.slane %v995_v30, 4  ;;  %v1006_v33 = vrot.slane %v994_v29, %v13132_v52  ;;  %v1054_v27 = vrot.slane %v995_v30, %v13132_v52 }
 0x340   : > { %v1007_v34 = vcombine.high %v1006_v33, %v1006_v33  ;;  %v1055_v35 = vcombine.high %v1054_v27, %v1054_v27  ;;  %v1062_v36 = vrot.slane %v1054_v27, %v13132_v52  ;;  %v1078_v0 = vrot.slane %v999_v32, %v13132_v52  ;;  %v12924_v32 = vld [vmem:[%s22489_s3 + $0x28] sm:$0xff]  }
 0x341   : > { %v1014_v37 = vrot.slane %v1006_v33, %v13132_v52  ;;  %v1030_v38 = vrot.slane %v997_v31, %v13132_v52  ;;  %11232 = vmatpush3.bf16.msra.mxu0 %v12924_v32 }
 0x342   : > { %v1069_v39 = vrot.slane %v1055_v35, %v13132_v52  ;;  %v1070_v40 = vcombine.high %v1062_v36, %v1062_v36  ;;  %v1079_v41 = vcombine.high %v1078_v0, %v1078_v0  ;;  %v1086_v42 = vrot.slane %v1078_v0, %v13132_v52 }
 0x343   : > { %v1131_v43 = vrot.slane %v1062_v36, %v13136_v57  ;;  %v1021_v44 = vrot.slane %v1007_v34, %v13132_v52  ;;  %v1031_v45 = vcombine.high %v1030_v38, %v1030_v38  ;;  %v1022_v51 = vcombine.high %v1014_v37, %v1014_v37  ;;  %v12925_v36 = vld [vmem:[%s22489_s3 + $0x70] sm:$0xff]  }
 0x344   : > { %v1071_v46 = vcombine.high %v1069_v39, %v1069_v39  ;;  %v1093_v47 = vrot.slane %v1079_v41, %v13132_v52  ;;  %v1094_v48 = vcombine.high %v1086_v42, %v1086_v42  ;;  %v1135_v49 = vrot.slane %v1069_v39, %v13136_v57  ;;  %11233 = vmatprep.subr.bf16.mxu0 %v12925_v36 }
 0x345   : > { %v1139_v50 = vrot.slane %v1070_v40, %v13136_v57  ;;  %v1023_v53 = vcombine.high %v1021_v44, %v1021_v44  ;;  %v1038_v54 = vrot.slane %v1030_v38, %v13132_v52  ;;  %v1147_v58 = vrot.slane %v1086_v42, %v13136_v57  ;;  %v12926_v40 = vld [vmem:[%s22489_s3 + $0x30] sm:$0xff]  }
 0x346   : > { %v1095_v55 = vcombine.high %v1093_v47, %v1093_v47  ;;  %v1143_v56 = vrot.slane %v1071_v46, %v13136_v57  ;;  %v1151_v59 = vrot.slane %v1093_v47, %v13136_v57  ;;  %v1155_v60 = vrot.slane %v1094_v48, %v13136_v57  ;;  %11234 = vmatpush3.bf16.msra.mxu0 %v12926_v40 }
 0x347   : > { %v1202_v61 = vcombine.low %v1131_v43, %v1135_v49  ;;  %v1045_v62 = vrot.slane %v1031_v45, %v13132_v52  ;;  %v1046_v63 = vcombine.high %v1038_v54, %v1038_v54  ;;  %v1103_v4 = vrot.slane %v1021_v44, %v13136_v57 }
 0x348   : > { %v1159_v1 = vrot.slane %v1095_v55, %v13136_v57  ;;  %v1203_v2 = vcombine.low %v1139_v50, %v1143_v56  ;;  %v1219_v3 = vcombine.low %v1147_v58, %v1151_v59  ;;  %v1099_v7 = vrot.slane %v1014_v37, %v13136_v57 }
 0x349   : > { %v1210_v5 = vrot.slane %v1202_v61, %v13052_v11  ;;  %v1047_v6 = vcombine.high %v1045_v62, %v1045_v62  ;;  %v1111_v9 = vrot.slane %v1023_v53, %v13136_v57  ;;  %v1107_v13 = vrot.slane %v1022_v51, %v13136_v57  ;;  %v12927_v53 = vld [vmem:[%s22489_s3 + $0x78] sm:$0xff]  }
 0x34a   : > { %v1217_v10 = vrot.slane %v1203_v2, %v13052_v11  ;;  %v1220_v12 = vcombine.low %v1155_v60, %v1159_v1  ;;  %v1115_v14 = vrot.slane %v1038_v54, %v13136_v57  ;;  %v1119_v15 = vrot.slane %v1045_v62, %v13136_v57  ;;  %11235 = vmatprep.subr.bf16.mxu0 %v12927_v53 }
 0x34b   : > { %v1123_v16 = vrot.slane %v1046_v63, %v13136_v57  ;;  %v1127_v17 = vrot.slane %v1047_v6, %v13136_v57  ;;  %v1168_v8 = vcombine.low %v1099_v7, %v1103_v4  ;;  %v1227_v20 = vrot.slane %v1219_v3, %v13052_v11  ;;  %v12928_v63 = vld [vmem:[%s22489_s3 + $0x38] sm:$0xff]  }
 0x34c   : > { %v1218_v19 = vcombine.low %v1210_v5, %v1217_v10  ;;  %v1234_v21 = vrot.slane %v1220_v12, %v13052_v11  ;;  %v1169_v22 = vcombine.low %v1107_v13, %v1111_v9  ;;  %v1185_v23 = vcombine.low %v1115_v14, %v1119_v15  ;;  %11236 = vmatpush3.bf16.msra.mxu0 %v12928_v63 }
 0x34d   : > { %v1186_v24 = vcombine.low %v1123_v16, %v1127_v17  ;;  %v1176_v28 = vrot.slane %v1168_v8, %v13052_v11 }
 0x34e   : > { %v1235_v25 = vcombine.low %v1227_v20, %v1234_v21  ;;  %v1238_v26 = vrot.slane %v1218_v19, 7  ;;  %v1183_v29 = vrot.slane %v1169_v22, %v13052_v11  ;;  %v1193_v30 = vrot.slane %v1185_v23, %v13052_v11 }
 0x34f   : > { %v1200_v31 = vrot.slane %v1186_v24, %v13052_v11 }
 0x350   : > { %v1239_v33 = vrot.slane %v1235_v25, 7  ;;  %v13313_v27 = vsel %vm264_vm0, %v1131_v43, %v1238_v26  ;;  %v1184_v34 = vcombine.low %v1176_v28, %v1183_v29  ;;  %v1250_v35 = vsel %vm264_vm0, %v1238_v26, %v1143_v56 }
 0x351   : > { %v1201_v0 = vcombine.low %v1193_v30, %v1200_v31  ;;  %v1284_v42 = vrot.slane %v13313_v27, 2  ;;  %v1285_v43 = vrot.slane %v1250_v35, 2  ;;  %v1267_v12 = vrot.slane %v13313_v27, 1 }
 0x352   : > { %v13320_v37 = vsel %vm264_vm0, %v1147_v58, %v1239_v33  ;;  %v1236_v38 = vrot.slane %v1184_v34, 7  ;;  %v1251_v39 = vsel %vm264_vm0, %v1239_v33, %v1159_v1  ;;  %v1268_v13 = vrot.slane %v1250_v35, 1 }
 0x353   : > { %v1237_v41 = vrot.slane %v1201_v0, 7  ;;  %v1287_v46 = vrot.slane %v13320_v37, 2  ;;  %v1288_v47 = vrot.slane %v1251_v39, 2  ;;  %v1286_v2 = vsel %vm1277_vm14, %v1284_v42, %v1285_v43 }
 0x354   : > { %v13328_v44 = vsel %vm264_vm0, %v1099_v7, %v1236_v38  ;;  %v1248_v45 = vsel %vm264_vm0, %v1236_v38, %v1111_v9  ;;  %v1270_v19 = vrot.slane %v13320_v37, 1  ;;  %v1271_v20 = vrot.slane %v1251_v39, 1 }
 0x355   : > { %v13333_v48 = vsel %vm264_vm0, %v1115_v14, %v1237_v41  ;;  %v1261_v49 = vrot.slane %v13328_v44, 1  ;;  %v1262_v50 = vrot.slane %v1248_v45, 1  ;;  %v1278_v51 = vrot.slane %v13328_v44, 2 }
 0x356   : > { %v11638_v54 = vpack.i.bf16 %v13333_v48, %v13328_v44  ;;  %v1279_v55 = vrot.slane %v1248_v45, 2  ;;  %v1249_v56 = vsel %vm264_vm0, %v1237_v41, %v1127_v17  ;;  %v1281_v58 = vrot.slane %v13333_v48, 2 }
 0x357   : > { %v1263_v59 = vsel %vm1260_vm9, %v1261_v49, %v1262_v50  ;;  %v1282_v60 = vrot.slane %v1249_v56, 2  ;;  %v1264_v61 = vrot.slane %v13333_v48, 1  ;;  %v1265_v62 = vrot.slane %v1249_v56, 1 }
 0x358   : > { %11639 = vrot.lane.b32.xlu1 %v11638_v54, %s12983_s19  ;;  %v1280_v1 = vsel %vm1277_vm14, %v1278_v51, %v1279_v55  ;;  %v1289_v6 = vsel %vm1277_vm14, %v1287_v46, %v1288_v47  ;;  %v13364_v17 = vsel %vm1260_vm9, %v1267_v12, %v1268_v13  ;;  %v11673_v21 = vpack.i.bf16 %v1286_v2, %v13320_v37 }
 0x359   : > { %v11643_v3 = vpack.i.bf16 %v1263_v59, %v1280_v1  ;;  %v1283_v4 = vsel %vm1277_vm14, %v1281_v58, %v1282_v60  ;;  %v1266_v5 = vsel %vm1260_vm9, %v1264_v61, %v1265_v62  ;;  %v1407_v14 = vpack.c.bf16 %v1289_v6, %v1286_v2 }
 0x35a   : > { %v1401_v7 = vpack.c.bf16 %v1283_v4, %v1280_v1  ;;  %v1404_v9 = vpack.c.bf16 %v1286_v2, %v1283_v4  ;;  %v11653_v10 = vpack.i.bf16 %v1266_v5, %v1263_v59  ;;  %v11648_v15 = vpack.i.bf16 %v13313_v27, %v1280_v1 }
 0x35b   : > { %11644 = vrot.lane.b32.xlu0 %v11643_v3, %s12981_s17  ;;  %v11658_v16 = vpack.i.bf16 %v1266_v5, %v1283_v4  ;;  %v11663_v8 = vpack.i.bf16 %v13333_v48, %v13364_v17  ;;  %v1410_v18 = vpack.c.bf16 %v1289_v6, %v1289_v6  ;;  %v13377_v22 = vsel %vm1260_vm9, %v1270_v19, %v1271_v20 }
 0x35c   : > { %11495 = vmatprep.mubr.msk.bf16.mxu1 %vm420_vm13, %v1401_v7  ;;  %11654 = vrot.lane.b32.xlu1 %v11653_v10, %s12986_s11  ;;  %v11668_v23 = vpack.i.bf16 %v13364_v17, %v1286_v2  ;;  %v11683_v24 = vpack.i.bf16 %v13377_v22, %v1289_v6  ;;  %v11678_v25 = vpack.i.bf16 %v13313_v27, %v13377_v22 }
 0x35d   : > { %11496 = vmatmul.mubr.msk.bf16.vlgmr.msra.gmra.mrb[8].mxu1 %vm420_vm13, %v1404_v9 }
 0x35e   : > { %11499 = vmatprep.mubr.msk.bf16.mxu1 %vm420_vm13, %v1407_v14 }
 0x35f   : > { %11649 = vrot.lane.b32.xlu0 %v11648_v15, %s12983_s19 }
 0x360   : > { %11659 = vrot.lane.b32.xlu1 %v11658_v16, %s12981_s17 }
 0x363   : > { %1318 = vrot.lane.b32.xlu0 %v13328_v44, %s12986_s11 }
 0x364   : > { %11664 = vrot.lane.b32.xlu1 %v11663_v8, %s12986_s11 }
 0x365   : > { %11500 = vmatmul.mubr.msk.bf16.gmra.mrb[12].mxu1 %vm420_vm13, %v1410_v18 }
 0x367   : > { %1308 = vrot.lane.b32.xlu0 %v1283_v4, %s12983_s19 }
 0x368   : > { %11674 = vrot.lane.b32.xlu1 %v11673_v21, %s12983_s19 }
 0x36b   : > { %11669 = vrot.lane.b32.xlu0 %v11668_v23, %s12981_s17 }
 0x36c   : > { %11684 = vrot.lane.b32.xlu1 %v11683_v24, %s12981_s17 }
 0x36f   : > { %11679 = vrot.lane.b32.xlu0 %v11678_v25, %s12986_s11 }
 0x370   : > { %1324 = vrot.lane.b32.xlu1 %v13320_v37, %s12986_s11 }
 0x373   : > { %1312 = vrot.lane.b32.xlu0 %v1289_v6, %s12983_s19 }
 0x3ca   : > { %v11640_v26 = vpop.permute.xlu1 %11639 }
 0x3cb   : > { %v11642_v29 = vunpack.i.h.bf16 %v11640_v26  ;;  %v11641_v32 = vunpack.i.l.bf16 %v11640_v26 }
 0x3cd   : > { %v11645_v28 = vpop.permute.xlu0 %11644 }
 0x3ce   : > { %v11646_v30 = vunpack.i.l.bf16 %v11645_v28  ;;  %v11655_v31 = vpop.permute.xlu1 %11654  ;;  %v11647_v33 = vunpack.i.h.bf16 %v11645_v28 }
 0x3cf   : > { %v11657_v34 = vunpack.i.h.bf16 %v11655_v31  ;;  %v11656_v35 = vunpack.i.l.bf16 %v11655_v31 }
 0x3d0   : > { %v1381_v36 = vsel %vm420_vm13, %v1263_v59, %v11646_v30  ;;  %v1366_v46 = vsel %vm420_vm13, %v13328_v44, %v11647_v33 }
 0x3d1   : > { %v11650_v0 = vpop.permute.xlu0 %11649  ;;  %v1385_v38 = vsel %vm428_vm3, %v1381_v36, %v11641_v32  ;;  %v1386_v39 = vsel %vm428_vm3, %v1381_v36, %v11642_v29 }
 0x3d2   : > { %v11651_v40 = vunpack.i.l.bf16 %v11650_v0  ;;  %v11660_v41 = vpop.permute.xlu1 %11659  ;;  %v1392_v42 = vsel %vm721_vm1, %v1385_v38, %v11656_v35  ;;  %v1393_v43 = vsel %vm721_vm1, %v1386_v39, %v11657_v34  ;;  %v11652_v54 = vunpack.i.h.bf16 %v11650_v0 }
 0x3d3   : > { %v11661_v45 = vunpack.i.l.bf16 %v11660_v41  ;;  %v1400_v47 = vpack.c.bf16 %v1393_v43, %v1392_v42  ;;  %v11662_v50 = vunpack.i.h.bf16 %v11660_v41 }
 0x3d4   : > { %v1370_v49 = vsel %vm428_vm3, %v1366_v46, %v11651_v40 }
 0x3d5   : > { %v1382_v51 = vsel %vm420_vm13, %v1266_v5, %v11661_v45  ;;  %v1319_v53 = vpop.permute.xlu0 %1318  ;;  %1599 = vmatprep.mubr.bf16.mxu0 %v1400_v47  ;;  %v1367_v63 = vsel %vm420_vm13, %v13333_v48, %v11662_v50 }
 0x3d6   : > { %v1374_v55 = vsel %vm721_vm1, %v1370_v49, %v1319_v53  ;;  %v11665_v56 = vpop.permute.xlu1 %11664  ;;  %v1387_v58 = vsel %vm428_vm3, %v1382_v51, %v11642_v29  ;;  %v1388_v62 = vsel %vm428_vm3, %v1382_v51, %v11652_v54  ;;  %v12929_v51 = vld [vmem:[%s22490_s4 + $0x80] sm:$0xff]   ;;  %v12930_v53 = vld [vmem:[%s22490_s4 + $0x88] sm:$0xff]  }
 0x3d7   : > { %v1399_v59 = vpack.c.bf16 %v1374_v55, %v1374_v55  ;;  %v11666_v60 = vunpack.i.l.bf16 %v11665_v56  ;;  %v11667_v61 = vunpack.i.h.bf16 %v11665_v56  ;;  %v1394_v1 = vsel %vm721_vm1, %v1387_v58, %v11657_v34  ;;  %11503 = vmatprep.subr.bf16.mxu0 %v12929_v51 }
 0x3d9   : > { %v1309_v44 = vpop.permute.xlu0 %1308  ;;  %1600 = vmatmul.mubr.bf16.vlgmr.msra.gmra.mrb[4].mxu0 %v1399_v59  ;;  %v1395_v2 = vsel %vm721_vm1, %v1388_v62, %v11666_v60  ;;  %v1375_v7 = vsel %vm721_vm1, %v1370_v49, %v11667_v61 }
 0x3da   : > { %v1371_v3 = vsel %vm428_vm3, %v1367_v63, %v1309_v44  ;;  %v11675_v4 = vpop.permute.xlu1 %11674  ;;  %v1403_v5 = vpack.c.bf16 %v1395_v2, %v1394_v1  ;;  %11504 = vmatpush3.bf16.msra.mxu0 %v12929_v51 }
 0x3db   : > { %v1376_v6 = vsel %vm721_vm1, %v1371_v3, %v11667_v61  ;;  %v11677_v8 = vunpack.i.h.bf16 %v11675_v4  ;;  %v11676_v18 = vunpack.i.l.bf16 %v11675_v4  ;;  %11505 = vmatprep.subr.bf16.mxu0 %v12930_v53 }
 0x3dc   : > { %1607 = vmatprep.mubr.bf16.mxu0 %v1403_v5  ;;  %v1402_v48 = vpack.c.bf16 %v1376_v6, %v1375_v7 }
 0x3dd   : > { %v11670_v9 = vpop.permute.xlu0 %11669 }
 0x3de   : > { %v11672_v10 = vunpack.i.h.bf16 %v11670_v9  ;;  %v11671_v12 = vunpack.i.l.bf16 %v11670_v9  ;;  %v11685_v13 = vpop.permute.xlu1 %11684  ;;  %11506 = vmatpush3.bf16.msra.mxu0 %v12930_v53 }
 0x3df   : > { %v11686_v14 = vunpack.i.l.bf16 %v11685_v13  ;;  %v11687_v25 = vunpack.i.h.bf16 %v11685_v13 }
 0x3e0   : > { %v1383_v15 = vsel %vm420_vm13, %v13364_v17, %v11671_v12  ;;  %v1368_v16 = vsel %vm420_vm13, %v13313_v27, %v11672_v10 }
 0x3e1   : > { %v1384_v19 = vsel %vm420_vm13, %v13377_v22, %v11686_v14  ;;  %v11680_v20 = vpop.permute.xlu0 %11679  ;;  %1608 = vmatmul.mubr.bf16.gmra.mrb[8].mxu0 %v1402_v48  ;;  %v1389_v21 = vsel %vm428_vm3, %v1383_v15, %v11652_v54  ;;  %v1372_v26 = vsel %vm428_vm3, %v1368_v16, %v11677_v8  ;;  %v1390_v28 = vsel %vm428_vm3, %v1383_v15, %v11676_v18 }
 0x3e2   : > { %v11682_v23 = vunpack.i.h.bf16 %v11680_v20  ;;  %v11681_v24 = vunpack.i.l.bf16 %v11680_v20  ;;  %v1391_v17 = vsel %vm428_vm3, %v1384_v19, %v11676_v18  ;;  %v1396_v27 = vsel %vm721_vm1, %v1389_v21, %v11666_v60  ;;  %v1325_v38 = vpop.permute.xlu1 %1324 }
 0x3e3   : > { %v1369_v35 = vsel %vm420_vm13, %v13320_v37, %v11687_v25  ;;  %v1379_v40 = vsel %vm721_vm1, %v1372_v26, %v1325_v38 }
 0x3e4   : > { %v1397_v29 = vsel %vm721_vm1, %v1390_v28, %v11681_v24  ;;  %v1377_v30 = vsel %vm721_vm1, %v1371_v3, %v11682_v23  ;;  %v1378_v22 = vsel %vm721_vm1, %v1372_v26, %v11682_v23  ;;  %v1398_v32 = vsel %vm721_vm1, %v1391_v17, %v11681_v24 }
 0x3e5   : > { %v1406_v31 = vpack.c.bf16 %v1397_v29, %v1396_v27  ;;  %v1313_v33 = vpop.permute.xlu0 %1312  ;;  %v1405_v34 = vpack.c.bf16 %v1378_v22, %v1377_v30  ;;  %v1409_v36 = vpack.c.bf16 %v1398_v32, %v1398_v32 }
 0x3e6   : > { %v1373_v0 = vsel %vm428_vm3, %v1369_v35, %v1313_v33 }
 0x3e7   : > { %1615 = vmatprep.mubr.bf16.mxu0 %v1406_v31  ;;  %v1380_v39 = vsel %vm721_vm1, %v1373_v0, %v1325_v38 }
 0x3e8   : > { %v1408_v41 = vpack.c.bf16 %v1380_v39, %v1379_v40 }
 0x3e9   : > { %1616 = vmatmul.mubr.bf16.gmra.mrb[12].mxu0 %v1405_v34 }
 0x3ea   : > { %1623 = vmatprep.mubr.bf16.mxu0 %v1409_v36 }
 0x3f1   : > { %1624 = vmatmul.mubr.bf16.gmra.mrb[16].mxu0 %v1408_v41 }
 0x430   : > { %v11497_v42 = vpop.f32.mrb[8].mxu1 }
 0x431   : > { %v1666_v43 = vpop.f32.mrb[9].mxu1 }
 0x432   : > { %v11498_v45 = vpop.f32.mrb[10].mxu1 }
 0x433   : > { %v1669_v46 = vpop.f32.mrb[11].mxu1 }
 0x438   : > { %v13429_v47 = vpop.f32.mrb[12].mxu1 }
 0x439   : > { %v1682_v49 = vpop.f32.mrb[13].mxu1 }
 0x43a   : > { %v13431_v37 = vpop.f32.mrb[14].mxu1 }
 0x43b   : > { %v1685_v50 = vpop.f32.mrb[15].mxu1 }
 0x4ac   : > { %v11237_v54 = vpop.f32.mrb[4].mxu0 }
 0x4ad   : > { %v11238_v55 = vpop.f32.mrb[5].mxu0 }
 0x4ae   : > { %v11239_v56 = vadd.f32 %v11238_v55, %v11237_v54  ;;  %v11240_v58 = vpop.f32.mrb[6].mxu0 }
 0x4af   : > { %v11241_v59 = vpop.f32.mrb[7].mxu0 }
 0x4b0   : > { %v13439_v60 = vadd.f32 %v11239_v56, %v1666_v43  ;;  %v11242_v61 = vadd.f32 %v11241_v59, %v11240_v58 }
 0x4b2   : > { %v1720_v62 = vmul.f32 %v13439_v60, %v13439_v60  ;;  %v13443_v44 = vadd.f32 %v11242_v61, %v1669_v46  ;;  %v1697_v63 = vsel %vm420_vm13, %v13439_v60, 0.0 }
 0x4b4   : > { %v1698_v1 = vsel %vm420_vm13, %v13443_v44, 0.0  ;;  %v1721_v2 = vmul.f32 %v13443_v44, %v13443_v44  ;;  %v11243_v3 = vpop.f32.mrb[8].mxu0  ;;  %v1728_v6 = vsel %vm420_vm13, %v1720_v62, 0.0 }
 0x4b5   : > { %v1699_v4 = vadd.f32 %v1698_v1, %v1697_v63  ;;  %v11244_v5 = vpop.f32.mrb[9].mxu0 }
 0x4b6   : > { %v1729_v7 = vsel %vm420_vm13, %v1721_v2, 0.0  ;;  %v11245_v9 = vadd.f32 %v11244_v5, %v11243_v3  ;;  %v11246_v10 = vpop.f32.mrb[10].mxu0 }
 0x4b7   : > { %v1730_v12 = vadd.f32 %v1729_v7, %v1728_v6  ;;  %v11247_v13 = vpop.f32.mrb[11].mxu0 }
 0x4b8   : > { %v13453_v14 = vadd.f32 %v11497_v42, %v11245_v9  ;;  %v11248_v48 = vadd.f32 %v11247_v13, %v11246_v10 }
 0x4ba   : > { %v1700_v15 = vsel %vm420_vm13, %v13453_v14, 0.0  ;;  %v1722_v16 = vmul.f32 %v13453_v14, %v13453_v14  ;;  %v13459_v8 = vadd.f32 %v11498_v45, %v11248_v48 }
 0x4bb   : > { %v1701_v18 = vadd.f32 %v1700_v15, %v1699_v4 }
 0x4bc   : > { %v1731_v19 = vsel %vm420_vm13, %v1722_v16, 0.0  ;;  %v1702_v20 = vsel %vm420_vm13, %v13459_v8, 0.0  ;;  %v1723_v21 = vmul.f32 %v13459_v8, %v13459_v8  ;;  %v11249_v23 = vpop.f32.mrb[12].mxu0 }
 0x4bd   : > { %v1732_v24 = vadd.f32 %v1731_v19, %v1730_v12  ;;  %v1703_v25 = vadd.f32 %v1702_v20, %v1701_v18  ;;  %v11250_v26 = vpop.f32.mrb[13].mxu0 }
 0x4be   : > { %v1733_v28 = vsel %vm420_vm13, %v1723_v21, 0.0  ;;  %v11251_v17 = vadd.f32 %v11250_v26, %v11249_v23  ;;  %v11252_v27 = vpop.f32.mrb[14].mxu0 }
 0x4bf   : > { %v1734_v29 = vadd.f32 %v1733_v28, %v1732_v24  ;;  %v11253_v30 = vpop.f32.mrb[15].mxu0 }
 0x4c0   : > { %v13467_v22 = vadd.f32 %v11251_v17, %v1682_v49  ;;  %v11254_v31 = vadd.f32 %v11253_v30, %v11252_v27 }
 0x4c2   : > { %v1704_v32 = vsel %vm420_vm13, %v13467_v22, 0.0  ;;  %v1724_v33 = vmul.f32 %v13467_v22, %v13467_v22  ;;  %v1686_v34 = vadd.f32 %v11254_v31, %v1685_v50 }
 0x4c3   : > { %v1705_v35 = vadd.f32 %v1704_v32, %v1703_v25 }
 0x4c4   : > { %v1735_v36 = vsel %vm420_vm13, %v1724_v33, 0.0  ;;  %v1706_v0 = vsel %vm420_vm13, %v1686_v34, 0.0  ;;  %v1725_v38 = vmul.f32 %v1686_v34, %v1686_v34  ;;  %v11255_v39 = vpop.f32.mrb[16].mxu0 }
 0x4c5   : > { %v1736_v40 = vadd.f32 %v1735_v36, %v1734_v29  ;;  %v1707_v41 = vadd.f32 %v1706_v0, %v1705_v35  ;;  %v11256_v42 = vpop.f32.mrb[17].mxu0 }
 0x4c6   : > { %v1737_v43 = vsel %vm420_vm13, %v1725_v38, 0.0  ;;  %v11257_v45 = vadd.f32 %v11256_v42, %v11255_v39  ;;  %v11258_v46 = vpop.f32.mrb[18].mxu0 }
 0x4c7   : > { %v1738_v49 = vadd.f32 %v1737_v43, %v1736_v40  ;;  %v11259_v51 = vpop.f32.mrb[19].mxu0 }
 0x4c8   : > { %v1691_v53 = vadd.f32 %v13429_v47, %v11257_v45  ;;  %v11260_v54 = vadd.f32 %v11259_v51, %v11258_v46 }
 0x4ca   : > { %v1708_v50 = vsel %vm420_vm13, %v1691_v53, 0.0  ;;  %v1726_v55 = vmul.f32 %v1691_v53, %v1691_v53  ;;  %v1694_v56 = vadd.f32 %v13431_v37, %v11260_v54 }
 0x4cb   : > { %v1709_v58 = vadd.f32 %v1708_v50, %v1707_v41 }
 0x4cc   : > { %v1739_v59 = vsel %vm420_vm13, %v1726_v55, 0.0  ;;  %v1710_v61 = vsel %vm420_vm13, %v1694_v56, 0.0  ;;  %v1727_v62 = vmul.f32 %v1694_v56, %v1694_v56 }
 0x4cd   : > { %v1740_v63 = vadd.f32 %v1739_v59, %v1738_v49  ;;  %v1711_v1 = vadd.f32 %v1710_v61, %v1709_v58 }
 0x4ce   : > { %v1741_v2 = vsel %vm420_vm13, %v1727_v62, 0.0 }
 0x4cf   : > { %v1712_v3 = vrot.slane %v1711_v1, 4  ;;  %v1742_v4 = vadd.f32 %v1741_v2, %v1740_v63 }
 0x4d1   : > { %v1713_v5 = vadd.f32 %v1712_v3, %v1711_v1  ;;  %v1743_v47 = vrot.slane %v1742_v4, 4 }
 0x4d3   : > { %v1714_v6 = vrot.slane %v1713_v5, 2  ;;  %v1744_v7 = vadd.f32 %v1743_v47, %v1742_v4 }
 0x4d5   : > { %v1715_v9 = vadd.f32 %v1714_v6, %v1713_v5  ;;  %v1745_v10 = vrot.slane %v1744_v7, 2 }
 0x4d7   : > { %v1716_v12 = vrot.slane %v1715_v9, 1  ;;  %v1746_v37 = vadd.f32 %v1745_v10, %v1744_v7 }
 0x4d9   : > { %v1717_v13 = vadd.f32 %v1716_v12, %v1715_v9  ;;  %v1747_v48 = vrot.slane %v1746_v37, 1 }
 0x4db   : > { %v1719_v15 = vmul.f32 0.015625, %v1717_v13  ;;  %v1748_v16 = vadd.f32 %v1747_v48, %v1746_v37  ;;  %v12931_v13 = vld [vmem:[%s22490_s4 + $0x40] sm:$0xff]  }
 0x4dc   : > { %v12932_v48 = vld [vmem:[%s22490_s4] sm:$0xff]   ;;  %11267 = vmatprep.subr.bf16.mxu1 %v12931_v13  ;;  %v12938_v13 = vld [vmem:[%s22490_s4 + $0x18] sm:$0xff]  }
 0x4dd   : > { %v1749_v18 = vmul.f32 0.015625, %v1748_v16  ;;  %v1750_v19 = vmul.f32 %v1719_v15, %v1719_v15  ;;  %v1760_v20 = vsub.f32 %v1694_v56, %v1719_v15  ;;  %v1753_v21 = vsub.f32 %v13439_v60, %v1719_v15  ;;  %11268 = vmatpush3.bf16.msra.mxu1 %v12932_v48 }
 0x4de   : > { %v1754_v23 = vsub.f32 %v13443_v44, %v1719_v15  ;;  %v1755_v24 = vsub.f32 %v13453_v14, %v1719_v15  ;;  %v1756_v25 = vsub.f32 %v13459_v8, %v1719_v15  ;;  %v1757_v26 = vsub.f32 %v13467_v22, %v1719_v15 }
 0x4df   : > { %v1751_v28 = vsub.f32 %v1749_v18, %v1750_v19  ;;  %v1758_v17 = vsub.f32 %v1686_v34, %v1719_v15  ;;  %v1759_v27 = vsub.f32 %v1691_v53, %v1719_v15  ;;  %v12933_v15 = vld [vmem:[%s22490_s4 + $0x48] sm:$0xff]  }
 0x4e0   : > { %11269 = vmatprep.subr.bf16.mxu1 %v12933_v15 }
 0x4e1   : > { %v1752_v29 = vmax.f32 %v1751_v28, 0.0 }
 0x4e3   : > { %v1761_v30 = vadd.f32 1e-05, %v1752_v29  ;;  %v12934_v29 = vld [vmem:[%s22490_s4 + $0x8] sm:$0xff]  }
 0x4e4   : > { %11270 = vmatpush3.bf16.msra.mxu1 %v12934_v29 }
 0x4e5   : > { %12955 = vrsqrt.f32 %v1761_v30 }
 0x4ef   : > { %v12956_v31 = vpop.eup %12955 }
 0x4f0   : > { %v1770_v32 = vmul.f32 %v12956_v31, %v1760_v20  ;;  %v1763_v33 = vmul.f32 %v12956_v31, %v1753_v21  ;;  %v1764_v35 = vmul.f32 %v12956_v31, %v1754_v23  ;;  %v1765_v36 = vmul.f32 %v12956_v31, %v1755_v24 }
 0x4f1   : > { %v1766_v60 = vmul.f32 %v12956_v31, %v1756_v25  ;;  %v1767_v0 = vmul.f32 %v12956_v31, %v1757_v26  ;;  %v13487_v44 = vmul.f32 %v12956_v31, %v1758_v17  ;;  %v13489_v14 = vmul.f32 %v12956_v31, %v1759_v27 }
 0x4f2   : > { %v1778_v8 = vmax.f32 %v1770_v32, 0.0  ;;  %v1771_v38 = vmax.f32 %v1763_v33, 0.0  ;;  %v1772_v22 = vmax.f32 %v1764_v35, 0.0  ;;  %v13493_v42 = vmax.f32 %v1765_v36, 0.0  ;;  %v12935_v35 = vld [vmem:[%s22490_s4 + $0x50] sm:$0xff]  }
 0x4f3   : > { %v13506_v63 = vmax.f32 %v1766_v60, 0.0  ;;  %v13513_v4 = vmax.f32 %v1767_v0, 0.0  ;;  %11271 = vmatprep.subr.bf16.mxu1 %v12935_v35 }
 0x4f4   : > { %v2130_v39 = vcombine.high %v1778_v8, %v1778_v8  ;;  %v2137_v34 = vrot.slane %v1778_v8, %v13132_v52  ;;  %v1787_v40 = vcombine.high %v1771_v38, %v1771_v38  ;;  %v1794_v41 = vrot.slane %v1771_v38, %v13132_v52 }
 0x4f5   : > { %v1836_v54 = vcombine.high %v1772_v22, %v1772_v22  ;;  %v1843_v58 = vrot.slane %v1772_v22, %v13132_v52  ;;  %v1885_v3 = vcombine.high %v13493_v42, %v13493_v42  ;;  %v13518_v7 = vrot.slane %v13493_v42, %v13132_v52 }
 0x4f6   : > { %v2144_v43 = vrot.slane %v2130_v39, %v13132_v52  ;;  %v2145_v45 = vcombine.high %v2137_v34, %v2137_v34  ;;  %v2153_v46 = vrot.slane %v2137_v34, %v13132_v52  ;;  %v1801_v49 = vrot.slane %v1787_v40, %v13132_v52 }
 0x4f7   : > { %v1802_v51 = vcombine.high %v1794_v41, %v1794_v41  ;;  %v1810_v53 = vrot.slane %v1794_v41, %v13132_v52  ;;  %v1850_v12 = vrot.slane %v1836_v54, %v13132_v52  ;;  %v1851_v37 = vcombine.high %v1843_v58, %v1843_v58 }
 0x4f8   : > { %v2146_v50 = vcombine.high %v2144_v43, %v2144_v43  ;;  %v13500_v55 = vrot.slane %v2144_v43, %v13132_v52  ;;  %v2167_v56 = vrot.slane %v2145_v45, %v13132_v52  ;;  %v1803_v59 = vcombine.high %v1801_v49, %v1801_v49 }
 0x4f9   : > { %v1817_v61 = vrot.slane %v1801_v49, %v13132_v52  ;;  %v1824_v62 = vrot.slane %v1802_v51, %v13132_v52  ;;  %v2175_v2 = vcombine.high %v2153_v46, %v2153_v46  ;;  %v1832_v6 = vcombine.high %v1810_v53, %v1810_v53 }
 0x4fa   : > { %v13509_v1 = vrot.slane %v2146_v50, %v13132_v52  ;;  %v2177_v5 = vcombine.high %v2167_v56, %v2167_v56  ;;  %v1831_v47 = vrot.slane %v1803_v59, %v13132_v52  ;;  %v2176_v9 = vcombine.high %v13500_v55, %v13500_v55  ;;  %v12937_v50 = vld [vmem:[%s22490_s4 + $0x58] sm:$0xff]  }
 0x4fb   : > { %v13523_v10 = vrot.slane %v2153_v46, %v13136_v57  ;;  %v2410_v16 = vrot.slane %v2167_v56, %v13136_v57  ;;  %v1833_v18 = vcombine.high %v1817_v61, %v1817_v61  ;;  %v1834_v19 = vcombine.high %v1824_v62, %v1824_v62  ;;  %v12936_v46 = vld [vmem:[%s22490_s4 + $0x10] sm:$0xff]  }
 0x4fc   : > { %v1835_v20 = vcombine.high %v1831_v47, %v1831_v47  ;;  %v2178_v21 = vcombine.high %v13509_v1, %v13509_v1  ;;  %v13539_v23 = vrot.slane %v2175_v2, %v13136_v57  ;;  %v2422_v24 = vrot.slane %v13500_v55, %v13136_v57  ;;  %11272 = vmatpush3.bf16.msra.mxu1 %v12936_v46 }
 0x4fd   : > { %v2186_v25 = vrot.slane %v1824_v62, %v13136_v57  ;;  %v13545_v26 = vrot.slane %v2177_v5, %v13136_v57  ;;  %v2182_v28 = vrot.slane %v1810_v53, %v13136_v57  ;;  %v2190_v17 = vrot.slane %v1832_v6, %v13136_v57  ;;  %11273 = vmatprep.subr.bf16.mxu1 %v12937_v50 }
 0x4fe   : > { %v2194_v27 = vrot.slane %v1834_v19, %v13136_v57  ;;  %v2426_v30 = vrot.slane %v13509_v1, %v13136_v57  ;;  %v2198_v31 = vrot.slane %v1817_v61, %v13136_v57  ;;  %v2202_v32 = vrot.slane %v1831_v47, %v13136_v57  ;;  %v12939_v19 = vld [vmem:[%s22490_s4 + $0x60] sm:$0xff]  }
 0x4ff   : > { %v2206_v33 = vrot.slane %v1833_v18, %v13136_v57  ;;  %v2210_v36 = vrot.slane %v1835_v20, %v13136_v57  ;;  %v2451_v60 = vcombine.low %v2182_v28, %v2186_v25  ;;  %v1852_v8 = vcombine.high %v1850_v12, %v1850_v12 }
 0x500   : > { %v2452_v0 = vcombine.low %v2190_v17, %v2194_v27  ;;  %v13563_v38 = vrot.slane %v2176_v9, %v13136_v57  ;;  %v2468_v22 = vcombine.low %v2198_v31, %v2202_v32  ;;  %v1859_v39 = vrot.slane %v1843_v58, %v13132_v52  ;;  %11274 = vmatpush3.bf16.msra.mxu1 %v12938_v13 }
 0x501   : > { %v1866_v34 = vrot.slane %v1850_v12, %v13132_v52  ;;  %v2459_v40 = vrot.slane %v2451_v60, %v13052_v11  ;;  %v2469_v43 = vcombine.low %v2206_v33, %v2210_v36  ;;  %v1873_v45 = vrot.slane %v1851_v37, %v13132_v52  ;;  %11275 = vmatprep.subr.bf16.mxu1 %v12939_v19 }
 0x502   : > { %v2466_v41 = vrot.slane %v2452_v0, %v13052_v11  ;;  %v13574_v49 = vcombine.low %v13523_v10, %v2410_v16  ;;  %v2476_v51 = vrot.slane %v2468_v22, %v13052_v11  ;;  %v1880_v53 = vrot.slane %v1852_v8, %v13132_v52 }
 0x503   : > { %v1881_v54 = vcombine.high %v1859_v39, %v1859_v39  ;;  %v2483_v58 = vrot.slane %v2469_v43, %v13052_v11  ;;  %v1882_v59 = vcombine.high %v1866_v34, %v1866_v34  ;;  %v1883_v61 = vcombine.high %v1873_v45, %v1873_v45 }
 0x504   : > { %v2467_v56 = vcombine.low %v2459_v40, %v2466_v41  ;;  %v2690_v62 = vcombine.low %v13539_v23, %v13545_v26  ;;  %v1884_v2 = vcombine.high %v1880_v53, %v1880_v53  ;;  %v2214_v5 = vrot.slane %v1859_v39, %v13136_v57 }
 0x505   : > { %v2218_v47 = vrot.slane %v1873_v45, %v13136_v57  ;;  %v2484_v6 = vcombine.low %v2476_v51, %v2483_v58  ;;  %v2222_v12 = vrot.slane %v1881_v54, %v13136_v57  ;;  %v2226_v37 = vrot.slane %v1883_v61, %v13136_v57  ;;  %v12942_v61 = vld [vmem:[%s22490_s4 + $0x28] sm:$0xff]  }
 0x506   : > { %v2723_v9 = vrot.slane %v2467_v56, 7  ;;  %v2230_v48 = vrot.slane %v1866_v34, %v13136_v57  ;;  %v2234_v15 = vrot.slane %v1880_v53, %v13136_v57  ;;  %v2238_v16 = vrot.slane %v1882_v59, %v13136_v57 }
 0x507   : > { %v2242_v18 = vrot.slane %v1884_v2, %v13136_v57  ;;  %v2724_v20 = vrot.slane %v2484_v6, 7  ;;  %v2485_v17 = vcombine.low %v2214_v5, %v2218_v47  ;;  %v2486_v27 = vcombine.low %v2222_v12, %v2226_v37  ;;  %v12943_v6 = vld [vmem:[%s22490_s4 + $0x70] sm:$0xff]  }
 0x508   : > { %v13599_v25 = vsel %vm264_vm0, %v2182_v28, %v2723_v9  ;;  %v2502_v32 = vcombine.low %v2230_v48, %v2234_v15  ;;  %v12940_v28 = vld [vmem:[%s22490_s4 + $0x20] sm:$0xff]   ;;  %v1899_v12 = vrot.slane %v1885_v3, %v13132_v52  ;;  %v1900_v37 = vcombine.high %v13518_v7, %v13518_v7 }
 0x509   : > { %v2859_v29 = vrot.slane %v13599_v25, 2  ;;  %v2803_v31 = vrot.slane %v13599_v25, 1  ;;  %v2503_v33 = vcombine.low %v2238_v16, %v2242_v18  ;;  %v13604_v35 = vsel %vm264_vm0, %v2723_v9, %v2724_v20  ;;  %11276 = vmatpush3.bf16.msra.mxu1 %v12940_v28 }
 0x50a   : > { %v2779_v60 = vsel %vm264_vm0, %v2724_v20, %v2210_v36  ;;  %v2493_v0 = vrot.slane %v2485_v17, %v13052_v11  ;;  %v2500_v8 = vrot.slane %v2486_v27, %v13052_v11  ;;  %v13614_v22 = vpack.i.bf16 %v13604_v35, %v13599_v25  ;;  %v12941_v36 = vld [vmem:[%s22490_s4 + $0x68] sm:$0xff]  }
 0x50b   : > { %v2860_v39 = vrot.slane %v13604_v35, 2  ;;  %v2862_v34 = vrot.slane %v2779_v60, 2  ;;  %v2804_v40 = vrot.slane %v13604_v35, 1  ;;  %v2806_v41 = vrot.slane %v2779_v60, 1  ;;  %11277 = vmatprep.subr.bf16.mxu1 %v12941_v36 }
 0x50c   : > { %v2501_v43 = vcombine.low %v2493_v0, %v2500_v8  ;;  %v2510_v45 = vrot.slane %v2502_v32, %v13052_v11  ;;  %v2517_v46 = vrot.slane %v2503_v33, %v13052_v11  ;;  %11689 = vrot.lane.b32.xlu0 %v13614_v22, %s12983_s19  ;;  %v1908_v13 = vrot.slane %v13518_v7, %v13132_v52 }
 0x50d   : > { %v2861_v51 = vsel %vm1277_vm14, %v2859_v29, %v2860_v39  ;;  %v2863_v53 = vsel %vm1277_vm14, %v2860_v39, %v2862_v34  ;;  %v13628_v54 = vsel %vm1260_vm9, %v2803_v31, %v2804_v40  ;;  %v13631_v56 = vsel %vm1260_vm9, %v2804_v40, %v2806_v41  ;;  %11278 = vmatpush3.bf16.msra.mxu1 %v12942_v61 }
 0x50e   : > { %v3343_v50 = vpack.c.bf16 %v2863_v53, %v2861_v51  ;;  %v11693_v58 = vpack.i.bf16 %v2863_v53, %v2861_v51  ;;  %v2518_v59 = vcombine.low %v2510_v45, %v2517_v46  ;;  %v11698_v2 = vpack.i.bf16 %v13631_v56, %v13628_v54  ;;  %11279 = vmatprep.subr.bf16.mxu1 %v12943_v6  ;;  %v12946_v51 = vld [vmem:[%s22490_s4 + $0x38] sm:$0xff]  }
 0x50f   : > { %v2726_v47 = vrot.slane %v2501_v43, 7  ;;  %v1934_v15 = vcombine.high %v13506_v63, %v13506_v63  ;;  %v1941_v42 = vrot.slane %v13506_v63, %v13132_v52  ;;  %v13660_v3 = vmax.f32 %v13487_v44, 0.0 }
 0x510   : > { %11507 = vmatprep.mubr.msk.bf16.mxu0 %vm420_vm13, %v3343_v50  ;;  %v2727_v9 = vrot.slane %v2518_v59, 7  ;;  %11699 = vrot.lane.b32.xlu1 %v11698_v2, %s12981_s17  ;;  %v1901_v20 = vcombine.high %v1899_v12, %v1899_v12  ;;  %v1915_v63 = vrot.slane %v1899_v12, %v13132_v52  ;;  %v1922_v44 = vrot.slane %v1900_v37, %v13132_v52 }
 0x511   : > { %11694 = vrot.lane.b32.xlu0 %v11693_v58, %s12981_s17  ;;  %v13653_v48 = vsel %vm264_vm0, %v2214_v5, %v2726_v47  ;;  %v12944_v5 = vld [vmem:[%s22490_s4 + $0x30] sm:$0xff]   ;;  %v1930_v31 = vcombine.high %v1908_v13, %v1908_v13  ;;  %v13678_v32 = vrot.slane %v1908_v13, %v13136_v57  ;;  %v2697_v55 = vrot.slane %v13574_v49, %v13052_v11 }
 0x512   : > { %v13663_v16 = vsel %vm264_vm0, %v2726_v47, %v2727_v9  ;;  %v2780_v7 = vsel %vm264_vm0, %v2727_v9, %v2242_v18  ;;  %v2864_v19 = vrot.slane %v13653_v48, 2  ;;  %v12945_v18 = vld [vmem:[%s22490_s4 + $0x78] sm:$0xff]   ;;  %v1929_v29 = vrot.slane %v1901_v20, %v13132_v52  ;;  %11280 = vmatpush3.bf16.msra.mxu1 %v12944_v5 }
 0x513   : > { %v2865_v17 = vrot.slane %v13663_v16, 2  ;;  %v2867_v27 = vrot.slane %v2780_v7, 2  ;;  %v13682_v33 = vpack.i.bf16 %v13663_v16, %v13653_v48  ;;  %v1931_v8 = vcombine.high %v1915_v63, %v1915_v63  ;;  %11281 = vmatprep.subr.bf16.mxu1 %v12945_v18 }
 0x514   : > { %11704 = vrot.lane.b32.xlu1 %v11693_v58, %s12983_s19  ;;  %v2808_v28 = vrot.slane %v13653_v48, 1  ;;  %v1932_v34 = vcombine.high %v1922_v44, %v1922_v44  ;;  %v1933_v40 = vcombine.high %v1929_v29, %v1929_v29  ;;  %v2250_v36 = vrot.slane %v1922_v44, %v13136_v57 }
 0x515   : > { %v2866_v60 = vsel %vm1277_vm14, %v2864_v19, %v2865_v17  ;;  %v2868_v0 = vsel %vm1277_vm14, %v2865_v17, %v2867_v27  ;;  %11709 = vrot.lane.b32.xlu0 %v11698_v2, %s12986_s11  ;;  %v2254_v41 = vrot.slane %v1930_v31, %v13136_v57  ;;  %v2262_v43 = vrot.slane %v1915_v63, %v13136_v57 }
 0x516   : > { %v3345_v39 = vpack.c.bf16 %v2868_v0, %v2866_v60  ;;  %v2266_v45 = vrot.slane %v1929_v29, %v13136_v57  ;;  %v2270_v46 = vrot.slane %v1931_v8, %v13136_v57  ;;  %v2258_v53 = vrot.slane %v1932_v34, %v13136_v57  ;;  %11282 = vmatpush3.bf16.msra.mxu1 %v12946_v51 }
 0x517   : > { %v2274_v50 = vrot.slane %v1933_v40, %v13136_v57  ;;  %v2519_v58 = vcombine.low %v13678_v32, %v2250_v36  ;;  %v2809_v59 = vrot.slane %v13663_v16, 1  ;;  %v2811_v2 = vrot.slane %v2780_v7, 1 }
 0x518   : > { %11508 = vmatmul.mubr.msk.bf16.vlgmr.msra.gmra.mrb[20].mxu0 %vm420_vm13, %v3345_v39  ;;  %11714 = vrot.lane.b32.xlu1 %v13614_v22, %s12986_s11  ;;  %v2536_v61 = vcombine.low %v2262_v43, %v2266_v45  ;;  %v11728_v47 = vpack.i.bf16 %v2868_v0, %v2866_v60  ;;  %v2520_v6 = vcombine.low %v2254_v41, %v2258_v53  ;;  %v13726_v60 = vmax.f32 %v13489_v14, 0.0 }
 0x519   : > { %11511 = vmatprep.mubr.msk.bf16.mxu0 %vm420_vm13, %v3345_v39  ;;  %v2527_v9 = vrot.slane %v2519_v58, %v13052_v11  ;;  %v2537_v12 = vcombine.low %v2270_v46, %v2274_v50  ;;  %11719 = vrot.lane.b32.xlu0 %v13682_v33, %s12983_s19  ;;  %v13709_v37 = vsel %vm1260_vm9, %v2808_v28, %v2809_v59 }
 0x51a   : > { %v2544_v13 = vrot.slane %v2536_v61, %v13052_v11  ;;  %v13713_v19 = vsel %vm1260_vm9, %v2809_v59, %v2811_v2  ;;  %v1948_v22 = vrot.slane %v1934_v15, %v13132_v52  ;;  %v1949_v20 = vcombine.high %v1941_v42, %v1941_v42 }
 0x51b   : > { %v2534_v7 = vrot.slane %v2520_v6, %v13052_v11  ;;  %v2551_v5 = vrot.slane %v2537_v12, %v13052_v11  ;;  %v11723_v17 = vpack.i.bf16 %v13713_v19, %v13709_v37  ;;  %v1957_v27 = vrot.slane %v1941_v42, %v13132_v52 }
 0x51c   : > { %v1950_v63 = vcombine.high %v1948_v22, %v1948_v22  ;;  %v1964_v44 = vrot.slane %v1948_v22, %v13132_v52  ;;  %v1971_v18 = vrot.slane %v1949_v20, %v13132_v52 }
 0x51d   : > { %v2535_v29 = vcombine.low %v2527_v9, %v2534_v7  ;;  %v2552_v31 = vcombine.low %v2544_v13, %v2551_v5  ;;  %11724 = vrot.lane.b32.xlu1 %v11723_v17, %s12986_s11  ;;  %11729 = vrot.lane.b32.xlu0 %v11728_v47, %s12981_s17  ;;  %v1979_v15 = vcombine.high %v1957_v27, %v1957_v27 }
 0x51e   : > { %v1978_v0 = vrot.slane %v1950_v63, %v13132_v52  ;;  %v1980_v8 = vcombine.high %v1964_v44, %v1964_v44  ;;  %v1981_v28 = vcombine.high %v1971_v18, %v1971_v18  ;;  %v2278_v42 = vrot.slane %v1957_v27, %v13136_v57 }
 0x51f   : > { %v2729_v39 = vrot.slane %v2535_v29, 7  ;;  %v2730_v34 = vrot.slane %v2552_v31, 7  ;;  %v2282_v40 = vrot.slane %v1971_v18, %v13136_v57  ;;  %v2286_v36 = vrot.slane %v1979_v15, %v13136_v57 }
 0x520   : > { %v1982_v41 = vcombine.high %v1978_v0, %v1978_v0  ;;  %v2290_v43 = vrot.slane %v1981_v28, %v13136_v57  ;;  %v2294_v45 = vrot.slane %v1964_v44, %v13136_v57  ;;  %v2298_v14 = vrot.slane %v1978_v0, %v13136_v57 }
 0x521   : > { %v13736_v46 = vsel %vm264_vm0, %v2729_v39, %v2730_v34  ;;  %v13740_v51 = vsel %vm264_vm0, %v13678_v32, %v2729_v39  ;;  %v2781_v53 = vsel %vm264_vm0, %v2730_v34, %v2274_v50  ;;  %11734 = vrot.lane.b32.xlu1 %v13682_v33, %s12986_s11  ;;  %v2302_v58 = vrot.slane %v1980_v8, %v13136_v57 }
 0x522   : > { %v2869_v59 = vrot.slane %v13740_v51, 2  ;;  %v2870_v61 = vrot.slane %v13736_v46, 2  ;;  %v2872_v2 = vrot.slane %v2781_v53, 2  ;;  %v2306_v6 = vrot.slane %v1982_v41, %v13136_v57  ;;  %11744 = vrot.lane.b32.xlu0 %v11723_v17, %s12981_s17 }
 0x523   : > { %v2553_v9 = vcombine.low %v2278_v42, %v2282_v40  ;;  %v2554_v12 = vcombine.low %v2286_v36, %v2290_v43  ;;  %v2570_v32 = vcombine.low %v2294_v45, %v2298_v14  ;;  %v11738_v50 = vpack.i.bf16 %v13736_v46, %v13740_v51 }
 0x524   : > { %v2871_v13 = vsel %vm1277_vm14, %v2869_v59, %v2870_v61  ;;  %v2873_v33 = vsel %vm1277_vm14, %v2870_v61, %v2872_v2  ;;  %v2571_v22 = vcombine.low %v2302_v58, %v2306_v6  ;;  %v2813_v63 = vrot.slane %v13740_v51, 1 }
 0x525   : > { %v3350_v20 = vpack.c.bf16 %v2873_v33, %v2871_v13  ;;  %v2561_v7 = vrot.slane %v2553_v9, %v13052_v11  ;;  %v2568_v5 = vrot.slane %v2554_v12, %v13052_v11  ;;  %v2578_v27 = vrot.slane %v2570_v32, %v13052_v11  ;;  %11739 = vrot.lane.b32.xlu1 %v11738_v50, %s12983_s19 }
 0x526   : > { %v2585_v17 = vrot.slane %v2571_v22, %v13052_v11  ;;  %11749 = vrot.lane.b32.xlu0 %v11728_v47, %s12983_s19  ;;  %v2814_v44 = vrot.slane %v13736_v46, 1  ;;  %v2816_v18 = vrot.slane %v2781_v53, 1  ;;  %v1983_v31 = vcombine.high %v13513_v4, %v13513_v4 }
 0x527   : > { %11512 = vmatmul.mubr.msk.bf16.gmra.mrb[24].mxu0 %vm420_vm13, %v3350_v20  ;;  %v2569_v29 = vcombine.low %v2561_v7, %v2568_v5  ;;  %v1990_v15 = vrot.slane %v13513_v4, %v13132_v52  ;;  %v11758_v0 = vpack.i.bf16 %v2873_v33, %v2871_v13  ;;  %v2032_v43 = vcombine.high %v13660_v3, %v13660_v3 }
 0x528   : > { %11515 = vmatprep.mubr.msk.bf16.mxu0 %vm420_vm13, %v3350_v20  ;;  %v2586_v8 = vcombine.low %v2578_v27, %v2585_v17  ;;  %v13769_v47 = vsel %vm1260_vm9, %v2813_v63, %v2814_v44  ;;  %v13772_v28 = vsel %vm1260_vm9, %v2814_v44, %v2816_v18  ;;  %v1997_v40 = vrot.slane %v1983_v31, %v13132_v52 }
 0x529   : > { %v2732_v39 = vrot.slane %v2569_v29, 7  ;;  %v11753_v34 = vpack.i.bf16 %v13772_v28, %v13769_v47  ;;  %v1998_v36 = vcombine.high %v1990_v15, %v1990_v15  ;;  %v2006_v4 = vrot.slane %v1990_v15, %v13132_v52 }
 0x52a   : > { %v2733_v41 = vrot.slane %v2586_v8, 7  ;;  %11759 = vrot.lane.b32.xlu0 %v11758_v0, %s12981_s17  ;;  %v1999_v14 = vcombine.high %v1997_v40, %v1997_v40  ;;  %v2013_v53 = vrot.slane %v1997_v40, %v13132_v52  ;;  %v2046_v40 = vrot.slane %v2032_v43, %v13132_v52 }
 0x52b   : > { %v13782_v45 = vsel %vm264_vm0, %v2278_v42, %v2732_v39  ;;  %11754 = vrot.lane.b32.xlu1 %v11753_v34, %s12986_s11  ;;  %v2020_v58 = vrot.slane %v1998_v36, %v13132_v52  ;;  %v2028_v9 = vcombine.high %v2006_v4, %v2006_v4  ;;  %v2310_v22 = vrot.slane %v2006_v4, %v13136_v57 }
 0x52c   : > { %v13788_v59 = vsel %vm264_vm0, %v2732_v39, %v2733_v41  ;;  %v13791_v61 = vsel %vm264_vm0, %v2733_v41, %v2306_v6  ;;  %v2874_v2 = vrot.slane %v13782_v45, 2  ;;  %v2027_v32 = vrot.slane %v1999_v14, %v13132_v52 }
 0x52d   : > { %v2875_v12 = vrot.slane %v13788_v59, 2  ;;  %v2877_v42 = vrot.slane %v13791_v61, 2  ;;  %v2029_v13 = vcombine.high %v2013_v53, %v2013_v53  ;;  %v2030_v33 = vcombine.high %v2020_v58, %v2020_v58 }
 0x52e   : > { %v2314_v20 = vrot.slane %v2020_v58, %v13136_v57  ;;  %v2318_v7 = vrot.slane %v2028_v9, %v13136_v57  ;;  %11774 = vrot.lane.b32.xlu0 %v11753_v34, %s12981_s17  ;;  %v2031_v27 = vcombine.high %v2027_v32, %v2027_v32  ;;  %v2326_v17 = vrot.slane %v2013_v53, %v13136_v57 }
 0x52f   : > { %v13802_v6 = vsel %vm1277_vm14, %v2874_v2, %v2875_v12  ;;  %v2878_v5 = vsel %vm1277_vm14, %v2875_v12, %v2877_v42  ;;  %11764 = vrot.lane.b32.xlu1 %v11738_v50, %s12986_s11  ;;  %v2322_v44 = vrot.slane %v2030_v33, %v13136_v57  ;;  %v2330_v18 = vrot.slane %v2027_v32, %v13136_v57 }
 0x530   : > { %v3355_v63 = vpack.c.bf16 %v2878_v5, %v13802_v6  ;;  %v2334_v29 = vrot.slane %v2029_v13, %v13136_v57  ;;  %v2338_v31 = vrot.slane %v2031_v27, %v13136_v57  ;;  %v2587_v15 = vcombine.low %v2310_v22, %v2314_v20 }
 0x531   : > { %v13814_v8 = vpack.i.bf16 %v13788_v59, %v13782_v45  ;;  %v2039_v39 = vrot.slane %v13660_v3, %v13132_v52  ;;  %v2588_v50 = vcombine.low %v2318_v7, %v2322_v44  ;;  %v2604_v34 = vcombine.low %v2326_v17, %v2330_v18 }
 0x532   : > { %11516 = vmatmul.mubr.msk.bf16.gmra.mrb[28].mxu0 %vm420_vm13, %v3355_v63  ;;  %v2595_v36 = vrot.slane %v2587_v15, %v13052_v11  ;;  %v2605_v41 = vcombine.low %v2334_v29, %v2338_v31  ;;  %v2818_v14 = vrot.slane %v13782_v45, 1  ;;  %v2048_v58 = vcombine.high %v2046_v40, %v2046_v40  ;;  %11779 = vrot.lane.b32.xlu0 %v11758_v0, %s12983_s19 }
 0x533   : > { %11519 = vmatprep.mubr.msk.bf16.mxu0 %vm420_vm13, %v3355_v63  ;;  %11769 = vrot.lane.b32.xlu1 %v13814_v8, %s12983_s19  ;;  %v2047_v4 = vcombine.high %v2039_v39, %v2039_v39  ;;  %v2602_v53 = vrot.slane %v2588_v50, %v13052_v11  ;;  %v2612_v3 = vrot.slane %v2604_v34, %v13052_v11  ;;  %v2819_v42 = vrot.slane %v13788_v59, 1 }
 0x534   : > { %v2055_v2 = vrot.slane %v2039_v39, %v13132_v52  ;;  %v2619_v43 = vrot.slane %v2605_v41, %v13052_v11  ;;  %v2062_v9 = vrot.slane %v2046_v40, %v13132_v52  ;;  %v2076_v13 = vrot.slane %v2048_v58, %v13132_v52 }
 0x535   : > { %v2069_v12 = vrot.slane %v2047_v4, %v13132_v52  ;;  %v2603_v32 = vcombine.low %v2595_v36, %v2602_v53  ;;  %v13846_v4 = vsel %vm1260_vm9, %v2818_v14, %v2819_v42 }
 0x536   : > { %v2077_v33 = vcombine.high %v2055_v2, %v2055_v2  ;;  %v2342_v20 = vrot.slane %v2055_v2, %v13136_v57  ;;  %v2620_v7 = vcombine.low %v2612_v3, %v2619_v43  ;;  %v2078_v27 = vcombine.high %v2062_v9, %v2062_v9 }
 0x537   : > { %v2079_v17 = vcombine.high %v2069_v12, %v2069_v12  ;;  %v2346_v63 = vrot.slane %v2069_v12, %v13136_v57  ;;  %v2735_v0 = vrot.slane %v2603_v32, 7  ;;  %v2080_v44 = vcombine.high %v2076_v13, %v2076_v13 }
 0x538   : > { %v2350_v18 = vrot.slane %v2077_v33, %v13136_v57  ;;  %v2358_v29 = vrot.slane %v2062_v9, %v13136_v57  ;;  %v2736_v15 = vrot.slane %v2620_v7, 7  ;;  %v2362_v50 = vrot.slane %v2076_v13, %v13136_v57 }
 0x539   : > { %v2354_v39 = vrot.slane %v2079_v17, %v13136_v57  ;;  %v2366_v34 = vrot.slane %v2078_v27, %v13136_v57  ;;  %v13842_v40 = vsel %vm264_vm0, %v2310_v22, %v2735_v0  ;;  %v2370_v36 = vrot.slane %v2080_v44, %v13136_v57 }
 0x53a   : > { %v2621_v41 = vcombine.low %v2342_v20, %v2346_v63  ;;  %v13849_v53 = vsel %vm264_vm0, %v2735_v0, %v2736_v15  ;;  %v13852_v3 = vsel %vm264_vm0, %v2736_v15, %v2338_v31  ;;  %v2879_v58 = vrot.slane %v13842_v40, 2 }
 0x53b   : > { %v2622_v2 = vcombine.low %v2350_v18, %v2354_v39  ;;  %v2880_v43 = vrot.slane %v13849_v53, 2  ;;  %v2882_v22 = vrot.slane %v13852_v3, 2  ;;  %v2638_v12 = vcombine.low %v2358_v29, %v2362_v50 }
 0x53c   : > { %v2629_v9 = vrot.slane %v2621_v41, %v13052_v11  ;;  %v2639_v14 = vcombine.low %v2366_v34, %v2370_v36  ;;  %v2821_v13 = vrot.slane %v13791_v61, 1  ;;  %v11788_v33 = vpack.i.bf16 %v2878_v5, %v13802_v6 }
 0x53d   : > { %v2636_v32 = vrot.slane %v2622_v2, %v13052_v11  ;;  %v13862_v31 = vsel %vm1277_vm14, %v2879_v58, %v2880_v43  ;;  %v13865_v7 = vsel %vm1277_vm14, %v2880_v43, %v2882_v22  ;;  %v2646_v27 = vrot.slane %v2638_v12, %v13052_v11 }
 0x53e   : > { %v3360_v17 = vpack.c.bf16 %v13865_v7, %v13862_v31  ;;  %v2653_v0 = vrot.slane %v2639_v14, %v13052_v11  ;;  %v13872_v44 = vsel %vm1260_vm9, %v2819_v42, %v2821_v13  ;;  %11789 = vrot.lane.b32.xlu0 %v11788_v33, %s12981_s17  ;;  %v2081_v6 = vcombine.high %v13726_v60, %v13726_v60 }
 0x53f   : > { %v2637_v63 = vcombine.low %v2629_v9, %v2636_v32  ;;  %v11783_v61 = vpack.i.bf16 %v13872_v44, %v13846_v4  ;;  %v2088_v5 = vrot.slane %v13726_v60, %v13132_v52  ;;  %v13884_v15 = vpack.i.bf16 %v13849_v53, %v13842_v40 }
 0x540   : > { %11520 = vmatmul.mubr.msk.bf16.gmra.mrb[32].mxu0 %vm420_vm13, %v3360_v17  ;;  %v2654_v18 = vcombine.low %v2646_v27, %v2653_v0  ;;  %v2095_v42 = vrot.slane %v2081_v6, %v13132_v52  ;;  %v2823_v34 = vrot.slane %v13842_v40, 1  ;;  %v2824_v58 = vrot.slane %v13849_v53, 1 }
 0x541   : > { %v2738_v29 = vrot.slane %v2637_v63, 7  ;;  %11523 = vmatprep.mubr.msk.bf16.mxu0 %vm420_vm13, %v3360_v17  ;;  %11784 = vrot.lane.b32.xlu1 %v11783_v61, %s12986_s11  ;;  %v2096_v39 = vcombine.high %v2088_v5, %v2088_v5  ;;  %v2104_v50 = vrot.slane %v2088_v5, %v13132_v52  ;;  %v2826_v2 = vrot.slane %v13852_v3, 1 }
 0x542   : > { %v2739_v60 = vrot.slane %v2654_v18, 7  ;;  %11804 = vrot.lane.b32.xlu0 %v11783_v61, %s12981_s17  ;;  %v2097_v22 = vcombine.high %v2095_v42, %v2095_v42  ;;  %v2111_v9 = vrot.slane %v2095_v42, %v13132_v52  ;;  %v11818_v26 = vpack.i.bf16 %v13865_v7, %v13862_v31 }
 0x543   : > { %v13892_v41 = vsel %vm264_vm0, %v2342_v20, %v2738_v29  ;;  %v2118_v12 = vrot.slane %v2096_v39, %v13132_v52  ;;  %v2126_v20 = vcombine.high %v2104_v50, %v2104_v50  ;;  %v2374_v13 = vrot.slane %v2104_v50, %v13136_v57 }
 0x544   : > { %v2884_v43 = vrot.slane %v13892_v41, 2  ;;  %v13901_v32 = vsel %vm264_vm0, %v2738_v29, %v2739_v60  ;;  %v13904_v14 = vsel %vm264_vm0, %v2739_v60, %v2370_v36  ;;  %v2125_v17 = vrot.slane %v2097_v22, %v13132_v52 }
 0x545   : > { %v2885_v27 = vrot.slane %v13901_v32, 2  ;;  %v2887_v3 = vrot.slane %v13904_v14, 2  ;;  %11794 = vrot.lane.b32.xlu1 %v13814_v8, %s12986_s11  ;;  %v2127_v63 = vcombine.high %v2111_v9, %v2111_v9  ;;  %v2128_v0 = vcombine.high %v2118_v12, %v2118_v12 }
 0x546   : > { %v2378_v61 = vrot.slane %v2118_v12, %v13136_v57  ;;  %v2382_v6 = vrot.slane %v2126_v20, %v13136_v57  ;;  %v2390_v36 = vrot.slane %v2111_v9, %v13136_v57  ;;  %11809 = vrot.lane.b32.xlu0 %v11788_v33, %s12983_s19  ;;  %v2129_v29 = vcombine.high %v2125_v17, %v2125_v17 }
 0x547   : > { %v13917_v5 = vsel %vm1277_vm14, %v2884_v43, %v2885_v27  ;;  %v13920_v18 = vsel %vm1277_vm14, %v2885_v27, %v2887_v3  ;;  %v2394_v8 = vrot.slane %v2125_v17, %v13136_v57  ;;  %v2386_v39 = vrot.slane %v2128_v0, %v13136_v57 }
 0x548   : > { %v3365_v42 = vpack.c.bf16 %v13920_v18, %v13917_v5  ;;  %v2398_v50 = vrot.slane %v2127_v63, %v13136_v57  ;;  %v2655_v60 = vcombine.low %v2374_v13, %v2378_v61  ;;  %v2402_v22 = vrot.slane %v2129_v29, %v13136_v57 }
 0x549   : > { %v2672_v33 = vcombine.low %v2390_v36, %v2394_v8  ;;  %11799 = vrot.lane.b32.xlu1 %v13884_v15, %s12983_s19  ;;  %v13931_v43 = vsel %vm1260_vm9, %v2823_v34, %v2824_v58  ;;  %v13934_v9 = vsel %vm1260_vm9, %v2824_v58, %v2826_v2  ;;  %v2704_v12 = vrot.slane %v2690_v62, %v13052_v11 }
 0x54a   : > { %v2706_v20 = vcombine.low %v2422_v24, %v2426_v30  ;;  %11524 = vmatmul.mubr.msk.bf16.gmra.mrb[36].mxu0 %vm420_vm13, %v3365_v42  ;;  %v2656_v27 = vcombine.low %v2382_v6, %v2386_v39  ;;  %v2434_v34 = vrot.slane %v2178_v21, %v13136_v57  ;;  %v2673_v58 = vcombine.low %v2398_v50, %v2402_v22 }
 0x54b   : > { %11527 = vmatprep.mubr.msk.bf16.mxu0 %vm420_vm13, %v3365_v42  ;;  %v11813_v23 = vpack.i.bf16 %v13934_v9, %v13931_v43  ;;  %v2663_v24 = vrot.slane %v2655_v60, %v13052_v11  ;;  %v2680_v1 = vrot.slane %v2672_v33, %v13052_v11  ;;  %11819 = vrot.lane.b32.xlu0 %v11818_v26, %s12981_s17  ;;  %v2829_v17 = vrot.slane %v13901_v32, 1 }
 0x54c   : > { %v2670_v30 = vrot.slane %v2656_v27, %v13052_v11  ;;  %v2707_v62 = vcombine.low %v13563_v38, %v2434_v34  ;;  %v2687_v21 = vrot.slane %v2673_v58, %v13052_v11  ;;  %v2705_v2 = vcombine.low %v2697_v55, %v2704_v12 }
 0x54d   : > { %11814 = vrot.lane.b32.xlu1 %v11813_v23, %s12986_s11  ;;  %v2714_v31 = vrot.slane %v2706_v20, %v13052_v11  ;;  %v2831_v38 = vrot.slane %v13904_v14, 1  ;;  %v2828_v6 = vrot.slane %v13892_v41, 1  ;;  %v11828_v42 = vpack.i.bf16 %v13901_v32, %v13892_v41 }
 0x54e   : > { %v2671_v7 = vcombine.low %v2663_v24, %v2670_v30  ;;  %v2721_v49 = vrot.slane %v2707_v62, %v13052_v11  ;;  %v2688_v3 = vcombine.low %v2680_v1, %v2687_v21  ;;  %v2744_v36 = vrot.slane %v2705_v2, 7 }
 0x54f   : > { %11834 = vrot.lane.b32.xlu0 %v11813_v23, %s12981_s17  ;;  %v13983_v50 = vsel %vm1260_vm9, %v2828_v6, %v2829_v17 }
 0x550   : > { %v2741_v63 = vrot.slane %v2671_v7, 7  ;;  %v2722_v0 = vcombine.low %v2714_v31, %v2721_v49  ;;  %v2742_v61 = vrot.slane %v2688_v3, 7  ;;  %v14000_v58 = vsel %vm264_vm0, %v13523_v10, %v2744_v36 }
 0x551   : > { %11824 = vrot.lane.b32.xlu1 %v13884_v15, %s12986_s11 }
 0x552   : > { %v13974_v29 = vsel %vm264_vm0, %v2374_v13, %v2741_v63  ;;  %v2745_v8 = vrot.slane %v2722_v0, 7  ;;  %v13979_v39 = vsel %vm264_vm0, %v2741_v63, %v2742_v61  ;;  %v2785_v14 = vsel %vm264_vm0, %v2742_v61, %v2402_v22 }
 0x553   : > { %v2889_v15 = vrot.slane %v13974_v29, 2  ;;  %v2890_v60 = vrot.slane %v13979_v39, 2  ;;  %v2892_v33 = vrot.slane %v2785_v14, 2  ;;  %v13988_v13 = vsel %vm1260_vm9, %v2829_v17, %v2831_v38  ;;  %11839 = vrot.lane.b32.xlu0 %v11818_v26, %s12983_s19 }
 0x554   : > { %v13991_v12 = vsel %vm264_vm0, %v2744_v36, %v2745_v8  ;;  %v2786_v20 = vsel %vm264_vm0, %v2745_v8, %v2434_v34  ;;  %v11843_v55 = vpack.i.bf16 %v13988_v13, %v13983_v50  ;;  %v11848_v34 = vpack.i.bf16 %v13920_v18, %v13917_v5 }
 0x555   : > { %11829 = vrot.lane.b32.xlu1 %v11828_v42, %s12983_s19  ;;  %v2891_v22 = vsel %vm1277_vm14, %v2889_v15, %v2890_v60  ;;  %v2893_v27 = vsel %vm1277_vm14, %v2890_v60, %v2892_v33  ;;  %v2895_v24 = vrot.slane %v13991_v12, 2  ;;  %v2897_v30 = vrot.slane %v2786_v20, 2 }
 0x556   : > { %v3370_v23 = vpack.c.bf16 %v2893_v27, %v2891_v22  ;;  %v2894_v26 = vrot.slane %v14000_v58, 2  ;;  %v2834_v1 = vrot.slane %v13979_v39, 1  ;;  %v2836_v21 = vrot.slane %v2785_v14, 1 }
 0x557   : > { %11849 = vrot.lane.b32.xlu0 %v11848_v34, %s12981_s17  ;;  %v2898_v62 = vsel %vm1277_vm14, %v2895_v24, %v2897_v30  ;;  %v2833_v5 = vrot.slane %v13974_v29, 1  ;;  %v11858_v2 = vpack.i.bf16 %v13979_v39, %v13974_v29  ;;  %v11878_v3 = vpack.i.bf16 %v2893_v27, %v2891_v22 }
 0x558   : > { %11528 = vmatmul.mubr.msk.bf16.gmra.mrb[40].mxu0 %vm420_vm13, %v3370_v23  ;;  %v2896_v10 = vsel %vm1277_vm14, %v2894_v26, %v2895_v24  ;;  %v14024_v7 = vsel %vm1260_vm9, %v2834_v1, %v2836_v21  ;;  %v2839_v17 = vrot.slane %v13991_v12, 1  ;;  %v2841_v63 = vrot.slane %v2786_v20, 1 }
 0x559   : > { %11844 = vrot.lane.b32.xlu1 %v11843_v55, %s12986_s11  ;;  %11531 = vmatprep.mubr.msk.bf16.mxu0 %vm420_vm13, %v3370_v23  ;;  %v3375_v18 = vpack.c.bf16 %v2898_v62, %v2896_v10  ;;  %v14021_v31 = vsel %vm1260_vm9, %v2833_v5, %v2834_v1  ;;  %v2838_v0 = vrot.slane %v14000_v58, 1  ;;  %v11888_v38 = vpack.i.bf16 %v13991_v12, %v14000_v58 }
 0x55a   : > { %v11873_v49 = vpack.i.bf16 %v14024_v7, %v14021_v31  ;;  %v14045_v6 = vsel %vm1260_vm9, %v2839_v17, %v2841_v63  ;;  %v11908_v8 = vpack.i.bf16 %v2898_v62, %v2896_v10 }
 0x55b   : > { %11864 = vrot.lane.b32.xlu0 %v11843_v55, %s12981_s17  ;;  %v14042_v61 = vsel %vm1260_vm9, %v2838_v0, %v2839_v17 }
 0x55c   : > { %v11903_v36 = vpack.i.bf16 %v14045_v6, %v14042_v61 }
 0x55d   : > { %11854 = vrot.lane.b32.xlu1 %v11828_v42, %s12986_s11 }
 0x55f   : > { %11869 = vrot.lane.b32.xlu0 %v11848_v34, %s12983_s19 }
 0x560   : > { %11532 = vmatmul.mubr.msk.bf16.gmra.mrb[44].mxu0 %vm420_vm13, %v3375_v18 }
 0x561   : > { %11859 = vrot.lane.b32.xlu1 %v11858_v2, %s12983_s19  ;;  %11535 = vmatprep.mubr.msk.bf16.mxu0 %vm420_vm13, %v3375_v18 }
 0x563   : > { %11879 = vrot.lane.b32.xlu0 %v11878_v3, %s12981_s17 }
 0x565   : > { %11874 = vrot.lane.b32.xlu1 %v11873_v49, %s12986_s11 }
 0x567   : > { %11894 = vrot.lane.b32.xlu0 %v11873_v49, %s12981_s17 }
 0x568   : > { %11536 = vmatmul.mubr.msk.bf16.gmra.mrb[48].mxu0 %vm420_vm13, %v3375_v18 }
 0x569   : > { %11884 = vrot.lane.b32.xlu1 %v11858_v2, %s12986_s11 }
 0x56b   : > { %11899 = vrot.lane.b32.xlu0 %v11878_v3, %s12983_s19 }
 0x56d   : > { %11889 = vrot.lane.b32.xlu1 %v11888_v38, %s12983_s19 }
 0x56f   : > { %11909 = vrot.lane.b32.xlu0 %v11908_v8, %s12981_s17 }
 0x571   : > { %11904 = vrot.lane.b32.xlu1 %v11903_v36, %s12986_s11 }
 0x573   : > { %11919 = vrot.lane.b32.xlu0 %v11903_v36, %s12981_s17 }
 0x575   : > { %11914 = vrot.lane.b32.xlu1 %v11888_v38, %s12986_s11 }
 0x579   : > { %11924 = vrot.lane.b32.xlu1 %v11908_v8, %s12983_s19 }
 0x57e   : > { %v11690_v42 = vpop.permute.xlu0 %11689 }
 0x57f   : > { %v11692_v27 = vunpack.i.h.bf16 %v11690_v42  ;;  %v11691_v23 = vunpack.i.l.bf16 %v11690_v42 }
 0x582   : > { %v11700_v14 = vpop.permute.xlu1 %11699 }
 0x583   : > { %v11695_v15 = vpop.permute.xlu0 %11694  ;;  %v11702_v30 = vunpack.i.h.bf16 %v11700_v14  ;;  %v11701_v34 = vunpack.i.l.bf16 %v11700_v14 }
 0x584   : > { %v11697_v60 = vunpack.i.h.bf16 %v11695_v15  ;;  %v11696_v33 = vunpack.i.l.bf16 %v11695_v15 }
 0x585   : > { %v3204_v49 = vsel %vm420_vm13, %v13604_v35, %v11702_v30  ;;  %v3203_v3 = vsel %vm420_vm13, %v13599_v25, %v11701_v34 }
 0x586   : > { %v3265_v20 = vsel %vm420_vm13, %v13628_v54, %v11696_v33  ;;  %v3266_v22 = vsel %vm420_vm13, %v13631_v56, %v11697_v60  ;;  %v11705_v55 = vpop.permute.xlu1 %11704 }
 0x587   : > { %v11710_v24 = vpop.permute.xlu0 %11709  ;;  %v11707_v62 = vunpack.i.h.bf16 %v11705_v55  ;;  %v11706_v1 = vunpack.i.l.bf16 %v11705_v55  ;;  %v3281_v21 = vsel %vm428_vm3, %v3265_v20, %v11691_v23  ;;  %v3282_v5 = vsel %vm428_vm3, %v3266_v22, %v11692_v27 }
 0x588   : > { %v11712_v26 = vunpack.i.h.bf16 %v11710_v24  ;;  %v11711_v10 = vunpack.i.l.bf16 %v11710_v24 }
 0x589   : > { %v3219_v38 = vsel %vm428_vm3, %v3203_v3, %v11706_v1  ;;  %v3220_v36 = vsel %vm428_vm3, %v3204_v49, %v11707_v62 }
 0x58a   : > { %v3311_v18 = vsel %vm721_vm1, %v3281_v21, %v11711_v10  ;;  %v3312_v54 = vsel %vm721_vm1, %v3282_v5, %v11712_v26  ;;  %v11715_v2 = vpop.permute.xlu1 %11714 }
 0x58b   : > { %v3342_v56 = vpack.c.bf16 %v3312_v54, %v3311_v18  ;;  %v11717_v17 = vunpack.i.h.bf16 %v11715_v2  ;;  %v11716_v63 = vunpack.i.l.bf16 %v11715_v2  ;;  %v11720_v0 = vpop.permute.xlu0 %11719 }
 0x58c   : > { %v11722_v14 = vunpack.i.h.bf16 %v11720_v0  ;;  %v11721_v15 = vunpack.i.l.bf16 %v11720_v0 }
 0x58d   : > { %3579 = vmatprep.mubr.bf16.mxu1 %v3342_v56  ;;  %v3235_v8 = vsel %vm721_vm1, %v3219_v38, %v11716_v63  ;;  %v3236_v42 = vsel %vm721_vm1, %v3220_v36, %v11717_v17 }
 0x58e   : > { %v3341_v60 = vpack.c.bf16 %v3236_v42, %v3235_v8  ;;  %v3283_v24 = vsel %vm428_vm3, %v3265_v20, %v11721_v15  ;;  %v3284_v30 = vsel %vm428_vm3, %v3266_v22, %v11722_v14 }
 0x58f   : > { %v11725_v33 = vpop.permute.xlu1 %11724  ;;  %v11730_v35 = vpop.permute.xlu0 %11729 }
 0x590   : > { %v11727_v27 = vunpack.i.h.bf16 %v11725_v33  ;;  %v11726_v23 = vunpack.i.l.bf16 %v11725_v33  ;;  %v11732_v25 = vunpack.i.h.bf16 %v11730_v35  ;;  %v11731_v55 = vunpack.i.l.bf16 %v11730_v35  ;;  %3580 = vmatmul.mubr.bf16.vlgmr.msra.gmra.mrb[16].mxu1 %v3341_v60 }
 0x592   : > { %v3268_v34 = vsel %vm420_vm13, %v13713_v19, %v11732_v25  ;;  %v3267_v26 = vsel %vm420_vm13, %v13709_v37, %v11731_v55  ;;  %v3313_v10 = vsel %vm721_vm1, %v3283_v24, %v11726_v23  ;;  %v3314_v62 = vsel %vm721_vm1, %v3284_v30, %v11727_v27 }
 0x593   : > { %v11735_v1 = vpop.permute.xlu1 %11734  ;;  %v3344_v21 = vpack.c.bf16 %v3314_v62, %v3313_v10  ;;  %v3285_v5 = vsel %vm428_vm3, %v3267_v26, %v11721_v15  ;;  %v3286_v18 = vsel %vm428_vm3, %v3268_v34, %v11722_v14 }
 0x594   : > { %v11745_v54 = vpop.permute.xlu0 %11744  ;;  %v3315_v20 = vsel %vm721_vm1, %v3285_v5, %v11726_v23  ;;  %v3316_v22 = vsel %vm721_vm1, %v3286_v18, %v11727_v27  ;;  %v11737_v19 = vunpack.i.h.bf16 %v11735_v1  ;;  %v11736_v2 = vunpack.i.l.bf16 %v11735_v1 }
 0x595   : > { %3587 = vmatprep.mubr.bf16.mxu1 %v3344_v21  ;;  %v3347_v37 = vpack.c.bf16 %v3316_v22, %v3315_v20  ;;  %v11747_v3 = vunpack.i.h.bf16 %v11745_v54  ;;  %v11746_v17 = vunpack.i.l.bf16 %v11745_v54 }
 0x596   : > { %v3237_v8 = vsel %vm721_vm1, %v3219_v38, %v11736_v2  ;;  %v3238_v42 = vsel %vm721_vm1, %v3220_v36, %v11737_v19 }
 0x597   : > { %v11740_v56 = vpop.permute.xlu1 %11739  ;;  %v3206_v35 = vsel %vm420_vm13, %v13663_v16, %v11747_v3  ;;  %v3346_v30 = vpack.c.bf16 %v3238_v42, %v3237_v8 }
 0x598   : > { %v11750_v49 = vpop.permute.xlu0 %11749  ;;  %3588 = vmatmul.mubr.bf16.gmra.mrb[20].mxu1 %v3341_v60  ;;  %v11742_v63 = vunpack.i.h.bf16 %v11740_v56  ;;  %v11741_v0 = vunpack.i.l.bf16 %v11740_v56  ;;  %v3205_v60 = vsel %vm420_vm13, %v13653_v48, %v11746_v17 }
 0x599   : > { %3595 = vmatprep.mubr.bf16.mxu1 %v3347_v37  ;;  %v11752_v14 = vunpack.i.h.bf16 %v11750_v49  ;;  %v11751_v15 = vunpack.i.l.bf16 %v11750_v49 }
 0x59a   : > { %v3287_v10 = vsel %vm428_vm3, %v3267_v26, %v11741_v0  ;;  %v3288_v62 = vsel %vm428_vm3, %v3268_v34, %v11742_v63 }
 0x59b   : > { %v3221_v48 = vsel %vm428_vm3, %v3205_v60, %v11751_v15  ;;  %v3222_v21 = vsel %vm428_vm3, %v3206_v35, %v11752_v14 }
 0x59c   : > { %v11760_v33 = vpop.permute.xlu0 %11759  ;;  %v3240_v26 = vsel %vm721_vm1, %v3222_v21, %v11737_v19 }
 0x59d   : > { %v11755_v27 = vpop.permute.xlu1 %11754  ;;  %v11762_v23 = vunpack.i.h.bf16 %v11760_v33  ;;  %v11761_v25 = vunpack.i.l.bf16 %v11760_v33 }
 0x59e   : > { %v11757_v55 = vunpack.i.h.bf16 %v11755_v27  ;;  %v11756_v24 = vunpack.i.l.bf16 %v11755_v27 }
 0x59f   : > { %v3270_v38 = vsel %vm420_vm13, %v13772_v28, %v11762_v23  ;;  %v3269_v36 = vsel %vm420_vm13, %v13769_v47, %v11761_v25  ;;  %v3239_v47 = vsel %vm721_vm1, %v3221_v48, %v11736_v2 }
 0x5a0   : > { %3596 = vmatmul.mubr.bf16.gmra.mrb[24].mxu1 %v3346_v30  ;;  %v3317_v16 = vsel %vm721_vm1, %v3287_v10, %v11756_v24  ;;  %v3318_v1 = vsel %vm721_vm1, %v3288_v62, %v11757_v55  ;;  %v3289_v18 = vsel %vm428_vm3, %v3269_v36, %v11741_v0  ;;  %v3290_v28 = vsel %vm428_vm3, %v3270_v38, %v11742_v63  ;;  %v11775_v22 = vpop.permute.xlu0 %11774 }
 0x5a1   : > { %v3349_v5 = vpack.c.bf16 %v3318_v1, %v3317_v16  ;;  %v11765_v34 = vpop.permute.xlu1 %11764  ;;  %v3319_v54 = vsel %vm721_vm1, %v3289_v18, %v11756_v24  ;;  %v3320_v20 = vsel %vm721_vm1, %v3290_v28, %v11757_v55  ;;  %v3348_v56 = vpack.c.bf16 %v3240_v26, %v3239_v47 }
 0x5a2   : > { %v11767_v37 = vunpack.i.h.bf16 %v11765_v34  ;;  %v11766_v49 = vunpack.i.l.bf16 %v11765_v34  ;;  %v3352_v3 = vpack.c.bf16 %v3320_v20, %v3319_v54  ;;  %v11777_v2 = vunpack.i.h.bf16 %v11775_v22 }
 0x5a3   : > { %3603 = vmatprep.mubr.bf16.mxu1 %v3349_v5  ;;  %v11776_v8 = vunpack.i.l.bf16 %v11775_v22 }
 0x5a4   : > { %v11780_v17 = vpop.permute.xlu0 %11779  ;;  %v3241_v63 = vsel %vm721_vm1, %v3221_v48, %v11766_v49  ;;  %v3242_v0 = vsel %vm721_vm1, %v3222_v21, %v11767_v37  ;;  %v3208_v33 = vsel %vm420_vm13, %v13736_v46, %v11777_v2 }
 0x5a5   : > { %v11770_v19 = vpop.permute.xlu1 %11769  ;;  %v3351_v42 = vpack.c.bf16 %v3242_v0, %v3241_v63  ;;  %v11782_v14 = vunpack.i.h.bf16 %v11780_v17  ;;  %v11781_v15 = vunpack.i.l.bf16 %v11780_v17  ;;  %v3207_v35 = vsel %vm420_vm13, %v13740_v51, %v11776_v8 }
 0x5a6   : > { %v11772_v23 = vunpack.i.h.bf16 %v11770_v19  ;;  %v11771_v25 = vunpack.i.l.bf16 %v11770_v19 }
 0x5a7   : > { %v3223_v24 = vsel %vm428_vm3, %v3207_v35, %v11781_v15  ;;  %v3224_v30 = vsel %vm428_vm3, %v3208_v33, %v11782_v14 }
 0x5a8   : > { %3604 = vmatmul.mubr.bf16.gmra.mrb[28].mxu1 %v3348_v56  ;;  %v3291_v5 = vsel %vm428_vm3, %v3269_v36, %v11771_v25  ;;  %v3292_v18 = vsel %vm428_vm3, %v3270_v38, %v11772_v23  ;;  %v3243_v28 = vsel %vm721_vm1, %v3223_v24, %v11766_v49  ;;  %v3244_v47 = vsel %vm721_vm1, %v3224_v30, %v11767_v37 }
 0x5a9   : > { %3611 = vmatprep.mubr.bf16.mxu1 %v3352_v3  ;;  %v3353_v3 = vpack.c.bf16 %v3244_v47, %v3243_v28 }
 0x5b0   : > { %3612 = vmatmul.mubr.bf16.gmra.mrb[32].mxu1 %v3351_v42  ;;  %v11790_v27 = vpop.permute.xlu0 %11789 }
 0x5b1   : > { %v11792_v60 = vunpack.i.h.bf16 %v11790_v27  ;;  %v11791_v55 = vunpack.i.l.bf16 %v11790_v27 }
 0x5b3   : > { %v11785_v10 = vpop.permute.xlu1 %11784  ;;  %v3272_v62 = vsel %vm420_vm13, %v13872_v44, %v11792_v60  ;;  %v3271_v16 = vsel %vm420_vm13, %v13846_v4, %v11791_v55 }
 0x5b4   : > { %v11787_v46 = vunpack.i.h.bf16 %v11785_v10  ;;  %v11786_v1 = vunpack.i.l.bf16 %v11785_v10  ;;  %v11805_v48 = vpop.permute.xlu0 %11804  ;;  %v3293_v51 = vsel %vm428_vm3, %v3271_v16, %v11771_v25  ;;  %v3294_v21 = vsel %vm428_vm3, %v3272_v62, %v11772_v23 }
 0x5b5   : > { %v11807_v49 = vunpack.i.h.bf16 %v11805_v48  ;;  %v11806_v17 = vunpack.i.l.bf16 %v11805_v48 }
 0x5b6   : > { %v3321_v44 = vsel %vm721_vm1, %v3291_v5, %v11786_v1  ;;  %v3322_v26 = vsel %vm721_vm1, %v3292_v18, %v11787_v46  ;;  %v3323_v4 = vsel %vm721_vm1, %v3293_v51, %v11786_v1  ;;  %v3324_v34 = vsel %vm721_vm1, %v3294_v21, %v11787_v46 }
 0x5b7   : > { %v11795_v54 = vpop.permute.xlu1 %11794  ;;  %v3354_v20 = vpack.c.bf16 %v3322_v26, %v3321_v44  ;;  %v3357_v38 = vpack.c.bf16 %v3324_v34, %v3323_v4  ;;  %v3210_v14 = vsel %vm420_vm13, %v13788_v59, %v11807_v49  ;;  %v3209_v15 = vsel %vm420_vm13, %v13782_v45, %v11806_v17 }
 0x5b8   : > { %v11797_v22 = vunpack.i.h.bf16 %v11795_v54  ;;  %v11796_v56 = vunpack.i.l.bf16 %v11795_v54  ;;  %v11810_v36 = vpop.permute.xlu0 %11809 }
 0x5b9   : > { %3619 = vmatprep.mubr.bf16.mxu1 %v3354_v20  ;;  %v11812_v19 = vunpack.i.h.bf16 %v11810_v36  ;;  %v11811_v42 = vunpack.i.l.bf16 %v11810_v36 }
 0x5ba   : > { %3620 = vmatmul.mubr.bf16.gmra.mrb[36].mxu1 %v3353_v3  ;;  %v3245_v63 = vsel %vm721_vm1, %v3223_v24, %v11796_v56  ;;  %v3246_v0 = vsel %vm721_vm1, %v3224_v30, %v11797_v22 }
 0x5bb   : > { %v11800_v37 = vpop.permute.xlu1 %11799  ;;  %3627 = vmatprep.mubr.bf16.mxu1 %v3357_v38  ;;  %v3356_v27 = vpack.c.bf16 %v3246_v0, %v3245_v63  ;;  %v3225_v10 = vsel %vm428_vm3, %v3209_v15, %v11811_v42  ;;  %v3226_v46 = vsel %vm428_vm3, %v3210_v14, %v11812_v19 }
 0x5bc   : > { %v11802_v2 = vunpack.i.h.bf16 %v11800_v37  ;;  %v11801_v8 = vunpack.i.l.bf16 %v11800_v37  ;;  %v3247_v18 = vsel %vm721_vm1, %v3225_v10, %v11796_v56 }
 0x5bd   : > { %v11820_v35 = vpop.permute.xlu0 %11819 }
 0x5be   : > { %v11822_v60 = vunpack.i.h.bf16 %v11820_v35  ;;  %v11821_v55 = vunpack.i.l.bf16 %v11820_v35  ;;  %v3295_v24 = vsel %vm428_vm3, %v3271_v16, %v11801_v8  ;;  %v3296_v30 = vsel %vm428_vm3, %v3272_v62, %v11802_v2 }
 0x5bf   : > { %v11815_v33 = vpop.permute.xlu1 %11814 }
 0x5c0   : > { %v11817_v23 = vunpack.i.h.bf16 %v11815_v33  ;;  %v11816_v25 = vunpack.i.l.bf16 %v11815_v33  ;;  %v3274_v59 = vsel %vm420_vm13, %v13934_v9, %v11822_v60  ;;  %v3273_v45 = vsel %vm420_vm13, %v13931_v43, %v11821_v55 }
 0x5c1   : > { %v11835_v21 = vpop.permute.xlu0 %11834  ;;  %v3297_v62 = vsel %vm428_vm3, %v3273_v45, %v11801_v8  ;;  %v3298_v5 = vsel %vm428_vm3, %v3274_v59, %v11802_v2  ;;  %v3248_v9 = vsel %vm721_vm1, %v3226_v46, %v11797_v22 }
 0x5c2   : > { %3628 = vmatmul.mubr.bf16.gmra.mrb[40].mxu1 %v3356_v27  ;;  %v3325_v1 = vsel %vm721_vm1, %v3295_v24, %v11816_v25  ;;  %v3326_v48 = vsel %vm721_vm1, %v3296_v30, %v11817_v23  ;;  %v3327_v28 = vsel %vm721_vm1, %v3297_v62, %v11816_v25  ;;  %v3328_v43 = vsel %vm721_vm1, %v3298_v5, %v11817_v23 }
 0x5c3   : > { %v11825_v51 = vpop.permute.xlu1 %11824  ;;  %v3359_v16 = vpack.c.bf16 %v3326_v48, %v3325_v1  ;;  %v3358_v34 = vpack.c.bf16 %v3248_v9, %v3247_v18  ;;  %v3362_v3 = vpack.c.bf16 %v3328_v43, %v3327_v28  ;;  %v11837_v36 = vunpack.i.h.bf16 %v11835_v21 }
 0x5c4   : > { %v11827_v26 = vunpack.i.h.bf16 %v11825_v51  ;;  %v11826_v4 = vunpack.i.l.bf16 %v11825_v51  ;;  %v11836_v38 = vunpack.i.l.bf16 %v11835_v21 }
 0x5c5   : > { %3635 = vmatprep.mubr.bf16.mxu1 %v3359_v16  ;;  %v11840_v44 = vpop.permute.xlu0 %11839  ;;  %v3212_v55 = vsel %vm420_vm13, %v13849_v53, %v11837_v36 }
 0x5c6   : > { %v3249_v37 = vsel %vm721_vm1, %v3225_v10, %v11826_v4  ;;  %v3250_v63 = vsel %vm721_vm1, %v3226_v46, %v11827_v26  ;;  %v11842_v42 = vunpack.i.h.bf16 %v11840_v44  ;;  %v11841_v14 = vunpack.i.l.bf16 %v11840_v44 }
 0x5c7   : > { %v11830_v47 = vpop.permute.xlu1 %11829  ;;  %v3361_v60 = vpack.c.bf16 %v3250_v63, %v3249_v37  ;;  %v3211_v24 = vsel %vm420_vm13, %v13842_v40, %v11836_v38 }
 0x5c8   : > { %v11832_v54 = vunpack.i.h.bf16 %v11830_v47  ;;  %v11831_v20 = vunpack.i.l.bf16 %v11830_v47  ;;  %v3227_v10 = vsel %vm428_vm3, %v3211_v24, %v11841_v14  ;;  %v3228_v46 = vsel %vm428_vm3, %v3212_v55, %v11842_v42 }
 0x5c9   : > { %v11850_v22 = vpop.permute.xlu0 %11849  ;;  %v3251_v1 = vsel %vm721_vm1, %v3227_v10, %v11826_v4  ;;  %v3252_v53 = vsel %vm721_vm1, %v3228_v46, %v11827_v26 }
 0x5ca   : > { %3636 = vmatmul.mubr.bf16.gmra.mrb[44].mxu1 %v3358_v34  ;;  %v11852_v0 = vunpack.i.h.bf16 %v11850_v22  ;;  %v11851_v2 = vunpack.i.l.bf16 %v11850_v22  ;;  %v3299_v8 = vsel %vm428_vm3, %v3273_v45, %v11831_v20  ;;  %v3300_v19 = vsel %vm428_vm3, %v3274_v59, %v11832_v54 }
 0x5cb   : > { %v11845_v49 = vpop.permute.xlu1 %11844  ;;  %3643 = vmatprep.mubr.bf16.mxu1 %v3362_v3  ;;  %v3363_v62 = vpack.c.bf16 %v3252_v53, %v3251_v1 }
 0x5cc   : > { %v11847_v56 = vunpack.i.h.bf16 %v11845_v49  ;;  %v11846_v17 = vunpack.i.l.bf16 %v11845_v49  ;;  %v3276_v27 = vsel %vm420_vm13, %v13988_v13, %v11852_v0  ;;  %v3275_v23 = vsel %vm420_vm13, %v13983_v50, %v11851_v2 }
 0x5cd   : > { %v11865_v25 = vpop.permute.xlu0 %11864  ;;  %v3301_v13 = vsel %vm428_vm3, %v3275_v23, %v11831_v20  ;;  %v3302_v50 = vsel %vm428_vm3, %v3276_v27, %v11832_v54 }
 0x5ce   : > { %v3329_v15 = vsel %vm721_vm1, %v3299_v8, %v11846_v17  ;;  %v3330_v33 = vsel %vm721_vm1, %v3300_v19, %v11847_v56  ;;  %v3331_v48 = vsel %vm721_vm1, %v3301_v13, %v11846_v17  ;;  %v3332_v40 = vsel %vm721_vm1, %v3302_v50, %v11847_v56 }
 0x5cf   : > { %v14156_v35 = vpop.permute.xlu1 %11854  ;;  %v3364_v30 = vpack.c.bf16 %v3330_v33, %v3329_v15  ;;  %v3367_v28 = vpack.c.bf16 %v3332_v40, %v3331_v48  ;;  %v11867_v26 = vunpack.i.h.bf16 %v11865_v25  ;;  %v11866_v4 = vunpack.i.l.bf16 %v11865_v25 }
 0x5d0   : > { %v11857_v21 = vunpack.i.h.bf16 %v14156_v35  ;;  %v11856_v5 = vunpack.i.l.bf16 %v14156_v35 }
 0x5d1   : > { %v11870_v45 = vpop.permute.xlu0 %11869  ;;  %v3214_v8 = vsel %vm420_vm13, %v13901_v32, %v11867_v26  ;;  %v3213_v19 = vsel %vm420_vm13, %v13892_v41, %v11866_v4 }
 0x5d2   : > { %3644 = vmatmul.mubr.bf16.gmra.mrb[48].mxu1 %v3361_v60  ;;  %v3253_v3 = vsel %vm721_vm1, %v3227_v10, %v11856_v5  ;;  %v3254_v36 = vsel %vm721_vm1, %v3228_v46, %v11857_v21  ;;  %v11872_v56 = vunpack.i.h.bf16 %v11870_v45  ;;  %v11871_v17 = vunpack.i.l.bf16 %v11870_v45 }
 0x5d3   : > { %v11860_v59 = vpop.permute.xlu1 %11859  ;;  %3651 = vmatprep.mubr.bf16.mxu1 %v3364_v30  ;;  %v3366_v2 = vpack.c.bf16 %v3254_v36, %v3253_v3 }
 0x5d4   : > { %v11862_v18 = vunpack.i.h.bf16 %v11860_v59  ;;  %v11861_v9 = vunpack.i.l.bf16 %v11860_v59  ;;  %v3229_v15 = vsel %vm428_vm3, %v3213_v19, %v11871_v17  ;;  %v3230_v33 = vsel %vm428_vm3, %v3214_v8, %v11872_v56 }
 0x5d5   : > { %v11880_v16 = vpop.permute.xlu0 %11879  ;;  %v3256_v32 = vsel %vm721_vm1, %v3230_v33, %v11857_v21 }
 0x5d6   : > { %v11882_v34 = vunpack.i.h.bf16 %v11880_v16  ;;  %v11881_v54 = vunpack.i.l.bf16 %v11880_v16  ;;  %v3303_v38 = vsel %vm428_vm3, %v3275_v23, %v11861_v9  ;;  %v3304_v49 = vsel %vm428_vm3, %v3276_v27, %v11862_v18 }
 0x5d7   : > { %v11875_v51 = vpop.permute.xlu1 %11874  ;;  %v3255_v27 = vsel %vm721_vm1, %v3229_v15, %v11856_v5 }
 0x5d8   : > { %v11877_v43 = vunpack.i.h.bf16 %v11875_v51  ;;  %v11876_v47 = vunpack.i.l.bf16 %v11875_v51  ;;  %v3278_v63 = vsel %vm420_vm13, %v14024_v7, %v11882_v34  ;;  %v3277_v0 = vsel %vm420_vm13, %v14021_v31, %v11881_v54 }
 0x5d9   : > { %v11895_v20 = vpop.permute.xlu0 %11894  ;;  %v3305_v7 = vsel %vm428_vm3, %v3277_v0, %v11861_v9  ;;  %v3306_v31 = vsel %vm428_vm3, %v3278_v63, %v11862_v18  ;;  %v3368_v55 = vpack.c.bf16 %v3256_v32, %v3255_v27 }
 0x5da   : > { %3652 = vmatmul.mubr.bf16.gmra.mrb[52].mxu1 %v3363_v62  ;;  %v3333_v22 = vsel %vm721_vm1, %v3303_v38, %v11876_v47  ;;  %v3334_v37 = vsel %vm721_vm1, %v3304_v49, %v11877_v43  ;;  %v3335_v23 = vsel %vm721_vm1, %v3305_v7, %v11876_v47  ;;  %v3336_v41 = vsel %vm721_vm1, %v3306_v31, %v11877_v43 }
 0x5db   : > { %v14176_v44 = vpop.permute.xlu1 %11884  ;;  %3659 = vmatprep.mubr.bf16.mxu1 %v3367_v28  ;;  %v3369_v14 = vpack.c.bf16 %v3334_v37, %v3333_v22  ;;  %v3372_v13 = vpack.c.bf16 %v3336_v41, %v3335_v23  ;;  %v11897_v48 = vunpack.i.h.bf16 %v11895_v20  ;;  %v11896_v40 = vunpack.i.l.bf16 %v11895_v20 }
 0x5dc   : > { %v11887_v60 = vunpack.i.h.bf16 %v14176_v44  ;;  %v11886_v24 = vunpack.i.l.bf16 %v14176_v44 }
 0x5dd   : > { %v11900_v35 = vpop.permute.xlu0 %11899  ;;  %v3216_v54 = vsel %vm420_vm13, %v13979_v39, %v11897_v48  ;;  %v3215_v20 = vsel %vm420_vm13, %v13974_v29, %v11896_v40 }
 0x5de   : > { %v3257_v62 = vsel %vm721_vm1, %v3229_v15, %v11886_v24  ;;  %v3258_v5 = vsel %vm721_vm1, %v3230_v33, %v11887_v60  ;;  %v11902_v28 = vunpack.i.h.bf16 %v11900_v35  ;;  %v11901_v43 = vunpack.i.l.bf16 %v11900_v35 }
 0x5df   : > { %v11890_v42 = vpop.permute.xlu1 %11889  ;;  %v3371_v34 = vpack.c.bf16 %v3258_v5, %v3257_v62 }
 0x5e0   : > { %v11892_v30 = vunpack.i.h.bf16 %v11890_v42  ;;  %v11891_v10 = vunpack.i.l.bf16 %v11890_v42  ;;  %v3231_v36 = vsel %vm428_vm3, %v3215_v20, %v11901_v43  ;;  %v3232_v38 = vsel %vm428_vm3, %v3216_v54, %v11902_v28 }
 0x5e1   : > { %v11910_v46 = vpop.permute.xlu0 %11909  ;;  %v3260_v17 = vsel %vm721_vm1, %v3232_v38, %v11887_v60 }
 0x5e2   : > { %3660 = vmatmul.mubr.bf16.gmra.mrb[56].mxu1 %v3366_v2  ;;  %v11912_v51 = vunpack.i.h.bf16 %v11910_v46  ;;  %v11911_v21 = vunpack.i.l.bf16 %v11910_v46  ;;  %v3307_v18 = vsel %vm428_vm3, %v3277_v0, %v11891_v10  ;;  %v3308_v9 = vsel %vm428_vm3, %v3278_v63, %v11892_v30 }
 0x5e3   : > { %3667 = vmatprep.mubr.bf16.mxu1 %v3369_v14  ;;  %v11905_v25 = vpop.permute.xlu1 %11904 }
 0x5e4   : > { %v11907_v50 = vunpack.i.h.bf16 %v11905_v25  ;;  %v11906_v45 = vunpack.i.l.bf16 %v11905_v25  ;;  %v3280_v26 = vsel %vm420_vm13, %v14045_v6, %v11912_v51  ;;  %v3279_v4 = vsel %vm420_vm13, %v14042_v61, %v11911_v21 }
 0x5e5   : > { %v3309_v49 = vsel %vm428_vm3, %v3279_v4, %v11891_v10  ;;  %v3310_v6 = vsel %vm428_vm3, %v3280_v26, %v11892_v30  ;;  %v3259_v61 = vsel %vm721_vm1, %v3231_v36, %v11886_v24  ;;  %v11920_v8 = vpop.permute.xlu0 %11919 }
 0x5e6   : > { %v3337_v47 = vsel %vm721_vm1, %v3307_v18, %v11906_v45  ;;  %v3338_v44 = vsel %vm721_vm1, %v3308_v9, %v11907_v50  ;;  %v3339_v39 = vsel %vm721_vm1, %v3309_v49, %v11906_v45  ;;  %v3340_v29 = vsel %vm721_vm1, %v3310_v6, %v11907_v50 }
 0x5e7   : > { %v3374_v3 = vpack.c.bf16 %v3338_v44, %v3337_v47  ;;  %v11915_v56 = vpop.permute.xlu1 %11914  ;;  %v3373_v22 = vpack.c.bf16 %v3260_v17, %v3259_v61  ;;  %v3377_v2 = vpack.c.bf16 %v3340_v29, %v3339_v39  ;;  %v11922_v33 = vunpack.i.h.bf16 %v11920_v8 }
 0x5e8   : > { %v11917_v37 = vunpack.i.h.bf16 %v11915_v56  ;;  %v11916_v63 = vunpack.i.l.bf16 %v11915_v56  ;;  %v11921_v35 = vunpack.i.l.bf16 %v11920_v8 }
 0x5e9   : > { %v3218_v41 = vsel %vm420_vm13, %v13991_v12, %v11922_v33 }
 0x5ea   : > { %3668 = vmatmul.mubr.bf16.gmra.mrb[60].mxu1 %v3368_v55  ;;  %v3261_v7 = vsel %vm721_vm1, %v3231_v36, %v11916_v63  ;;  %v3262_v31 = vsel %vm721_vm1, %v3232_v38, %v11917_v37  ;;  %v3217_v25 = vsel %vm420_vm13, %v14000_v58, %v11921_v35 }
 0x5eb   : > { %v14202_v59 = vpop.f32.mrb[20].mxu0  ;;  %3675 = vmatprep.mubr.bf16.mxu1 %v3372_v13  ;;  %v11925_v42 = vpop.permute.xlu1 %11924  ;;  %v3376_v23 = vpack.c.bf16 %v3262_v31, %v3261_v7 }
 0x5ec   : > { %v14204_v1 = vpop.f32.mrb[21].mxu0  ;;  %v11927_v27 = vunpack.i.h.bf16 %v11925_v42  ;;  %v11926_v32 = vunpack.i.l.bf16 %v11925_v42 }
 0x5ed   : > { %v14206_v53 = vpop.f32.mrb[22].mxu0 }
 0x5ee   : > { %v14208_v16 = vpop.f32.mrb[23].mxu0  ;;  %v3233_v60 = vsel %vm428_vm3, %v3217_v25, %v11926_v32  ;;  %v3234_v55 = vsel %vm428_vm3, %v3218_v41, %v11927_v27 }
 0x5ef   : > { %v3263_v10 = vsel %vm721_vm1, %v3233_v60, %v11916_v63  ;;  %v3264_v46 = vsel %vm721_vm1, %v3234_v55, %v11917_v37 }
 0x5f0   : > { %v3378_v50 = vpack.c.bf16 %v3264_v46, %v3263_v10 }
 0x5f2   : > { %3676 = vmatmul.mubr.bf16.gmra.mrb[64].mxu1 %v3371_v34 }
 0x5f3   : > { %3683 = vmatprep.mubr.bf16.mxu1 %v3374_v3 }
 0x5fa   : > { %v14232_v0 = vpop.f32.mrb[24].mxu0  ;;  %3684 = vmatmul.mubr.bf16.gmra.mrb[68].mxu1 %v3373_v22 }
 0x5fb   : > { %v14234_v19 = vpop.f32.mrb[25].mxu0  ;;  %3691 = vmatprep.mubr.bf16.mxu1 %v3377_v2 }
 0x5fc   : > { %v14236_v14 = vpop.f32.mrb[26].mxu0 }
 0x5fd   : > { %v14238_v15 = vpop.f32.mrb[27].mxu0 }
 0x602   : > { %3692 = vmatmul.mubr.bf16.gmra.mrb[72].mxu1 %v3376_v23 }
 0x603   : > { %3699 = vmatprep.mubr.bf16.mxu1 %v3377_v2 }
 0x605   : > { %v14248_v24 = vpop.f32.mrb[28].mxu0 }
 0x606   : > { %v14250_v30 = vpop.f32.mrb[29].mxu0 }
 0x607   : > { %v14254_v13 = vpop.f32.mrb[30].mxu0 }
 0x608   : > { %v14256_v12 = vpop.f32.mrb[31].mxu0 }
 0x60a   : > { %3700 = vmatmul.mubr.bf16.gmra.mrb[76].mxu1 %v3378_v50 }
 0x613   : > { %v14258_v58 = vpop.f32.mrb[32].mxu0 }
 0x614   : > { %v14260_v45 = vpop.f32.mrb[33].mxu0 }
 0x615   : > { %v14262_v48 = vpop.f32.mrb[34].mxu0 }
 0x616   : > { %v14264_v40 = vpop.f32.mrb[35].mxu0 }
 0x61d   : > { %v14266_v51 = vpop.f32.mrb[36].mxu0 }
 0x61e   : > { %v14268_v21 = vpop.f32.mrb[37].mxu0 }
 0x61f   : > { %v14270_v62 = vpop.f32.mrb[38].mxu0 }
 0x620   : > { %v14272_v5 = vpop.f32.mrb[39].mxu0 }
 0x62b   : > { %v14274_v18 = vpop.f32.mrb[40].mxu0 }
 0x62c   : > { %v14276_v9 = vpop.f32.mrb[41].mxu0 }
 0x62d   : > { %v14278_v28 = vpop.f32.mrb[42].mxu0 }
 0x62e   : > { %v14280_v43 = vpop.f32.mrb[43].mxu0 }
 0x633   : > { %v14282_v47 = vpop.f32.mrb[44].mxu0 }
 0x634   : > { %v14284_v44 = vpop.f32.mrb[45].mxu0 }
 0x635   : > { %v14286_v26 = vpop.f32.mrb[46].mxu0 }
 0x636   : > { %v14288_v4 = vpop.f32.mrb[47].mxu0 }
 0x63b   : > { %v14290_v34 = vpop.f32.mrb[48].mxu0 }
 0x63c   : > { %v14292_v54 = vpop.f32.mrb[49].mxu0 }
 0x63d   : > { %v14294_v20 = vpop.f32.mrb[50].mxu0 }
 0x63e   : > { %v14296_v3 = vpop.f32.mrb[51].mxu0 }
 0x663   : > { %v11283_v36 = vpop.f32.mrb[16].mxu1 }
 0x664   : > { %v11284_v38 = vpop.f32.mrb[17].mxu1 }
 0x665   : > { %v11285_v49 = vadd.f32 %v11284_v38, %v11283_v36  ;;  %v11286_v6 = vpop.f32.mrb[18].mxu1 }
 0x666   : > { %v11287_v56 = vpop.f32.mrb[19].mxu1 }
 0x667   : > { %v14299_v61 = vadd.f32 %v11285_v49, %v14204_v1  ;;  %v11288_v17 = vadd.f32 %v11287_v56, %v11286_v6 }
 0x669   : > { %v14302_v39 = vadd.f32 %v11288_v17, %v14208_v16 }
 0x66b   : > { %v11289_v29 = vpop.f32.mrb[20].mxu1  ;;  %v3870_v36 = vsel %vm420_vm13, %v14302_v39, 0.0 }
 0x66c   : > { %v11290_v22 = vpop.f32.mrb[21].mxu1 }
 0x66d   : > { %v11291_v37 = vadd.f32 %v11290_v22, %v11289_v29  ;;  %v11292_v63 = vpop.f32.mrb[22].mxu1 }
 0x66e   : > { %v11293_v2 = vpop.f32.mrb[23].mxu1 }
 0x66f   : > { %v14305_v8 = vadd.f32 %v14202_v59, %v11291_v37  ;;  %v11294_v42 = vadd.f32 %v11293_v2, %v11292_v63 }
 0x671   : > { %v14308_v33 = vadd.f32 %v14206_v53, %v11294_v42  ;;  %v3942_v38 = vmul.f32 %v14305_v8, %v14305_v8  ;;  %v3872_v17 = vsel %vm420_vm13, %v14305_v8, 0.0 }
 0x673   : > { %v11295_v35 = vpop.f32.mrb[24].mxu1  ;;  %v3975_v42 = vsel %vm420_vm13, %v3942_v38, 0.0 }
 0x674   : > { %v11296_v7 = vpop.f32.mrb[25].mxu1 }
 0x675   : > { %v11297_v1 = vadd.f32 %v11296_v7, %v11295_v35  ;;  %v11298_v31 = vpop.f32.mrb[26].mxu1  ;;  %v3943_v35 = vmul.f32 %v14308_v33, %v14308_v33 }
 0x676   : > { %v11299_v27 = vpop.f32.mrb[27].mxu1 }
 0x677   : > { %v14311_v16 = vadd.f32 %v11297_v1, %v14234_v19  ;;  %v11300_v32 = vadd.f32 %v11299_v27, %v11298_v31  ;;  %v3941_v19 = vmul.f32 %v14302_v39, %v14302_v39  ;;  %v3874_v27 = vsel %vm420_vm13, %v14308_v33, 0.0 }
 0x679   : > { %v14314_v23 = vadd.f32 %v11300_v32, %v14238_v15  ;;  %v3940_v15 = vmul.f32 %v14299_v61, %v14299_v61  ;;  %v3973_v56 = vsel %vm420_vm13, %v3941_v19, 0.0 }
 0x67b   : > { %v11301_v41 = vpop.f32.mrb[28].mxu1  ;;  %v3972_v2 = vsel %vm420_vm13, %v3940_v15, 0.0  ;;  %v3878_v15 = vsel %vm420_vm13, %v14314_v23, 0.0 }
 0x67c   : > { %v11302_v25 = vpop.f32.mrb[29].mxu1  ;;  %v3974_v7 = vadd.f32 %v3973_v56, %v3972_v2 }
 0x67d   : > { %v11303_v59 = vadd.f32 %v11302_v25, %v11301_v41  ;;  %v11304_v60 = vpop.f32.mrb[30].mxu1  ;;  %v3977_v41 = vsel %vm420_vm13, %v3943_v35, 0.0  ;;  %v3876_v25 = vsel %vm420_vm13, %v14311_v16, 0.0 }
 0x67e   : > { %v11305_v55 = vpop.f32.mrb[31].mxu1  ;;  %v3976_v32 = vadd.f32 %v3975_v42, %v3974_v7 }
 0x67f   : > { %v14317_v53 = vadd.f32 %v14232_v0, %v11303_v59  ;;  %v11306_v10 = vadd.f32 %v11305_v55, %v11304_v60  ;;  %v3945_v55 = vmul.f32 %v14314_v23, %v14314_v23 }
 0x681   : > { %v14320_v46 = vadd.f32 %v14236_v14, %v11306_v10  ;;  %v3869_v14 = vsel %vm420_vm13, %v14299_v61, 0.0  ;;  %v3978_v10 = vadd.f32 %v3977_v41, %v3976_v32  ;;  %v3880_v56 = vsel %vm420_vm13, %v14317_v53, 0.0 }
 0x682   : > { %v3871_v22 = vadd.f32 %v3870_v36, %v3869_v14  ;;  %v3946_v36 = vmul.f32 %v14317_v53, %v14317_v53  ;;  %v3981_v14 = vsel %vm420_vm13, %v3945_v55, 0.0 }
 0x683   : > { %v11307_v50 = vpop.f32.mrb[32].mxu1  ;;  %v3947_v2 = vmul.f32 %v14320_v46, %v14320_v46 }
 0x684   : > { %v11308_v49 = vpop.f32.mrb[33].mxu1  ;;  %v3873_v1 = vadd.f32 %v3872_v17, %v3871_v22 }
 0x685   : > { %v11309_v0 = vadd.f32 %v11308_v49, %v11307_v50  ;;  %v11310_v6 = vpop.f32.mrb[34].mxu1  ;;  %v3985_v41 = vsel %vm420_vm13, %v3947_v2, 0.0 }
 0x686   : > { %v11311_v29 = vpop.f32.mrb[35].mxu1  ;;  %v3875_v59 = vadd.f32 %v3874_v27, %v3873_v1  ;;  %v3882_v1 = vsel %vm420_vm13, %v14320_v46, 0.0 }
 0x687   : > { %v14336_v37 = vadd.f32 %v11309_v0, %v14250_v30  ;;  %v11312_v63 = vadd.f32 %v11311_v29, %v11310_v6  ;;  %v3944_v30 = vmul.f32 %v14311_v16, %v14311_v16 }
 0x688   : > { %v3877_v19 = vadd.f32 %v3876_v25, %v3875_v59 }
 0x689   : > { %v14343_v31 = vadd.f32 %v11312_v63, %v14256_v12  ;;  %v3979_v60 = vsel %vm420_vm13, %v3944_v30, 0.0  ;;  %v3983_v63 = vsel %vm420_vm13, %v3946_v36, 0.0  ;;  %v3948_v27 = vmul.f32 %v14336_v37, %v14336_v37 }
 0x68a   : > { %v3980_v0 = vadd.f32 %v3979_v60, %v3978_v10  ;;  %v3879_v22 = vadd.f32 %v3878_v15, %v3877_v19  ;;  %v3884_v25 = vsel %vm420_vm13, %v14336_v37, 0.0 }
 0x68b   : > { %v3949_v10 = vmul.f32 %v14343_v31, %v14343_v31 }
 0x68c   : > { %v3982_v35 = vadd.f32 %v3981_v14, %v3980_v0  ;;  %v3881_v7 = vadd.f32 %v3880_v56, %v3879_v22 }
 0x68d   : > { %v11313_v12 = vpop.f32.mrb[36].mxu1  ;;  %v3989_v14 = vsel %vm420_vm13, %v3949_v10, 0.0 }
 0x68e   : > { %v11314_v50 = vpop.f32.mrb[37].mxu1  ;;  %v3984_v30 = vadd.f32 %v3983_v63, %v3982_v35 }
 0x68f   : > { %v11315_v38 = vadd.f32 %v11314_v50, %v11313_v12  ;;  %v11316_v49 = vpop.f32.mrb[38].mxu1  ;;  %v3987_v12 = vsel %vm420_vm13, %v3948_v27, 0.0 }
 0x690   : > { %v11317_v6 = vpop.f32.mrb[39].mxu1  ;;  %v3986_v15 = vadd.f32 %v3985_v41, %v3984_v30 }
 0x691   : > { %v14363_v17 = vadd.f32 %v14248_v24, %v11315_v38  ;;  %v11318_v29 = vadd.f32 %v11317_v6, %v11316_v49  ;;  %v3886_v38 = vsel %vm420_vm13, %v14343_v31, 0.0 }
 0x692   : > { %v3988_v6 = vadd.f32 %v3987_v12, %v3986_v15 }
 0x693   : > { %v14369_v42 = vadd.f32 %v14254_v13, %v11318_v29  ;;  %v3883_v13 = vadd.f32 %v3882_v1, %v3881_v7  ;;  %v3950_v49 = vmul.f32 %v14363_v17, %v14363_v17  ;;  %v3888_v56 = vsel %vm420_vm13, %v14363_v17, 0.0 }
 0x694   : > { %v3990_v1 = vadd.f32 %v3989_v14, %v3988_v6 }
 0x695   : > { %v11319_v24 = vpop.f32.mrb[40].mxu1  ;;  %v3885_v36 = vadd.f32 %v3884_v25, %v3883_v13  ;;  %v3991_v63 = vsel %vm420_vm13, %v3950_v49, 0.0  ;;  %v3951_v2 = vmul.f32 %v14369_v42, %v14369_v42 }
 0x696   : > { %v11320_v32 = vpop.f32.mrb[41].mxu1  ;;  %v3992_v25 = vadd.f32 %v3991_v63, %v3990_v1 }
 0x697   : > { %v11321_v59 = vadd.f32 %v11320_v32, %v11319_v24  ;;  %v11322_v60 = vpop.f32.mrb[42].mxu1  ;;  %v3887_v29 = vadd.f32 %v3886_v38, %v3885_v36  ;;  %v3890_v24 = vsel %vm420_vm13, %v14369_v42, 0.0 }
 0x698   : > { %v11323_v55 = vpop.f32.mrb[43].mxu1 }
 0x699   : > { %v14382_v19 = vadd.f32 %v11321_v59, %v14260_v45  ;;  %v11324_v50 = vadd.f32 %v11323_v55, %v11322_v60  ;;  %v3889_v27 = vadd.f32 %v3888_v56, %v3887_v29  ;;  %v3993_v59 = vsel %vm420_vm13, %v3951_v2, 0.0 }
 0x69a   : > { %v3994_v15 = vadd.f32 %v3993_v59, %v3992_v25 }
 0x69b   : > { %v14389_v0 = vadd.f32 %v11324_v50, %v14264_v40  ;;  %v3952_v30 = vmul.f32 %v14382_v19, %v14382_v19  ;;  %v3892_v60 = vsel %vm420_vm13, %v14382_v19, 0.0  ;;  %v3891_v55 = vadd.f32 %v3890_v24, %v3889_v27 }
 0x69d   : > { %v11325_v45 = vpop.f32.mrb[44].mxu1  ;;  %v3995_v12 = vsel %vm420_vm13, %v3952_v30, 0.0  ;;  %v3953_v10 = vmul.f32 %v14389_v0, %v14389_v0  ;;  %v3894_v38 = vsel %vm420_vm13, %v14389_v0, 0.0 }
 0x69e   : > { %v11326_v22 = vpop.f32.mrb[45].mxu1 }
 0x69f   : > { %v11327_v35 = vadd.f32 %v11326_v22, %v11325_v45  ;;  %v11328_v7 = vpop.f32.mrb[46].mxu1  ;;  %v3997_v45 = vsel %vm420_vm13, %v3953_v10, 0.0 }
 0x6a0   : > { %v11329_v40 = vpop.f32.mrb[47].mxu1 }
 0x6a1   : > { %v14402_v32 = vadd.f32 %v14258_v58, %v11327_v35  ;;  %v11330_v41 = vadd.f32 %v11329_v40, %v11328_v7  ;;  %v3893_v58 = vadd.f32 %v3892_v60, %v3891_v55 }
 0x6a3   : > { %v14408_v13 = vadd.f32 %v14262_v48, %v11330_v41  ;;  %v3954_v49 = vmul.f32 %v14402_v32, %v14402_v32  ;;  %v3996_v48 = vadd.f32 %v3995_v12, %v3994_v15  ;;  %v3896_v29 = vsel %vm420_vm13, %v14402_v32, 0.0 }
 0x6a4   : > { %v3895_v2 = vadd.f32 %v3894_v38, %v3893_v58 }
 0x6a5   : > { %v11331_v50 = vpop.f32.mrb[48].mxu1  ;;  %v3999_v35 = vsel %vm420_vm13, %v3954_v49, 0.0  ;;  %v3955_v7 = vmul.f32 %v14408_v13, %v14408_v13  ;;  %v3998_v27 = vadd.f32 %v3997_v45, %v3996_v48  ;;  %v3898_v24 = vsel %vm420_vm13, %v14408_v13, 0.0 }
 0x6a6   : > { %v11332_v36 = vpop.f32.mrb[49].mxu1  ;;  %v3897_v40 = vadd.f32 %v3896_v29, %v3895_v2 }
 0x6a7   : > { %v11333_v6 = vadd.f32 %v11332_v36, %v11331_v50  ;;  %v11334_v14 = vpop.f32.mrb[50].mxu1  ;;  %v4000_v41 = vadd.f32 %v3999_v35, %v3998_v27  ;;  %v4001_v59 = vsel %vm420_vm13, %v3955_v7, 0.0 }
 0x6a8   : > { %v11335_v56 = vpop.f32.mrb[51].mxu1 }
 0x6a9   : > { %v14421_v22 = vadd.f32 %v11333_v6, %v14268_v21  ;;  %v11336_v63 = vadd.f32 %v11335_v56, %v11334_v14  ;;  %v4002_v38 = vadd.f32 %v4001_v59, %v4000_v41 }
 0x6ab   : > { %v14427_v1 = vadd.f32 %v11336_v63, %v14272_v5  ;;  %v3956_v30 = vmul.f32 %v14421_v22, %v14421_v22  ;;  %v3900_v60 = vsel %vm420_vm13, %v14421_v22, 0.0  ;;  %v3899_v5 = vadd.f32 %v3898_v24, %v3897_v40 }
 0x6ad   : > { %v11337_v21 = vpop.f32.mrb[52].mxu1  ;;  %v4003_v50 = vsel %vm420_vm13, %v3956_v30, 0.0  ;;  %v3957_v15 = vmul.f32 %v14427_v1, %v14427_v1  ;;  %v3901_v49 = vadd.f32 %v3900_v60, %v3899_v5  ;;  %v3902_v6 = vsel %vm420_vm13, %v14427_v1, 0.0 }
 0x6ae   : > { %v11338_v25 = vpop.f32.mrb[53].mxu1  ;;  %v4004_v56 = vadd.f32 %v4003_v50, %v4002_v38 }
 0x6af   : > { %v11339_v55 = vadd.f32 %v11338_v25, %v11337_v21  ;;  %v11340_v12 = vpop.f32.mrb[54].mxu1  ;;  %v4005_v45 = vsel %vm420_vm13, %v3957_v15, 0.0  ;;  %v3903_v63 = vadd.f32 %v3902_v6, %v3901_v49 }
 0x6b0   : > { %v11341_v10 = vpop.f32.mrb[55].mxu1  ;;  %v4006_v24 = vadd.f32 %v4005_v45, %v4004_v56 }
 0x6b1   : > { %v14440_v58 = vadd.f32 %v14266_v51, %v11339_v55  ;;  %v11342_v36 = vadd.f32 %v11341_v10, %v11340_v12 }
 0x6b3   : > { %v3958_v14 = vmul.f32 %v14440_v58, %v14440_v58  ;;  %v14447_v48 = vadd.f32 %v14270_v62, %v11342_v36  ;;  %v3904_v29 = vsel %vm420_vm13, %v14440_v58, 0.0 }
 0x6b4   : > { %v3905_v30 = vadd.f32 %v3904_v29, %v3903_v63 }
 0x6b5   : > { %v11343_v51 = vpop.f32.mrb[56].mxu1  ;;  %v4007_v35 = vsel %vm420_vm13, %v3958_v14, 0.0  ;;  %v3959_v7 = vmul.f32 %v14447_v48, %v14447_v48  ;;  %v3906_v21 = vsel %vm420_vm13, %v14447_v48, 0.0 }
 0x6b6   : > { %v11344_v2 = vpop.f32.mrb[57].mxu1  ;;  %v4008_v59 = vadd.f32 %v4007_v35, %v4006_v24  ;;  %v3907_v10 = vadd.f32 %v3906_v21, %v3905_v30 }
 0x6b7   : > { %v11345_v27 = vadd.f32 %v11344_v2, %v11343_v51  ;;  %v11346_v40 = vpop.f32.mrb[58].mxu1  ;;  %v4009_v60 = vsel %vm420_vm13, %v3959_v7, 0.0 }
 0x6b8   : > { %v11347_v62 = vpop.f32.mrb[59].mxu1  ;;  %v4010_v36 = vadd.f32 %v4009_v60, %v4008_v59 }
 0x6b9   : > { %v14458_v41 = vadd.f32 %v11345_v27, %v14276_v9  ;;  %v11348_v25 = vadd.f32 %v11347_v62, %v11346_v40 }
 0x6bb   : > { %v3908_v55 = vsel %vm420_vm13, %v14458_v41, 0.0  ;;  %v3960_v12 = vmul.f32 %v14458_v41, %v14458_v41  ;;  %v14466_v5 = vadd.f32 %v11348_v25, %v14280_v43 }
 0x6bc   : > { %v3909_v38 = vadd.f32 %v3908_v55, %v3907_v10 }
 0x6bd   : > { %v4011_v50 = vsel %vm420_vm13, %v3960_v12, 0.0  ;;  %v3961_v9 = vmul.f32 %v14466_v5, %v14466_v5  ;;  %v11349_v15 = vpop.f32.mrb[60].mxu1  ;;  %v3910_v6 = vsel %vm420_vm13, %v14466_v5, 0.0 }
 0x6be   : > { %v11350_v49 = vpop.f32.mrb[61].mxu1  ;;  %v4012_v45 = vadd.f32 %v4011_v50, %v4010_v36  ;;  %v3911_v2 = vadd.f32 %v3910_v6, %v3909_v38 }
 0x6bf   : > { %v11351_v14 = vadd.f32 %v11350_v49, %v11349_v15  ;;  %v11352_v56 = vpop.f32.mrb[62].mxu1  ;;  %v4013_v43 = vsel %vm420_vm13, %v3961_v9, 0.0 }
 0x6c0   : > { %v11353_v29 = vpop.f32.mrb[63].mxu1  ;;  %v4014_v40 = vadd.f32 %v4013_v43, %v4012_v45 }
 0x6c1   : > { %v14475_v51 = vadd.f32 %v14274_v18, %v11351_v14  ;;  %v11354_v63 = vadd.f32 %v11353_v29, %v11352_v56 }
 0x6c3   : > { %v3912_v35 = vsel %vm420_vm13, %v14475_v51, 0.0  ;;  %v3962_v7 = vmul.f32 %v14475_v51, %v14475_v51  ;;  %v14482_v27 = vadd.f32 %v14278_v28, %v11354_v63 }
 0x6c4   : > { %v3913_v24 = vadd.f32 %v3912_v35, %v3911_v2 }
 0x6c5   : > { %v4015_v30 = vsel %vm420_vm13, %v3962_v7, 0.0  ;;  %v3914_v62 = vsel %vm420_vm13, %v14482_v27, 0.0  ;;  %v3963_v18 = vmul.f32 %v14482_v27, %v14482_v27  ;;  %v11355_v21 = vpop.f32.mrb[64].mxu1 }
 0x6c6   : > { %v4016_v25 = vadd.f32 %v4015_v30, %v4014_v40  ;;  %v3915_v59 = vadd.f32 %v3914_v62, %v3913_v24  ;;  %v11356_v60 = vpop.f32.mrb[65].mxu1 }
 0x6c7   : > { %v4017_v55 = vsel %vm420_vm13, %v3963_v18, 0.0  ;;  %v11357_v12 = vadd.f32 %v11356_v60, %v11355_v21  ;;  %v11358_v10 = vpop.f32.mrb[66].mxu1 }
 0x6c8   : > { %v4018_v28 = vadd.f32 %v4017_v55, %v4016_v25  ;;  %v11359_v50 = vpop.f32.mrb[67].mxu1 }
 0x6c9   : > { %v14491_v9 = vadd.f32 %v11357_v12, %v14284_v44  ;;  %v11360_v15 = vadd.f32 %v11359_v50, %v11358_v10 }
 0x6cb   : > { %v3916_v36 = vsel %vm420_vm13, %v14491_v9, 0.0  ;;  %v3964_v38 = vmul.f32 %v14491_v9, %v14491_v9  ;;  %v14498_v49 = vadd.f32 %v11360_v15, %v14288_v4 }
 0x6cc   : > { %v3917_v6 = vadd.f32 %v3916_v36, %v3915_v59 }
 0x6cd   : > { %v4019_v14 = vsel %vm420_vm13, %v3964_v38, 0.0  ;;  %v3918_v56 = vsel %vm420_vm13, %v14498_v49, 0.0  ;;  %v3965_v44 = vmul.f32 %v14498_v49, %v14498_v49  ;;  %v11361_v45 = vpop.f32.mrb[68].mxu1 }
 0x6ce   : > { %v4020_v29 = vadd.f32 %v4019_v14, %v4018_v28  ;;  %v3919_v43 = vadd.f32 %v3918_v56, %v3917_v6  ;;  %v11362_v63 = vpop.f32.mrb[69].mxu1 }
 0x6cf   : > { %v4021_v2 = vsel %vm420_vm13, %v3965_v44, 0.0  ;;  %v11363_v35 = vadd.f32 %v11362_v63, %v11361_v45  ;;  %v11364_v7 = vpop.f32.mrb[70].mxu1 }
 0x6d0   : > { %v4022_v40 = vadd.f32 %v4021_v2, %v4020_v29  ;;  %v11365_v4 = vpop.f32.mrb[71].mxu1 }
 0x6d1   : > { %v14507_v24 = vadd.f32 %v14282_v47, %v11363_v35  ;;  %v11366_v30 = vadd.f32 %v11365_v4, %v11364_v7 }
 0x6d3   : > { %v3920_v62 = vsel %vm420_vm13, %v14507_v24, 0.0  ;;  %v3966_v18 = vmul.f32 %v14507_v24, %v14507_v24  ;;  %v14514_v21 = vadd.f32 %v14286_v26, %v11366_v30 }
 0x6d4   : > { %v3921_v25 = vadd.f32 %v3920_v62, %v3919_v43 }
 0x6d5   : > { %v4023_v59 = vsel %vm420_vm13, %v3966_v18, 0.0  ;;  %v3922_v60 = vsel %vm420_vm13, %v14514_v21, 0.0  ;;  %v3967_v47 = vmul.f32 %v14514_v21, %v14514_v21  ;;  %v11367_v55 = vpop.f32.mrb[72].mxu1 }
 0x6d6   : > { %v4024_v12 = vadd.f32 %v4023_v59, %v4022_v40  ;;  %v3923_v10 = vadd.f32 %v3922_v60, %v3921_v25  ;;  %v11368_v28 = vpop.f32.mrb[73].mxu1 }
 0x6d7   : > { %v4025_v50 = vsel %vm420_vm13, %v3967_v47, 0.0  ;;  %v11369_v15 = vadd.f32 %v11368_v28, %v11367_v55  ;;  %v11370_v36 = vpop.f32.mrb[74].mxu1 }
 0x6d8   : > { %v4026_v38 = vadd.f32 %v4025_v50, %v4024_v12  ;;  %v11371_v26 = vpop.f32.mrb[75].mxu1 }
 0x6d9   : > { %v14523_v6 = vadd.f32 %v11369_v15, %v14292_v54  ;;  %v11372_v14 = vadd.f32 %v11371_v26, %v11370_v36 }
 0x6db   : > { %v3924_v56 = vsel %vm420_vm13, %v14523_v6, 0.0  ;;  %v3968_v44 = vmul.f32 %v14523_v6, %v14523_v6  ;;  %v14530_v45 = vadd.f32 %v11372_v14, %v14296_v3 }
 0x6dc   : > { %v3925_v29 = vadd.f32 %v3924_v56, %v3923_v10 }
 0x6dd   : > { %v4027_v43 = vsel %vm420_vm13, %v3968_v44, 0.0  ;;  %v3926_v63 = vsel %vm420_vm13, %v14530_v45, 0.0  ;;  %v3969_v54 = vmul.f32 %v14530_v45, %v14530_v45  ;;  %v11373_v2 = vpop.f32.mrb[76].mxu1 }
 0x6de   : > { %v4028_v35 = vadd.f32 %v4027_v43, %v4026_v38  ;;  %v3927_v7 = vadd.f32 %v3926_v63, %v3925_v29  ;;  %v11374_v40 = vpop.f32.mrb[77].mxu1 }
 0x6df   : > { %v4029_v4 = vsel %vm420_vm13, %v3969_v54, 0.0  ;;  %v11375_v30 = vadd.f32 %v11374_v40, %v11373_v2  ;;  %v11376_v62 = vpop.f32.mrb[78].mxu1 }
 0x6e0   : > { %v4030_v18 = vadd.f32 %v4029_v4, %v4028_v35  ;;  %v11377_v3 = vpop.f32.mrb[79].mxu1 }
 0x6e1   : > { %v14539_v25 = vadd.f32 %v14290_v34, %v11375_v30  ;;  %v11378_v59 = vadd.f32 %v11377_v3, %v11376_v62 }
 0x6e3   : > { %v3928_v60 = vsel %vm420_vm13, %v14539_v25, 0.0  ;;  %v3970_v47 = vmul.f32 %v14539_v25, %v14539_v25  ;;  %v3866_v55 = vadd.f32 %v14294_v20, %v11378_v59 }
 0x6e4   : > { %v3929_v12 = vadd.f32 %v3928_v60, %v3927_v7 }
 0x6e5   : > { %v4031_v10 = vsel %vm420_vm13, %v3970_v47, 0.0  ;;  %v3930_v28 = vsel %vm420_vm13, %v3866_v55, 0.0  ;;  %v3971_v50 = vmul.f32 %v3866_v55, %v3866_v55 }
 0x6e6   : > { %v4032_v15 = vadd.f32 %v4031_v10, %v4030_v18  ;;  %v3931_v36 = vadd.f32 %v3930_v28, %v3929_v12 }
 0x6e7   : > { %v4033_v34 = vsel %vm420_vm13, %v3971_v50, 0.0 }
 0x6e8   : > { %v3932_v38 = vrot.slane %v3931_v36, 4  ;;  %v4034_v26 = vadd.f32 %v4033_v34, %v4032_v15 }
 0x6ea   : > { %v3933_v14 = vadd.f32 %v3932_v38, %v3931_v36  ;;  %v4035_v56 = vrot.slane %v4034_v26, 4 }
 0x6ec   : > { %v3934_v44 = vrot.slane %v3933_v14, 2  ;;  %v4036_v29 = vadd.f32 %v4035_v56, %v4034_v26 }
 0x6ee   : > { %v3935_v43 = vadd.f32 %v3934_v44, %v3933_v14  ;;  %v4037_v63 = vrot.slane %v4036_v29, 2 }
 0x6f0   : > { %v3936_v54 = vrot.slane %v3935_v43, 1  ;;  %v4038_v20 = vadd.f32 %v4037_v63, %v4036_v29 }
 0x6f2   : > { %v3937_v2 = vadd.f32 %v3936_v54, %v3935_v43  ;;  %v4039_v35 = vrot.slane %v4038_v20, 1 }
 0x6f4   : > { %v14549_v7 = vmul.f32 0.00390625, %v3937_v2  ;;  %v4040_v40 = vadd.f32 %v4039_v35, %v4038_v20 }
 0x6f6   : > { %v4041_v4 = vmul.f32 0.00390625, %v4040_v40  ;;  %v4042_v30 = vmul.f32 %v14549_v7, %v14549_v7  ;;  %v4076_v62 = vsub.f32 %v3866_v55, %v14549_v7  ;;  %v4066_v60 = vsub.f32 %v14466_v5, %v14549_v7 }
 0x6f7   : > { %v4067_v47 = vsub.f32 %v14475_v51, %v14549_v7  ;;  %v4068_v12 = vsub.f32 %v14482_v27, %v14549_v7  ;;  %v4069_v10 = vsub.f32 %v14491_v9, %v14549_v7  ;;  %v4070_v28 = vsub.f32 %v14498_v49, %v14549_v7 }
 0x6f8   : > { %v4043_v18 = vsub.f32 %v4041_v4, %v4042_v30  ;;  %v4071_v55 = vsub.f32 %v14507_v24, %v14549_v7  ;;  %v4045_v38 = vsub.f32 %v14299_v61, %v14549_v7  ;;  %v4046_v26 = vsub.f32 %v14302_v39, %v14549_v7 }
 0x6f9   : > { %v4047_v14 = vsub.f32 %v14305_v8, %v14549_v7  ;;  %v4048_v56 = vsub.f32 %v14308_v33, %v14549_v7  ;;  %v4049_v44 = vsub.f32 %v14311_v16, %v14549_v7  ;;  %v4050_v29 = vsub.f32 %v14314_v23, %v14549_v7 }
 0x6fa   : > { %v4044_v3 = vmax.f32 %v4043_v18, 0.0  ;;  %v4051_v43 = vsub.f32 %v14317_v53, %v14549_v7  ;;  %v4052_v61 = vsub.f32 %v14320_v46, %v14549_v7  ;;  %v4053_v39 = vsub.f32 %v14336_v37, %v14549_v7 }
 0x6fb   : > { %v4054_v8 = vsub.f32 %v14343_v31, %v14549_v7  ;;  %v4055_v33 = vsub.f32 %v14363_v17, %v14549_v7  ;;  %v4056_v16 = vsub.f32 %v14369_v42, %v14549_v7  ;;  %v4057_v23 = vsub.f32 %v14382_v19, %v14549_v7 }
 0x6fc   : > { %v4077_v59 = vadd.f32 1e-05, %v4044_v3  ;;  %v4058_v53 = vsub.f32 %v14389_v0, %v14549_v7  ;;  %v4059_v46 = vsub.f32 %v14402_v32, %v14549_v7  ;;  %v4060_v37 = vsub.f32 %v14408_v13, %v14549_v7 }
 0x6fd   : > { %v4061_v31 = vsub.f32 %v14421_v22, %v14549_v7  ;;  %v4062_v20 = vsub.f32 %v14427_v1, %v14549_v7  ;;  %v4063_v3 = vsub.f32 %v14440_v58, %v14549_v7  ;;  %v23224_v9 = vsub.f32 %v14514_v21, %v14549_v7 }
 0x6fe   : > { %12957 = vrsqrt.f32 %v4077_v59  ;;  %v23225_v49 = vsub.f32 %v14523_v6, %v14549_v7  ;;  %v23226_v24 = vsub.f32 %v14530_v45, %v14549_v7 }
 0x708   : > { %v14600_v63 = vpop.eup %12957 }
 0x709   : > { %v4110_v17 = vmul.f32 %v14600_v63, %v4076_v62  ;;  %v4079_v42 = vmul.f32 %v14600_v63, %v4045_v38  ;;  %v14613_v19 = vmul.f32 %v14600_v63, %v4046_v26  ;;  %v14616_v54 = vmul.f32 %v14600_v63, %v4047_v14 }
 0x70a   : > { %v14619_v0 = vmul.f32 %v14600_v63, %v4048_v56  ;;  %v14622_v32 = vmul.f32 %v14600_v63, %v4049_v44  ;;  %v14625_v13 = vmul.f32 %v14600_v63, %v4050_v29  ;;  %v14628_v22 = vmul.f32 %v14600_v63, %v4051_v43 }
 0x70b   : > { %v4111_v2 = vmax.f32 %v4079_v42, 0.0  ;;  %v14633_v35 = vmul.f32 %v14600_v63, %v4052_v61  ;;  %v14636_v40 = vmul.f32 %v14600_v63, %v4053_v39  ;;  %v14639_v4 = vmul.f32 %v14600_v63, %v4054_v8 }
 0x70c   : > { %v14642_v30 = vmul.f32 %v14600_v63, %v4055_v33  ;;  %v14645_v62 = vmul.f32 %v14600_v63, %v4056_v16  ;;  %v14648_v18 = vmul.f32 %v14600_v63, %v4057_v23  ;;  %v4142_v1 = vmax.f32 %v4110_v17, 0.0 }
 0x70d   : > { %v4175_v59 = vcombine.high %v4111_v2, %v4111_v2  ;;  %v4182_v38 = vrot.slane %v4111_v2, %v13132_v52  ;;  %v14654_v26 = vmul.f32 %v14600_v63, %v4058_v53  ;;  %v14657_v14 = vmul.f32 %v14600_v63, %v4059_v46 }
 0x70e   : > { %v14660_v56 = vmul.f32 %v14600_v63, %v4060_v37  ;;  %v14663_v44 = vmul.f32 %v14600_v63, %v4061_v31  ;;  %v14668_v61 = vmul.f32 %v14600_v63, %v4062_v20  ;;  %v14671_v39 = vmul.f32 %v14600_v63, %v4063_v3 }
 0x70f   : > { %v4189_v29 = vrot.slane %v4175_v59, %v13132_v52  ;;  %v4190_v43 = vcombine.high %v4182_v38, %v4182_v38  ;;  %v4198_v58 = vrot.slane %v4182_v38, %v13132_v52  ;;  %v5694_v8 = vcombine.high %v4142_v1, %v4142_v1 }
 0x710   : > { %v5701_v53 = vrot.slane %v4142_v1, %v13132_v52  ;;  %v4064_v3 = vsub.f32 %v14447_v48, %v14549_v7  ;;  %v4065_v59 = vsub.f32 %v14458_v41, %v14549_v7  ;;  %v14721_v51 = vmul.f32 %v14600_v63, %v4069_v10 }
 0x711   : > { %v4191_v33 = vcombine.high %v4189_v29, %v4189_v29  ;;  %v4205_v16 = vrot.slane %v4189_v29, %v13132_v52  ;;  %v4212_v23 = vrot.slane %v4190_v43, %v13132_v52  ;;  %v4220_v37 = vcombine.high %v4198_v58, %v4198_v58 }
 0x712   : > { %v5708_v31 = vrot.slane %v5694_v8, %v13132_v52  ;;  %v5709_v2 = vcombine.high %v5701_v53, %v5701_v53  ;;  %v5746_v38 = vrot.slane %v4198_v58, %v13136_v57  ;;  %v14691_v41 = vmul.f32 %v14600_v63, %v4064_v3 }
 0x713   : > { %v4219_v46 = vrot.slane %v4191_v33, %v13132_v52  ;;  %v4221_v17 = vcombine.high %v4205_v16, %v4205_v16  ;;  %v4222_v42 = vcombine.high %v4212_v23, %v4212_v23  ;;  %v5750_v29 = vrot.slane %v4212_v23, %v13136_v57 }
 0x714   : > { %v5754_v1 = vrot.slane %v4220_v37, %v13136_v57  ;;  %v5710_v33 = vcombine.high %v5708_v31, %v5708_v31  ;;  %v5762_v8 = vrot.slane %v4205_v16, %v13136_v57  ;;  %v14694_v23 = vmul.f32 %v14600_v63, %v4065_v59 }
 0x715   : > { %v4223_v20 = vcombine.high %v4219_v46, %v4219_v46  ;;  %v5758_v43 = vrot.slane %v4222_v42, %v13136_v57  ;;  %v5766_v34 = vrot.slane %v4219_v46, %v13136_v57  ;;  %v5770_v36 = vrot.slane %v4221_v17, %v13136_v57 }
 0x716   : > { %v6799_v15 = vcombine.low %v5746_v38, %v5750_v29  ;;  %v14700_v16 = vmul.f32 %v14600_v63, %v4066_v60  ;;  %v14706_v46 = vmul.f32 %v14600_v63, %v4067_v47  ;;  %v14714_v42 = vmul.f32 %v14600_v63, %v4068_v12 }
 0x717   : > { %v5774_v48 = vrot.slane %v4223_v20, %v13136_v57  ;;  %v6800_v50 = vcombine.low %v5754_v1, %v5758_v43  ;;  %v6816_v58 = vcombine.low %v5762_v8, %v5766_v34  ;;  %v14727_v60 = vmul.f32 %v14600_v63, %v4070_v28 }
 0x718   : > { %v6807_v37 = vrot.slane %v6799_v15, %v13052_v11  ;;  %v14733_v27 = vmul.f32 %v14600_v63, %v4071_v55  ;;  %v14740_v10 = vmul.f32 %v14600_v63, %v23224_v9  ;;  %v14746_v28 = vmul.f32 %v14600_v63, %v23225_v49 }
 0x719   : > { %v6814_v17 = vrot.slane %v6800_v50, %v13052_v11  ;;  %v6817_v34 = vcombine.low %v5770_v36, %v5774_v48  ;;  %v6824_v5 = vrot.slane %v6816_v58, %v13052_v11  ;;  %v14752_v55 = vmul.f32 %v14600_v63, %v23226_v24 }
 0x71a   : > { %v23227_v50 = vsub.f32 %v14539_v25, %v14549_v7  ;;  %v5731_v6 = vrot.slane %v5709_v2, %v13132_v52  ;;  %v14764_v20 = vrot.slane %v5710_v33, %v13132_v52  ;;  %v5717_v3 = vrot.slane %v5701_v53, %v13132_v52 }
 0x71b   : > { %v6815_v47 = vcombine.low %v6807_v37, %v6814_v17  ;;  %v6831_v12 = vrot.slane %v6817_v34, %v13052_v11  ;;  %v14769_v59 = vrot.slane %v5708_v31, %v13132_v52 }
 0x71c   : > { %v14758_v21 = vmul.f32 %v14600_v63, %v23227_v50  ;;  %23228 = vst [vmem:[#allocation4_spill] sm:$0xff] %v14764_v20  ;;  %v4119_v63 = vmax.f32 %v14636_v40, 0.0  ;;  %v5741_v2 = vcombine.high %v5731_v6, %v5731_v6  ;;  %v5742_v29 = vcombine.high %v14764_v20, %v14764_v20 }
 0x71d   : > { %v14760_v15 = vcombine.low %v6824_v5, %v6831_v12  ;;  %v7887_v36 = vrot.slane %v6815_v47, 7  ;;  %23229 = vst [vmem:[#allocation5_spill] sm:$0xff] %v14769_v59  ;;  %v5739_v1 = vcombine.high %v5717_v3, %v5717_v3  ;;  %v5740_v31 = vcombine.high %v14769_v59, %v14769_v59 }
 0x71e   : > { %v4567_v43 = vcombine.high %v4119_v63, %v4119_v63  ;;  %v14790_v40 = vrot.slane %v5741_v2, %v13136_v57  ;;  %v14793_v33 = vrot.slane %v5742_v29, %v13136_v57  ;;  %v4574_v8 = vrot.slane %v4119_v63, %v13132_v52 }
 0x71f   : > { %v22494_v45 = vrot.slane %v14760_v15, 7  ;;  %v14777_v7 = vsel %vm264_vm0, %v5746_v38, %v7887_v36  ;;  %v6742_v38 = vrot.slane %v5731_v6, %v13136_v57  ;;  %v6738_v48 = vrot.slane %v5717_v3, %v13136_v57 }
 0x720   : > { %23231 = vst [vmem:[#allocation7_spill] sm:$0xff] %v14777_v7  ;;  %23232 = vst [vmem:[#allocation8_spill] sm:$0xff] %v14790_v40  ;;  %v14798_v58 = vrot.slane %v5739_v1, %v13136_v57  ;;  %v4581_v37 = vrot.slane %v4567_v43, %v13132_v52  ;;  %v14804_v34 = vrot.slane %v5740_v31, %v13136_v57  ;;  %v14818_v63 = vmax.f32 %v14613_v19, 0.0 }
 0x721   : > { %v14774_v25 = vsel %vm264_vm0, %v7887_v36, %v22494_v45  ;;  %23233 = vst [vmem:[#allocation9_spill] sm:$0xff] %v14793_v33  ;;  %v4582_v5 = vcombine.high %v4574_v8, %v4574_v8  ;;  %v4590_v47 = vrot.slane %v4574_v8, %v13132_v52  ;;  %v14809_v9 = vcombine.low %v6738_v48, %v6742_v38 }
 0x722   : > { %23230 = vst [vmem:[#allocation6_spill] sm:$0xff] %v14774_v25  ;;  %v11933_v53 = vpack.i.bf16 %v14774_v25, %v14777_v7  ;;  %23234 = vst [vmem:[#allocation10_spill] sm:$0xff] %v14798_v58  ;;  %v4583_v49 = vcombine.high %v4581_v37, %v4581_v37  ;;  %v4597_v24 = vrot.slane %v4581_v37, %v13132_v52  ;;  %v14821_v2 = vmax.f32 %v14616_v54, 0.0 }
 0x723   : > { %23235 = vst [vmem:[#allocation11_spill] sm:$0xff] %v14804_v34  ;;  %23236 = vst [vmem:[#allocation12_spill] sm:$0xff] %v14809_v9  ;;  %v4604_v6 = vrot.slane %v4582_v5, %v13132_v52  ;;  %v4612_v3 = vcombine.high %v4590_v47, %v4590_v47  ;;  %v14825_v1 = vmax.f32 %v14619_v0, 0.0  ;;  %v6002_v38 = vrot.slane %v4590_v47, %v13136_v57 }
 0x724   : > { %11934 = vrot.lane.b32.xlu0 %v11933_v53, %s12986_s11  ;;  %11929 = vrot.lane.b32.xlu1 %v11933_v53, %s12983_s19  ;;  %v4611_v29 = vrot.slane %v4583_v49, %v13132_v52  ;;  %v4613_v53 = vcombine.high %v4597_v24, %v4597_v24  ;;  %v14830_v8 = vmax.f32 %v14622_v32, 0.0  ;;  %v6018_v19 = vrot.slane %v4597_v24, %v13136_v57 }
 0x725   : > { %v4614_v31 = vcombine.high %v4604_v6, %v4604_v6  ;;  %v6006_v43 = vrot.slane %v4604_v6, %v13136_v57  ;;  %v14835_v37 = vmax.f32 %v14625_v13, 0.0  ;;  %v6010_v5 = vrot.slane %v4612_v3, %v13136_v57 }
 0x726   : > { %v4615_v48 = vcombine.high %v4611_v29, %v4611_v29  ;;  %v6022_v54 = vrot.slane %v4611_v29, %v13136_v57  ;;  %v14840_v47 = vmax.f32 %v14628_v22, 0.0  ;;  %v6026_v6 = vrot.slane %v4613_v53, %v13136_v57 }
 0x727   : > { %v6014_v0 = vrot.slane %v4614_v31, %v13136_v57  ;;  %v7071_v49 = vcombine.low %v6002_v38, %v6006_v43  ;;  %v14845_v24 = vmax.f32 %v14633_v35, 0.0  ;;  %v14848_v29 = vmax.f32 %v14639_v4, 0.0 }
 0x728   : > { %v6030_v32 = vrot.slane %v4615_v48, %v13136_v57  ;;  %v7088_v36 = vcombine.low %v6018_v19, %v6022_v54  ;;  %v14851_v13 = vmax.f32 %v14642_v30, 0.0  ;;  %v14854_v31 = vmax.f32 %v14645_v62, 0.0 }
 0x729   : > { %v7072_v3 = vcombine.low %v6010_v5, %v6014_v0  ;;  %v14857_v22 = vmax.f32 %v14648_v18, 0.0  ;;  %v14860_v53 = vmax.f32 %v14654_v26, 0.0  ;;  %v14863_v35 = vmax.f32 %v14657_v14, 0.0 }
 0x72a   : > { %v7089_v43 = vcombine.low %v6026_v6, %v6030_v32  ;;  %v14866_v4 = vmax.f32 %v14660_v56, 0.0  ;;  %v7079_v30 = vrot.slane %v7071_v49, %v13052_v11  ;;  %v14871_v62 = vmax.f32 %v14663_v44, 0.0 }
 0x72b   : > { %v7086_v48 = vrot.slane %v7072_v3, %v13052_v11  ;;  %v14874_v18 = vmax.f32 %v14668_v61, 0.0  ;;  %v7096_v26 = vrot.slane %v7088_v36, %v13052_v11  ;;  %v14879_v14 = vmax.f32 %v14671_v39, 0.0 }
 0x72c   : > { %v7103_v19 = vrot.slane %v7089_v43, %v13052_v11  ;;  %v14882_v56 = vmax.f32 %v14691_v41, 0.0  ;;  %v14885_v54 = vmax.f32 %v14694_v23, 0.0  ;;  %v14888_v44 = vmax.f32 %v14700_v16, 0.0 }
 0x72d   : > { %v7087_v5 = vcombine.low %v7079_v30, %v7086_v48  ;;  %v14891_v61 = vmax.f32 %v14706_v46, 0.0  ;;  %v14894_v36 = vmax.f32 %v14714_v42, 0.0  ;;  %v14899_v39 = vmax.f32 %v14721_v51, 0.0 }
 0x72e   : > { %v14896_v0 = vcombine.low %v7096_v26, %v7103_v19  ;;  %v14902_v41 = vmax.f32 %v14727_v60, 0.0  ;;  %v14905_v23 = vmax.f32 %v14733_v27, 0.0  ;;  %v14908_v16 = vmax.f32 %v14740_v10, 0.0 }
 0x72f   : > { %v7915_v49 = vrot.slane %v7087_v5, 7  ;;  %v14911_v46 = vmax.f32 %v14746_v28, 0.0  ;;  %v14914_v42 = vmax.f32 %v14752_v55, 0.0  ;;  %v14918_v51 = vmax.f32 %v14758_v21, 0.0 }
 0x730   : > { %23237 = vst [vmem:[#allocation13_spill] sm:$0xff] %v14896_v0  ;;  %v22493_v6 = vrot.slane %v14896_v0, 7  ;;  %v14924_v27 = vrot.slane %v14818_v63, %v13132_v52  ;;  %v14938_v21 = vrot.slane %v14821_v2, %v13132_v52  ;;  %v14946_v43 = vrot.slane %v14825_v1, %v13132_v52 }
 0x731   : > { %23238 = vst [vmem:[#allocation14_spill] sm:$0xff] %v14911_v46  ;;  %23239 = vst [vmem:[#allocation15_spill] sm:$0xff] %v14918_v51  ;;  %v14934_v55 = vsel %vm264_vm0, %v6002_v38, %v7915_v49  ;;  %v14952_v38 = vrot.slane %v14830_v8, %v13132_v52  ;;  %v14958_v26 = vrot.slane %v14835_v37, %v13132_v52 }
 0x732   : > { %v14931_v28 = vsel %vm264_vm0, %v7915_v49, %v22493_v6  ;;  %23241 = vst [vmem:[#allocation17_spill] sm:$0xff] %v14934_v55  ;;  %v14964_v5 = vrot.slane %v14840_v47, %v13132_v52  ;;  %v14971_v50 = vrot.slane %v14845_v24, %v13132_v52  ;;  %v14977_v12 = vrot.slane %v14848_v29, %v13132_v52 }
 0x733   : > { %23240 = vst [vmem:[#allocation16_spill] sm:$0xff] %v14931_v28  ;;  %v11943_v3 = vpack.i.bf16 %v14931_v28, %v14934_v55  ;;  %v14983_v45 = vrot.slane %v14851_v13, %v13132_v52  ;;  %v14989_v19 = vrot.slane %v14854_v31, %v13132_v52  ;;  %v14995_v48 = vrot.slane %v14857_v22, %v13132_v52 }
 0x734   : > { %v15001_v30 = vrot.slane %v14860_v53, %v13132_v52  ;;  %v15007_v32 = vrot.slane %v14863_v35, %v13132_v52  ;;  %v15014_v10 = vrot.slane %v14866_v4, %v13132_v52  ;;  %v15020_v60 = vrot.slane %v14871_v62, %v13132_v52 }
 0x735   : > { %11944 = vrot.lane.b32.xlu0 %v11943_v3, %s12986_s11  ;;  %11939 = vrot.lane.b32.xlu1 %v11943_v3, %s12983_s19  ;;  %v15026_v33 = vrot.slane %v14874_v18, %v13132_v52  ;;  %v15032_v17 = vrot.slane %v14879_v14, %v13132_v52  ;;  %v15038_v34 = vrot.slane %v14882_v56, %v13132_v52 }
 0x736   : > { %23242 = vst [vmem:[#allocation18_spill] sm:$0xff] %v15014_v10  ;;  %23243 = vst [vmem:[#allocation19_spill] sm:$0xff] %v15020_v60  ;;  %v15044_v40 = vrot.slane %v14885_v54, %v13132_v52  ;;  %v15050_v58 = vrot.slane %v14888_v44, %v13132_v52  ;;  %v15056_v59 = vrot.slane %v14891_v61, %v13132_v52 }
 0x737   : > { %23244 = vst [vmem:[#allocation20_spill] sm:$0xff] %v15026_v33  ;;  %23245 = vst [vmem:[#allocation21_spill] sm:$0xff] %v15032_v17  ;;  %v15062_v20 = vrot.slane %v14894_v36, %v13132_v52  ;;  %v15068_v9 = vrot.slane %v14899_v39, %v13132_v52  ;;  %v15074_v55 = vrot.slane %v14902_v41, %v13132_v52 }
 0x738   : > { %v15080_v28 = vrot.slane %v14905_v23, %v13132_v52  ;;  %v15086_v7 = vrot.slane %v14908_v16, %v13132_v52  ;;  %v15092_v25 = vrot.slane %v14911_v46, %v13132_v52  ;;  %v15098_v0 = vrot.slane %v14914_v42, %v13132_v52 }
 0x739   : > { %v23250_v6 = vcombine.high %v14818_v63, %v14818_v63  ;;  %v15114_v49 = vrot.slane %v14924_v27, %v13132_v52  ;;  %v23251_v3 = vcombine.high %v14821_v2, %v14821_v2  ;;  %v15126_v63 = vrot.slane %v14938_v21, %v13132_v52 }
 0x73a   : > { %23246 = vst [vmem:[#allocation22_spill] sm:$0xff] %v15086_v7  ;;  %23247 = vst [vmem:[#allocation23_spill] sm:$0xff] %v15092_v25  ;;  %v15104_v7 = vrot.slane %v14918_v51, %v13132_v52  ;;  %v4239_v25 = vcombine.high %v14924_v27, %v14924_v27  ;;  %v15138_v2 = vrot.slane %v14946_v43, %v13132_v52 }
 0x73b   : > { %23248 = vst [vmem:[#allocation24_spill] sm:$0xff] %v15098_v0  ;;  %v4238_v46 = vrot.slane %v23250_v6, %v13132_v52  ;;  %v15120_v0 = vrot.slane %v23251_v3, %v13132_v52  ;;  %23253 = vst [vmem:[#allocation27_spill] sm:$0xff] %v15126_v63  ;;  %v23254_v6 = vcombine.high %v14825_v1, %v14825_v1 }
 0x73c   : > { %23249 = vst [vmem:[#allocation25_spill] sm:$0xff] %v15104_v7  ;;  %23255 = vst [vmem:[#allocation28_spill] sm:$0xff] %v15138_v2  ;;  %v23256_v3 = vcombine.high %v14830_v8, %v14830_v8  ;;  %v15150_v1 = vrot.slane %v14952_v38, %v13132_v52  ;;  %v15162_v8 = vrot.slane %v14958_v26, %v13132_v52 }
 0x73d   : > { %23252 = vst [vmem:[#allocation26_spill] sm:$0xff] %v15120_v0  ;;  %v15132_v51 = vrot.slane %v23254_v6, %v13132_v52  ;;  %v23259_v6 = vcombine.high %v14835_v37, %v14835_v37  ;;  %v15174_v37 = vrot.slane %v14964_v5, %v13132_v52 }
 0x73e   : > { %v15144_v7 = vrot.slane %v23256_v3, %v13132_v52  ;;  %23258 = vst [vmem:[#allocation30_spill] sm:$0xff] %v15150_v1  ;;  %23260 = vst [vmem:[#allocation31_spill] sm:$0xff] %v15162_v8  ;;  %v23261_v3 = vcombine.high %v14840_v47, %v14840_v47  ;;  %v15186_v47 = vrot.slane %v14971_v50, %v13132_v52 }
 0x73f   : > { %v15156_v27 = vrot.slane %v23259_v6, %v13132_v52  ;;  %23263 = vst [vmem:[#allocation33_spill] sm:$0xff] %v15174_v37  ;;  %v23264_v6 = vcombine.high %v14845_v24, %v14845_v24  ;;  %v15198_v24 = vrot.slane %v14977_v12, %v13132_v52 }
 0x740   : > { %23257 = vst [vmem:[#allocation29_spill] sm:$0xff] %v15144_v7  ;;  %v15168_v63 = vrot.slane %v23261_v3, %v13132_v52  ;;  %23266 = vst [vmem:[#allocation35_spill] sm:$0xff] %v15186_v47  ;;  %v23267_v3 = vcombine.high %v14848_v29, %v14848_v29  ;;  %v15210_v29 = vrot.slane %v14983_v45, %v13132_v52 }
 0x741   : > { %v15180_v2 = vrot.slane %v23264_v6, %v13132_v52  ;;  %23269 = vst [vmem:[#allocation37_spill] sm:$0xff] %v15198_v24  ;;  %v23270_v6 = vcombine.high %v14851_v13, %v14851_v13  ;;  %v15222_v13 = vrot.slane %v14989_v19, %v13132_v52 }
 0x742   : > { %23262 = vst [vmem:[#allocation32_spill] sm:$0xff] %v15168_v63  ;;  %v15192_v1 = vrot.slane %v23267_v3, %v13132_v52  ;;  %23272 = vst [vmem:[#allocation39_spill] sm:$0xff] %v15210_v29  ;;  %v23273_v3 = vcombine.high %v14854_v31, %v14854_v31  ;;  %v15234_v31 = vrot.slane %v14995_v48, %v13132_v52 }
 0x743   : > { %23265 = vst [vmem:[#allocation34_spill] sm:$0xff] %v15180_v2  ;;  %v15204_v8 = vrot.slane %v23270_v6, %v13132_v52  ;;  %23274 = vst [vmem:[#allocation40_spill] sm:$0xff] %v15222_v13  ;;  %v23275_v6 = vcombine.high %v14857_v22, %v14857_v22  ;;  %v15246_v22 = vrot.slane %v15001_v30, %v13132_v52 }
 0x744   : > { %23268 = vst [vmem:[#allocation36_spill] sm:$0xff] %v15192_v1  ;;  %v15216_v37 = vrot.slane %v23273_v3, %v13132_v52  ;;  %23277 = vst [vmem:[#allocation42_spill] sm:$0xff] %v15234_v31  ;;  %v23278_v3 = vcombine.high %v14860_v53, %v14860_v53  ;;  %v15258_v53 = vrot.slane %v15007_v32, %v13132_v52 }
 0x745   : > { %23271 = vst [vmem:[#allocation38_spill] sm:$0xff] %v15204_v8  ;;  %v15228_v47 = vrot.slane %v23275_v6, %v13132_v52  ;;  %23280 = vst [vmem:[#allocation44_spill] sm:$0xff] %v15246_v22  ;;  %v23281_v6 = vcombine.high %v14863_v35, %v14863_v35  ;;  %v15270_v35 = vrot.slane %v15014_v10, %v13132_v52 }
 0x746   : > { %v15240_v24 = vrot.slane %v23278_v3, %v13132_v52  ;;  %23283 = vst [vmem:[#allocation46_spill] sm:$0xff] %v15258_v53  ;;  %v23284_v3 = vcombine.high %v14866_v4, %v14866_v4  ;;  %v15282_v4 = vrot.slane %v15020_v60, %v13132_v52  ;;  %v4254_v10 = vrot.slane %v4238_v46, %v13132_v52 }
 0x747   : > { %23276 = vst [vmem:[#allocation41_spill] sm:$0xff] %v15228_v47  ;;  %v15252_v29 = vrot.slane %v23281_v6, %v13132_v52  ;;  %23286 = vst [vmem:[#allocation48_spill] sm:$0xff] %v15270_v35  ;;  %v23287_v6 = vcombine.high %v14871_v62, %v14871_v62  ;;  %v4240_v35 = vcombine.high %v4238_v46, %v4238_v46 }
 0x748   : > { %23279 = vst [vmem:[#allocation43_spill] sm:$0xff] %v15240_v24  ;;  %v15264_v13 = vrot.slane %v23284_v3, %v13132_v52  ;;  %23289 = vst [vmem:[#allocation50_spill] sm:$0xff] %v15282_v4  ;;  %v23290_v3 = vcombine.high %v14874_v18, %v14874_v18  ;;  %v4261_v62 = vrot.slane %v4239_v25, %v13132_v52 }
 0x749   : > { %23282 = vst [vmem:[#allocation45_spill] sm:$0xff] %v15252_v29  ;;  %v15276_v31 = vrot.slane %v23287_v6, %v13132_v52  ;;  %v15296_v53 = vrot.slane %v15026_v33, %v13132_v52  ;;  %v23293_v4 = vcombine.high %v14879_v14, %v14879_v14  ;;  %v4269_v18 = vcombine.high %v15114_v49, %v15114_v49 }
 0x74a   : > { %23285 = vst [vmem:[#allocation47_spill] sm:$0xff] %v15264_v13  ;;  %v15288_v22 = vrot.slane %v23290_v3, %v13132_v52  ;;  %v4268_v46 = vrot.slane %v4240_v35, %v13132_v52  ;;  %v4270_v3 = vcombine.high %v4254_v10, %v4254_v10  ;;  %v4271_v25 = vcombine.high %v4261_v62, %v4261_v62 }
 0x74b   : > { %23288 = vst [vmem:[#allocation49_spill] sm:$0xff] %v15276_v31  ;;  %23292 = vst [vmem:[#allocation52_spill] sm:$0xff] %v15296_v53  ;;  %v15302_v60 = vrot.slane %v23293_v4, %v13132_v52  ;;  %v15312_v53 = vrot.slane %v15032_v17, %v13132_v52  ;;  %v5778_v14 = vrot.slane %v15114_v49, %v13136_v57 }
 0x74c   : > { %23291 = vst [vmem:[#allocation51_spill] sm:$0xff] %v15288_v22  ;;  %v5782_v22 = vrot.slane %v4261_v62, %v13136_v57  ;;  %v5786_v4 = vrot.slane %v4269_v18, %v13136_v57  ;;  %v5790_v33 = vrot.slane %v4271_v25, %v13136_v57  ;;  %v5794_v35 = vrot.slane %v4254_v10, %v13136_v57 }
 0x74d   : > { %23294 = vst [vmem:[#allocation53_spill] sm:$0xff] %v15302_v60  ;;  %23295 = vst [vmem:[#allocation54_spill] sm:$0xff] %v15312_v53  ;;  %v4272_v60 = vcombine.high %v4268_v46, %v4268_v46  ;;  %v5798_v31 = vrot.slane %v4268_v46, %v13136_v57  ;;  %v23296_v62 = vcombine.high %v14882_v56, %v14882_v56 }
 0x74e   : > { %v15330_v49 = vrot.slane %v15038_v34, %v13132_v52  ;;  %v6833_v18 = vcombine.low %v5778_v14, %v5782_v22  ;;  %v5802_v25 = vrot.slane %v4270_v3, %v13136_v57  ;;  %v6834_v46 = vcombine.low %v5786_v4, %v5790_v33 }
 0x74f   : > { %v15324_v6 = vrot.slane %v23296_v62, %v13132_v52  ;;  %v15334_v10 = vrot.slane %v4272_v60, %v13136_v57  ;;  %v6850_v17 = vcombine.low %v5794_v35, %v5798_v31  ;;  %v23299_v56 = vcombine.high %v14885_v54, %v14885_v54  ;;  %v23325_v57 = vld [vmem:[#allocation23_spill] sm:$0xff] }
 0x750   : > { %23297 = vst [vmem:[#allocation55_spill] sm:$0xff] %v15330_v49  ;;  %v15346_v49 = vrot.slane %v15044_v40, %v13132_v52  ;;  %v23301_v60 = vcombine.high %v14888_v44, %v14888_v44  ;;  %v6841_v54 = vrot.slane %v6833_v18, %v13052_v11  ;;  %v6848_v31 = vrot.slane %v6834_v46, %v13052_v11 }
 0x751   : > { %23298 = vst [vmem:[#allocation56_spill] sm:$0xff] %v15334_v10  ;;  %v15340_v62 = vrot.slane %v23299_v56, %v13132_v52  ;;  %v6851_v3 = vcombine.low %v5802_v25, %v15334_v10  ;;  %v15361_v14 = vrot.slane %v15050_v58, %v13132_v52  ;;  %v23303_v4 = vcombine.high %v14891_v61, %v14891_v61 }
 0x752   : > { %23300 = vst [vmem:[#allocation57_spill] sm:$0xff] %v15346_v49  ;;  %v15352_v22 = vrot.slane %v23301_v60, %v13132_v52  ;;  %v15373_v18 = vrot.slane %v15056_v59, %v13132_v52  ;;  %v23305_v25 = vcombine.high %v14894_v36, %v14894_v36  ;;  %v6849_v56 = vcombine.low %v6841_v54, %v6848_v31 }
 0x753   : > { %23302 = vst [vmem:[#allocation58_spill] sm:$0xff] %v15361_v14  ;;  %v15367_v44 = vrot.slane %v23303_v4, %v13132_v52  ;;  %v6858_v60 = vrot.slane %v6850_v17, %v13052_v11  ;;  %v6865_v61 = vrot.slane %v6851_v3, %v13052_v11  ;;  %v15387_v35 = vrot.slane %v15062_v20, %v13132_v52  ;;  %v23322_v11 = vld [vmem:[#allocation14_spill] sm:$0xff] }
 0x754   : > { %23304 = vst [vmem:[#allocation59_spill] sm:$0xff] %v15373_v18  ;;  %v15379_v46 = vrot.slane %v23305_v25, %v13132_v52  ;;  %v23307_v33 = vcombine.high %v14899_v39, %v14899_v39  ;;  %v15399_v17 = vrot.slane %v15068_v9, %v13132_v52  ;;  %v23309_v54 = vcombine.high %v14902_v41, %v14902_v41 }
 0x755   : > { %23306 = vst [vmem:[#allocation60_spill] sm:$0xff] %v15387_v35  ;;  %v15407_v3 = vcombine.low %v6858_v60, %v6865_v61  ;;  %v7890_v25 = vrot.slane %v6849_v56, 7  ;;  %v23313_v36 = vcombine.high %v14905_v23, %v14905_v23  ;;  %v15425_v60 = vrot.slane %v15080_v28, %v13132_v52 }
 0x756   : > { %v15393_v53 = vrot.slane %v23307_v33, %v13132_v52  ;;  %23308 = vst [vmem:[#allocation61_spill] sm:$0xff] %v15399_v17  ;;  %v15405_v31 = vrot.slane %v23309_v54, %v13132_v52  ;;  %v15413_v33 = vrot.slane %v15074_v55, %v13132_v52  ;;  %v23316_v56 = vcombine.high %v14908_v16, %v14908_v16 }
 0x757   : > { %23311 = vst [vmem:[#allocation63_spill] sm:$0xff] %v15407_v3  ;;  %v15419_v4 = vrot.slane %v23313_v36, %v13132_v52  ;;  %23315 = vst [vmem:[#allocation66_spill] sm:$0xff] %v15425_v60  ;;  %v23318_v54 = vrot.slane %v14760_v15, 7  ;;  %v23320_v36 = vld [vmem:[#allocation22_spill] sm:$0xff]  ;;  %v23323_v16 = vcombine.high %v23322_v11, %v23322_v11  ;;  %v23327_v41 = vcombine.high %v14914_v42, %v14914_v42  ;;  %v23334_v42 = vld [vmem:[#allocation25_spill] sm:$0xff] }
 0x758   : > { %23310 = vst [vmem:[#allocation62_spill] sm:$0xff] %v15405_v31  ;;  %23312 = vst [vmem:[#allocation64_spill] sm:$0xff] %v15413_v33  ;;  %v15431_v61 = vrot.slane %v23316_v56, %v13132_v52  ;;  %v15443_v10 = vrot.slane %v23320_v36, %v13132_v52  ;;  %v23329_v11 = vrot.slane %v15407_v3, 7  ;;  %v15494_v3 = vrot.slane %v15120_v0, %v13132_v52 }
 0x759   : > { %23314 = vst [vmem:[#allocation65_spill] sm:$0xff] %v15419_v4  ;;  %v15436_v39 = vsel %vm264_vm0, %v23318_v54, %v7890_v25  ;;  %v15449_v56 = vrot.slane %v23323_v16, %v13132_v52  ;;  %v15455_v54 = vrot.slane %v23325_v57, %v13132_v52  ;;  %v15461_v23 = vrot.slane %v23327_v41, %v13132_v52 }
 0x75a   : > { %23317 = vst [vmem:[#allocation67_spill] sm:$0xff] %v15431_v61  ;;  %23319 = vst [vmem:[#allocation68_spill] sm:$0xff] %v15436_v39  ;;  %v15468_v16 = vsel %vm264_vm0, %v7890_v25, %v23329_v11  ;;  %v15488_v25 = vrot.slane %v23334_v42, %v13132_v52  ;;  %v15510_v11 = vrot.slane %v15132_v51, %v13132_v52 }
 0x75b   : > { %23321 = vst [vmem:[#allocation69_spill] sm:$0xff] %v15443_v10  ;;  %23324 = vst [vmem:[#allocation14_spill] sm:$0xff] %v15449_v56  ;;  %v23328_v10 = vld [vmem:[#allocation24_spill] sm:$0xff]  ;;  %v15484_v36 = vpack.i.bf16 %v15468_v16, %v15436_v39  ;;  %v23344_v39 = vcombine.high %v14952_v38, %v14952_v38  ;;  %v23348_v0 = vcombine.high %v14958_v26, %v14958_v26 }
 0x75c   : > { %23326 = vst [vmem:[#allocation70_spill] sm:$0xff] %v15455_v54  ;;  %23330 = vst [vmem:[#allocation24_spill] sm:$0xff] %v15468_v16  ;;  %v15472_v15 = vrot.slane %v23328_v10, %v13132_v52  ;;  %v23332_v54 = vld [vmem:[#allocation15_spill] sm:$0xff]  ;;  %v15524_v16 = vrot.slane %v15144_v7, %v13132_v52  ;;  %v15566_v38 = vrot.slane %v15180_v2, %v13132_v52  ;;  %v23358_v2 = vld [vmem:[#allocation37_spill] sm:$0xff] }
 0x75d   : > { %v23333_v57 = vcombine.high %v23332_v54, %v23332_v54  ;;  %23335 = vst [vmem:[#allocation15_spill] sm:$0xff] %v15488_v25  ;;  %23336 = vst [vmem:[#allocation25_spill] sm:$0xff] %v15494_v3  ;;  %11949 = vrot.lane.b32.xlu0 %v15484_v36, %s12983_s19  ;;  %v23341_v3 = vcombine.high %v14946_v43, %v14946_v43  ;;  %v15530_v41 = vrot.slane %v23344_v39, %v13132_v52  ;;  %v23349_v7 = vld [vmem:[#allocation31_spill] sm:$0xff] }
 0x75e   : > { %23331 = vst [vmem:[#allocation71_spill] sm:$0xff] %v15472_v15  ;;  %23340 = vst [vmem:[#allocation73_spill] sm:$0xff] %v15510_v11  ;;  %v15552_v43 = vrot.slane %v15168_v63, %v13132_v52  ;;  %v23354_v39 = vcombine.high %v14971_v50, %v14971_v50  ;;  %v23355_v63 = vld [vmem:[#allocation35_spill] sm:$0xff]  ;;  %v23357_v26 = vcombine.high %v14977_v12, %v14977_v12  ;;  %11954 = vrot.lane.b32.xlu1 %v15484_v36, %s12986_s11 }
 0x75f   : > { %v15478_v56 = vrot.slane %v23333_v57, %v13132_v52  ;;  %v23337_v57 = vcombine.high %v14938_v21, %v14938_v21  ;;  %v15516_v21 = vrot.slane %v23341_v3, %v13132_v52  ;;  %23343 = vst [vmem:[#allocation74_spill] sm:$0xff] %v15524_v16  ;;  %23345 = vst [vmem:[#allocation75_spill] sm:$0xff] %v15530_v41 }
 0x760   : > { %v15544_v16 = vrot.slane %v23348_v0, %v13132_v52  ;;  %23350 = vst [vmem:[#allocation77_spill] sm:$0xff] %v15552_v43  ;;  %v23351_v3 = vcombine.high %v14964_v5, %v14964_v5  ;;  %v15572_v43 = vrot.slane %v23354_v39, %v13132_v52  ;;  %v15580_v0 = vrot.slane %v15192_v1, %v13132_v52 }
 0x761   : > { %v15500_v54 = vrot.slane %v23337_v57, %v13132_v52  ;;  %v23342_v57 = vld [vmem:[#allocation28_spill] sm:$0xff]  ;;  %v15594_v5 = vrot.slane %v15204_v8, %v13132_v52  ;;  %v15608_v50 = vrot.slane %v15216_v37, %v13132_v52  ;;  %v23364_v39 = vcombine.high %v14989_v19, %v14989_v19 }
 0x762   : > { %v15558_v11 = vrot.slane %v23351_v3, %v13132_v52  ;;  %23356 = vst [vmem:[#allocation78_spill] sm:$0xff] %v15580_v0  ;;  %v23360_v3 = vcombine.high %v14983_v45, %v14983_v45  ;;  %v23366_v8 = vld [vmem:[#allocation40_spill] sm:$0xff]  ;;  %v15622_v12 = vrot.slane %v15228_v47, %v13132_v52  ;;  %v15636_v45 = vrot.slane %v15240_v24, %v13132_v52  ;;  %v23389_v24 = vld [vmem:[#allocation50_spill] sm:$0xff] }
 0x763   : > { %23338 = vst [vmem:[#allocation72_spill] sm:$0xff] %v15500_v54  ;;  %v15538_v54 = vrot.slane %v15156_v27, %v13132_v52  ;;  %23359 = vst [vmem:[#allocation37_spill] sm:$0xff] %v15594_v5  ;;  %v15614_v5 = vrot.slane %v23364_v39, %v13132_v52  ;;  %v23374_v47 = vld [vmem:[#allocation44_spill] sm:$0xff]  ;;  %v15650_v19 = vrot.slane %v15252_v29, %v13132_v52 }
 0x764   : > { %v15600_v0 = vrot.slane %v23360_v3, %v13132_v52  ;;  %23363 = vst [vmem:[#allocation80_spill] sm:$0xff] %v15608_v50  ;;  %23367 = vst [vmem:[#allocation82_spill] sm:$0xff] %v15622_v12  ;;  %v23372_v3 = vcombine.high %v15001_v30, %v15001_v30  ;;  %v23376_v39 = vcombine.high %v15007_v32, %v15007_v32 }
 0x765   : > { %23347 = vst [vmem:[#allocation76_spill] sm:$0xff] %v15538_v54  ;;  %v23352_v54 = vld [vmem:[#allocation33_spill] sm:$0xff]  ;;  %23365 = vst [vmem:[#allocation81_spill] sm:$0xff] %v15614_v5  ;;  %v23400_v5 = vld [vmem:[#allocation54_spill] sm:$0xff]  ;;  %v23438_v36 = vcombine.high %v23334_v42, %v23334_v42 }
 0x766   : > { %23353 = vst [vmem:[#allocation33_spill] sm:$0xff] %v15566_v38  ;;  %v15586_v38 = vrot.slane %v23357_v26, %v13132_v52  ;;  %23361 = vst [vmem:[#allocation79_spill] sm:$0xff] %v15600_v0  ;;  %v23368_v26 = vcombine.high %v14995_v48, %v14995_v48  ;;  %v15642_v12 = vrot.slane %v23372_v3, %v13132_v52  ;;  %v23386_v3 = vld [vmem:[#allocation19_spill] sm:$0xff]  ;;  %v23462_v15 = vld [vmem:[#allocation74_spill] sm:$0xff] }
 0x767   : > { %23371 = vst [vmem:[#allocation84_spill] sm:$0xff] %v15636_v45  ;;  %23375 = vst [vmem:[#allocation86_spill] sm:$0xff] %v15650_v19  ;;  %v15656_v50 = vrot.slane %v23376_v39, %v13132_v52  ;;  %v23378_v45 = vld [vmem:[#allocation46_spill] sm:$0xff]  ;;  %v15664_v48 = vrot.slane %v15264_v13, %v13132_v52  ;;  %v23384_v39 = vld [vmem:[#allocation49_spill] sm:$0xff] }
 0x768   : > { %v15628_v1 = vrot.slane %v23368_v26, %v13132_v52  ;;  %23373 = vst [vmem:[#allocation85_spill] sm:$0xff] %v15642_v12  ;;  %v23380_v26 = vld [vmem:[#allocation18_spill] sm:$0xff]  ;;  %v15678_v30 = vrot.slane %v23384_v39, %v13132_v52  ;;  %v23469_v33 = vld [vmem:[#allocation77_spill] sm:$0xff] }
 0x769   : > { %23377 = vst [vmem:[#allocation87_spill] sm:$0xff] %v15656_v50  ;;  %23379 = vst [vmem:[#allocation88_spill] sm:$0xff] %v15664_v48  ;;  %v23381_v19 = vcombine.high %v23380_v26, %v23380_v26  ;;  %v23387_v48 = vcombine.high %v23386_v3, %v23386_v3  ;;  %v23390_v26 = vld [vmem:[#allocation51_spill] sm:$0xff]  ;;  %v23392_v50 = vld [vmem:[#allocation20_spill] sm:$0xff] }
 0x76a   : > { %23369 = vst [vmem:[#allocation83_spill] sm:$0xff] %v15628_v1  ;;  %23385 = vst [vmem:[#allocation89_spill] sm:$0xff] %v15678_v30  ;;  %v15692_v32 = vrot.slane %v23390_v26, %v13132_v52  ;;  %v23393_v30 = vcombine.high %v23392_v50, %v23392_v50  ;;  %v23396_v3 = vld [vmem:[#allocation53_spill] sm:$0xff]  ;;  %v15734_v50 = vrot.slane %v15340_v62, %v13132_v52  ;;  %v23477_v35 = vld [vmem:[#allocation78_spill] sm:$0xff] }
 0x76b   : > { %v15670_v29 = vrot.slane %v23381_v19, %v13132_v52  ;;  %v15684_v13 = vrot.slane %v23387_v48, %v13132_v52  ;;  %v15706_v19 = vrot.slane %v23396_v3, %v13132_v52  ;;  %v15720_v48 = vrot.slane %v15324_v6, %v13132_v52  ;;  %v23484_v14 = vld [vmem:[#allocation80_spill] sm:$0xff]  ;;  %v23489_v3 = vld [vmem:[#allocation82_spill] sm:$0xff] }
 0x76c   : > { %23391 = vst [vmem:[#allocation90_spill] sm:$0xff] %v15692_v32  ;;  %v15698_v39 = vrot.slane %v23393_v30, %v13132_v52  ;;  %23404 = vst [vmem:[#allocation92_spill] sm:$0xff] %v15734_v50  ;;  %v23405_v30 = vcombine.high %v15044_v40, %v15044_v40  ;;  %v15776_v40 = vrot.slane %v15379_v46, %v13132_v52 }
 0x76d   : > { %23382 = vst [vmem:[#allocation18_spill] sm:$0xff] %v15670_v29  ;;  %23388 = vst [vmem:[#allocation19_spill] sm:$0xff] %v15684_v13  ;;  %v23398_v29 = vld [vmem:[#allocation21_spill] sm:$0xff]  ;;  %v23402_v13 = vcombine.high %v15038_v34, %v15038_v34  ;;  %v15762_v34 = vrot.slane %v15367_v44, %v13132_v52 }
 0x76e   : > { %23394 = vst [vmem:[#allocation20_spill] sm:$0xff] %v15698_v39  ;;  %23397 = vst [vmem:[#allocation91_spill] sm:$0xff] %v15706_v19  ;;  %v23399_v32 = vcombine.high %v23398_v29, %v23398_v29  ;;  %v15748_v29 = vrot.slane %v15352_v22, %v13132_v52 }
 0x76f   : > { %23401 = vst [vmem:[#allocation21_spill] sm:$0xff] %v15720_v48  ;;  %v15726_v19 = vrot.slane %v23402_v13, %v13132_v52  ;;  %v15740_v48 = vrot.slane %v23405_v30, %v13132_v52  ;;  %23408 = vst [vmem:[#allocation94_spill] sm:$0xff] %v15762_v34  ;;  %v23409_v13 = vcombine.high %v15056_v59, %v15056_v59 }
 0x770   : > { %v15712_v26 = vrot.slane %v23399_v32, %v13132_v52  ;;  %23406 = vst [vmem:[#allocation93_spill] sm:$0xff] %v15748_v29  ;;  %v23407_v32 = vcombine.high %v15050_v58, %v15050_v58  ;;  %23411 = vst [vmem:[#allocation96_spill] sm:$0xff] %v15776_v40  ;;  %v23412_v30 = vcombine.high %v15062_v20, %v15062_v20 }
 0x771   : > { %v15768_v29 = vrot.slane %v23409_v13, %v13132_v52  ;;  %v15790_v58 = vrot.slane %v15393_v53, %v13132_v52  ;;  %v15804_v59 = vrot.slane %v15405_v31, %v13132_v52  ;;  %v23418_v13 = vcombine.high %v15074_v55, %v15074_v55  ;;  %v23433_v31 = vld [vmem:[#allocation70_spill] sm:$0xff] }
 0x772   : > { %v15754_v50 = vrot.slane %v23407_v32, %v13132_v52  ;;  %v15782_v34 = vrot.slane %v23412_v30, %v13132_v52  ;;  %v23415_v32 = vcombine.high %v15068_v9, %v15068_v9  ;;  %v15818_v20 = vrot.slane %v15419_v4, %v13132_v52 }
 0x773   : > { %23410 = vst [vmem:[#allocation95_spill] sm:$0xff] %v15768_v29  ;;  %23414 = vst [vmem:[#allocation98_spill] sm:$0xff] %v15790_v58  ;;  %v15810_v58 = vrot.slane %v23418_v13, %v13132_v52  ;;  %v23421_v30 = vcombine.high %v15080_v28, %v15080_v28  ;;  %v15832_v9 = vrot.slane %v15431_v61, %v13132_v52  ;;  %v23430_v13 = vld [vmem:[#allocation23_spill] sm:$0xff] }
 0x774   : > { %23413 = vst [vmem:[#allocation97_spill] sm:$0xff] %v15782_v34  ;;  %v15796_v40 = vrot.slane %v23415_v32, %v13132_v52  ;;  %23417 = vst [vmem:[#allocation100_spill] sm:$0xff] %v15804_v59  ;;  %v23424_v32 = vld [vmem:[#allocation22_spill] sm:$0xff]  ;;  %v15860_v28 = vrot.slane %v15461_v23, %v13132_v52 }
 0x775   : > { %23419 = vst [vmem:[#allocation101_spill] sm:$0xff] %v15810_v58  ;;  %23420 = vst [vmem:[#allocation102_spill] sm:$0xff] %v15818_v20  ;;  %v15824_v59 = vrot.slane %v23421_v30, %v13132_v52  ;;  %v23425_v20 = vcombine.high %v23424_v32, %v23424_v32  ;;  %v23428_v30 = vld [vmem:[#allocation14_spill] sm:$0xff]  ;;  %v15876_v32 = vrot.slane %v15478_v56, %v13132_v52  ;;  %v23455_v58 = vld [vmem:[#allocation72_spill] sm:$0xff] }
 0x776   : > { %23416 = vst [vmem:[#allocation99_spill] sm:$0xff] %v15796_v40  ;;  %23423 = vst [vmem:[#allocation104_spill] sm:$0xff] %v15832_v9  ;;  %v15846_v55 = vrot.slane %v23428_v30, %v13132_v52  ;;  %v23431_v9 = vcombine.high %v23430_v13, %v23430_v13 }
 0x777   : > { %23422 = vst [vmem:[#allocation103_spill] sm:$0xff] %v15824_v59  ;;  %v15838_v4 = vrot.slane %v23425_v20, %v13132_v52  ;;  %23434 = vst [vmem:[#allocation105_spill] sm:$0xff] %v15860_v28  ;;  %v23435_v59 = vcombine.high %v23328_v10, %v23328_v10  ;;  %v15882_v28 = vrot.slane %v23438_v36, %v13132_v52  ;;  %v23451_v10 = vld [vmem:[#allocation26_spill] sm:$0xff] }
 0x778   : > { %23429 = vst [vmem:[#allocation14_spill] sm:$0xff] %v15846_v55  ;;  %v15852_v61 = vrot.slane %v23431_v9, %v13132_v52  ;;  %23437 = vst [vmem:[#allocation107_spill] sm:$0xff] %v15876_v32  ;;  %v23456_v32 = vcombine.high %v15132_v51, %v15132_v51 }
 0x779   : > { %23426 = vst [vmem:[#allocation22_spill] sm:$0xff] %v15838_v4  ;;  %v15868_v13 = vrot.slane %v23435_v59, %v13132_v52  ;;  %23439 = vst [vmem:[#allocation108_spill] sm:$0xff] %v15882_v28  ;;  %v23440_v59 = vld [vmem:[#allocation3_spill] sm:$0xff] }
 0x77a   : > { %23432 = vst [vmem:[#allocation23_spill] sm:$0xff] %v15852_v61  ;;  %v15892_v20 = vrot.slane %v23352_v54, %v23440_v59  ;;  %v15916_v36 = vrot.slane %v23400_v5, %v23440_v59  ;;  %v15922_v42 = vrot.slane %v15346_v49, %v23440_v59  ;;  %v23485_v49 = vld [vmem:[#allocation81_spill] sm:$0xff]  ;;  %v23490_v5 = vld [vmem:[#allocation83_spill] sm:$0xff]  ;;  %v23603_v39 = vrot.slane %v23358_v2, %v23440_v59 }
 0x77b   : > { %23436 = vst [vmem:[#allocation106_spill] sm:$0xff] %v15868_v13  ;;  %v15904_v13 = vrot.slane %v23378_v45, %v23440_v59 }
 0x77c   : > { %23441 = vst [vmem:[#allocation109_spill] sm:$0xff] %v15892_v20  ;;  %v15910_v20 = vrot.slane %v23389_v24, %v23440_v59  ;;  %23444 = vst [vmem:[#allocation112_spill] sm:$0xff] %v15916_v36  ;;  %v15934_v36 = vrot.slane %v15399_v17, %v23440_v59  ;;  %v23473_v17 = vld [vmem:[#allocation33_spill] sm:$0xff]  ;;  %v23518_v24 = vld [vmem:[#allocation91_spill] sm:$0xff] }
 0x77d   : > { %23442 = vst [vmem:[#allocation110_spill] sm:$0xff] %v15904_v13  ;;  %23445 = vst [vmem:[#allocation113_spill] sm:$0xff] %v15922_v42  ;;  %v15940_v42 = vrot.slane %v15425_v60, %v23440_v59  ;;  %v23452_v13 = vcombine.high %v23451_v10, %v23451_v10 }
 0x77e   : > { %23443 = vst [vmem:[#allocation111_spill] sm:$0xff] %v15910_v20  ;;  %v15928_v20 = vrot.slane %v15373_v18, %v23440_v59  ;;  %23447 = vst [vmem:[#allocation115_spill] sm:$0xff] %v15934_v36  ;;  %v15952_v36 = vrot.slane %v15488_v25, %v23440_v59  ;;  %v23458_v25 = vld [vmem:[#allocation73_spill] sm:$0xff] }
 0x77f   : > { %23448 = vst [vmem:[#allocation116_spill] sm:$0xff] %v15940_v42  ;;  %v15958_v60 = vrot.slane %v23452_v13, %v13132_v52  ;;  %v23454_v42 = vld [vmem:[#allocation25_spill] sm:$0xff] }
 0x780   : > { %23446 = vst [vmem:[#allocation114_spill] sm:$0xff] %v15928_v20  ;;  %v15946_v20 = vrot.slane %v23433_v31, %v23440_v59  ;;  %23450 = vst [vmem:[#allocation118_spill] sm:$0xff] %v15952_v36  ;;  %v23459_v13 = vld [vmem:[#allocation29_spill] sm:$0xff] }
 0x781   : > { %23453 = vst [vmem:[#allocation26_spill] sm:$0xff] %v15958_v60  ;;  %v23460_v60 = vcombine.high %v23459_v13, %v23459_v13  ;;  %v23481_v18 = vld [vmem:[#allocation37_spill] sm:$0xff] }
 0x782   : > { %23449 = vst [vmem:[#allocation117_spill] sm:$0xff] %v15946_v20  ;;  %v15968_v20 = vrot.slane %v23456_v32, %v13132_v52  ;;  %v23463_v32 = vcombine.high %v15156_v27, %v15156_v27 }
 0x783   : > { %v15978_v9 = vrot.slane %v23460_v60, %v13132_v52  ;;  %v23466_v60 = vld [vmem:[#allocation32_spill] sm:$0xff] }
 0x784   : > { %23457 = vst [vmem:[#allocation119_spill] sm:$0xff] %v15968_v20  ;;  %v15988_v36 = vrot.slane %v23463_v32, %v13132_v52  ;;  %v23465_v20 = vld [vmem:[#allocation76_spill] sm:$0xff]  ;;  %v23470_v32 = vld [vmem:[#allocation34_spill] sm:$0xff] }
 0x785   : > { %23461 = vst [vmem:[#allocation29_spill] sm:$0xff] %v15978_v9  ;;  %v23467_v9 = vcombine.high %v23466_v60, %v23466_v60 }
 0x786   : > { %23464 = vst [vmem:[#allocation120_spill] sm:$0xff] %v15988_v36  ;;  %v23471_v36 = vcombine.high %v23470_v32, %v23470_v32 }
 0x787   : > { %v15998_v31 = vrot.slane %v23467_v9, %v13132_v52  ;;  %v23474_v9 = vld [vmem:[#allocation36_spill] sm:$0xff] }
 0x788   : > { %v16008_v10 = vrot.slane %v23471_v36, %v13132_v52  ;;  %v23478_v36 = vld [vmem:[#allocation38_spill] sm:$0xff] }
 0x789   : > { %23468 = vst [vmem:[#allocation32_spill] sm:$0xff] %v15998_v31  ;;  %v23475_v31 = vcombine.high %v23474_v9, %v23474_v9 }
 0x78a   : > { %23472 = vst [vmem:[#allocation77_spill] sm:$0xff] %v16008_v10  ;;  %v23479_v10 = vcombine.high %v23478_v36, %v23478_v36 }
 0x78b   : > { %v16018_v51 = vrot.slane %v23475_v31, %v13132_v52  ;;  %v23482_v31 = vcombine.high %v15216_v37, %v15216_v37 }
 0x78c   : > { %v16028_v13 = vrot.slane %v23479_v10, %v13132_v52  ;;  %v23486_v10 = vld [vmem:[#allocation41_spill] sm:$0xff] }
 0x78d   : > { %23476 = vst [vmem:[#allocation34_spill] sm:$0xff] %v16018_v51  ;;  %v16038_v27 = vrot.slane %v23482_v31, %v13132_v52  ;;  %v23491_v31 = vld [vmem:[#allocation43_spill] sm:$0xff]  ;;  %v23495_v51 = vld [vmem:[#allocation85_spill] sm:$0xff] }
 0x78e   : > { %23480 = vst [vmem:[#allocation33_spill] sm:$0xff] %v16028_v13  ;;  %v23487_v13 = vcombine.high %v23486_v10, %v23486_v10 }
 0x78f   : > { %23483 = vst [vmem:[#allocation36_spill] sm:$0xff] %v16038_v27  ;;  %v23492_v27 = vcombine.high %v23491_v31, %v23491_v31 }
 0x790   : > { %v16048_v60 = vrot.slane %v23487_v13, %v13132_v52  ;;  %v23496_v13 = vld [vmem:[#allocation45_spill] sm:$0xff] }
 0x791   : > { %v16058_v32 = vrot.slane %v23492_v27, %v13132_v52  ;;  %v23501_v27 = vld [vmem:[#allocation47_spill] sm:$0xff] }
 0x792   : > { %23488 = vst [vmem:[#allocation78_spill] sm:$0xff] %v16048_v60  ;;  %v23497_v60 = vcombine.high %v23496_v13, %v23496_v13 }
 0x793   : > { %23493 = vst [vmem:[#allocation38_spill] sm:$0xff] %v16058_v32  ;;  %v23502_v32 = vcombine.high %v23501_v27, %v23501_v27 }
 0x794   : > { %v16068_v9 = vrot.slane %v23497_v60, %v13132_v52  ;;  %v23506_v60 = vld [vmem:[#allocation49_spill] sm:$0xff] }
 0x795   : > { %v16078_v36 = vrot.slane %v23502_v32, %v13132_v52  ;;  %v23511_v32 = vld [vmem:[#allocation51_spill] sm:$0xff] }
 0x796   : > { %23498 = vst [vmem:[#allocation81_spill] sm:$0xff] %v16068_v9  ;;  %v23507_v9 = vcombine.high %v23506_v60, %v23506_v60 }
 0x797   : > { %23503 = vst [vmem:[#allocation41_spill] sm:$0xff] %v16078_v36  ;;  %v23512_v36 = vcombine.high %v23511_v32, %v23511_v32 }
 0x798   : > { %v16088_v37 = vrot.slane %v23507_v9, %v13132_v52  ;;  %v23515_v9 = vld [vmem:[#allocation53_spill] sm:$0xff] }
 0x799   : > { %v16098_v10 = vrot.slane %v23512_v36, %v13132_v52  ;;  %v23519_v36 = vcombine.high %v15324_v6, %v15324_v6 }
 0x79a   : > { %23508 = vst [vmem:[#allocation43_spill] sm:$0xff] %v16088_v37  ;;  %v23516_v37 = vcombine.high %v23515_v9, %v23515_v9 }
 0x79b   : > { %23513 = vst [vmem:[#allocation85_spill] sm:$0xff] %v16098_v10  ;;  %v16118_v13 = vrot.slane %v23519_v36, %v13132_v52  ;;  %v23521_v10 = vld [vmem:[#allocation21_spill] sm:$0xff]  ;;  %v23525_v36 = vcombine.high %v15352_v22, %v15352_v22 }
 0x79c   : > { %v16108_v31 = vrot.slane %v23516_v37, %v13132_v52  ;;  %v23522_v37 = vcombine.high %v15340_v62, %v15340_v62 }
 0x79d   : > { %23520 = vst [vmem:[#allocation47_spill] sm:$0xff] %v16118_v13  ;;  %v16138_v60 = vrot.slane %v23525_v36, %v13132_v52  ;;  %v23531_v36 = vcombine.high %v15379_v46, %v15379_v46  ;;  %v23668_v55 = vld [vmem:[#allocation81_spill] sm:$0xff] }
 0x79e   : > { %23517 = vst [vmem:[#allocation45_spill] sm:$0xff] %v16108_v31  ;;  %v16128_v27 = vrot.slane %v23522_v37, %v13132_v52  ;;  %v23524_v31 = vld [vmem:[#allocation92_spill] sm:$0xff]  ;;  %v23528_v37 = vcombine.high %v15367_v44, %v15367_v44 }
 0x79f   : > { %23526 = vst [vmem:[#allocation51_spill] sm:$0xff] %v16138_v60  ;;  %v16158_v9 = vrot.slane %v23531_v36, %v13132_v52  ;;  %v23537_v36 = vld [vmem:[#allocation62_spill] sm:$0xff] }
 0x7a0   : > { %23523 = vst [vmem:[#allocation49_spill] sm:$0xff] %v16128_v27  ;;  %v16148_v32 = vrot.slane %v23528_v37, %v13132_v52  ;;  %v23534_v37 = vcombine.high %v15393_v53, %v15393_v53 }
 0x7a1   : > { %23532 = vst [vmem:[#allocation121_spill] sm:$0xff] %v16158_v9  ;;  %v23538_v9 = vcombine.high %v23537_v36, %v23537_v36  ;;  %v23670_v61 = vld [vmem:[#allocation43_spill] sm:$0xff] }
 0x7a2   : > { %23529 = vst [vmem:[#allocation53_spill] sm:$0xff] %v16148_v32  ;;  %v16168_v6 = vrot.slane %v23534_v37, %v13132_v52  ;;  %v23542_v37 = vld [vmem:[#allocation65_spill] sm:$0xff] }
 0x7a3   : > { %v16178_v62 = vrot.slane %v23538_v9, %v13132_v52  ;;  %v23547_v9 = vld [vmem:[#allocation67_spill] sm:$0xff]  ;;  %v23671_v60 = vld [vmem:[#allocation85_spill] sm:$0xff] }
 0x7a4   : > { %23535 = vst [vmem:[#allocation122_spill] sm:$0xff] %v16168_v6  ;;  %v23543_v6 = vcombine.high %v23542_v37, %v23542_v37  ;;  %v23559_v37 = vld [vmem:[#allocation27_spill] sm:$0xff] }
 0x7a5   : > { %23539 = vst [vmem:[#allocation62_spill] sm:$0xff] %v16178_v62  ;;  %v23548_v62 = vcombine.high %v23547_v9, %v23547_v9  ;;  %v23672_v4 = vld [vmem:[#allocation45_spill] sm:$0xff]  ;;  %v23673_v32 = vld [vmem:[#allocation47_spill] sm:$0xff] }
 0x7a6   : > { %v16188_v22 = vrot.slane %v23543_v6, %v13132_v52  ;;  %v23551_v6 = vcombine.high %v23428_v30, %v23428_v30 }
 0x7a7   : > { %v16198_v44 = vrot.slane %v23548_v62, %v13132_v52  ;;  %v23553_v62 = vcombine.high %v15461_v23, %v15461_v23  ;;  %v23674_v40 = vld [vmem:[#allocation49_spill] sm:$0xff] }
 0x7a8   : > { %23544 = vst [vmem:[#allocation65_spill] sm:$0xff] %v16188_v22  ;;  %v16208_v46 = vrot.slane %v23551_v6, %v13132_v52  ;;  %v23557_v6 = vcombine.high %v15478_v56, %v15478_v56  ;;  %v23667_v22 = vld [vmem:[#allocation38_spill] sm:$0xff] }
 0x7a9   : > { %23549 = vst [vmem:[#allocation67_spill] sm:$0xff] %v16198_v44  ;;  %v16218_v53 = vrot.slane %v23553_v62, %v13132_v52  ;;  %v23676_v34 = vld [vmem:[#allocation53_spill] sm:$0xff]  ;;  %v23726_v44 = vld [vmem:[#allocation18_spill] sm:$0xff] }
 0x7aa   : > { %23552 = vst [vmem:[#allocation123_spill] sm:$0xff] %v16208_v46  ;;  %v16228_v36 = vrot.slane %v23557_v6, %v13132_v52  ;;  %v23562_v6 = vcombine.high %v23342_v57, %v23342_v57  ;;  %v23684_v46 = vcombine.high %v23455_v58, %v23455_v58 }
 0x7ab   : > { %23554 = vst [vmem:[#allocation124_spill] sm:$0xff] %v16218_v53  ;;  %v23560_v53 = vcombine.high %v23559_v37, %v23559_v37 }
 0x7ac   : > { %v16250_v9 = vrot.slane %v23562_v6, %v23440_v59  ;;  %v23567_v6 = vcombine.high %v23349_v7, %v23349_v7  ;;  %v23599_v7 = vcombine.high %v15586_v38, %v15586_v38 }
 0x7ad   : > { %v16240_v30 = vrot.slane %v23560_v53, %v23440_v59  ;;  %v23564_v53 = vld [vmem:[#allocation30_spill] sm:$0xff] }
 0x7ae   : > { %23563 = vst [vmem:[#allocation126_spill] sm:$0xff] %v16250_v9  ;;  %v16270_v62 = vrot.slane %v23567_v6, %v23440_v59  ;;  %v23571_v6 = vcombine.high %v23355_v63, %v23355_v63 }
 0x7af   : > { %23561 = vst [vmem:[#allocation125_spill] sm:$0xff] %v16240_v30  ;;  %v23565_v30 = vcombine.high %v23564_v53, %v23564_v53 }
 0x7b0   : > { %23568 = vst [vmem:[#allocation128_spill] sm:$0xff] %v16270_v62  ;;  %v16290_v23 = vrot.slane %v23571_v6, %v23440_v59  ;;  %v23574_v6 = vld [vmem:[#allocation39_spill] sm:$0xff] }
 0x7b1   : > { %v16260_v56 = vrot.slane %v23565_v30, %v23440_v59  ;;  %v23569_v30 = vcombine.high %v23352_v54, %v23352_v54  ;;  %v6038_v54 = vrot.slane %v15586_v38, %v23440_v59  ;;  %v23575_v9 = vcombine.high %v23574_v6, %v23574_v6  ;;  %v23584_v6 = vld [vmem:[#allocation84_spill] sm:$0xff]  ;;  %v23681_v27 = vld [vmem:[#allocation67_spill] sm:$0xff] }
 0x7b2   : > { %23572 = vst [vmem:[#allocation130_spill] sm:$0xff] %v16290_v23  ;;  %v23682_v29 = vld [vmem:[#allocation123_spill] sm:$0xff]  ;;  %v23683_v13 = vld [vmem:[#allocation124_spill] sm:$0xff] }
 0x7b3   : > { %23566 = vst [vmem:[#allocation127_spill] sm:$0xff] %v16260_v56  ;;  %v16280_v52 = vrot.slane %v23569_v30, %v23440_v59  ;;  %v23573_v30 = vcombine.high %v23358_v2, %v23358_v2  ;;  %v6050_v56 = vrot.slane %v23477_v35, %v23440_v59  ;;  %v16308_v23 = vrot.slane %v23575_v9, %v23440_v59  ;;  %v23579_v9 = vld [vmem:[#allocation42_spill] sm:$0xff] }
 0x7b4   : > { %v7105_v38 = vcombine.low %v23603_v39, %v6038_v54 }
 0x7b5   : > { %23570 = vst [vmem:[#allocation129_spill] sm:$0xff] %v16280_v52  ;;  %v6042_v37 = vrot.slane %v23573_v30, %v23440_v59  ;;  %23576 = vst [vmem:[#allocation131_spill] sm:$0xff] %v16308_v23  ;;  %v23577_v30 = vcombine.high %v23366_v8, %v23366_v8  ;;  %v23580_v23 = vcombine.high %v23579_v9, %v23579_v9  ;;  %v23589_v8 = vld [vmem:[#allocation86_spill] sm:$0xff]  ;;  %v23593_v9 = vld [vmem:[#allocation88_spill] sm:$0xff] }
 0x7b7   : > { %v16318_v63 = vrot.slane %v23577_v30, %v23440_v59  ;;  %v16328_v53 = vrot.slane %v23580_v23, %v23440_v59  ;;  %v23582_v30 = vcombine.high %v23374_v47, %v23374_v47  ;;  %v23586_v23 = vld [vmem:[#allocation46_spill] sm:$0xff] }
 0x7b9   : > { %23578 = vst [vmem:[#allocation132_spill] sm:$0xff] %v16318_v63  ;;  %23581 = vst [vmem:[#allocation133_spill] sm:$0xff] %v16328_v53  ;;  %v16338_v62 = vrot.slane %v23582_v30, %v23440_v59  ;;  %v23587_v53 = vcombine.high %v23586_v23, %v23586_v23  ;;  %v23590_v30 = vld [vmem:[#allocation48_spill] sm:$0xff]  ;;  %v6046_v23 = vrot.slane %v23599_v7, %v23440_v59 }
 0x7ba   : > { %v23604_v7 = vcombine.high %v23477_v35, %v23477_v35  ;;  %v23609_v35 = vld [vmem:[#allocation55_spill] sm:$0xff] }
 0x7bb   : > { %23583 = vst [vmem:[#allocation134_spill] sm:$0xff] %v16338_v62  ;;  %v16348_v52 = vrot.slane %v23587_v53, %v23440_v59  ;;  %v23591_v62 = vcombine.high %v23590_v30, %v23590_v30  ;;  %v23594_v53 = vld [vmem:[#allocation50_spill] sm:$0xff]  ;;  %v23610_v54 = vcombine.high %v23609_v35, %v23609_v35 }
 0x7bd   : > { %23588 = vst [vmem:[#allocation84_spill] sm:$0xff] %v16348_v52  ;;  %v16358_v63 = vrot.slane %v23591_v62, %v23440_v59  ;;  %v23595_v52 = vcombine.high %v23594_v53, %v23594_v53  ;;  %v23598_v62 = vld [vmem:[#allocation34_spill] sm:$0xff] }
 0x7be   : > { %v6054_v12 = vrot.slane %v23598_v62, %v23440_v59 }
 0x7bf   : > { %23592 = vst [vmem:[#allocation46_spill] sm:$0xff] %v16358_v63  ;;  %v16368_v57 = vrot.slane %v23595_v52, %v23440_v59  ;;  %v4664_v63 = vcombine.high %v23598_v62, %v23598_v62  ;;  %v23600_v52 = vld [vmem:[#allocation52_spill] sm:$0xff]  ;;  %v6058_v62 = vrot.slane %v23604_v7, %v23440_v59  ;;  %v23613_v7 = vld [vmem:[#allocation57_spill] sm:$0xff] }
 0x7c0   : > { %v23601_v53 = vcombine.high %v23600_v52, %v23600_v52  ;;  %v23606_v52 = vld [vmem:[#allocation54_spill] sm:$0xff]  ;;  %v23614_v2 = vcombine.high %v23613_v7, %v23613_v7 }
 0x7c1   : > { %23596 = vst [vmem:[#allocation86_spill] sm:$0xff] %v16368_v57  ;;  %v16400_v47 = vrot.slane %v4664_v63, %v23440_v59  ;;  %v23607_v1 = vcombine.high %v23606_v52, %v23606_v52  ;;  %v16416_v63 = vrot.slane %v23610_v54, %v23440_v59  ;;  %v23619_v54 = vld [vmem:[#allocation59_spill] sm:$0xff] }
 0x7c2   : > { %v16386_v57 = vrot.slane %v23601_v53, %v23440_v59  ;;  %v7106_v53 = vcombine.low %v6042_v37, %v6046_v23  ;;  %v23612_v37 = vld [vmem:[#allocation2_spill] sm:$0xff]  ;;  %v16429_v39 = vrot.slane %v23614_v2, %v23440_v59 }
 0x7c3   : > { %23605 = vst [vmem:[#allocation50_spill] sm:$0xff] %v16400_v47  ;;  %v16406_v45 = vrot.slane %v23607_v1, %v23440_v59  ;;  %23611 = vst [vmem:[#allocation54_spill] sm:$0xff] %v16416_v63  ;;  %v7123_v23 = vcombine.low %v6058_v62, %v16400_v47  ;;  %v23679_v63 = vld [vmem:[#allocation62_spill] sm:$0xff] }
 0x7c4   : > { %23602 = vst [vmem:[#allocation88_spill] sm:$0xff] %v16386_v57  ;;  %v7122_v57 = vcombine.low %v6050_v56, %v6054_v12  ;;  %v7113_v56 = vrot.slane %v7105_v38, %v23612_v37  ;;  %v7120_v1 = vrot.slane %v7106_v53, %v23612_v37  ;;  %23615 = vst [vmem:[#allocation57_spill] sm:$0xff] %v16429_v39  ;;  %v23616_v38 = vld [vmem:[#allocation58_spill] sm:$0xff] }
 0x7c5   : > { %23608 = vst [vmem:[#allocation34_spill] sm:$0xff] %v16406_v45  ;;  %v23617_v53 = vcombine.high %v23616_v38, %v23616_v38  ;;  %v7137_v47 = vrot.slane %v7123_v23, %v23612_v37  ;;  %v23620_v12 = vcombine.high %v23619_v54, %v23619_v54  ;;  %v23636_v54 = vld [vmem:[#allocation13_spill] sm:$0xff] }
 0x7c6   : > { %v7121_v30 = vcombine.low %v7113_v56, %v7120_v1  ;;  %v7130_v52 = vrot.slane %v7122_v57, %v23612_v37  ;;  %v23623_v1 = vld [vmem:[#allocation60_spill] sm:$0xff]  ;;  %v23680_v56 = vld [vmem:[#allocation65_spill] sm:$0xff] }
 0x7c7   : > { %v16439_v62 = vrot.slane %v23617_v53, %v23440_v59  ;;  %v16451_v39 = vrot.slane %v23620_v12, %v23440_v59  ;;  %v23624_v23 = vcombine.high %v23623_v1, %v23623_v1  ;;  %v23629_v53 = vld [vmem:[#allocation61_spill] sm:$0xff]  ;;  %v23678_v12 = vld [vmem:[#allocation122_spill] sm:$0xff] }
 0x7c8   : > { %v7918_v7 = vrot.slane %v7121_v30, 7  ;;  %v23630_v45 = vcombine.high %v23629_v53, %v23629_v53  ;;  %v23633_v30 = vld [vmem:[#allocation64_spill] sm:$0xff]  ;;  %v23675_v53 = vld [vmem:[#allocation51_spill] sm:$0xff]  ;;  %v23778_v37 = vld [vmem:[#allocation101_spill] sm:$0xff] }
 0x7c9   : > { %23618 = vst [vmem:[#allocation135_spill] sm:$0xff] %v16439_v62  ;;  %23621 = vst [vmem:[#allocation59_spill] sm:$0xff] %v16451_v39  ;;  %v16461_v2 = vrot.slane %v23624_v23, %v23440_v59  ;;  %v16463_v62 = vcombine.low %v7130_v52, %v7137_v47  ;;  %v23634_v52 = vcombine.high %v23633_v30, %v23633_v30  ;;  %v23637_v39 = vrot.slane %v23636_v54, 7  ;;  %v23640_v47 = vld [vmem:[#allocation66_spill] sm:$0xff] }
 0x7ca   : > { %v16473_v57 = vrot.slane %v23630_v45, %v23440_v59  ;;  %v23641_v38 = vcombine.high %v23640_v47, %v23640_v47  ;;  %v23648_v54 = vld [vmem:[#allocation70_spill] sm:$0xff] }
 0x7cb   : > { %23625 = vst [vmem:[#allocation136_spill] sm:$0xff] %v16461_v2  ;;  %23626 = vst [vmem:[#allocation137_spill] sm:$0xff] %v16463_v62  ;;  %v16483_v23 = vrot.slane %v23634_v52, %v23440_v59  ;;  %v16488_v2 = vsel %vm264_vm0, %v23637_v39, %v7918_v7  ;;  %v23643_v52 = vld [vmem:[#allocation69_spill] sm:$0xff]  ;;  %v23649_v39 = vcombine.high %v23648_v54, %v23648_v54 }
 0x7cc   : > { %23631 = vst [vmem:[#allocation61_spill] sm:$0xff] %v16473_v57  ;;  %23638 = vst [vmem:[#allocation13_spill] sm:$0xff] %v16488_v2  ;;  %v16499_v30 = vrot.slane %v23641_v38, %v23440_v59  ;;  %v23644_v45 = vcombine.high %v23643_v52, %v23643_v52  ;;  %v23663_v52 = vld [vmem:[#allocation77_spill] sm:$0xff] }
 0x7cd   : > { %23635 = vst [vmem:[#allocation138_spill] sm:$0xff] %v16483_v23  ;;  %v23646_v23 = vrot.slane %v16463_v62, 7 }
 0x7ce   : > { %23642 = vst [vmem:[#allocation66_spill] sm:$0xff] %v16499_v30  ;;  %v16509_v57 = vrot.slane %v23644_v45, %v23440_v59  ;;  %v16524_v30 = vrot.slane %v23649_v39, %v23440_v59  ;;  %v23655_v45 = vld [vmem:[#allocation15_spill] sm:$0xff]  ;;  %v23686_v39 = vcombine.high %v23454_v42, %v23454_v42 }
 0x7cf   : > { %v16516_v38 = vsel %vm264_vm0, %v7918_v7, %v23646_v23  ;;  %v23652_v23 = vld [vmem:[#allocation71_spill] sm:$0xff] }
 0x7d0   : > { %23645 = vst [vmem:[#allocation139_spill] sm:$0xff] %v16509_v57  ;;  %23647 = vst [vmem:[#allocation140_spill] sm:$0xff] %v16516_v38  ;;  %v16530_v1 = vpack.i.bf16 %v16516_v38, %v16488_v2  ;;  %v23653_v47 = vcombine.high %v23652_v23, %v23652_v23  ;;  %v23656_v38 = vcombine.high %v23655_v45, %v23655_v45 }
 0x7d1   : > { %23650 = vst [vmem:[#allocation70_spill] sm:$0xff] %v16524_v30  ;;  %v16620_v45 = vrot.slane %v23686_v39, %v23440_v59  ;;  %v23692_v39 = vcombine.high %v15530_v41, %v15530_v41 }
 0x7d2   : > { %23651 = vst [vmem:[#allocation141_spill] sm:$0xff] %v16530_v1  ;;  %v16538_v62 = vrot.slane %v23653_v47, %v23440_v59  ;;  %v16548_v2 = vrot.slane %v23656_v38, %v23440_v59  ;;  %11959 = vrot.lane.b32.xlu0 %v16530_v1, %s12983_s19  ;;  %v23662_v38 = vld [vmem:[#allocation32_spill] sm:$0xff]  ;;  %v23669_v1 = vld [vmem:[#allocation41_spill] sm:$0xff] }
 0x7d3   : > { %23687 = vst [vmem:[#allocation38_spill] sm:$0xff] %v16620_v45  ;;  %v16640_v45 = vrot.slane %v23692_v39, %v23440_v59  ;;  %v23698_v39 = vcombine.high %v23465_v20, %v23465_v20 }
 0x7d4   : > { %23654 = vst [vmem:[#allocation142_spill] sm:$0xff] %v16538_v62  ;;  %23657 = vst [vmem:[#allocation15_spill] sm:$0xff] %v16548_v2  ;;  %v16612_v62 = vrot.slane %v23684_v46, %v23440_v59  ;;  %v23688_v2 = vcombine.high %v15516_v21, %v15516_v21  ;;  %v23690_v46 = vcombine.high %v23458_v25, %v23458_v25 }
 0x7d5   : > { %23693 = vst [vmem:[#allocation43_spill] sm:$0xff] %v16640_v45  ;;  %v16662_v42 = vrot.slane %v23698_v39, %v23440_v59  ;;  %v23703_v39 = vcombine.high %v15572_v43, %v15572_v43 }
 0x7d6   : > { %23685 = vst [vmem:[#allocation32_spill] sm:$0xff] %v16612_v62  ;;  %v16626_v7 = vrot.slane %v23688_v2, %v23440_v59  ;;  %v16634_v54 = vrot.slane %v23690_v46, %v23440_v59  ;;  %v23694_v2 = vcombine.high %v23462_v15, %v23462_v15  ;;  %v23696_v46 = vcombine.high %v15544_v16, %v15544_v16  ;;  %v23796_v62 = vld [vmem:[#allocation23_spill] sm:$0xff] }
 0x7d7   : > { %23699 = vst [vmem:[#allocation47_spill] sm:$0xff] %v16662_v42  ;;  %v16682_v42 = vrot.slane %v23703_v39, %v23440_v59  ;;  %v23708_v39 = vcombine.high %v23481_v18, %v23481_v18 }
 0x7d8   : > { %23689 = vst [vmem:[#allocation81_spill] sm:$0xff] %v16626_v7  ;;  %23691 = vst [vmem:[#allocation41_spill] sm:$0xff] %v16634_v54  ;;  %v16648_v58 = vrot.slane %v23694_v2, %v23440_v59  ;;  %v16654_v54 = vrot.slane %v23696_v46, %v23440_v59  ;;  %v23700_v2 = vcombine.high %v15558_v11, %v15558_v11  ;;  %v23737_v7 = vld [vmem:[#allocation20_spill] sm:$0xff] }
 0x7d9   : > { %v23701_v46 = vcombine.high %v23469_v33, %v23469_v33  ;;  %v16704_v20 = vrot.slane %v23708_v39, %v23440_v59  ;;  %v23714_v39 = vcombine.high %v23490_v5, %v23490_v5 }
 0x7da   : > { %23695 = vst [vmem:[#allocation85_spill] sm:$0xff] %v16648_v58  ;;  %23697 = vst [vmem:[#allocation45_spill] sm:$0xff] %v16654_v54  ;;  %v16668_v58 = vrot.slane %v23700_v2, %v23440_v59  ;;  %v23704_v2 = vcombine.high %v23473_v17, %v23473_v17 }
 0x7db   : > { %v16676_v41 = vrot.slane %v23701_v46, %v23440_v59  ;;  %v23706_v46 = vcombine.high %v15600_v0, %v15600_v0  ;;  %23709 = vst [vmem:[#allocation122_spill] sm:$0xff] %v16704_v20  ;;  %v16724_v57 = vrot.slane %v23714_v39, %v23440_v59  ;;  %v23719_v39 = vcombine.high %v23584_v6, %v23584_v6 }
 0x7dc   : > { %v16690_v15 = vrot.slane %v23704_v2, %v23440_v59  ;;  %v23710_v2 = vcombine.high %v23485_v49, %v23485_v49 }
 0x7dd   : > { %23702 = vst [vmem:[#allocation49_spill] sm:$0xff] %v16676_v41  ;;  %v16696_v54 = vrot.slane %v23706_v46, %v23440_v59  ;;  %v23712_v46 = vcombine.high %v23484_v14, %v23484_v14  ;;  %23715 = vst [vmem:[#allocation67_spill] sm:$0xff] %v16724_v57  ;;  %v16746_v41 = vrot.slane %v23719_v39, %v23440_v59  ;;  %v23721_v57 = vld [vmem:[#allocation87_spill] sm:$0xff] }
 0x7de   : > { %23705 = vst [vmem:[#allocation51_spill] sm:$0xff] %v16690_v15  ;;  %v16710_v15 = vrot.slane %v23710_v2, %v23440_v59  ;;  %v23716_v2 = vcombine.high %v23489_v3, %v23489_v3  ;;  %v23727_v39 = vcombine.high %v23726_v44, %v23726_v44 }
 0x7df   : > { %23707 = vst [vmem:[#allocation53_spill] sm:$0xff] %v16696_v54  ;;  %v16718_v23 = vrot.slane %v23712_v46, %v23440_v59  ;;  %v23718_v46 = vcombine.high %v23495_v51, %v23495_v51  ;;  %23720 = vst [vmem:[#allocation124_spill] sm:$0xff] %v16746_v41 }
 0x7e0   : > { %23711 = vst [vmem:[#allocation62_spill] sm:$0xff] %v16710_v15  ;;  %v16732_v45 = vrot.slane %v23716_v2, %v23440_v59  ;;  %v23722_v2 = vcombine.high %v23721_v57, %v23721_v57  ;;  %v16766_v41 = vrot.slane %v23727_v39, %v23440_v59  ;;  %v23731_v15 = vld [vmem:[#allocation19_spill] sm:$0xff]  ;;  %v23734_v39 = vld [vmem:[#allocation89_spill] sm:$0xff] }
 0x7e1   : > { %23713 = vst [vmem:[#allocation65_spill] sm:$0xff] %v16718_v23  ;;  %v16738_v23 = vrot.slane %v23718_v46, %v23440_v59  ;;  %v23724_v46 = vcombine.high %v23589_v8, %v23589_v8  ;;  %v23735_v25 = vcombine.high %v23734_v39, %v23734_v39 }
 0x7e2   : > { %23717 = vst [vmem:[#allocation123_spill] sm:$0xff] %v16732_v45  ;;  %v16752_v45 = vrot.slane %v23722_v2, %v23440_v59  ;;  %23728 = vst [vmem:[#allocation18_spill] sm:$0xff] %v16766_v41  ;;  %v23729_v2 = vcombine.high %v23593_v9, %v23593_v9 }
 0x7e3   : > { %v16760_v5 = vrot.slane %v23724_v46, %v23440_v59  ;;  %v23732_v46 = vcombine.high %v23731_v15, %v23731_v15  ;;  %v16788_v14 = vrot.slane %v23735_v25, %v23440_v59  ;;  %v23743_v25 = vcombine.high %v15712_v26, %v15712_v26 }
 0x7e4   : > { %23723 = vst [vmem:[#allocation87_spill] sm:$0xff] %v16752_v45  ;;  %v16774_v3 = vrot.slane %v23729_v2, %v23440_v59  ;;  %v23738_v2 = vcombine.high %v23737_v7, %v23737_v7 }
 0x7e5   : > { %23725 = vst [vmem:[#allocation143_spill] sm:$0xff] %v16760_v5  ;;  %v16780_v5 = vrot.slane %v23732_v46, %v23440_v59  ;;  %23736 = vst [vmem:[#allocation145_spill] sm:$0xff] %v16788_v14  ;;  %v23740_v46 = vld [vmem:[#allocation90_spill] sm:$0xff]  ;;  %v16808_v14 = vrot.slane %v23743_v25, %v23440_v59  ;;  %v23749_v25 = vcombine.high %v23521_v10, %v23521_v10  ;;  %v23760_v10 = vld [vmem:[#allocation95_spill] sm:$0xff] }
 0x7e6   : > { %23730 = vst [vmem:[#allocation144_spill] sm:$0xff] %v16774_v3  ;;  %v16794_v3 = vrot.slane %v23738_v2, %v23440_v59  ;;  %v23741_v20 = vcombine.high %v23740_v46, %v23740_v46  ;;  %v23745_v2 = vcombine.high %v23518_v24, %v23518_v24  ;;  %v23772_v24 = vld [vmem:[#allocation99_spill] sm:$0xff]  ;;  %v23790_v46 = vld [vmem:[#allocation22_spill] sm:$0xff] }
 0x7e7   : > { %23733 = vst [vmem:[#allocation19_spill] sm:$0xff] %v16780_v5  ;;  %23744 = vst [vmem:[#allocation147_spill] sm:$0xff] %v16808_v14  ;;  %v16830_v0 = vrot.slane %v23749_v25, %v23440_v59  ;;  %v23755_v25 = vcombine.high %v15754_v50, %v15754_v50  ;;  %v23784_v14 = vld [vmem:[#allocation103_spill] sm:$0xff] }
 0x7e8   : > { %23739 = vst [vmem:[#allocation20_spill] sm:$0xff] %v16794_v3  ;;  %v16802_v28 = vrot.slane %v23741_v20, %v23440_v59  ;;  %v16816_v30 = vrot.slane %v23745_v2, %v23440_v59  ;;  %v23747_v20 = vcombine.high %v15726_v19, %v15726_v19  ;;  %v23751_v2 = vcombine.high %v15740_v48, %v15740_v48  ;;  %v23809_v3 = vld [vmem:[#allocation108_spill] sm:$0xff] }
 0x7e9   : > { %23750 = vst [vmem:[#allocation150_spill] sm:$0xff] %v16830_v0  ;;  %v16850_v0 = vrot.slane %v23755_v25, %v23440_v59  ;;  %v23763_v25 = vld [vmem:[#allocation94_spill] sm:$0xff] }
 0x7ea   : > { %23742 = vst [vmem:[#allocation146_spill] sm:$0xff] %v16802_v28  ;;  %23746 = vst [vmem:[#allocation148_spill] sm:$0xff] %v16816_v30  ;;  %v16822_v28 = vrot.slane %v23747_v20, %v23440_v59  ;;  %v16836_v30 = vrot.slane %v23751_v2, %v23440_v59  ;;  %v23753_v20 = vcombine.high %v23524_v31, %v23524_v31  ;;  %v23757_v2 = vld [vmem:[#allocation93_spill] sm:$0xff] }
 0x7eb   : > { %23756 = vst [vmem:[#allocation153_spill] sm:$0xff] %v16850_v0  ;;  %v23764_v0 = vcombine.high %v23763_v25, %v23763_v25 }
 0x7ec   : > { %23748 = vst [vmem:[#allocation149_spill] sm:$0xff] %v16822_v28  ;;  %23752 = vst [vmem:[#allocation151_spill] sm:$0xff] %v16836_v30  ;;  %v16844_v18 = vrot.slane %v23753_v20, %v23440_v59  ;;  %v23758_v30 = vcombine.high %v23757_v2, %v23757_v2  ;;  %v23761_v20 = vcombine.high %v23760_v10, %v23760_v10  ;;  %v23766_v28 = vld [vmem:[#allocation97_spill] sm:$0xff] }
 0x7ed   : > { %v16872_v35 = vrot.slane %v23764_v0, %v23440_v59  ;;  %v23773_v0 = vcombine.high %v23772_v24, %v23772_v24 }
 0x7ee   : > { %23754 = vst [vmem:[#allocation152_spill] sm:$0xff] %v16844_v18  ;;  %v16858_v54 = vrot.slane %v23758_v30, %v23440_v59  ;;  %v16864_v18 = vrot.slane %v23761_v20, %v23440_v59  ;;  %v23767_v30 = vcombine.high %v23766_v28, %v23766_v28  ;;  %v23769_v20 = vld [vmem:[#allocation96_spill] sm:$0xff] }
 0x7ef   : > { %23765 = vst [vmem:[#allocation155_spill] sm:$0xff] %v16872_v35  ;;  %v16892_v35 = vrot.slane %v23773_v0, %v23440_v59  ;;  %v23781_v0 = vld [vmem:[#allocation100_spill] sm:$0xff] }
 0x7f0   : > { %23759 = vst [vmem:[#allocation154_spill] sm:$0xff] %v16858_v54  ;;  %23762 = vst [vmem:[#allocation95_spill] sm:$0xff] %v16864_v18  ;;  %v16878_v54 = vrot.slane %v23767_v30, %v23440_v59  ;;  %v23770_v18 = vcombine.high %v23769_v20, %v23769_v20  ;;  %v23775_v30 = vld [vmem:[#allocation98_spill] sm:$0xff] }
 0x7f1   : > { %23774 = vst [vmem:[#allocation99_spill] sm:$0xff] %v16892_v35  ;;  %v23782_v35 = vcombine.high %v23781_v0, %v23781_v0  ;;  %v23800_v0 = vld [vmem:[#allocation14_spill] sm:$0xff] }
 0x7f2   : > { %23768 = vst [vmem:[#allocation97_spill] sm:$0xff] %v16878_v54  ;;  %v16886_v31 = vrot.slane %v23770_v18, %v23440_v59  ;;  %v23776_v54 = vcombine.high %v23775_v30, %v23775_v30  ;;  %v23779_v18 = vcombine.high %v23778_v37, %v23778_v37 }
 0x7f3   : > { %v16914_v25 = vrot.slane %v23782_v35, %v23440_v59  ;;  %v23791_v35 = vcombine.high %v23790_v46, %v23790_v46 }
 0x7f4   : > { %23771 = vst [vmem:[#allocation156_spill] sm:$0xff] %v16886_v31  ;;  %v16900_v2 = vrot.slane %v23776_v54, %v23440_v59  ;;  %v16906_v31 = vrot.slane %v23779_v18, %v23440_v59  ;;  %v23785_v54 = vcombine.high %v23784_v14, %v23784_v14  ;;  %v23787_v18 = vld [vmem:[#allocation102_spill] sm:$0xff] }
 0x7f5   : > { %23783 = vst [vmem:[#allocation158_spill] sm:$0xff] %v16914_v25  ;;  %v16934_v25 = vrot.slane %v23791_v35, %v23440_v59  ;;  %v23799_v35 = vld [vmem:[#allocation141_spill] sm:$0xff] }
 0x7f6   : > { %23777 = vst [vmem:[#allocation157_spill] sm:$0xff] %v16900_v2  ;;  %23780 = vst [vmem:[#allocation101_spill] sm:$0xff] %v16906_v31  ;;  %v16920_v2 = vrot.slane %v23785_v54, %v23440_v59  ;;  %v23788_v31 = vcombine.high %v23787_v18, %v23787_v18  ;;  %v23793_v54 = vld [vmem:[#allocation104_spill] sm:$0xff]  ;;  %11964 = vrot.lane.b32.xlu1 %v23799_v35, %s12986_s11  ;;  %v23806_v18 = vld [vmem:[#allocation105_spill] sm:$0xff] }
 0x7f7   : > { %23792 = vst [vmem:[#allocation22_spill] sm:$0xff] %v16934_v25  ;;  %v23801_v25 = vcombine.high %v23800_v0, %v23800_v0 }
 0x7f8   : > { %23786 = vst [vmem:[#allocation103_spill] sm:$0xff] %v16920_v2  ;;  %v16928_v20 = vrot.slane %v23788_v31, %v23440_v59  ;;  %v23794_v2 = vcombine.high %v23793_v54, %v23793_v54  ;;  %v23797_v31 = vcombine.high %v23796_v62, %v23796_v62 }
 0x7f9   : > { %v16958_v47 = vrot.slane %v23801_v25, %v23440_v59  ;;  %v23810_v25 = vcombine.high %v23809_v3, %v23809_v3 }
 0x7fa   : > { %23789 = vst [vmem:[#allocation159_spill] sm:$0xff] %v16928_v20  ;;  %v16942_v30 = vrot.slane %v23794_v2, %v23440_v59  ;;  %v16948_v20 = vrot.slane %v23797_v31, %v23440_v59  ;;  %v23803_v2 = vld [vmem:[#allocation106_spill] sm:$0xff] }
 0x7fb   : > { %23802 = vst [vmem:[#allocation141_spill] sm:$0xff] %v16958_v47  ;;  %v16978_v47 = vrot.slane %v23810_v25, %v23440_v59  ;;  %v23818_v25 = vrot.slane %v15544_v16, %v23440_v59  ;;  %v23828_v16 = vrot.slane %v23485_v49, %v23440_v59  ;;  %v23837_v49 = vrot.slane %v23726_v44, %v23440_v59 }
 0x7fc   : > { %23795 = vst [vmem:[#allocation160_spill] sm:$0xff] %v16942_v30  ;;  %23798 = vst [vmem:[#allocation23_spill] sm:$0xff] %v16948_v20  ;;  %v23804_v30 = vcombine.high %v23803_v2, %v23803_v2  ;;  %v23807_v20 = vcombine.high %v23806_v18, %v23806_v18  ;;  %v23815_v18 = vrot.slane %v15516_v21, %v23440_v59 }
 0x7fd   : > { %23811 = vst [vmem:[#allocation108_spill] sm:$0xff] %v16978_v47  ;;  %v23819_v47 = vld [vmem:[#allocation31_spill] sm:$0xff]  ;;  %v23825_v21 = vrot.slane %v15572_v43, %v23440_v59  ;;  %v23847_v44 = vrot.slane %v15712_v26, %v23440_v59  ;;  %v23857_v26 = vrot.slane %v15754_v50, %v23440_v59  ;;  %v23866_v50 = vrot.slane %v23772_v24, %v23440_v59 }
 0x7fe   : > { %v16964_v54 = vrot.slane %v23804_v30, %v23440_v59  ;;  %v16972_v35 = vrot.slane %v23807_v20, %v23440_v59  ;;  %v23812_v30 = vld [vmem:[#allocation107_spill] sm:$0xff]  ;;  %v23816_v20 = vld [vmem:[#allocation28_spill] sm:$0xff]  ;;  %v23820_v0 = vrot.slane %v23819_v47, %v23440_v59  ;;  %v23876_v24 = vrot.slane %v23790_v46, %v23440_v59 }
 0x7ff   : > { %v23829_v47 = vld [vmem:[#allocation40_spill] sm:$0xff]  ;;  %v23887_v46 = vrot.slane %v23809_v3, %v23440_v59 }
 0x800   : > { %23805 = vst [vmem:[#allocation106_spill] sm:$0xff] %v16964_v54  ;;  %23808 = vst [vmem:[#allocation161_spill] sm:$0xff] %v16972_v35  ;;  %v23813_v54 = vcombine.high %v23812_v30, %v23812_v30  ;;  %v23817_v35 = vrot.slane %v23816_v20, %v23440_v59  ;;  %v17002_v5 = vcombine.low %v23820_v0, %v23818_v25  ;;  %v23826_v20 = vld [vmem:[#allocation35_spill] sm:$0xff] }
 0x801   : > { %v23830_v0 = vrot.slane %v23829_v47, %v23440_v59  ;;  %v23838_v47 = vld [vmem:[#allocation48_spill] sm:$0xff] }
 0x802   : > { %v16986_v31 = vrot.slane %v23813_v54, %v23440_v59  ;;  %v16994_v39 = vcombine.low %v23817_v35, %v23815_v18  ;;  %23821 = vst [vmem:[#allocation28_spill] sm:$0xff] %v17002_v5  ;;  %v23822_v54 = vrot.slane %v15558_v11, %v23440_v59  ;;  %v23827_v18 = vrot.slane %v23826_v20, %v23440_v59  ;;  %v23835_v20 = vld [vmem:[#allocation110_spill] sm:$0xff] }
 0x803   : > { %v17024_v25 = vcombine.low %v23830_v0, %v23828_v16  ;;  %v23831_v11 = vrot.slane %v23495_v51, %v23440_v59  ;;  %v23839_v16 = vrot.slane %v23838_v47, %v23440_v59  ;;  %v23841_v51 = vrot.slane %v23731_v15, %v23440_v59  ;;  %v23848_v47 = vld [vmem:[#allocation112_spill] sm:$0xff] }
 0x804   : > { %23814 = vst [vmem:[#allocation162_spill] sm:$0xff] %v16986_v31  ;;  %v23823_v31 = vld [vmem:[#allocation109_spill] sm:$0xff]  ;;  %v17016_v35 = vcombine.low %v23827_v18, %v23825_v21  ;;  %v23834_v21 = vrot.slane %v23721_v57, %v23440_v59  ;;  %v23844_v57 = vrot.slane %v23737_v7, %v23440_v59  ;;  %v23850_v15 = vrot.slane %v15726_v19, %v23440_v59 }
 0x805   : > { %v17008_v30 = vcombine.low %v23823_v31, %v23822_v54  ;;  %v23832_v54 = vld [vmem:[#allocation44_spill] sm:$0xff]  ;;  %v17046_v0 = vcombine.low %v23839_v16, %v23837_v49  ;;  %v17066_v49 = vcombine.low %v23848_v47, %v23847_v44  ;;  %v23851_v16 = vld [vmem:[#allocation55_spill] sm:$0xff]  ;;  %v23854_v7 = vrot.slane %v15740_v48, %v23440_v59 }
 0x806   : > { %v23833_v31 = vrot.slane %v23832_v54, %v23440_v59  ;;  %v17038_v18 = vcombine.low %v23835_v20, %v23834_v21  ;;  %v23842_v54 = vld [vmem:[#allocation111_spill] sm:$0xff]  ;;  %v23861_v19 = vrot.slane %v23760_v10, %v23440_v59  ;;  %v23863_v48 = vrot.slane %v23766_v28, %v23440_v59 }
 0x807   : > { %23824 = vst [vmem:[#allocation31_spill] sm:$0xff] %v17008_v30  ;;  %23840 = vst [vmem:[#allocation40_spill] sm:$0xff] %v17046_v0  ;;  %v23869_v10 = vrot.slane %v23778_v37, %v23440_v59  ;;  %v23873_v28 = vrot.slane %v23784_v14, %v23440_v59  ;;  %v23880_v37 = vrot.slane %v23796_v62, %v23440_v59  ;;  %v23950_v0 = vld [vmem:[#allocation88_spill] sm:$0xff] }
 0x808   : > { %v17032_v43 = vcombine.low %v23833_v31, %v23831_v11  ;;  %23836 = vst [vmem:[#allocation35_spill] sm:$0xff] %v17038_v18  ;;  %v17052_v31 = vcombine.low %v23842_v54, %v23841_v51  ;;  %v23845_v11 = vld [vmem:[#allocation52_spill] sm:$0xff]  ;;  %23849 = vst [vmem:[#allocation48_spill] sm:$0xff] %v17066_v49  ;;  %v23852_v51 = vrot.slane %v23851_v16, %v23440_v59  ;;  %v23862_v16 = vld [vmem:[#allocation114_spill] sm:$0xff] }
 0x809   : > { %v23846_v21 = vrot.slane %v23845_v11, %v23440_v59  ;;  %v23855_v11 = vld [vmem:[#allocation113_spill] sm:$0xff]  ;;  %v23883_v14 = vrot.slane %v23803_v2, %v23440_v59  ;;  %v23890_v62 = vcombine.high %v23662_v38, %v23662_v38  ;;  %v23891_v2 = vcombine.high %v23667_v22, %v23667_v22  ;;  %v23952_v18 = vld [vmem:[#allocation26_spill] sm:$0xff] }
 0x80a   : > { %23843 = vst [vmem:[#allocation44_spill] sm:$0xff] %v17052_v31  ;;  %v17074_v54 = vcombine.low %v23852_v51, %v23850_v15  ;;  %v17094_v15 = vcombine.low %v23862_v16, %v23861_v19  ;;  %v23864_v51 = vld [vmem:[#allocation60_spill] sm:$0xff] }
 0x80b   : > { %v17060_v20 = vcombine.low %v23846_v21, %v23844_v57  ;;  %v17080_v57 = vcombine.low %v23855_v11, %v23854_v7  ;;  %v23858_v21 = vld [vmem:[#allocation58_spill] sm:$0xff]  ;;  %v23865_v7 = vrot.slane %v23864_v51, %v23440_v59  ;;  %v23874_v51 = vld [vmem:[#allocation116_spill] sm:$0xff] }
 0x80c   : > { %23853 = vst [vmem:[#allocation52_spill] sm:$0xff] %v17074_v54  ;;  %v23859_v44 = vrot.slane %v23858_v21, %v23440_v59  ;;  %v23867_v21 = vld [vmem:[#allocation115_spill] sm:$0xff] }
 0x80d   : > { %23856 = vst [vmem:[#allocation55_spill] sm:$0xff] %v17080_v57  ;;  %v17102_v11 = vcombine.low %v23865_v7, %v23863_v48  ;;  %v17122_v48 = vcombine.low %v23874_v51, %v23873_v28  ;;  %v23877_v7 = vld [vmem:[#allocation69_spill] sm:$0xff] }
 0x80e   : > { %v17088_v47 = vcombine.low %v23859_v44, %v23857_v26  ;;  %v17108_v26 = vcombine.low %v23867_v21, %v23866_v50  ;;  %v23870_v44 = vld [vmem:[#allocation64_spill] sm:$0xff]  ;;  %v23878_v50 = vrot.slane %v23877_v7, %v23440_v59  ;;  %v23888_v7 = vld [vmem:[#allocation118_spill] sm:$0xff]  ;;  %v23987_v57 = vld [vmem:[#allocation93_spill] sm:$0xff] }
 0x80f   : > { %v23871_v19 = vrot.slane %v23870_v44, %v23440_v59  ;;  %23875 = vst [vmem:[#allocation163_spill] sm:$0xff] %v17122_v48  ;;  %v23881_v44 = vld [vmem:[#allocation117_spill] sm:$0xff] }
 0x810   : > { %23860 = vst [vmem:[#allocation58_spill] sm:$0xff] %v17088_v47  ;;  %23868 = vst [vmem:[#allocation60_spill] sm:$0xff] %v17108_v26  ;;  %v17130_v21 = vcombine.low %v23878_v50, %v23876_v24  ;;  %v17150_v24 = vcombine.low %v23888_v7, %v23887_v46  ;;  %v17156_v50 = vrot.slane %v23890_v62, %v23440_v59 }
 0x811   : > { %v17116_v16 = vcombine.low %v23871_v19, %v23869_v10  ;;  %v17136_v10 = vcombine.low %v23881_v44, %v23880_v37  ;;  %v23884_v19 = vld [vmem:[#allocation71_spill] sm:$0xff]  ;;  %v17162_v37 = vrot.slane %v23891_v2, %v23440_v59  ;;  %v23897_v46 = vcombine.high %v23670_v61, %v23670_v61 }
 0x812   : > { %23879 = vst [vmem:[#allocation69_spill] sm:$0xff] %v17130_v21  ;;  %v23885_v28 = vrot.slane %v23884_v19, %v23440_v59  ;;  %23889 = vst [vmem:[#allocation165_spill] sm:$0xff] %v17150_v24  ;;  %v23895_v19 = vcombine.high %v23669_v1, %v23669_v1  ;;  %v23899_v2 = vcombine.high %v23671_v60, %v23671_v60 }
 0x813   : > { %23872 = vst [vmem:[#allocation64_spill] sm:$0xff] %v17116_v16  ;;  %23882 = vst [vmem:[#allocation164_spill] sm:$0xff] %v17136_v10  ;;  %v17180_v62 = vrot.slane %v23897_v46, %v23440_v59  ;;  %v23905_v46 = vcombine.high %v23674_v40, %v23674_v40 }
 0x814   : > { %v17144_v51 = vcombine.low %v23885_v28, %v23883_v14  ;;  %23892 = vst [vmem:[#allocation166_spill] sm:$0xff] %v17162_v37  ;;  %v23893_v14 = vcombine.high %v23668_v55, %v23668_v55  ;;  %v17174_v28 = vrot.slane %v23895_v19, %v23440_v59  ;;  %v17186_v7 = vrot.slane %v23899_v2, %v23440_v59 }
 0x815   : > { %23898 = vst [vmem:[#allocation169_spill] sm:$0xff] %v17180_v62  ;;  %v23903_v19 = vcombine.high %v23673_v32, %v23673_v32  ;;  %v17204_v62 = vrot.slane %v23905_v46, %v23440_v59  ;;  %v23907_v2 = vcombine.high %v23675_v53, %v23675_v53  ;;  %v23913_v46 = vcombine.high %v23679_v63, %v23679_v63 }
 0x816   : > { %23886 = vst [vmem:[#allocation71_spill] sm:$0xff] %v17144_v51  ;;  %v17168_v3 = vrot.slane %v23893_v14, %v23440_v59  ;;  %23896 = vst [vmem:[#allocation168_spill] sm:$0xff] %v17174_v28  ;;  %v23901_v14 = vcombine.high %v23672_v4, %v23672_v4  ;;  %v23926_v28 = vld [vmem:[#allocation2_spill] sm:$0xff]  ;;  %v24088_v51 = vld [vmem:[#allocation85_spill] sm:$0xff] }
 0x817   : > { %23900 = vst [vmem:[#allocation170_spill] sm:$0xff] %v17186_v7  ;;  %v17198_v5 = vrot.slane %v23903_v19, %v23440_v59  ;;  %23906 = vst [vmem:[#allocation173_spill] sm:$0xff] %v17204_v62  ;;  %v17210_v7 = vrot.slane %v23907_v2, %v23440_v59  ;;  %v23911_v19 = vcombine.high %v23678_v12, %v23678_v12 }
 0x818   : > { %23894 = vst [vmem:[#allocation167_spill] sm:$0xff] %v17168_v3  ;;  %v17192_v44 = vrot.slane %v23901_v14, %v23440_v59  ;;  %v23909_v14 = vcombine.high %v23676_v34, %v23676_v34  ;;  %v17228_v62 = vrot.slane %v23913_v46, %v23440_v59  ;;  %v23915_v2 = vcombine.high %v23680_v56, %v23680_v56 }
 0x819   : > { %23904 = vst [vmem:[#allocation172_spill] sm:$0xff] %v17198_v5  ;;  %23908 = vst [vmem:[#allocation174_spill] sm:$0xff] %v17210_v7  ;;  %v17222_v5 = vrot.slane %v23911_v19, %v23440_v59  ;;  %v23919_v19 = vcombine.high %v23682_v29, %v23682_v29  ;;  %v23921_v46 = vcombine.high %v23683_v13, %v23683_v13 }
 0x81a   : > { %23902 = vst [vmem:[#allocation171_spill] sm:$0xff] %v17192_v44  ;;  %v17216_v44 = vrot.slane %v23909_v14, %v23440_v59  ;;  %23914 = vst [vmem:[#allocation177_spill] sm:$0xff] %v17228_v62  ;;  %v17234_v7 = vrot.slane %v23915_v2, %v23440_v59  ;;  %v23917_v14 = vcombine.high %v23681_v27, %v23681_v27 }
 0x81b   : > { %23912 = vst [vmem:[#allocation176_spill] sm:$0xff] %v17222_v5  ;;  %v17246_v5 = vrot.slane %v23919_v19, %v23440_v59  ;;  %v17252_v62 = vrot.slane %v23921_v46, %v23440_v59  ;;  %v23923_v2 = vcombine.high %v16228_v36, %v16228_v36  ;;  %v23927_v19 = vrot.slane %v23662_v38, %v23440_v59  ;;  %v23932_v38 = vld [vmem:[#allocation134_spill] sm:$0xff] }
 0x81c   : > { %23910 = vst [vmem:[#allocation175_spill] sm:$0xff] %v17216_v44  ;;  %23916 = vst [vmem:[#allocation178_spill] sm:$0xff] %v17234_v7  ;;  %v17240_v44 = vrot.slane %v23917_v14, %v23440_v59  ;;  %v23925_v14 = vld [vmem:[#allocation129_spill] sm:$0xff]  ;;  %v23931_v3 = vrot.slane %v23473_v17, %v23440_v59 }
 0x81d   : > { %23920 = vst [vmem:[#allocation180_spill] sm:$0xff] %v17246_v5  ;;  %23922 = vst [vmem:[#allocation181_spill] sm:$0xff] %v17252_v62  ;;  %v17258_v7 = vrot.slane %v23923_v2, %v23440_v59  ;;  %v23928_v5 = vrot.slane %v23469_v33, %v23440_v59  ;;  %v23929_v62 = vld [vmem:[#allocation130_spill] sm:$0xff] }
 0x81e   : > { %23918 = vst [vmem:[#allocation179_spill] sm:$0xff] %v17240_v44  ;;  %v23930_v44 = vrot.slane %v23663_v52, %v23440_v59 }
 0x81f   : > { %23924 = vst [vmem:[#allocation182_spill] sm:$0xff] %v17258_v7  ;;  %v17270_v46 = vcombine.low %v23928_v5, %v23927_v19  ;;  %v23933_v5 = vrot.slane %v23667_v22, %v23440_v59  ;;  %v23934_v19 = vrot.slane %v23584_v6, %v23440_v59  ;;  %v23973_v22 = vld [vmem:[#allocation38_spill] sm:$0xff] }
 0x820   : > { %v17282_v7 = vcombine.low %v23931_v3, %v23930_v44  ;;  %v23936_v44 = vrot.slane %v23668_v55, %v23440_v59  ;;  %v23937_v3 = vrot.slane %v23589_v8, %v23440_v59  ;;  %v23953_v8 = vcombine.high %v23952_v18, %v23952_v18  ;;  %v23955_v55 = vld [vmem:[#allocation125_spill] sm:$0xff] }
 0x821   : > { %v17294_v2 = vcombine.low %v23934_v19, %v23933_v5  ;;  %v23940_v5 = vrot.slane %v23669_v1, %v23440_v59  ;;  %v23941_v19 = vrot.slane %v23593_v9, %v23440_v59  ;;  %v23949_v1 = vld [vmem:[#allocation20_spill] sm:$0xff]  ;;  %v23951_v9 = vld [vmem:[#allocation27_spill] sm:$0xff] }
 0x822   : > { %v17306_v33 = vcombine.low %v23937_v3, %v23936_v44  ;;  %v23945_v44 = vrot.slane %v23670_v61, %v23440_v59  ;;  %v23946_v3 = vld [vmem:[#allocation89_spill] sm:$0xff]  ;;  %v5838_v31 = vrot.slane %v23953_v8, %v23440_v59  ;;  %v23954_v61 = vld [vmem:[#allocation32_spill] sm:$0xff] }
 0x823   : > { %v17318_v17 = vcombine.low %v23941_v19, %v23940_v5  ;;  %v23947_v6 = vrot.slane %v23946_v3, %v23440_v59  ;;  %v5810_v5 = vrot.slane %v23951_v9, %v23440_v59  ;;  %v6868_v52 = vcombine.low %v23955_v55, %v23954_v61  ;;  %v23965_v61 = vld [vmem:[#allocation72_spill] sm:$0xff] }
 0x824   : > { %23938 = vst [vmem:[#allocation129_spill] sm:$0xff] %v17306_v33  ;;  %v23959_v9 = vrot.slane %v23671_v60, %v23440_v59  ;;  %v6885_v8 = vcombine.low %v23973_v22, %v5838_v31  ;;  %v23980_v31 = vrot.slane %v23674_v40, %v23440_v59  ;;  %v23981_v22 = vld [vmem:[#allocation92_spill] sm:$0xff]  ;;  %v23988_v40 = vrot.slane %v23987_v57, %v23440_v59  ;;  %v23995_v57 = vld [vmem:[#allocation97_spill] sm:$0xff]  ;;  %v24108_v33 = vld [vmem:[#allocation123_spill] sm:$0xff] }
 0x825   : > { %23942 = vst [vmem:[#allocation130_spill] sm:$0xff] %v17318_v17  ;;  %v17330_v30 = vcombine.low %v23947_v6, %v23945_v44  ;;  %v23956_v6 = vrot.slane %v23952_v18, %v23440_v59  ;;  %v23957_v44 = vld [vmem:[#allocation25_spill] sm:$0xff]  ;;  %v23966_v18 = vrot.slane %v23965_v61, %v23440_v59  ;;  %v6882_v45 = vrot.slane %v6868_v52, %v23926_v28 }
 0x826   : > { %v23958_v3 = vrot.slane %v23957_v44, %v23440_v59  ;;  %v23968_v44 = vld [vmem:[#allocation91_spill] sm:$0xff]  ;;  %v23974_v61 = vrot.slane %v23673_v32, %v23440_v59  ;;  %v23982_v55 = vrot.slane %v23981_v22, %v23440_v59  ;;  %v23986_v52 = vrot.slane %v23675_v53, %v23440_v59 }
 0x827   : > { %23948 = vst [vmem:[#allocation134_spill] sm:$0xff] %v17330_v30  ;;  %v23960_v30 = vld [vmem:[#allocation90_spill] sm:$0xff]  ;;  %v6867_v37 = vcombine.low %v5810_v5, %v23966_v18  ;;  %v23969_v60 = vrot.slane %v23968_v44, %v23440_v59  ;;  %v23975_v18 = vld [vmem:[#allocation21_spill] sm:$0xff]  ;;  %v23991_v22 = vld [vmem:[#allocation59_spill] sm:$0xff] }
 0x828   : > { %v6884_v41 = vcombine.low %v23958_v3, %v23956_v6  ;;  %v23961_v19 = vrot.slane %v23960_v30, %v23440_v59  ;;  %v23967_v6 = vrot.slane %v23672_v4, %v23440_v59  ;;  %v23976_v4 = vrot.slane %v23975_v18, %v23440_v59  ;;  %v23993_v44 = vld [vmem:[#allocation94_spill] sm:$0xff]  ;;  %v24017_v30 = vld [vmem:[#allocation33_spill] sm:$0xff] }
 0x829   : > { %v17398_v32 = vcombine.low %v23982_v55, %v23980_v31  ;;  %v23990_v31 = vld [vmem:[#allocation95_spill] sm:$0xff] }
 0x82a   : > { %v17356_v17 = vcombine.low %v23961_v19, %v23959_v9  ;;  %v17371_v3 = vcombine.low %v23969_v60, %v23967_v6  ;;  %v17385_v49 = vcombine.low %v23976_v4, %v23974_v61  ;;  %v6875_v9 = vrot.slane %v6867_v37, %v23926_v28 }
 0x82b   : > { %23983 = vst [vmem:[#allocation27_spill] sm:$0xff] %v17398_v32  ;;  %v6892_v18 = vrot.slane %v6884_v41, %v23926_v28  ;;  %v6899_v61 = vrot.slane %v6885_v8, %v23926_v28  ;;  %v17412_v6 = vcombine.low %v23988_v40, %v23986_v52  ;;  %v23992_v60 = vrot.slane %v23676_v34, %v23440_v59  ;;  %v23996_v52 = vld [vmem:[#allocation136_spill] sm:$0xff]  ;;  %v24005_v40 = vld [vmem:[#allocation98_spill] sm:$0xff] }
 0x82c   : > { %23962 = vst [vmem:[#allocation89_spill] sm:$0xff] %v17356_v17  ;;  %23970 = vst [vmem:[#allocation20_spill] sm:$0xff] %v17371_v3  ;;  %v6883_v55 = vcombine.low %v6875_v9, %v6882_v45  ;;  %v23994_v37 = vrot.slane %v23993_v44, %v23440_v59  ;;  %v23997_v9 = vld [vmem:[#allocation121_spill] sm:$0xff]  ;;  %v23999_v8 = vld [vmem:[#allocation96_spill] sm:$0xff]  ;;  %v24006_v45 = vrot.slane %v24005_v40, %v23440_v59 }
 0x82d   : > { %23977 = vst [vmem:[#allocation88_spill] sm:$0xff] %v17385_v49  ;;  %23989 = vst [vmem:[#allocation26_spill] sm:$0xff] %v17412_v6  ;;  %v17426_v53 = vcombine.low %v6892_v18, %v6899_v61  ;;  %v23998_v41 = vrot.slane %v23997_v9, %v23440_v59  ;;  %v24000_v6 = vrot.slane %v23999_v8, %v23440_v59  ;;  %v24011_v18 = vld [vmem:[#allocation100_spill] sm:$0xff]  ;;  %v24025_v3 = vld [vmem:[#allocation102_spill] sm:$0xff] }
 0x82e   : > { %v17424_v47 = vcombine.low %v23994_v37, %v23992_v60  ;;  %v7894_v4 = vrot.slane %v6883_v55, 7  ;;  %v24004_v61 = vrot.slane %v23678_v12, %v23440_v59  ;;  %v24010_v37 = vrot.slane %v23679_v63, %v23440_v59  ;;  %v24030_v60 = vld [vmem:[#allocation79_spill] sm:$0xff]  ;;  %v24102_v17 = vld [vmem:[#allocation82_spill] sm:$0xff] }
 0x82f   : > { %v17438_v34 = vcombine.low %v24000_v6, %v23998_v41  ;;  %v7895_v9 = vrot.slane %v17426_v53, 7  ;;  %v24012_v32 = vrot.slane %v24011_v18, %v23440_v59  ;;  %v24016_v41 = vld [vmem:[#allocation39_spill] sm:$0xff]  ;;  %v24018_v63 = vcombine.high %v24017_v30, %v24017_v30  ;;  %v24019_v18 = vld [vmem:[#allocation53_spill] sm:$0xff]  ;;  %v24124_v6 = vld [vmem:[#allocation128_spill] sm:$0xff] }
 0x830   : > { %v17450_v49 = vcombine.low %v24006_v45, %v24004_v61  ;;  %v17471_v53 = vsel %vm264_vm0, %v5810_v5, %v7894_v4  ;;  %v6066_v55 = vrot.slane %v24016_v41, %v23440_v59  ;;  %v24020_v45 = vld [vmem:[#allocation131_spill] sm:$0xff]  ;;  %v24021_v5 = vrot.slane %v24017_v30, %v23440_v59  ;;  %v24032_v30 = vld [vmem:[#allocation122_spill] sm:$0xff] }
 0x831   : > { %24001 = vst [vmem:[#allocation32_spill] sm:$0xff] %v17438_v34  ;;  %v17463_v12 = vcombine.low %v24012_v32, %v24010_v37  ;;  %v17468_v61 = vsel %vm264_vm0, %v7894_v4, %v7895_v9  ;;  %v6094_v19 = vrot.slane %v24018_v63, %v23440_v59  ;;  %v7140_v54 = vcombine.low %v24020_v45, %v24019_v18  ;;  %v24022_v4 = vld [vmem:[#allocation37_spill] sm:$0xff]  ;;  %v24105_v8 = vld [vmem:[#allocation143_spill] sm:$0xff] }
 0x832   : > { %24007 = vst [vmem:[#allocation125_spill] sm:$0xff] %v17450_v49  ;;  %v17483_v37 = vpack.i.bf16 %v17468_v61, %v17471_v53  ;;  %v24023_v41 = vrot.slane %v24022_v4, %v23440_v59  ;;  %v24024_v63 = vrot.slane %v23680_v56, %v23440_v59  ;;  %v24026_v32 = vrot.slane %v24025_v3, %v23440_v59  ;;  %v24034_v4 = vld [vmem:[#allocation104_spill] sm:$0xff]  ;;  %v24205_v34 = vld [vmem:[#allocation77_spill] sm:$0xff] }
 0x833   : > { %24013 = vst [vmem:[#allocation25_spill] sm:$0xff] %v17463_v12  ;;  %v24031_v45 = vrot.slane %v24030_v60, %v23440_v59  ;;  %v7157_v16 = vcombine.low %v24032_v30, %v6094_v19  ;;  %v24033_v56 = vrot.slane %v23681_v27, %v23440_v59  ;;  %v24035_v3 = vrot.slane %v24034_v4, %v23440_v59  ;;  %v24040_v4 = vld [vmem:[#allocation14_spill] sm:$0xff]  ;;  %v24045_v19 = vld [vmem:[#allocation81_spill] sm:$0xff] }
 0x834   : > { %v7156_v40 = vcombine.low %v24023_v41, %v24021_v5  ;;  %v17499_v48 = vcombine.low %v24026_v32, %v24024_v63  ;;  %11969 = vrot.lane.b32.xlu0 %v17483_v37, %s12983_s19  ;;  %v7154_v60 = vrot.slane %v7140_v54, %v23926_v28  ;;  %v24043_v5 = vld [vmem:[#allocation119_spill] sm:$0xff]  ;;  %v24053_v12 = vld [vmem:[#allocation105_spill] sm:$0xff] }
 0x835   : > { %v7139_v18 = vcombine.low %v6066_v55, %v24031_v45  ;;  %v17515_v32 = vcombine.low %v24035_v3, %v24033_v56  ;;  %v7171_v30 = vrot.slane %v7157_v16, %v23926_v28  ;;  %v24039_v56 = vrot.slane %v23682_v29, %v23440_v59 }
 0x836   : > { %24027 = vst [vmem:[#allocation90_spill] sm:$0xff] %v17499_v48  ;;  %v7164_v27 = vrot.slane %v7156_v40, %v23926_v28  ;;  %v24041_v3 = vrot.slane %v24040_v4, %v23440_v59  ;;  %v24044_v54 = vcombine.high %v24043_v5, %v24043_v5  ;;  %v24047_v16 = vrot.slane %v24043_v5, %v23440_v59  ;;  %v24048_v40 = vld [vmem:[#allocation73_spill] sm:$0xff]  ;;  %v24096_v4 = vld [vmem:[#allocation124_spill] sm:$0xff] }
 0x837   : > { %24036 = vst [vmem:[#allocation72_spill] sm:$0xff] %v17515_v32  ;;  %v7147_v45 = vrot.slane %v7139_v18, %v23926_v28  ;;  %v24046_v18 = vld [vmem:[#allocation126_spill] sm:$0xff]  ;;  %v24049_v29 = vrot.slane %v24048_v40, %v23440_v59  ;;  %v6909_v5 = vrot.slane %v16994_v39, %v23926_v28  ;;  %v24056_v40 = vld [vmem:[#allocation41_spill] sm:$0xff] }
 0x838   : > { %v17533_v44 = vcombine.low %v24041_v3, %v24039_v56  ;;  %v17539_v41 = vrot.slane %v24044_v54, %v23440_v59  ;;  %v6902_v10 = vcombine.low %v24046_v18, %v24045_v19  ;;  %v7172_v21 = vcombine.low %v7164_v27, %v7171_v30  ;;  %v24060_v30 = vld [vmem:[#allocation107_spill] sm:$0xff]  ;;  %v24095_v32 = vld [vmem:[#allocation166_spill] sm:$0xff] }
 0x839   : > { %v6918_v63 = vcombine.low %v24049_v29, %v24047_v16  ;;  %v24052_v54 = vrot.slane %v23683_v13, %v23440_v59  ;;  %v24054_v19 = vrot.slane %v24053_v12, %v23440_v59  ;;  %v24059_v12 = vrot.slane %v16228_v36, %v23440_v59  ;;  %v24086_v3 = vld [vmem:[#allocation75_spill] sm:$0xff] }
 0x83a   : > { %24042 = vst [vmem:[#allocation91_spill] sm:$0xff] %v17533_v44  ;;  %v7155_v44 = vcombine.low %v7147_v45, %v7154_v60  ;;  %v6916_v16 = vrot.slane %v6902_v10, %v23926_v28  ;;  %v6919_v29 = vcombine.low %v24056_v40, %v17539_v41  ;;  %v7923_v27 = vrot.slane %v7172_v21, 7  ;;  %v24065_v21 = vld [vmem:[#allocation36_spill] sm:$0xff] }
 0x83b   : > { %v17559_v18 = vcombine.low %v24054_v19, %v24052_v54  ;;  %v24061_v54 = vrot.slane %v24060_v30, %v23440_v59  ;;  %v6926_v19 = vrot.slane %v6918_v63, %v23926_v28  ;;  %v24066_v36 = vcombine.high %v24065_v21, %v24065_v21  ;;  %v24067_v30 = vld [vmem:[#allocation62_spill] sm:$0xff] }
 0x83c   : > { %v7922_v13 = vrot.slane %v7155_v44, 7  ;;  %v6917_v10 = vcombine.low %v6909_v5, %v6916_v16  ;;  %v6933_v40 = vrot.slane %v6919_v29, %v23926_v28  ;;  %v24069_v63 = vcombine.low %v23925_v14, %v16668_v58 }
 0x83d   : > { %24055 = vst [vmem:[#allocation38_spill] sm:$0xff] %v17559_v18  ;;  %v17576_v39 = vcombine.low %v24061_v54, %v24059_v12  ;;  %v17590_v44 = vrot.slane %v24066_v36, %v23440_v59  ;;  %v24068_v12 = vld [vmem:[#allocation132_spill] sm:$0xff] }
 0x83e   : > { %v17581_v60 = vsel %vm264_vm0, %v7922_v13, %v7923_v27  ;;  %v17584_v45 = vsel %vm264_vm0, %v6066_v55, %v7922_v13  ;;  %v7174_v54 = vcombine.low %v24068_v12, %v24067_v30  ;;  %v17598_v5 = vrot.slane %v24069_v63, %v23926_v28  ;;  %v24071_v12 = vld [vmem:[#allocation80_spill] sm:$0xff]  ;;  %v24073_v63 = vld [vmem:[#allocation65_spill] sm:$0xff] }
 0x83f   : > { %24062 = vst [vmem:[#allocation21_spill] sm:$0xff] %v17576_v39  ;;  %24063 = vst [vmem:[#allocation92_spill] sm:$0xff] %v17581_v60  ;;  %v17602_v16 = vpack.i.bf16 %v17581_v60, %v17584_v45  ;;  %v17604_v55 = vcombine.low %v6926_v19, %v6933_v40  ;;  %v7897_v29 = vrot.slane %v6917_v10, 7  ;;  %v7181_v13 = vrot.slane %v17024_v25, %v23926_v28  ;;  %v24074_v39 = vld [vmem:[#allocation49_spill] sm:$0xff] }
 0x840   : > { %24064 = vst [vmem:[#allocation93_spill] sm:$0xff] %v17584_v45  ;;  %v7188_v36 = vrot.slane %v7174_v54, %v23926_v28  ;;  %v24070_v30 = vrot.slane %v24065_v21, %v23440_v59  ;;  %v24072_v58 = vrot.slane %v24071_v12, %v23440_v59  ;;  %v7191_v24 = vcombine.low %v24073_v63, %v17590_v44  ;;  %v24079_v63 = vld [vmem:[#allocation29_spill] sm:$0xff] }
 0x841   : > { %v7021_v19 = vcombine.low %v24074_v39, %v17156_v50  ;;  %11974 = vrot.lane.b32.xlu1 %v17602_v16, %s12983_s19  ;;  %v17624_v25 = vsel %vm264_vm0, %v7895_v9, %v7897_v29  ;;  %v22861_v40 = vrot.slane %v17604_v55, 7  ;;  %v24076_v21 = vcombine.low %v23929_v62, %v16682_v42  ;;  %v24078_v9 = vld [vmem:[#allocation30_spill] sm:$0xff]  ;;  %v24081_v62 = vld [vmem:[#allocation43_spill] sm:$0xff] }
 0x842   : > { %v7190_v14 = vcombine.low %v24072_v58, %v24070_v30  ;;  %24075 = vst [vmem:[#allocation95_spill] sm:$0xff] %v17624_v25  ;;  %v7189_v30 = vcombine.low %v7181_v13, %v7188_v36  ;;  %v7205_v39 = vrot.slane %v7191_v24, %v23926_v28  ;;  %v5874_v58 = vrot.slane %v24078_v9, %v23440_v59 }
 0x843   : > { %v17631_v54 = vrot.slane %v24076_v21, %v23926_v28  ;;  %v17638_v12 = vsel %vm264_vm0, %v7897_v29, %v22861_v40  ;;  %v24080_v10 = vcombine.high %v24079_v63, %v24079_v63  ;;  %v24082_v21 = vld [vmem:[#allocation127_spill] sm:$0xff]  ;;  %v24083_v29 = vrot.slane %v24079_v63, %v23440_v59  ;;  %v24084_v40 = vld [vmem:[#allocation74_spill] sm:$0xff] }
 0x844   : > { %v7198_v50 = vrot.slane %v7190_v14, %v23926_v28  ;;  %24077 = vst [vmem:[#allocation59_spill] sm:$0xff] %v17638_v12  ;;  %v6936_v13 = vcombine.low %v24082_v21, %v24081_v62  ;;  %v17650_v36 = vpack.i.bf16 %v17638_v12, %v17624_v25  ;;  %v7925_v14 = vrot.slane %v7189_v30, 7  ;;  %v24090_v63 = vld [vmem:[#allocation42_spill] sm:$0xff] }
 0x845   : > { %v5902_v42 = vrot.slane %v24080_v10, %v23440_v59  ;;  %v24085_v9 = vrot.slane %v24084_v40, %v23440_v59  ;;  %v24087_v62 = vrot.slane %v24086_v3, %v23440_v59  ;;  %v24094_v10 = vld [vmem:[#allocation133_spill] sm:$0xff]  ;;  %v7259_v40 = vcombine.low %v24096_v4, %v24095_v32 }
 0x846   : > { %v17652_v24 = vcombine.low %v7198_v50, %v7205_v39  ;;  %v6950_v18 = vrot.slane %v6936_v13, %v23926_v28  ;;  %11979 = vrot.lane.b32.xlu0 %v17650_v36, %s12983_s19  ;;  %v17670_v30 = vsel %vm264_vm0, %v7923_v27, %v7925_v14  ;;  %v24091_v13 = vld [vmem:[#allocation78_spill] sm:$0xff] }
 0x847   : > { %v6952_v56 = vcombine.low %v24085_v9, %v24083_v29  ;;  %v6935_v21 = vcombine.low %v5874_v58, %v24087_v62  ;;  %v6953_v50 = vcombine.low %v24088_v51, %v5902_v42  ;;  %24089 = vst [vmem:[#allocation94_spill] sm:$0xff] %v17670_v30  ;;  %v6130_v29 = vrot.slane %v24090_v63, %v23440_v59  ;;  %v24093_v62 = vld [vmem:[#allocation67_spill] sm:$0xff] }
 0x848   : > { %v24092_v51 = vcombine.high %v24091_v13, %v24091_v13  ;;  %v7208_v27 = vcombine.low %v24094_v10, %v24093_v62  ;;  %v24099_v63 = vld [vmem:[#allocation83_spill] sm:$0xff]  ;;  %v24101_v48 = vrot.slane %v24091_v13, %v23440_v59 }
 0x849   : > { %v6960_v39 = vrot.slane %v6952_v56, %v23926_v28  ;;  %v6943_v3 = vrot.slane %v6935_v21, %v23926_v28  ;;  %v6967_v9 = vrot.slane %v6953_v50, %v23926_v28  ;;  %v24097_v56 = vrot.slane %v17652_v24, 7 }
 0x84a   : > { %v6158_v42 = vrot.slane %v24092_v51, %v23440_v59  ;;  %v24100_v21 = vrot.slane %v24099_v63, %v23440_v59  ;;  %v24103_v51 = vrot.slane %v24102_v17, %v23440_v59 }
 0x84b   : > { %v17689_v26 = vsel %vm264_vm0, %v7925_v14, %v24097_v56  ;;  %v6951_v4 = vcombine.low %v6943_v3, %v6950_v18  ;;  %v17704_v62 = vcombine.low %v6960_v39, %v6967_v9  ;;  %v7222_v14 = vrot.slane %v7208_v27, %v23926_v28 }
 0x84c   : > { %24098 = vst [vmem:[#allocation97_spill] sm:$0xff] %v17689_v26  ;;  %v7207_v50 = vcombine.low %v6130_v29, %v24100_v21  ;;  %v7224_v49 = vcombine.low %v24103_v51, %v24101_v48  ;;  %v17702_v10 = vpack.i.bf16 %v17689_v26, %v17670_v30  ;;  %v7225_v17 = vcombine.low %v24108_v33, %v6158_v42  ;;  %v24112_v42 = vld [vmem:[#allocation6_spill] sm:$0xff]  ;;  %v24128_v21 = vld [vmem:[#allocation76_spill] sm:$0xff] }
 0x84d   : > { %v24111_v18 = vcombine.low %v23950_v0, %v23949_v1  ;;  %v7901_v3 = vrot.slane %v6951_v4, 7  ;;  %v7902_v9 = vrot.slane %v17704_v62, 7  ;;  %v8144_v32 = vrot.slane %v24112_v42, 1  ;;  %v24113_v1 = vld [vmem:[#allocation68_spill] sm:$0xff] }
 0x84e   : > { %v7215_v13 = vrot.slane %v7207_v50, %v23926_v28  ;;  %11984 = vrot.lane.b32.xlu1 %v17702_v10, %s12983_s19  ;;  %v7232_v50 = vrot.slane %v7224_v49, %v23926_v28  ;;  %v7239_v33 = vrot.slane %v7225_v17, %v23926_v28  ;;  %v7035_v56 = vrot.slane %v7021_v19, %v23926_v28 }
 0x84f   : > { %v17719_v39 = vrot.slane %v24111_v18, %v23926_v28  ;;  %v17728_v45 = vsel %vm264_vm0, %v7901_v3, %v7902_v9  ;;  %v17731_v0 = vsel %vm264_vm0, %v5874_v58, %v7901_v3  ;;  %v24120_v58 = vld [vmem:[#allocation120_spill] sm:$0xff]  ;;  %v24125_v19 = vrot.slane %v24113_v1, 1 }
 0x850   : > { %v7223_v27 = vcombine.low %v7215_v13, %v7222_v14  ;;  %v17736_v4 = vpack.i.bf16 %v17728_v45, %v17731_v0  ;;  %v7240_v62 = vcombine.low %v7232_v50, %v7239_v33  ;;  %v24115_v13 = vld [vmem:[#allocation7_spill] sm:$0xff]  ;;  %v24121_v3 = vcombine.high %v24120_v58, %v24120_v58  ;;  %v24123_v33 = vld [vmem:[#allocation45_spill] sm:$0xff] }
 0x851   : > { %v8143_v49 = vrot.slane %v24115_v13, 1  ;;  %v6970_v48 = vcombine.low %v24124_v6, %v24123_v33  ;;  %v8153_v51 = vrot.slane %v17468_v61, 1 }
 0x852   : > { %24114 = vst [vmem:[#allocation136_spill] sm:$0xff] %v17736_v4  ;;  %v7929_v14 = vrot.slane %v7223_v27, 7  ;;  %11989 = vrot.lane.b32.xlu1 %v17483_v37, %s12986_s11  ;;  %v17750_v18 = vrot.slane %v24121_v3, %v23440_v59  ;;  %12009 = vrot.lane.b32.xlu0 %v17736_v4, %s12983_s19  ;;  %v7930_v27 = vrot.slane %v7240_v62, 7  ;;  %v17762_v37 = vsel %vm1260_vm9, %v8144_v32, %v24125_v19 }
 0x853   : > { %v17755_v50 = vsel %vm1260_vm9, %v8143_v49, %v8144_v32  ;;  %24126 = vst [vmem:[#allocation98_spill] sm:$0xff] %v17762_v37  ;;  %v24127_v3 = vrot.slane %v24120_v58, %v23440_v59  ;;  %v24129_v4 = vrot.slane %v24128_v21, %v23440_v59  ;;  %v24130_v49 = vld [vmem:[#allocation47_spill] sm:$0xff]  ;;  %v24133_v32 = vld [vmem:[#allocation28_spill] sm:$0xff]  ;;  %v6984_v19 = vrot.slane %v6970_v48, %v23926_v28 }
 0x854   : > { %24122 = vst [vmem:[#allocation96_spill] sm:$0xff] %v17755_v50  ;;  %v6987_v63 = vcombine.low %v24130_v49, %v17750_v18  ;;  %v17774_v17 = vsel %vm264_vm0, %v7929_v14, %v7930_v27  ;;  %v17777_v6 = vsel %vm264_vm0, %v6130_v29, %v7929_v14  ;;  %v6977_v33 = vrot.slane %v24133_v32, %v23926_v28 }
 0x855   : > { %v6986_v62 = vcombine.low %v24129_v4, %v24127_v3  ;;  %24131 = vst [vmem:[#allocation100_spill] sm:$0xff] %v17774_v17  ;;  %24132 = vst [vmem:[#allocation39_spill] sm:$0xff] %v17777_v6  ;;  %v17784_v58 = vpack.i.bf16 %v17774_v17, %v17777_v6  ;;  %v22868_v21 = vrot.slane %v17624_v25, 1  ;;  %v24135_v14 = vcombine.low %v23932_v38, %v16738_v23 }
 0x856   : > { %11994 = vrot.lane.b32.xlu1 %v17602_v16, %s12986_s11  ;;  %v7001_v3 = vrot.slane %v6987_v63, %v23926_v28  ;;  %v6985_v29 = vcombine.low %v6977_v33, %v6984_v19  ;;  %v7266_v48 = vrot.slane %v17294_v2, %v23926_v28  ;;  %v7273_v32 = vrot.slane %v7259_v40, %v23926_v28  ;;  %v24185_v19 = vld [vmem:[#allocation160_spill] sm:$0xff] }
 0x857   : > { %24134 = vst [vmem:[#allocation33_spill] sm:$0xff] %v17784_v58  ;;  %v6994_v4 = vrot.slane %v6986_v62, %v23926_v28  ;;  %v7256_v49 = vrot.slane %v24135_v14, %v23926_v28  ;;  %v24136_v16 = vrot.slane %v17270_v46, %v23926_v28  ;;  %12014 = vrot.lane.b32.xlu0 %v17784_v58, %s12983_s19  ;;  %v8152_v63 = vrot.slane %v17471_v53, 1 }
 0x858   : > { %v7904_v38 = vrot.slane %v6985_v29, 7  ;;  %v24139_v2 = vrot.slane %v17032_v43, %v23926_v28  ;;  %v17811_v40 = vcombine.low %v7266_v48, %v7273_v32  ;;  %v24140_v46 = vrot.slane %v17016_v35, %v23926_v28 }
 0x859   : > { %v7036_v6 = vcombine.low %v24136_v16, %v7035_v56  ;;  %v17804_v62 = vcombine.low %v6994_v4, %v7001_v3  ;;  %v17823_v4 = vpack.i.bf16 %v17762_v37, %v17755_v50  ;;  %v17826_v3 = vsel %vm1260_vm9, %v8152_v63, %v8153_v51 }
 0x85a   : > { %v7257_v14 = vcombine.low %v24139_v2, %v7256_v49  ;;  %v17817_v56 = vcombine.low %v24140_v46, %v17631_v54  ;;  %11999 = vrot.lane.b32.xlu1 %v17650_v36, %s12986_s11  ;;  %24141 = vst [vmem:[#allocation53_spill] sm:$0xff] %v17826_v3  ;;  %v17832_v29 = vsel %vm1260_vm9, %v8153_v51, %v22868_v21  ;;  %v8162_v54 = vrot.slane %v17728_v45, 1  ;;  %v24144_v49 = vld [vmem:[#allocation31_spill] sm:$0xff] }
 0x85b   : > { %v7906_v43 = vrot.slane %v17804_v62, 7  ;;  %24142 = vst [vmem:[#allocation131_spill] sm:$0xff] %v17832_v29  ;;  %v17835_v35 = vsel %vm264_vm0, %v7902_v9, %v7904_v38  ;;  %v24145_v48 = vrot.slane %v24144_v49, %v23926_v28  ;;  %v7909_v16 = vrot.slane %v7036_v6, 7  ;;  %12029 = vrot.lane.b32.xlu0 %v17823_v4, %s12981_s17 }
 0x85c   : > { %24143 = vst [vmem:[#allocation37_spill] sm:$0xff] %v17835_v35  ;;  %v7932_v36 = vrot.slane %v7257_v14, 7  ;;  %v22872_v63 = vrot.slane %v17835_v35, 1  ;;  %v8161_v9 = vrot.slane %v17731_v0, 1  ;;  %v17860_v6 = vpack.i.bf16 %v17832_v29, %v17826_v3  ;;  %v24165_v3 = vld [vmem:[#allocation155_spill] sm:$0xff] }
 0x85d   : > { %v7019_v32 = vcombine.low %v24145_v48, %v17598_v5  ;;  %v17846_v51 = vsel %vm264_vm0, %v7904_v38, %v7906_v43  ;;  %v24150_v38 = vld [vmem:[#allocation56_spill] sm:$0xff]  ;;  %v24151_v48 = vld [vmem:[#allocation63_spill] sm:$0xff]  ;;  %v8351_v29 = vrot.slane %v24115_v13, 2  ;;  %v24163_v37 = vcombine.low %v23991_v22, %v23990_v31 }
 0x85e   : > { %24146 = vst [vmem:[#allocation102_spill] sm:$0xff] %v17846_v51  ;;  %v17850_v62 = vsel %vm264_vm0, %v7930_v27, %v7932_v36  ;;  %12004 = vrot.lane.b32.xlu1 %v17702_v10, %s12986_s11  ;;  %v24152_v23 = vrot.slane %v24151_v48, 7  ;;  %v17869_v21 = vsel %vm1260_vm9, %v8161_v9, %v8162_v54  ;;  %v17874_v49 = vsel %vm1260_vm9, %v8162_v54, %v22872_v63  ;;  %v24164_v5 = vld [vmem:[#allocation175_spill] sm:$0xff] }
 0x85f   : > { %24147 = vst [vmem:[#allocation79_spill] sm:$0xff] %v17850_v62  ;;  %24153 = vst [vmem:[#allocation122_spill] sm:$0xff] %v17869_v21  ;;  %v8352_v10 = vrot.slane %v24112_v42, 2  ;;  %v7908_v50 = vrot.slane %v7019_v32, 7  ;;  %12039 = vrot.lane.b32.xlu0 %v17860_v6, %s12981_s17  ;;  %v24158_v9 = vrot.slane %v17817_v56, 7  ;;  %v24162_v32 = vld [vmem:[#allocation24_spill] sm:$0xff]  ;;  %v7562_v42 = vrot.slane %v24163_v37, %v23926_v28 }
 0x860   : > { %v17866_v27 = vsel %vm264_vm0, %v24152_v23, %v24150_v38  ;;  %24154 = vst [vmem:[#allocation104_spill] sm:$0xff] %v17874_v49  ;;  %v17884_v23 = vpack.i.bf16 %v17846_v51, %v17835_v35  ;;  %v24160_v38 = vrot.slane %v17811_v40, 7  ;;  %v8148_v63 = vrot.slane %v24162_v32, 1 }
 0x861   : > { %v17889_v54 = vsel %vm264_vm0, %v7909_v16, %v24158_v9  ;;  %v8150_v2 = vrot.slane %v17866_v27, 1  ;;  %v7565_v9 = vcombine.low %v24165_v3, %v24164_v5  ;;  %v7572_v31 = vrot.slane %v17424_v47, %v23926_v28 }
 0x862   : > { %24157 = vst [vmem:[#allocation14_spill] sm:$0xff] %v17884_v23  ;;  %24159 = vst [vmem:[#allocation119_spill] sm:$0xff] %v17889_v54  ;;  %v17894_v48 = vsel %vm264_vm0, %v7932_v36, %v24160_v38  ;;  %12019 = vrot.lane.b32.xlu1 %v17884_v23, %s12983_s19  ;;  %v17909_v36 = vpack.i.bf16 %v17874_v49, %v17869_v21  ;;  %v24166_v38 = vrot.slane %v17604_v55, 7  ;;  %v24169_v5 = vrot.slane %v24113_v1, 2  ;;  %v24171_v55 = vld [vmem:[#allocation109_spill] sm:$0xff] }
 0x863   : > { %24161 = vst [vmem:[#allocation81_spill] sm:$0xff] %v17894_v48  ;;  %v24167_v22 = vcombine.low %v23996_v52, %v23995_v57  ;;  %v17924_v3 = vsel %vm1277_vm14, %v8351_v29, %v8352_v10  ;;  %v17941_v47 = vpack.i.bf16 %v17894_v48, %v17850_v62  ;;  %v17944_v57 = vsel %vm264_vm0, %v7908_v50, %v7909_v16 }
 0x864   : > { %v17915_v13 = vsel %vm264_vm0, %v24166_v38, %v17539_v41  ;;  %24168 = vst [vmem:[#allocation126_spill] sm:$0xff] %v17924_v3  ;;  %v17929_v21 = vsel %vm1277_vm14, %v8352_v10, %v24169_v5  ;;  %v17935_v38 = vsel %vm264_vm0, %v24171_v55, %v7908_v50  ;;  %12049 = vrot.lane.b32.xlu0 %v17909_v36, %s12981_s17  ;;  %24174 = vst [vmem:[#allocation107_spill] sm:$0xff] %v17944_v57  ;;  %v24178_v55 = vld [vmem:[#allocation176_spill] sm:$0xff]  ;;  %v24179_v41 = vld [vmem:[#allocation157_spill] sm:$0xff] }
 0x865   : > { %v7596_v37 = vrot.slane %v24167_v22, %v23926_v28  ;;  %24170 = vst [vmem:[#allocation73_spill] sm:$0xff] %v17929_v21  ;;  %24172 = vst [vmem:[#allocation105_spill] sm:$0xff] %v17935_v38  ;;  %v24175_v52 = vrot.slane %v24113_v1, 1  ;;  %v17952_v10 = vsel %vm1260_vm9, %v8148_v63, %v8150_v2  ;;  %v8157_v22 = vrot.slane %v17638_v12, 1  ;;  %v24183_v2 = vld [vmem:[#allocation159_spill] sm:$0xff] }
 0x866   : > { %24173 = vst [vmem:[#allocation41_spill] sm:$0xff] %v17941_v47  ;;  %24177 = vst [vmem:[#allocation62_spill] sm:$0xff] %v17952_v10  ;;  %v8159_v5 = vrot.slane %v17915_v13, 1  ;;  %12024 = vrot.lane.b32.xlu1 %v17941_v47, %s12983_s19  ;;  %v12058_v50 = vpack.i.bf16 %v17929_v21, %v17924_v3  ;;  %v17966_v16 = vsel %vm264_vm0, %v7906_v43, %v17750_v18  ;;  %v8171_v49 = vrot.slane %v17944_v57, 1 }
 0x867   : > { %v17949_v29 = vsel %vm1260_vm9, %v24175_v52, %v8148_v63  ;;  %v24182_v63 = vld [vmem:[#allocation178_spill] sm:$0xff]  ;;  %v7579_v58 = vrot.slane %v7565_v9, %v23926_v28  ;;  %v8170_v43 = vrot.slane %v17935_v38, 1  ;;  %v24188_v52 = vrot.slane %v17624_v25, 1 }
 0x868   : > { %24176 = vst [vmem:[#allocation36_spill] sm:$0xff] %v17949_v29  ;;  %12059 = vrot.lane.b32.xlu0 %v12058_v50, %s12981_s17  ;;  %v17980_v18 = vpack.i.bf16 %v17952_v10, %v17949_v29  ;;  %v17989_v46 = vsel %vm1260_vm9, %v8157_v22, %v8159_v5  ;;  %v8166_v47 = vrot.slane %v17846_v51, 1  ;;  %v8168_v9 = vrot.slane %v17966_v16, 1 }
 0x869   : > { %v17986_v23 = vsel %vm1260_vm9, %v24188_v52, %v8157_v22  ;;  %24190 = vst [vmem:[#allocation80_spill] sm:$0xff] %v17989_v46  ;;  %v24191_v21 = vrot.slane %v17060_v20, %v23926_v28  ;;  %v24192_v29 = vrot.slane %v17094_v15, %v23926_v28  ;;  %v24193_v52 = vrot.slane %v17102_v11, %v23926_v28 }
 0x86a   : > { %24189 = vst [vmem:[#allocation132_spill] sm:$0xff] %v17986_v23  ;;  %12034 = vrot.lane.b32.xlu1 %v17980_v18, %s12981_s17  ;;  %v18012_v5 = vsel %vm1260_vm9, %v8170_v43, %v8171_v49  ;;  %v24196_v20 = vrot.slane %v17889_v54, 1  ;;  %v8379_v15 = vrot.slane %v17944_v57, 2  ;;  %v18025_v14 = vcombine.low %v7572_v31, %v7579_v58 }
 0x86b   : > { %v17997_v3 = vcombine.low %v24191_v21, %v17719_v39  ;;  %v18002_v10 = vcombine.low %v24192_v29, %v7562_v42  ;;  %v18007_v22 = vcombine.low %v24193_v52, %v7596_v37  ;;  %24195 = vst [vmem:[#allocation49_spill] sm:$0xff] %v18012_v5  ;;  %v18030_v43 = vpack.i.bf16 %v17989_v46, %v17986_v23  ;;  %v24214_v37 = vld [vmem:[#allocation51_spill] sm:$0xff]  ;;  %v24216_v46 = vld [vmem:[#allocation13_spill] sm:$0xff] }
 0x86c   : > { %v18017_v39 = vsel %vm1260_vm9, %v8171_v49, %v24196_v20  ;;  %12064 = vrot.lane.b32.xlu0 %v12058_v50, %s12983_s19  ;;  %v24202_v49 = vrot.slane %v17835_v35, 1  ;;  %v18038_v42 = vsel %vm1260_vm9, %v8166_v47, %v8168_v9  ;;  %v8378_v11 = vrot.slane %v17935_v38, 2  ;;  %v24209_v9 = vld [vmem:[#allocation137_spill] sm:$0xff] }
 0x86d   : > { %24194 = vst [vmem:[#allocation65_spill] sm:$0xff] %v18007_v22  ;;  %24197 = vst [vmem:[#allocation30_spill] sm:$0xff] %v18017_v39  ;;  %v24206_v58 = vcombine.high %v24205_v34, %v24205_v34  ;;  %v24210_v52 = vrot.slane %v24209_v9, 7 }
 0x86e   : > { %v18035_v20 = vsel %vm1260_vm9, %v24202_v49, %v8166_v47  ;;  %24204 = vst [vmem:[#allocation43_spill] sm:$0xff] %v18038_v42  ;;  %12044 = vrot.lane.b32.xlu1 %v18030_v43, %s12981_s17  ;;  %v18051_v49 = vpack.i.bf16 %v18017_v39, %v18012_v5  ;;  %v24208_v47 = vld [vmem:[#allocation50_spill] sm:$0xff]  ;;  %v18059_v34 = vsel %vm1277_vm14, %v8378_v11, %v8379_v15  ;;  %v8390_v5 = vrot.slane %v24216_v46, 2  ;;  %v24217_v11 = vld [vmem:[#allocation140_spill] sm:$0xff] }
 0x86f   : > { %24203 = vst [vmem:[#allocation29_spill] sm:$0xff] %v18035_v20  ;;  %v5998_v31 = vrot.slane %v24206_v58, %v23440_v59  ;;  %v8099_v23 = vsel %vm264_vm0, %v24210_v52, %v24208_v47  ;;  %24211 = vst [vmem:[#allocation74_spill] sm:$0xff] %v18059_v34  ;;  %v24212_v58 = vrot.slane %v17889_v54, 2  ;;  %v18071_v9 = vpack.i.bf16 %v18038_v42, %v18035_v20  ;;  %v24215_v52 = vld [vmem:[#allocation16_spill] sm:$0xff]  ;;  %v24218_v20 = vld [vmem:[#allocation17_spill] sm:$0xff] }
 0x870   : > { %24207 = vst [vmem:[#allocation127_spill] sm:$0xff] %v18051_v49  ;;  %12079 = vrot.lane.b32.xlu0 %v18051_v49, %s12981_s17  ;;  %v8388_v47 = vrot.slane %v24215_v52, 2  ;;  %v8392_v39 = vrot.slane %v24217_v11, 2  ;;  %v8394_v21 = vrot.slane %v8099_v23, 2  ;;  %v8180_v29 = vrot.slane %v24215_v52, 1 }
 0x871   : > { %v18064_v50 = vsel %vm1277_vm14, %v8379_v15, %v24212_v58  ;;  %v7055_v59 = vcombine.low %v24214_v37, %v5998_v31  ;;  %v8182_v15 = vrot.slane %v24216_v46, 1  ;;  %v8387_v42 = vrot.slane %v24218_v20, 2 }
 0x872   : > { %24213 = vst [vmem:[#allocation75_spill] sm:$0xff] %v18064_v50  ;;  %12054 = vrot.lane.b32.xlu1 %v18071_v9, %s12981_s17  ;;  %v18083_v58 = vpack.i.bf16 %v18064_v50, %v18059_v34  ;;  %v8184_v49 = vrot.slane %v24217_v11, 1  ;;  %v8179_v22 = vrot.slane %v24218_v20, 1  ;;  %v8186_v33 = vrot.slane %v8099_v23, 1 }
 0x873   : > { %v7069_v37 = vrot.slane %v7055_v59, %v23926_v28  ;;  %v8356_v52 = vrot.slane %v24162_v32, 2  ;;  %v8358_v46 = vrot.slane %v17866_v27, 2  ;;  %v18093_v59 = vsel %vm1277_vm14, %v8387_v42, %v8388_v47 }
 0x874   : > { %12084 = vrot.lane.b32.xlu0 %v18083_v58, %s12983_s19  ;;  %24219 = vst [vmem:[#allocation85_spill] sm:$0xff] %v18093_v59  ;;  %v18096_v50 = vsel %vm1277_vm14, %v8388_v47, %v8390_v5  ;;  %v18099_v34 = vsel %vm1277_vm14, %v8390_v5, %v8392_v39  ;;  %v24222_v11 = vrot.slane %v17282_v7, %v23926_v28  ;;  %v24226_v42 = vrot.slane %v17652_v24, 7 }
 0x875   : > { %24220 = vst [vmem:[#allocation42_spill] sm:$0xff] %v18096_v50  ;;  %24221 = vst [vmem:[#allocation78_spill] sm:$0xff] %v18099_v34  ;;  %v18105_v20 = vsel %vm1277_vm14, %v8392_v39, %v8394_v21  ;;  %v18108_v27 = vsel %vm1260_vm9, %v8179_v22, %v8180_v29  ;;  %v18111_v32 = vsel %vm1260_vm9, %v8180_v29, %v8182_v15  ;;  %v24227_v7 = vrot.slane %v18002_v10, 7 }
 0x876   : > { %v7070_v23 = vcombine.low %v24222_v11, %v7069_v37  ;;  %24223 = vst [vmem:[#allocation67_spill] sm:$0xff] %v18105_v20  ;;  %24224 = vst [vmem:[#allocation133_spill] sm:$0xff] %v18108_v27  ;;  %v18117_v47 = vsel %vm264_vm0, %v24226_v42, %v17590_v44  ;;  %v24228_v11 = vld [vmem:[#allocation114_spill] sm:$0xff]  ;;  %12069 = vrot.lane.b32.xlu1 %v17823_v4, %s12986_s11  ;;  %v18129_v22 = vsel %vm1260_vm9, %v8182_v15, %v8184_v49 }
 0x877   : > { %24225 = vst [vmem:[#allocation124_spill] sm:$0xff] %v18111_v32  ;;  %v18124_v39 = vsel %vm264_vm0, %v24228_v11, %v24227_v7  ;;  %24230 = vst [vmem:[#allocation82_spill] sm:$0xff] %v18129_v22  ;;  %v18132_v21 = vsel %vm1260_vm9, %v8184_v49, %v8186_v33  ;;  %v24232_v44 = vrot.slane %v24113_v1, 2  ;;  %v18140_v29 = vsel %vm1277_vm14, %v8356_v52, %v8358_v46 }
 0x878   : > { %24229 = vst [vmem:[#allocation83_spill] sm:$0xff] %v18124_v39  ;;  %24231 = vst [vmem:[#allocation143_spill] sm:$0xff] %v18132_v21  ;;  %v8361_v37 = vrot.slane %v17468_v61, 2  ;;  %12104 = vrot.lane.b32.xlu0 %v17980_v18, %s12986_s11  ;;  %v18147_v4 = vpack.i.bf16 %v18096_v50, %v18093_v59  ;;  %v18151_v33 = vpack.i.bf16 %v18105_v20, %v18099_v34  ;;  %v7913_v15 = vrot.slane %v7070_v23, 7 }
 0x879   : > { %v18137_v24 = vsel %vm1277_vm14, %v24232_v44, %v8356_v52  ;;  %24234 = vst [vmem:[#allocation120_spill] sm:$0xff] %v18140_v29  ;;  %v12088_v49 = vpack.i.bf16 %v18111_v32, %v18108_v27  ;;  %v8360_v46 = vrot.slane %v17471_v53, 2  ;;  %v8363_v52 = vrot.slane %v17624_v25, 2  ;;  %v24236_v44 = vld [vmem:[#allocation93_spill] sm:$0xff] }
 0x87a   : > { %24233 = vst [vmem:[#allocation123_spill] sm:$0xff] %v18137_v24  ;;  %v8189_v42 = vrot.slane %v17581_v60, 1  ;;  %v8191_v18 = vrot.slane %v17670_v30, 1  ;;  %12074 = vrot.lane.b32.xlu1 %v18147_v4, %s12981_s17  ;;  %v18163_v7 = vpack.i.bf16 %v18132_v21, %v18129_v22  ;;  %v12093_v11 = vpack.i.bf16 %v18140_v29, %v18137_v24  ;;  %v18200_v21 = vpop.permute.xlu1 %11929 }
 0x87b   : > { %v18168_v23 = vsel %vm1277_vm14, %v8360_v46, %v8361_v37  ;;  %v8188_v5 = vrot.slane %v24236_v44, 1  ;;  %v24237_v20 = vrot.slane %v17817_v56, 7  ;;  %v8098_v50 = vsel %vm264_vm0, %v7913_v15, %v5998_v31  ;;  %24243 = vst [vmem:[#allocation56_spill] sm:$0xff] %v18200_v21 }
 0x87c   : > { %24235 = vst [vmem:[#allocation45_spill] sm:$0xff] %v18168_v23  ;;  %12109 = vrot.lane.b32.xlu0 %v18151_v33, %s12981_s17  ;;  %v8396_v59 = vrot.slane %v24236_v44, 2  ;;  %v8397_v25 = vrot.slane %v17581_v60, 2  ;;  %v18182_v29 = vsel %vm1277_vm14, %v8361_v37, %v8363_v52  ;;  %v18188_v24 = vsel %vm1260_vm9, %v8189_v42, %v8191_v18  ;;  %v18196_v37 = vpop.permute.xlu0 %11934 }
 0x87d   : > { %v18176_v34 = vsel %vm264_vm0, %v24237_v20, %v7913_v15  ;;  %24239 = vst [vmem:[#allocation76_spill] sm:$0xff] %v18182_v29  ;;  %v18185_v46 = vsel %vm1260_vm9, %v8188_v5, %v8189_v42  ;;  %24241 = vst [vmem:[#allocation28_spill] sm:$0xff] %v18188_v24  ;;  %v8399_v56 = vrot.slane %v17670_v30, 2  ;;  %v8365_v20 = vrot.slane %v17638_v12, 2 }
 0x87e   : > { %24238 = vst [vmem:[#allocation128_spill] sm:$0xff] %v18176_v34  ;;  %24240 = vst [vmem:[#allocation47_spill] sm:$0xff] %v18185_v46  ;;  %12089 = vrot.lane.b32.xlu1 %v12088_v49, %s12986_s11  ;;  %v8367_v31 = vrot.slane %v17915_v13, 2  ;;  %v8193_v15 = vrot.slane %v17689_v26, 1  ;;  %v8195_v44 = vrot.slane %v18117_v47, 1  ;;  %v8175_v5 = vrot.slane %v18176_v34, 1 }
 0x87f   : > { %24242 = vst [vmem:[#allocation31_spill] sm:$0xff] %v18196_v37  ;;  %v8177_v60 = vrot.slane %v8098_v50, 1  ;;  %v8383_v42 = vrot.slane %v18176_v34, 2  ;;  %v8385_v22 = vrot.slane %v8098_v50, 2  ;;  %v8401_v30 = vrot.slane %v17689_v26, 2 }
 0x880   : > { %12124 = vrot.lane.b32.xlu0 %v18163_v7, %s12986_s11  ;;  %v8403_v13 = vrot.slane %v18117_v47, 2  ;;  %v18208_v12 = vpack.i.bf16 %v18182_v29, %v18168_v23  ;;  %v18212_v27 = vpack.i.bf16 %v18188_v24, %v18185_v46  ;;  %v18215_v32 = vsel %vm1277_vm14, %v8396_v59, %v8397_v25 }
 0x881   : > { %24244 = vst [vmem:[#allocation63_spill] sm:$0xff] %v18215_v32  ;;  %v18218_v50 = vsel %vm1277_vm14, %v8397_v25, %v8399_v56  ;;  %v18222_v26 = vsel %vm1277_vm14, %v8363_v52, %v8365_v20  ;;  %v18225_v47 = vsel %vm1277_vm14, %v8365_v20, %v8367_v31  ;;  %v18228_v29 = vsel %vm1260_vm9, %v8191_v18, %v8193_v15 }
 0x882   : > { %24245 = vst [vmem:[#allocation175_spill] sm:$0xff] %v18218_v50  ;;  %12094 = vrot.lane.b32.xlu1 %v12093_v11, %s12981_s17  ;;  %24246 = vst [vmem:[#allocation155_spill] sm:$0xff] %v18222_v26  ;;  %v18231_v23 = vsel %vm1260_vm9, %v8193_v15, %v8195_v44  ;;  %v24250_v59 = vrot.slane %v17889_v54, 1  ;;  %v18239_v25 = vsel %vm1260_vm9, %v8175_v5, %v8177_v60  ;;  %v24253_v52 = vrot.slane %v17889_v54, 2  ;;  %v18258_v15 = vpop.permute.xlu0 %11944 }
 0x883   : > { %24247 = vst [vmem:[#allocation109_spill] sm:$0xff] %v18225_v47  ;;  %24248 = vst [vmem:[#allocation176_spill] sm:$0xff] %v18228_v29  ;;  %v18247_v20 = vsel %vm1277_vm14, %v8383_v42, %v8385_v22  ;;  %v18251_v18 = vsel %vm1277_vm14, %v8399_v56, %v8401_v30  ;;  %v18254_v44 = vsel %vm1277_vm14, %v8401_v30, %v8403_v13  ;;  %v8198_v31 = vrot.slane %v17774_v17, 1  ;;  %v24260_v30 = vld [vmem:[#allocation167_spill] sm:$0xff] }
 0x884   : > { %24249 = vst [vmem:[#allocation157_spill] sm:$0xff] %v18231_v23  ;;  %v18236_v46 = vsel %vm1260_vm9, %v24250_v59, %v8175_v5  ;;  %24252 = vst [vmem:[#allocation159_spill] sm:$0xff] %v18239_v25  ;;  %v18244_v24 = vsel %vm1277_vm14, %v24253_v52, %v8383_v42  ;;  %12134 = vrot.lane.b32.xlu0 %v12088_v49, %s12981_s17  ;;  %v18262_v5 = vpack.i.bf16 %v18218_v50, %v18215_v32  ;;  %v18268_v49 = vpop.permute.xlu1 %11939  ;;  %v24263_v52 = vld [vmem:[#allocation39_spill] sm:$0xff]  ;;  %v24273_v32 = vld [vmem:[#allocation46_spill] sm:$0xff] }
 0x885   : > { %24251 = vst [vmem:[#allocation178_spill] sm:$0xff] %v18236_v46  ;;  %24254 = vst [vmem:[#allocation160_spill] sm:$0xff] %v18244_v24  ;;  %v18266_v22 = vpack.i.bf16 %v18225_v47, %v18222_v26  ;;  %v24261_v56 = vcombine.low %v24105_v8, %v24260_v30  ;;  %v18277_v13 = vpack.i.bf16 %v18239_v25, %v18236_v46  ;;  %v8197_v60 = vrot.slane %v24263_v52, 1 }
 0x886   : > { %24255 = vst [vmem:[#allocation77_spill] sm:$0xff] %v18247_v20  ;;  %24256 = vst [vmem:[#allocation50_spill] sm:$0xff] %v18251_v18  ;;  %12099 = vrot.lane.b32.xlu1 %v12093_v11, %s12983_s19  ;;  %v18281_v59 = vpack.i.bf16 %v18247_v20, %v18244_v24  ;;  %v18286_v47 = vpack.i.bf16 %v18231_v23, %v18228_v29  ;;  %v18290_v8 = vpack.i.bf16 %v18254_v44, %v18251_v18  ;;  %v24264_v11 = vld [vmem:[#allocation129_spill] sm:$0xff]  ;;  %v18310_v18 = vpop.permute.xlu0 %11949  ;;  %v24270_v24 = vld [vmem:[#allocation84_spill] sm:$0xff] }
 0x887   : > { %24257 = vst [vmem:[#allocation137_spill] sm:$0xff] %v18254_v44  ;;  %24258 = vst [vmem:[#allocation51_spill] sm:$0xff] %v18258_v15  ;;  %v7307_v42 = vrot.slane %v24261_v56, %v23926_v28  ;;  %v7300_v30 = vrot.slane %v24264_v11, %v23926_v28  ;;  %v18297_v56 = vsel %vm1260_vm9, %v8197_v60, %v8198_v31  ;;  %v24266_v26 = vrot.slane %v17850_v62, 1  ;;  %v24274_v11 = vld [vmem:[#allocation18_spill] sm:$0xff] }
 0x888   : > { %24259 = vst [vmem:[#allocation114_spill] sm:$0xff] %v18268_v49  ;;  %24262 = vst [vmem:[#allocation167_spill] sm:$0xff] %v18281_v59  ;;  %12139 = vrot.lane.b32.xlu0 %v18147_v4, %s12983_s19  ;;  %v24275_v46 = vcombine.low %v24273_v32, %v24274_v11  ;;  %v24276_v29 = vld [vmem:[#allocation166_spill] sm:$0xff]  ;;  %v24277_v23 = vrot.slane %v17811_v40, 7  ;;  %v18349_v40 = vpack.i.bf16 %v17944_v57, %v17935_v38  ;;  %v8405_v15 = vrot.slane %v24263_v52, 2  ;;  %v24431_v57 = vld [vmem:[#allocation41_spill] sm:$0xff] }
 0x889   : > { %24265 = vst [vmem:[#allocation129_spill] sm:$0xff] %v18297_v56  ;;  %v18302_v20 = vsel %vm1260_vm9, %v8198_v31, %v24266_v26  ;;  %v7308_v44 = vcombine.low %v7300_v30, %v7307_v42  ;;  %24268 = vst [vmem:[#allocation184_spill] sm:$0xff] %v18310_v18  ;;  %v18317_v31 = vpop.permute.xlu1 %11954  ;;  %v24271_v42 = vld [vmem:[#allocation87_spill] sm:$0xff]  ;;  %v8376_v18 = vrot.slane %v17966_v16, 2 }
 0x88a   : > { %24267 = vst [vmem:[#allocation183_spill] sm:$0xff] %v18302_v20  ;;  %12114 = vrot.lane.b32.xlu1 %v18277_v13, %s12981_s17  ;;  %v18314_v60 = vpack.i.bf16 %v18302_v20, %v18297_v56  ;;  %24269 = vst [vmem:[#allocation185_spill] sm:$0xff] %v18317_v31  ;;  %v24272_v30 = vcombine.low %v24270_v24, %v24271_v42  ;;  %v7324_v4 = vrot.slane %v24275_v46, %v23926_v28  ;;  %v24278_v42 = vld [vmem:[#allocation40_spill] sm:$0xff] }
 0x88b   : > { %v7937_v20 = vrot.slane %v7308_v44, 7  ;;  %v8101_v24 = vsel %vm264_vm0, %v24277_v23, %v24276_v29  ;;  %v24280_v29 = vld [vmem:[#allocation35_spill] sm:$0xff]  ;;  %v8370_v44 = vrot.slane %v17728_v45, 2  ;;  %v24283_v46 = vld [vmem:[#allocation144_spill] sm:$0xff]  ;;  %v8374_v31 = vrot.slane %v17846_v51, 2 }
 0x88c   : > { %v7290_v50 = vrot.slane %v24272_v30, %v23926_v28  ;;  %12154 = vrot.lane.b32.xlu0 %v18163_v7, %s12981_s17  ;;  %v24279_v30 = vrot.slane %v24278_v42, %v23926_v28  ;;  %v24281_v23 = vrot.slane %v24280_v29, %v23926_v28  ;;  %v8202_v7 = vrot.slane %v17894_v48, 1  ;;  %v24284_v56 = vld [vmem:[#allocation168_spill] sm:$0xff] }
 0x88d   : > { %v8204_v11 = vrot.slane %v8101_v24, 1  ;;  %v24285_v26 = vcombine.low %v24283_v46, %v24284_v56  ;;  %v8372_v29 = vrot.slane %v17835_v35, 2 }
 0x88e   : > { %v18339_v32 = vcombine.low %v24279_v30, %v7324_v4  ;;  %12119 = vrot.lane.b32.xlu1 %v18281_v59, %s12983_s19  ;;  %v7291_v4 = vcombine.low %v24281_v23, %v7290_v50  ;;  %v18357_v30 = vpop.permute.xlu0 %11959  ;;  %v8406_v50 = vrot.slane %v17774_v17, 2  ;;  %v8369_v23 = vrot.slane %v17731_v0, 2 }
 0x88f   : > { %24282 = vst [vmem:[#allocation84_spill] sm:$0xff] %v18357_v30  ;;  %v7341_v25 = vrot.slane %v24285_v26, %v23926_v28  ;;  %v24287_v26 = vld [vmem:[#allocation130_spill] sm:$0xff]  ;;  %v18389_v16 = vsel %vm1260_vm9, %v8202_v7, %v8204_v11  ;;  %v8412_v11 = vrot.slane %v8101_v24, 2  ;;  %v24327_v30 = vld [vmem:[#allocation136_spill] sm:$0xff] }
 0x890   : > { %v7939_v42 = vrot.slane %v18339_v32, 7  ;;  %12159 = vrot.lane.b32.xlu0 %v18151_v33, %s12983_s19  ;;  %v8408_v32 = vrot.slane %v17850_v62, 2  ;;  %v7334_v46 = vrot.slane %v24287_v26, %v23926_v28  ;;  %v7936_v49 = vrot.slane %v7291_v4, 7  ;;  %24290 = vst [vmem:[#allocation18_spill] sm:$0xff] %v18389_v16 }
 0x891   : > { %v18392_v26 = vsel %vm1277_vm14, %v8369_v23, %v8370_v44  ;;  %v18398_v4 = vsel %vm1277_vm14, %v8370_v44, %v8372_v29  ;;  %v18401_v52 = vsel %vm1277_vm14, %v8405_v15, %v8406_v50  ;;  %v24298_v44 = vld [vmem:[#allocation110_spill] sm:$0xff] }
 0x892   : > { %v18369_v33 = vsel %vm264_vm0, %v7937_v20, %v7939_v42  ;;  %12129 = vrot.lane.b32.xlu1 %v17860_v6, %s12986_s11  ;;  %v24288_v6 = vrot.slane %v17850_v62, 1  ;;  %24291 = vst [vmem:[#allocation166_spill] sm:$0xff] %v18392_v26  ;;  %v7342_v35 = vcombine.low %v7334_v46, %v7341_v25  ;;  %v18395_v17 = vsel %vm264_vm0, %v7936_v49, %v7937_v20 }
 0x893   : > { %24286 = vst [vmem:[#allocation87_spill] sm:$0xff] %v18369_v33  ;;  %24292 = vst [vmem:[#allocation40_spill] sm:$0xff] %v18395_v17  ;;  %v18404_v62 = vsel %vm1277_vm14, %v8406_v50, %v8408_v32  ;;  %v18412_v25 = vsel %vm1277_vm14, %v8374_v31, %v8376_v18  ;;  %v8410_v20 = vrot.slane %v17894_v48, 2  ;;  %v18417_v23 = vsel %vm264_vm0, %v24298_v44, %v7936_v49  ;;  %v18425_v50 = vpop.permute.xlu1 %11964  ;;  %v24303_v48 = vld [vmem:[#allocation145_spill] sm:$0xff] }
 0x894   : > { %12184 = vrot.lane.b32.xlu0 %v18208_v12, %s12981_s17  ;;  %v18386_v59 = vsel %vm1260_vm9, %v24288_v6, %v8202_v7  ;;  %24293 = vst [vmem:[#allocation35_spill] sm:$0xff] %v18398_v4  ;;  %24294 = vst [vmem:[#allocation144_spill] sm:$0xff] %v18401_v52  ;;  %v18409_v7 = vsel %vm1277_vm14, %v8372_v29, %v8374_v31  ;;  %v18429_v18 = vpack.i.bf16 %v18395_v17, %v18417_v23  ;;  %v24302_v6 = vld [vmem:[#allocation134_spill] sm:$0xff] }
 0x895   : > { %24289 = vst [vmem:[#allocation46_spill] sm:$0xff] %v18386_v59  ;;  %24295 = vst [vmem:[#allocation168_spill] sm:$0xff] %v18404_v62  ;;  %v18421_v15 = vpack.i.bf16 %v18389_v16, %v18386_v59  ;;  %v18433_v31 = vpack.i.bf16 %v18398_v4, %v18392_v26  ;;  %v18437_v49 = vpack.i.bf16 %v18176_v34, %v17889_v54  ;;  %v7941_v24 = vrot.slane %v7342_v35, 7  ;;  %v24304_v4 = vld [vmem:[#allocation169_spill] sm:$0xff] }
 0x896   : > { %12144 = vrot.lane.b32.xlu1 %v18212_v27, %s12986_s11  ;;  %24296 = vst [vmem:[#allocation130_spill] sm:$0xff] %v18409_v7  ;;  %24297 = vst [vmem:[#allocation186_spill] sm:$0xff] %v18412_v25  ;;  %v18441_v29 = vpack.i.bf16 %v18404_v62, %v18401_v52  ;;  %v18445_v46 = vpack.i.bf16 %v18412_v25, %v18409_v7  ;;  %v7368_v44 = vrot.slane %v24302_v6, %v23926_v28  ;;  %v24316_v52 = vld [vmem:[#allocation101_spill] sm:$0xff] }
 0x897   : > { %24299 = vst [vmem:[#allocation110_spill] sm:$0xff] %v18417_v23  ;;  %24300 = vst [vmem:[#allocation187_spill] sm:$0xff] %v18425_v50  ;;  %v24305_v26 = vcombine.low %v24303_v48, %v24304_v4  ;;  %v18456_v35 = vsel %vm1277_vm14, %v8408_v32, %v8410_v20  ;;  %v18459_v62 = vsel %vm1277_vm14, %v8410_v20, %v8412_v11  ;;  %v8207_v25 = vrot.slane %v18395_v17, 1  ;;  %v24309_v32 = vld [vmem:[#allocation86_spill] sm:$0xff]  ;;  %v24326_v34 = vld [vmem:[#allocation89_spill] sm:$0xff] }
 0x898   : > { %12189 = vrot.lane.b32.xlu0 %v18262_v5, %s12981_s17  ;;  %24301 = vst [vmem:[#allocation188_spill] sm:$0xff] %v18437_v49  ;;  %24306 = vst [vmem:[#allocation134_spill] sm:$0xff] %v18456_v35  ;;  %v8209_v7 = vrot.slane %v18369_v33, 1  ;;  %v18468_v48 = vsel %vm264_vm0, %v7939_v42, %v7941_v24  ;;  %v18477_v11 = vpack.i.bf16 %v18459_v62, %v18456_v35  ;;  %v24321_v35 = vld [vmem:[#allocation170_spill] sm:$0xff] }
 0x899   : > { %v7375_v59 = vrot.slane %v24305_v26, %v23926_v28  ;;  %24307 = vst [vmem:[#allocation145_spill] sm:$0xff] %v18459_v62  ;;  %24308 = vst [vmem:[#allocation169_spill] sm:$0xff] %v18468_v48  ;;  %v24310_v26 = vld [vmem:[#allocation19_spill] sm:$0xff] }
 0x89a   : > { %12149 = vrot.lane.b32.xlu1 %v18030_v43, %s12986_s11  ;;  %v8206_v43 = vrot.slane %v18417_v23, 1  ;;  %v24311_v4 = vcombine.low %v24309_v32, %v24310_v26  ;;  %v18487_v6 = vsel %vm1260_vm9, %v8207_v25, %v8209_v7  ;;  %v24314_v32 = vcombine.low %v24179_v41, %v24178_v55  ;;  %v24323_v41 = vld [vmem:[#allocation125_spill] sm:$0xff] }
 0x89b   : > { %v7376_v16 = vcombine.low %v7368_v44, %v7375_v59  ;;  %v8102_v59 = vsel %vm264_vm0, %v7941_v24, %v24284_v56  ;;  %24313 = vst [vmem:[#allocation19_spill] sm:$0xff] %v18487_v6  ;;  %v24318_v24 = vrot.slane %v17997_v3, 7  ;;  %v7640_v55 = vrot.slane %v24323_v41, %v23926_v28  ;;  %v24329_v41 = vld [vmem:[#allocation64_spill] sm:$0xff] }
 0x89c   : > { %12194 = vrot.lane.b32.xlu0 %v18266_v22, %s12981_s17  ;;  %v7358_v20 = vrot.slane %v24311_v4, %v23926_v28  ;;  %v18484_v42 = vsel %vm1260_vm9, %v8206_v43, %v8207_v25  ;;  %v7647_v26 = vrot.slane %v24314_v32, %v23926_v28  ;;  %v24315_v4 = vld [vmem:[#allocation138_spill] sm:$0xff]  ;;  %v24330_v38 = vrot.slane %v24329_v41, %v23926_v28 }
 0x89d   : > { %v7944_v44 = vrot.slane %v7376_v16, 7  ;;  %24312 = vst [vmem:[#allocation86_spill] sm:$0xff] %v18484_v42  ;;  %v24317_v62 = vcombine.low %v24315_v4, %v24316_v52  ;;  %v8211_v16 = vrot.slane %v18468_v48, 1  ;;  %v24320_v25 = vld [vmem:[#allocation146_spill] sm:$0xff]  ;;  %v8213_v52 = vrot.slane %v8102_v59, 1 }
 0x89e   : > { %12164 = vrot.lane.b32.xlu1 %v18286_v47, %s12986_s11  ;;  %v24322_v50 = vcombine.low %v24320_v25, %v24321_v35  ;;  %v7648_v51 = vcombine.low %v7640_v55, %v7647_v26  ;;  %v18524_v25 = vpack.i.bf16 %v18487_v6, %v18484_v42  ;;  %v8419_v42 = vrot.slane %v18468_v48, 2  ;;  %v24334_v6 = vld [vmem:[#allocation99_spill] sm:$0xff] }
 0x89f   : > { %v7664_v56 = vrot.slane %v24317_v62, %v23926_v28  ;;  %v18501_v43 = vsel %vm264_vm0, %v7944_v44, %v24318_v24  ;;  %v24324_v62 = vld [vmem:[#allocation44_spill] sm:$0xff]  ;;  %v7402_v24 = vrot.slane %v24326_v34, %v23926_v28  ;;  %v8415_v34 = vrot.slane %v18395_v17, 2 }
 0x8a0   : > { %24319 = vst [vmem:[#allocation138_spill] sm:$0xff] %v18501_v43  ;;  %v7409_v54 = vrot.slane %v24322_v50, %v23926_v28  ;;  %12199 = vrot.lane.b32.xlu0 %v18290_v8, %s12981_s17  ;;  %v24325_v32 = vrot.slane %v24324_v62, %v23926_v28  ;;  %v18520_v50 = vpack.i.bf16 %v18468_v48, %v18369_v33 }
 0x8a1   : > { %v18529_v62 = vcombine.low %v24330_v38, %v7664_v56  ;;  %v18538_v55 = vsel %vm1260_vm9, %v8211_v16, %v8213_v52  ;;  %v8414_v38 = vrot.slane %v18417_v23, 2  ;;  %v8421_v56 = vrot.slane %v8102_v59, 2  ;;  %v24348_v23 = vld [vmem:[#allocation60_spill] sm:$0xff] }
 0x8a2   : > { %v7359_v4 = vcombine.low %v24325_v32, %v7358_v20  ;;  %12169 = vrot.lane.b32.xlu1 %v24327_v30, %s12986_s11  ;;  %24328 = vst [vmem:[#allocation101_spill] sm:$0xff] %v18520_v50  ;;  %v18532_v20 = vsel %vm1260_vm9, %v8209_v7, %v8211_v16  ;;  %v7410_v26 = vcombine.low %v7402_v24, %v7409_v54  ;;  %v7972_v30 = vrot.slane %v7648_v51, 7  ;;  %v24333_v7 = vld [vmem:[#allocation61_spill] sm:$0xff] }
 0x8a3   : > { %24331 = vst [vmem:[#allocation146_spill] sm:$0xff] %v18532_v20  ;;  %24332 = vst [vmem:[#allocation170_spill] sm:$0xff] %v18538_v55  ;;  %v8417_v32 = vrot.slane %v18369_v33, 2  ;;  %v24335_v17 = vcombine.low %v24333_v7, %v24334_v6  ;;  %v7974_v51 = vrot.slane %v18529_v62, 7  ;;  %v18555_v52 = vpack.i.bf16 %v18538_v55, %v18532_v20  ;;  %v24345_v7 = vld [vmem:[#allocation177_spill] sm:$0xff]  ;;  %v24350_v55 = vld [vmem:[#allocation14_spill] sm:$0xff] }
 0x8a4   : > { %12209 = vrot.lane.b32.xlu0 %v17909_v36, %s12986_s11  ;;  %v7943_v41 = vrot.slane %v7359_v4, 7  ;;  %v24336_v36 = vld [vmem:[#allocation33_spill] sm:$0xff]  ;;  %v18558_v4 = vsel %vm1277_vm14, %v8414_v38, %v8415_v34  ;;  %v7948_v59 = vrot.slane %v7410_v26, 7  ;;  %v24344_v38 = vld [vmem:[#allocation158_spill] sm:$0xff]  ;;  %v18580_v33 = vsel %vm1277_vm14, %v8419_v42, %v8421_v56 }
 0x8a5   : > { %v7630_v54 = vrot.slane %v24335_v17, %v23926_v28  ;;  %24338 = vst [vmem:[#allocation44_spill] sm:$0xff] %v18558_v4  ;;  %v18561_v24 = vsel %vm264_vm0, %v7972_v30, %v7974_v51  ;;  %v18566_v17 = vsel %vm1277_vm14, %v8415_v34, %v8417_v32  ;;  %v18569_v6 = vsel %vm1277_vm14, %v8417_v32, %v8419_v42 }
 0x8a6   : > { %12174 = vrot.lane.b32.xlu1 %v24336_v36, %s12986_s11  ;;  %v18551_v16 = vsel %vm264_vm0, %v7943_v41, %v7944_v44  ;;  %24339 = vst [vmem:[#allocation89_spill] sm:$0xff] %v18561_v24  ;;  %24340 = vst [vmem:[#allocation136_spill] sm:$0xff] %v18566_v17  ;;  %v24342_v44 = vld [vmem:[#allocation111_spill] sm:$0xff]  ;;  %v24346_v26 = vcombine.low %v24344_v38, %v24345_v7  ;;  %v8218_v34 = vrot.slane %v18501_v43, 1  ;;  %v24352_v56 = vrot.slane %v17997_v3, 7 }
 0x8a7   : > { %24337 = vst [vmem:[#allocation125_spill] sm:$0xff] %v18551_v16  ;;  %24341 = vst [vmem:[#allocation64_spill] sm:$0xff] %v18569_v6  ;;  %v18573_v62 = vsel %vm264_vm0, %v24342_v44, %v7943_v41  ;;  %v8216_v48 = vrot.slane %v18551_v16, 1  ;;  %v24349_v32 = vrot.slane %v24348_v23, %v23926_v28  ;;  %v24351_v41 = vld [vmem:[#allocation25_spill] sm:$0xff]  ;;  %v18593_v38 = vpack.i.bf16 %v18566_v17, %v18558_v4 }
 0x8a8   : > { %12224 = vrot.lane.b32.xlu0 %v18314_v60, %s12986_s11  ;;  %24343 = vst [vmem:[#allocation61_spill] sm:$0xff] %v18573_v62  ;;  %v7681_v36 = vrot.slane %v24346_v26, %v23926_v28  ;;  %24347 = vst [vmem:[#allocation99_spill] sm:$0xff] %v18580_v33  ;;  %v7674_v44 = vrot.slane %v24351_v41, %v23926_v28  ;;  %v8215_v42 = vrot.slane %v18573_v62, 1  ;;  %v24356_v41 = vld [vmem:[#allocation171_spill] sm:$0xff] }
 0x8a9   : > { %v7631_v20 = vcombine.low %v24349_v32, %v7630_v54  ;;  %v18599_v26 = vsel %vm264_vm0, %v24352_v56, %v7948_v59  ;;  %v18603_v23 = vsel %vm264_vm0, %v7948_v59, %v24321_v35  ;;  %v24355_v32 = vld [vmem:[#allocation148_spill] sm:$0xff]  ;;  %v18621_v35 = vsel %vm1260_vm9, %v8216_v48, %v8218_v34 }
 0x8aa   : > { %12179 = vrot.lane.b32.xlu1 %v24350_v55, %s12986_s11  ;;  %24353 = vst [vmem:[#allocation33_spill] sm:$0xff] %v18599_v26  ;;  %v18609_v55 = vpack.i.bf16 %v18580_v33, %v18569_v6  ;;  %v18611_v54 = vcombine.low %v7674_v44, %v7681_v36  ;;  %v24357_v3 = vcombine.low %v24355_v32, %v24356_v41  ;;  %24359 = vst [vmem:[#allocation177_spill] sm:$0xff] %v18621_v35  ;;  %v24369_v33 = vld [vmem:[#allocation147_spill] sm:$0xff] }
 0x8ab   : > { %v18618_v56 = vsel %vm1260_vm9, %v8215_v42, %v8216_v48  ;;  %v7971_v59 = vrot.slane %v7631_v20, 7  ;;  %v8220_v36 = vrot.slane %v18599_v26, 1  ;;  %v8222_v44 = vrot.slane %v18603_v23, 1  ;;  %v24372_v20 = vld [vmem:[#allocation149_spill] sm:$0xff] }
 0x8ac   : > { %12229 = vrot.lane.b32.xlu0 %v18266_v22, %s12983_s19  ;;  %24354 = vst [vmem:[#allocation111_spill] sm:$0xff] %v18609_v55  ;;  %v7443_v17 = vrot.slane %v24357_v3, %v23926_v28  ;;  %24358 = vst [vmem:[#allocation158_spill] sm:$0xff] %v18618_v56  ;;  %v24360_v22 = vld [vmem:[#allocation20_spill] sm:$0xff]  ;;  %v18631_v32 = vpack.i.bf16 %v18551_v16, %v18573_v62  ;;  %v18639_v48 = vpack.i.bf16 %v18621_v35, %v18618_v56  ;;  %v24371_v35 = vld [vmem:[#allocation54_spill] sm:$0xff] }
 0x8ad   : > { %v7436_v4 = vrot.slane %v24360_v22, %v23926_v28  ;;  %v24364_v41 = vcombine.low %v24183_v2, %v24182_v63  ;;  %v24368_v22 = vld [vmem:[#allocation34_spill] sm:$0xff]  ;;  %v18668_v63 = vsel %vm1260_vm9, %v8218_v34, %v8220_v36  ;;  %v18671_v2 = vsel %vm1260_vm9, %v8220_v36, %v8222_v44 }
 0x8ae   : > { %12204 = vrot.lane.b32.xlu1 %v18208_v12, %s12983_s19  ;;  %24361 = vst [vmem:[#allocation60_spill] sm:$0xff] %v18631_v32  ;;  %24362 = vst [vmem:[#allocation14_spill] sm:$0xff] %v18639_v48  ;;  %v18643_v12 = vpack.i.bf16 %v18599_v26, %v18501_v43  ;;  %v24370_v6 = vcombine.low %v24368_v22, %v24369_v33  ;;  %v8423_v33 = vrot.slane %v18573_v62, 2  ;;  %v8426_v36 = vrot.slane %v18501_v43, 2  ;;  %v24381_v22 = vld [vmem:[#allocation48_spill] sm:$0xff]  ;;  %v18741_v43 = vpop.permute.xlu0 %11969 }
 0x8af   : > { %v18633_v42 = vcombine.low %v7436_v4, %v7443_v17  ;;  %v7715_v3 = vrot.slane %v24364_v41, %v23926_v28  ;;  %v18651_v4 = vsel %vm264_vm0, %v7971_v59, %v7972_v30  ;;  %v24366_v17 = vld [vmem:[#allocation115_spill] sm:$0xff]  ;;  %24374 = vst [vmem:[#allocation20_spill] sm:$0xff] %v18668_v63  ;;  %v24376_v30 = vld [vmem:[#allocation90_spill] sm:$0xff] }
 0x8b0   : > { %12239 = vrot.lane.b32.xlu0 %v18286_v47, %s12981_s17  ;;  %24363 = vst [vmem:[#allocation25_spill] sm:$0xff] %v18643_v12  ;;  %24365 = vst [vmem:[#allocation148_spill] sm:$0xff] %v18651_v4  ;;  %v18655_v47 = vsel %vm264_vm0, %v24366_v17, %v7971_v59  ;;  %v7426_v56 = vrot.slane %v24370_v6, %v23926_v28  ;;  %v24373_v12 = vcombine.low %v24371_v35, %v24372_v20  ;;  %v24377_v35 = vld [vmem:[#allocation52_spill] sm:$0xff] }
 0x8b1   : > { %24367 = vst [vmem:[#allocation171_spill] sm:$0xff] %v18655_v47  ;;  %24375 = vst [vmem:[#allocation115_spill] sm:$0xff] %v18671_v2  ;;  %v7708_v59 = vrot.slane %v24376_v30, %v23926_v28  ;;  %v8424_v6 = vrot.slane %v18551_v16, 2  ;;  %v7951_v41 = vrot.slane %v18633_v42, 7  ;;  %v8460_v44 = vrot.slane %v18651_v4, 2 }
 0x8b2   : > { %v7460_v48 = vrot.slane %v24373_v12, %v23926_v28  ;;  %12214 = vrot.lane.b32.xlu1 %v18212_v27, %s12981_s17  ;;  %v24378_v12 = vrot.slane %v24377_v35, %v23926_v28  ;;  %v24379_v27 = vrot.slane %v18611_v54, 7  ;;  %v24382_v30 = vrot.slane %v24381_v22, %v23926_v28 }
 0x8b3   : > { %v7716_v17 = vcombine.low %v7708_v59, %v7715_v3  ;;  %v8459_v3 = vrot.slane %v18655_v47, 2  ;;  %v24387_v59 = vld [vmem:[#allocation66_spill] sm:$0xff] }
 0x8b4   : > { %v18681_v20 = vcombine.low %v24378_v12, %v7460_v48  ;;  %12244 = vrot.lane.b32.xlu0 %v18290_v8, %s12983_s19  ;;  %v18688_v34 = vsel %vm264_vm0, %v7974_v51, %v24379_v27  ;;  %v7427_v48 = vcombine.low %v24382_v30, %v7426_v56  ;;  %v24383_v8 = vld [vmem:[#allocation139_spill] sm:$0xff]  ;;  %v24384_v12 = vld [vmem:[#allocation22_spill] sm:$0xff]  ;;  %v18705_v51 = vpack.i.bf16 %v18651_v4, %v18655_v47 }
 0x8b5   : > { %24380 = vst [vmem:[#allocation34_spill] sm:$0xff] %v18688_v34  ;;  %v24385_v62 = vcombine.low %v24383_v8, %v24384_v12  ;;  %v24388_v27 = vld [vmem:[#allocation103_spill] sm:$0xff]  ;;  %v18714_v30 = vpack.i.bf16 %v18671_v2, %v18668_v63  ;;  %v18731_v12 = vsel %vm1277_vm14, %v8424_v6, %v8426_v36  ;;  %24398 = vst [vmem:[#allocation22_spill] sm:$0xff] %v18741_v43 }
 0x8b6   : > { %v22988_v35 = vrot.slane %v18681_v20, 7  ;;  %12219 = vrot.lane.b32.xlu1 %v18262_v5, %s12983_s19  ;;  %24386 = vst [vmem:[#allocation147_spill] sm:$0xff] %v18705_v51  ;;  %v24389_v56 = vcombine.low %v24387_v59, %v24388_v27  ;;  %v18721_v5 = vsel %vm1277_vm14, %v8423_v33, %v8424_v6  ;;  %24394 = vst [vmem:[#allocation48_spill] sm:$0xff] %v18731_v12  ;;  %v7979_v27 = vrot.slane %v7716_v17, 7 }
 0x8b7   : > { %v7732_v16 = vrot.slane %v24385_v62, %v23926_v28  ;;  %24390 = vst [vmem:[#allocation54_spill] sm:$0xff] %v18714_v30  ;;  %v18718_v62 = vpack.i.bf16 %v18688_v34, %v18561_v24  ;;  %24392 = vst [vmem:[#allocation90_spill] sm:$0xff] %v18721_v5  ;;  %v18734_v59 = vsel %vm1277_vm14, %v8459_v3, %v8460_v44  ;;  %v7950_v63 = vrot.slane %v7427_v48, 7  ;;  %v24402_v3 = vld [vmem:[#allocation172_spill] sm:$0xff] }
 0x8b8   : > { %v7698_v22 = vrot.slane %v24389_v56, %v23926_v28  ;;  %v18726_v8 = vsel %vm264_vm0, %v7951_v41, %v22988_v35  ;;  %12259 = vrot.lane.b32.xlu0 %v18349_v40, %s12983_s19  ;;  %24395 = vst [vmem:[#allocation139_spill] sm:$0xff] %v18734_v59  ;;  %v24396_v56 = vld [vmem:[#allocation69_spill] sm:$0xff]  ;;  %v24399_v35 = vrot.slane %v18561_v24, 2  ;;  %v8252_v6 = vrot.slane %v18651_v4, 1 }
 0x8b9   : > { %24391 = vst [vmem:[#allocation149_spill] sm:$0xff] %v18718_v62  ;;  %24393 = vst [vmem:[#allocation52_spill] sm:$0xff] %v18726_v8  ;;  %v24397_v42 = vrot.slane %v24396_v56, %v23926_v28  ;;  %v24401_v62 = vld [vmem:[#allocation150_spill] sm:$0xff]  ;;  %v24405_v56 = vld [vmem:[#allocation163_spill] sm:$0xff]  ;;  %v8428_v4 = vrot.slane %v18599_v26, 2 }
 0x8ba   : > { %v18746_v2 = vsel %vm1277_vm14, %v8460_v44, %v24399_v35  ;;  %v24403_v51 = vcombine.low %v24401_v62, %v24402_v3  ;;  %12234 = vrot.lane.b32.xlu1 %v18071_v9, %s12986_s11  ;;  %v24406_v30 = vrot.slane %v24405_v56, %v23926_v28  ;;  %v8251_v35 = vrot.slane %v18655_v47, 1  ;;  %v24417_v47 = vld [vmem:[#allocation152_spill] sm:$0xff] }
 0x8bb   : > { %v18739_v33 = vcombine.low %v24397_v42, %v7732_v16  ;;  %24400 = vst [vmem:[#allocation66_spill] sm:$0xff] %v18746_v2  ;;  %v18755_v16 = vpop.permute.xlu1 %11974  ;;  %v8430_v62 = vrot.slane %v18603_v23, 2  ;;  %v18772_v56 = vpack.i.bf16 %v18731_v12, %v18721_v5  ;;  %v18811_v5 = vsel %vm264_vm0, %v7950_v63, %v7951_v41  ;;  %v24425_v41 = vld [vmem:[#allocation179_spill] sm:$0xff] }
 0x8bc   : > { %v7477_v17 = vrot.slane %v24403_v51, %v23926_v28  ;;  %24404 = vst [vmem:[#allocation103_spill] sm:$0xff] %v18755_v16  ;;  %v7699_v44 = vcombine.low %v24406_v30, %v7698_v22  ;;  %v24407_v51 = vld [vmem:[#allocation88_spill] sm:$0xff]  ;;  %12264 = vrot.lane.b32.xlu0 %v18429_v18, %s12983_s19  ;;  %v18776_v22 = vpack.i.bf16 %v18746_v2, %v18734_v59  ;;  %v24414_v2 = vrot.slane %v18561_v24, 1 }
 0x8bd   : > { %v22999_v48 = vrot.slane %v18739_v33, 7  ;;  %v7470_v32 = vrot.slane %v24407_v51, %v23926_v28  ;;  %24408 = vst [vmem:[#allocation69_spill] sm:$0xff] %v18772_v56  ;;  %v24411_v51 = vld [vmem:[#allocation112_spill] sm:$0xff]  ;;  %v18789_v9 = vsel %vm1260_vm9, %v8251_v35, %v8252_v6  ;;  %v24416_v30 = vrot.slane %v18611_v54, 7  ;;  %v24418_v35 = vld [vmem:[#allocation173_spill] sm:$0xff]  ;;  %24420 = vst [vmem:[#allocation152_spill] sm:$0xff] %v18811_v5 }
 0x8be   : > { %24409 = vst [vmem:[#allocation150_spill] sm:$0xff] %v18776_v22  ;;  %v18786_v42 = vsel %vm264_vm0, %v24411_v51, %v7950_v63  ;;  %24413 = vst [vmem:[#allocation88_spill] sm:$0xff] %v18789_v9  ;;  %12249 = vrot.lane.b32.xlu1 %v18421_v15, %s12986_s11  ;;  %v18798_v59 = vsel %vm1260_vm9, %v8252_v6, %v24414_v2  ;;  %v24419_v12 = vcombine.low %v24417_v47, %v24418_v35  ;;  %v24423_v54 = vld [vmem:[#allocation27_spill] sm:$0xff] }
 0x8bf   : > { %v18781_v23 = vsel %vm264_vm0, %v7979_v27, %v22999_v48  ;;  %24412 = vst [vmem:[#allocation163_spill] sm:$0xff] %v18786_v42  ;;  %v18791_v26 = vcombine.low %v7470_v32, %v7477_v17  ;;  %24415 = vst [vmem:[#allocation112_spill] sm:$0xff] %v18798_v59  ;;  %v7978_v48 = vrot.slane %v7699_v44, 7  ;;  %v8107_v51 = vsel %vm264_vm0, %v24416_v30, %v24345_v7  ;;  %v18808_v17 = vpop.permute.xlu0 %11979  ;;  %v24428_v44 = vld [vmem:[#allocation180_spill] sm:$0xff] }
 0x8c0   : > { %24410 = vst [vmem:[#allocation172_spill] sm:$0xff] %v18781_v23  ;;  %v7511_v32 = vrot.slane %v24419_v12, %v23926_v28  ;;  %v18814_v22 = vsel %vm1277_vm14, %v8426_v36, %v8428_v4  ;;  %v18817_v2 = vsel %vm1277_vm14, %v8428_v4, %v8430_v62  ;;  %v7504_v6 = vrot.slane %v24423_v54, %v23926_v28  ;;  %v18823_v7 = vpop.permute.xlu1 %11984  ;;  %v24427_v4 = vld [vmem:[#allocation141_spill] sm:$0xff] }
 0x8c1   : > { %24421 = vst [vmem:[#allocation173_spill] sm:$0xff] %v18814_v22  ;;  %24422 = vst [vmem:[#allocation189_spill] sm:$0xff] %v18817_v2  ;;  %12279 = vrot.lane.b32.xlu0 %v18433_v31, %s12981_s17  ;;  %v18826_v47 = vsel %vm264_vm0, %v7978_v48, %v7979_v27  ;;  %v8464_v63 = vrot.slane %v18688_v34, 2  ;;  %v24426_v36 = vcombine.low %v24185_v19, %v24425_v41  ;;  %v8466_v54 = vrot.slane %v8107_v51, 2  ;;  %v24430_v27 = vld [vmem:[#allocation91_spill] sm:$0xff] }
 0x8c2   : > { %24424 = vst [vmem:[#allocation27_spill] sm:$0xff] %v18826_v47  ;;  %v24429_v62 = vcombine.low %v24427_v4, %v24428_v44  ;;  %v18838_v56 = vcombine.low %v7504_v6, %v7511_v32  ;;  %v7776_v55 = vrot.slane %v24430_v27, %v23926_v28  ;;  %12254 = vrot.lane.b32.xlu1 %v24431_v57, %s12986_s11  ;;  %v24435_v4 = vld [vmem:[#allocation72_spill] sm:$0xff]  ;;  %v24436_v32 = vld [vmem:[#allocation135_spill] sm:$0xff]  ;;  %v24437_v6 = vld [vmem:[#allocation153_spill] sm:$0xff] }
 0x8c3   : > { %v7749_v12 = vrot.slane %v24426_v36, %v23926_v28  ;;  %v18846_v19 = vpack.i.bf16 %v18798_v59, %v18789_v9  ;;  %v24433_v36 = vld [vmem:[#allocation116_spill] sm:$0xff]  ;;  %v7742_v44 = vrot.slane %v24435_v4, %v23926_v28  ;;  %v18860_v27 = vpack.i.bf16 %v18811_v5, %v18786_v42  ;;  %v24445_v9 = vld [vmem:[#allocation58_spill] sm:$0xff] }
 0x8c4   : > { %v7783_v30 = vrot.slane %v24429_v62, %v23926_v28  ;;  %v18850_v1 = vsel %vm264_vm0, %v24433_v36, %v7978_v48  ;;  %v24438_v62 = vcombine.low %v24436_v32, %v24437_v6  ;;  %v18868_v48 = vpack.i.bf16 %v18817_v2, %v18814_v22  ;;  %v18872_v4 = vpop.permute.xlu1 %11989  ;;  %v24447_v2 = vld [vmem:[#allocation142_spill] sm:$0xff] }
 0x8c5   : > { %24432 = vst [vmem:[#allocation179_spill] sm:$0xff] %v18846_v19  ;;  %24434 = vst [vmem:[#allocation141_spill] sm:$0xff] %v18850_v1  ;;  %v18864_v57 = vpack.i.bf16 %v18826_v47, %v18850_v1  ;;  %12284 = vrot.lane.b32.xlu0 %v18441_v29, %s12981_s17  ;;  %v24443_v32 = vrot.slane %v18561_v24, 2  ;;  %v24446_v59 = vrot.slane %v24445_v9, %v23926_v28  ;;  %v18891_v19 = vpop.permute.xlu0 %12009 }
 0x8c6   : > { %v7528_v35 = vrot.slane %v24438_v62, %v23926_v28  ;;  %24439 = vst [vmem:[#allocation180_spill] sm:$0xff] %v18860_v27  ;;  %24441 = vst [vmem:[#allocation41_spill] sm:$0xff] %v18868_v48  ;;  %v7784_v36 = vcombine.low %v7776_v55, %v7783_v30  ;;  %v18879_v62 = vcombine.low %v7742_v44, %v7749_v12  ;;  %v24448_v55 = vld [vmem:[#allocation106_spill] sm:$0xff]  ;;  %v24451_v27 = vrot.slane %v18791_v26, 7 }
 0x8c7   : > { %24440 = vst [vmem:[#allocation91_spill] sm:$0xff] %v18864_v57  ;;  %24442 = vst [vmem:[#allocation116_spill] sm:$0xff] %v18872_v4  ;;  %v18877_v6 = vsel %vm1277_vm14, %v24443_v32, %v8464_v63  ;;  %v24449_v30 = vcombine.low %v24447_v2, %v24448_v55  ;;  %v24452_v32 = vrot.slane %v18681_v20, 7  ;;  %v18901_v9 = vsel %vm1277_vm14, %v8464_v63, %v8466_v54  ;;  %v24455_v55 = vld [vmem:[#allocation57_spill] sm:$0xff] }
 0x8c8   : > { %24444 = vst [vmem:[#allocation72_spill] sm:$0xff] %v18877_v6  ;;  %v18884_v57 = vcombine.low %v24446_v59, %v7528_v35  ;;  %24450 = vst [vmem:[#allocation135_spill] sm:$0xff] %v18891_v19  ;;  %v7958_v59 = vrot.slane %v18838_v56, 7  ;;  %12269 = vrot.lane.b32.xlu1 %v18437_v49, %s12983_s19  ;;  %v8256_v2 = vrot.slane %v18688_v34, 1  ;;  %v8258_v44 = vrot.slane %v8107_v51, 1  ;;  %v24461_v35 = vld [vmem:[#allocation71_spill] sm:$0xff]  ;;  %v18924_v51 = vpop.permute.xlu1 %11994 }
 0x8c9   : > { %v7800_v22 = vrot.slane %v24449_v30, %v23926_v28  ;;  %v18898_v12 = vsel %vm264_vm0, %v24452_v32, %v24451_v27  ;;  %24454 = vst [vmem:[#allocation58_spill] sm:$0xff] %v18901_v9  ;;  %v24456_v30 = vld [vmem:[#allocation151_spill] sm:$0xff]  ;;  %v24458_v27 = vld [vmem:[#allocation70_spill] sm:$0xff]  ;;  %v7986_v43 = vrot.slane %v7784_v36, 7  ;;  %v24462_v16 = vrot.slane %v24461_v35, %v23926_v28  ;;  %12289 = vrot.lane.b32.xlu0 %v18445_v46, %s12981_s17  ;;  %v24475_v34 = vld [vmem:[#allocation65_spill] sm:$0xff] }
 0x8ca   : > { %24453 = vst [vmem:[#allocation153_spill] sm:$0xff] %v18898_v12  ;;  %v24457_v20 = vcombine.low %v24455_v55, %v24456_v30  ;;  %v24459_v32 = vld [vmem:[#allocation23_spill] sm:$0xff]  ;;  %v7960_v56 = vrot.slane %v18884_v57, 7  ;;  %v18928_v55 = vpack.i.bf16 %v18898_v12, %v18726_v8  ;;  %v18932_v30 = vpack.i.bf16 %v18901_v9, %v18877_v6  ;;  %v24465_v36 = vld [vmem:[#allocation154_spill] sm:$0xff] }
 0x8cb   : > { %v24460_v63 = vcombine.low %v24458_v27, %v24459_v32  ;;  %v18920_v21 = vcombine.low %v24462_v16, %v7800_v22  ;;  %v24466_v35 = vld [vmem:[#allocation174_spill] sm:$0xff]  ;;  %v18943_v32 = vpop.permute.xlu0 %12014  ;;  %v18953_v57 = vsel %vm1260_vm9, %v8256_v2, %v8258_v44  ;;  %v24483_v44 = vld [vmem:[#allocation181_spill] sm:$0xff] }
 0x8cc   : > { %v7494_v48 = vrot.slane %v24457_v20, %v23926_v28  ;;  %24463 = vst [vmem:[#allocation142_spill] sm:$0xff] %v18928_v55  ;;  %24464 = vst [vmem:[#allocation106_spill] sm:$0xff] %v18932_v30  ;;  %v24467_v16 = vcombine.low %v24465_v36, %v24466_v35  ;;  %v18940_v20 = vsel %vm264_vm0, %v7958_v59, %v7960_v56  ;;  %12274 = vrot.lane.b32.xlu1 %v18520_v50, %s12983_s19  ;;  %v24473_v36 = vld [vmem:[#allocation55_spill] sm:$0xff]  ;;  %v24479_v55 = vld [vmem:[#allocation164_spill] sm:$0xff] }
 0x8cd   : > { %v7766_v54 = vrot.slane %v24460_v63, %v23926_v28  ;;  %24468 = vst [vmem:[#allocation57_spill] sm:$0xff] %v18940_v20  ;;  %v7988_v27 = vrot.slane %v18920_v21, 7  ;;  %24469 = vst [vmem:[#allocation151_spill] sm:$0xff] %v18943_v32  ;;  %v24470_v63 = vrot.slane %v18561_v24, 1  ;;  %v24476_v35 = vrot.slane %v24475_v34, 7  ;;  %12294 = vrot.lane.b32.xlu0 %v18477_v11, %s12981_s17 }
 0x8ce   : > { %v7545_v22 = vrot.slane %v24467_v16, %v23926_v28  ;;  %24472 = vst [vmem:[#allocation23_spill] sm:$0xff] %v18953_v57  ;;  %v24474_v16 = vrot.slane %v24473_v36, %v23926_v28  ;;  %v24477_v21 = vrot.slane %v18025_v14, 7  ;;  %v24480_v24 = vrot.slane %v24479_v55, %v23926_v28 }
 0x8cf   : > { %v18950_v9 = vsel %vm1260_vm9, %v24470_v63, %v8256_v2  ;;  %v24481_v63 = vld [vmem:[#allocation26_spill] sm:$0xff]  ;;  %v24482_v2 = vld [vmem:[#allocation161_spill] sm:$0xff] }
 0x8d0   : > { %24471 = vst [vmem:[#allocation70_spill] sm:$0xff] %v18950_v9  ;;  %v7495_v6 = vcombine.low %v24474_v16, %v7494_v48  ;;  %v18963_v30 = vsel %vm264_vm0, %v24477_v21, %v24476_v35  ;;  %v7767_v50 = vcombine.low %v24480_v24, %v7766_v54  ;;  %v7538_v49 = vrot.slane %v24481_v63, %v23926_v28  ;;  %v18979_v35 = vpop.permute.xlu1 %11999  ;;  %v24490_v63 = vld [vmem:[#allocation38_spill] sm:$0xff] }
 0x8d1   : > { %24478 = vst [vmem:[#allocation71_spill] sm:$0xff] %v18963_v30  ;;  %v24484_v37 = vcombine.low %v24482_v2, %v24483_v44  ;;  %v18975_v48 = vsel %vm264_vm0, %v7986_v43, %v7988_v27  ;;  %v24486_v16 = vrot.slane %v18879_v62, 7  ;;  %v24487_v24 = vrot.slane %v18739_v33, 7  ;;  %v18994_v44 = vpop.permute.xlu0 %12029  ;;  %12299 = vrot.lane.b32.xlu1 %v18433_v31, %s12983_s19 }
 0x8d2   : > { %24485 = vst [vmem:[#allocation154_spill] sm:$0xff] %v18975_v48  ;;  %v7810_v2 = vrot.slane %v24490_v63, %v23926_v28  ;;  %v19000_v33 = vpack.i.bf16 %v18953_v57, %v18950_v9  ;;  %v7985_v55 = vrot.slane %v7767_v50, 7  ;;  %v24494_v63 = vld [vmem:[#allocation127_spill] sm:$0xff]  ;;  %v24498_v50 = vrot.slane %v18025_v14, 7 }
 0x8d3   : > { %v7817_v36 = vrot.slane %v24484_v37, %v23926_v28  ;;  %v18986_v54 = vsel %vm264_vm0, %v24487_v24, %v24486_v16  ;;  %v18990_v37 = vcombine.low %v7538_v49, %v7545_v22  ;;  %v7957_v16 = vrot.slane %v7495_v6, 7  ;;  %12304 = vrot.lane.b32.xlu0 %v24494_v63, %s12986_s11 }
 0x8d4   : > { %24488 = vst [vmem:[#allocation55_spill] sm:$0xff] %v18986_v54  ;;  %24491 = vst [vmem:[#allocation164_spill] sm:$0xff] %v19000_v33  ;;  %v19004_v24 = vpack.i.bf16 %v18986_v54, %v18781_v23  ;;  %v19011_v21 = vpop.permute.xlu1 %12004  ;;  %v19018_v6 = vsel %vm264_vm0, %v7985_v55, %v7986_v43  ;;  %v24501_v43 = vld [vmem:[#allocation113_spill] sm:$0xff]  ;;  %v8242_v14 = vrot.slane %v18124_v39, 1 }
 0x8d5   : > { %24489 = vst [vmem:[#allocation65_spill] sm:$0xff] %v18990_v37  ;;  %v19006_v49 = vcombine.low %v7810_v2, %v7817_v36  ;;  %24495 = vst [vmem:[#allocation38_spill] sm:$0xff] %v19011_v21  ;;  %v19014_v31 = vsel %vm264_vm0, %v7957_v16, %v7958_v59  ;;  %v23039_v9 = vrot.slane %v18990_v37, 7  ;;  %v24499_v36 = vrot.slane %v18002_v10, 7  ;;  %v19030_v59 = vpop.permute.xlu0 %12039  ;;  %12309 = vrot.lane.b32.xlu1 %v18314_v60, %s12981_s17 }
 0x8d6   : > { %24492 = vst [vmem:[#allocation26_spill] sm:$0xff] %v19004_v24  ;;  %24496 = vst [vmem:[#allocation127_spill] sm:$0xff] %v19014_v31  ;;  %v19036_v57 = vsel %vm264_vm0, %v24501_v43, %v7957_v16  ;;  %v8435_v37 = vrot.slane %v18726_v8, 2 }
 0x8d7   : > { %24493 = vst [vmem:[#allocation161_spill] sm:$0xff] %v19006_v49  ;;  %24497 = vst [vmem:[#allocation190_spill] sm:$0xff] %v19018_v6  ;;  %v19026_v2 = vsel %vm264_vm0, %v24499_v36, %v24498_v50  ;;  %v19041_v10 = vpack.i.bf16 %v19014_v31, %v19036_v57  ;;  %v24504_v50 = vld [vmem:[#allocation117_spill] sm:$0xff]  ;;  %12319 = vrot.lane.b32.xlu0 %v18524_v25, %s12986_s11  ;;  %v19064_v22 = vsel %vm264_vm0, %v7960_v56, %v23039_v9 }
 0x8d8   : > { %24500 = vst [vmem:[#allocation191_spill] sm:$0xff] %v19026_v2  ;;  %24502 = vst [vmem:[#allocation113_spill] sm:$0xff] %v19036_v57  ;;  %v19045_v36 = vsel %vm264_vm0, %v24504_v50, %v7985_v55  ;;  %v19051_v60 = vpop.permute.xlu1 %12019  ;;  %v8243_v43 = vrot.slane %v19026_v2, 1  ;;  %v24509_v55 = vld [vmem:[#allocation121_spill] sm:$0xff]  ;;  %v12032_v56 = vunpack.i.h.bf16 %v18994_v44  ;;  %v24511_v9 = vrot.slane %v19006_v49, 7 }
 0x8d9   : > { %24503 = vst [vmem:[#allocation192_spill] sm:$0xff] %v19041_v10  ;;  %24505 = vst [vmem:[#allocation117_spill] sm:$0xff] %v19045_v36  ;;  %v19055_v16 = vpack.i.bf16 %v19018_v6, %v19045_v36  ;;  %v19068_v33 = vpop.permute.xlu0 %12049  ;;  %12314 = vrot.lane.b32.xlu1 %v18441_v29, %s12983_s19  ;;  %v24510_v50 = vcombine.high %v24509_v55, %v24509_v55  ;;  %v8433_v10 = vrot.slane %v18811_v5, 2  ;;  %v12031_v29 = vunpack.i.l.bf16 %v18994_v44 }
 0x8da   : > { %24507 = vst [vmem:[#allocation194_spill] sm:$0xff] %v19064_v22  ;;  %v19083_v63 = vsel %vm264_vm0, %v7988_v27, %v24511_v9  ;;  %v19094_v55 = vpack.i.bf16 %v19064_v22, %v18940_v20  ;;  %v24515_v9 = vrot.slane %v18963_v30, 1  ;;  %v8432_v44 = vrot.slane %v18786_v42, 2 }
 0x8db   : > { %24506 = vst [vmem:[#allocation193_spill] sm:$0xff] %v19055_v16  ;;  %v24508_v16 = vld [vmem:[#allocation3_spill] sm:$0xff]  ;;  %24512 = vst [vmem:[#allocation121_spill] sm:$0xff] %v19083_v63  ;;  %12324 = vrot.lane.b32.xlu0 %v18445_v46, %s12983_s19  ;;  %v8451_v46 = vrot.slane %v19026_v2, 2 }
 0x8dc   : > { %v19077_v6 = vrot.slane %v24510_v50, %v24508_v16  ;;  %v19090_v32 = vpop.permute.xlu1 %12024  ;;  %24513 = vst [vmem:[#allocation195_spill] sm:$0xff] %v19094_v55  ;;  %v19097_v50 = vsel %vm1260_vm9, %v8242_v14, %v8243_v43  ;;  %v19102_v27 = vsel %vm1260_vm9, %v8243_v43, %v24515_v9  ;;  %v19115_v14 = vpack.i.bf16 %v19083_v63, %v18975_v48  ;;  %v24518_v9 = vld [vmem:[#allocation156_spill] sm:$0xff]  ;;  %v24519_v55 = vld [vmem:[#allocation6_spill] sm:$0xff]  ;;  %v24523_v63 = vld [vmem:[#allocation7_spill] sm:$0xff] }
 0x8dd   : > { %24514 = vst [vmem:[#allocation196_spill] sm:$0xff] %v19097_v50  ;;  %24516 = vst [vmem:[#allocation197_spill] sm:$0xff] %v19102_v27  ;;  %v19109_v22 = vpop.permute.xlu0 %12059  ;;  %12329 = vrot.lane.b32.xlu1 %v18277_v13, %s12986_s11  ;;  %v8450_v43 = vrot.slane %v18124_v39, 2  ;;  %v9712_v2 = vsel %vm420_vm13, %v24519_v55, %v12032_v56  ;;  %v19124_v36 = vpack.i.bf16 %v19102_v27, %v19097_v50  ;;  %v8469_v56 = vrot.slane %v18826_v47, 2 }
 0x8de   : > { %24517 = vst [vmem:[#allocation198_spill] sm:$0xff] %v19115_v14  ;;  %v7599_v16 = vcombine.low %v24518_v9, %v19077_v6  ;;  %v19127_v49 = vsel %vm1277_vm14, %v8432_v44, %v8433_v10  ;;  %v19130_v13 = vsel %vm1277_vm14, %v8433_v10, %v8435_v37  ;;  %v9711_v14 = vsel %vm420_vm13, %v24523_v63, %v12031_v29 }
 0x8df   : > { %24520 = vst [vmem:[#allocation156_spill] sm:$0xff] %v19124_v36  ;;  %24521 = vst [vmem:[#allocation6_spill] sm:$0xff] %v19127_v49  ;;  %12334 = vrot.lane.b32.xlu0 %v18421_v15, %s12981_s17  ;;  %v8471_v55 = vrot.slane %v18781_v23, 2  ;;  %v24524_v50 = vrot.slane %v18791_v26, 7  ;;  %v19149_v63 = vsel %vm1277_vm14, %v8450_v43, %v8451_v46  ;;  %v24526_v15 = vrot.slane %v18963_v30, 2 }
 0x8e0   : > { %24522 = vst [vmem:[#allocation199_spill] sm:$0xff] %v19130_v13  ;;  %v19136_v9 = vpop.permute.xlu1 %12034  ;;  %24525 = vst [vmem:[#allocation7_spill] sm:$0xff] %v19149_v63  ;;  %v12042_v39 = vunpack.i.h.bf16 %v19030_v59  ;;  %v12041_v36 = vunpack.i.l.bf16 %v19030_v59  ;;  %v19164_v43 = vpack.i.bf16 %v19130_v13, %v19127_v49  ;;  %v8437_v10 = vrot.slane %v18898_v12, 2 }
 0x8e1   : > { %v19144_v44 = vsel %vm264_vm0, %v24524_v50, %v24402_v3  ;;  %v19154_v29 = vsel %vm1277_vm14, %v8451_v46, %v24526_v15  ;;  %v12065_v26 = vpop.permute.xlu0 %12064  ;;  %12344 = vrot.lane.b32.xlu1 %v18555_v52, %s12986_s11  ;;  %v8468_v3 = vrot.slane %v18850_v1, 2  ;;  %v7613_v50 = vrot.slane %v7599_v16, %v23926_v28 }
 0x8e2   : > { %24527 = vst [vmem:[#allocation200_spill] sm:$0xff] %v19154_v29  ;;  %24528 = vst [vmem:[#allocation201_spill] sm:$0xff] %v19164_v43  ;;  %v8439_v46 = vrot.slane %v19144_v44, 2  ;;  %v24529_v15 = vrot.slane %v18879_v62, 7  ;;  %v12052_v27 = vunpack.i.h.bf16 %v19068_v33  ;;  %v19181_v13 = vpack.i.bf16 %v19154_v29, %v19149_v63 }
 0x8e3   : > { %12339 = vrot.lane.b32.xlu0 %v18477_v11, %s12983_s19  ;;  %v19184_v49 = vsel %vm1277_vm14, %v8468_v3, %v8469_v56  ;;  %v19187_v43 = vsel %vm1277_vm14, %v8469_v56, %v8471_v55  ;;  %v12067_v62 = vunpack.i.h.bf16 %v12065_v26  ;;  %v8473_v48 = vrot.slane %v18986_v54, 2  ;;  %v24535_v56 = vld [vmem:[#allocation32_spill] sm:$0xff] }
 0x8e4   : > { %v19172_v59 = vsel %vm264_vm0, %v24529_v15, %v24425_v41  ;;  %v19177_v16 = vpop.permute.xlu1 %12044  ;;  %24530 = vst [vmem:[#allocation202_spill] sm:$0xff] %v19181_v13  ;;  %24531 = vst [vmem:[#allocation203_spill] sm:$0xff] %v19184_v49  ;;  %v12051_v41 = vunpack.i.l.bf16 %v19068_v33  ;;  %v12066_v15 = vunpack.i.l.bf16 %v12065_v26  ;;  %v19193_v11 = vsel %vm420_vm13, %v17468_v61, %v12042_v39 }
 0x8e5   : > { %24532 = vst [vmem:[#allocation204_spill] sm:$0xff] %v19187_v43  ;;  %24533 = vst [vmem:[#allocation205_spill] sm:$0xff] %v19193_v11  ;;  %v19197_v29 = vsel %vm420_vm13, %v17471_v53, %v12041_v36  ;;  %v12080_v63 = vpop.permute.xlu0 %12079  ;;  %12349 = vrot.lane.b32.xlu1 %v18349_v40, %s12986_s11  ;;  %v24536_v3 = vrot.slane %v24535_v56, %v23926_v28  ;;  %v8475_v26 = vrot.slane %v19172_v59, 2  ;;  %v12062_v13 = vunpack.i.h.bf16 %v19109_v22  ;;  %v24554_v28 = vld [vmem:[#allocation22_spill] sm:$0xff] }
 0x8e6   : > { %24534 = vst [vmem:[#allocation206_spill] sm:$0xff] %v19197_v29  ;;  %v12061_v21 = vunpack.i.l.bf16 %v19109_v22  ;;  %v19208_v61 = vsel %vm1277_vm14, %v8435_v37, %v8437_v10  ;;  %v19211_v53 = vsel %vm1277_vm14, %v8437_v10, %v8439_v46  ;;  %v19216_v40 = vsel %vm420_vm13, %v17728_v45, %v12052_v27  ;;  %v24587_v29 = vld [vmem:[#allocation84_spill] sm:$0xff] }
 0x8e7   : > { %v7614_v33 = vcombine.low %v24536_v3, %v7613_v50  ;;  %24537 = vst [vmem:[#allocation32_spill] sm:$0xff] %v19208_v61  ;;  %24538 = vst [vmem:[#allocation207_spill] sm:$0xff] %v19211_v53  ;;  %12374 = vrot.lane.b32.xlu0 %v18083_v58, %s12981_s17  ;;  %v19224_v22 = vpack.i.bf16 %v19187_v43, %v19184_v49  ;;  %v19229_v10 = vsel %vm420_vm13, %v17731_v0, %v12051_v41  ;;  %v24545_v41 = vld [vmem:[#allocation98_spill] sm:$0xff] }
 0x8e8   : > { %24539 = vst [vmem:[#allocation208_spill] sm:$0xff] %v19216_v40  ;;  %v19220_v36 = vpop.permute.xlu1 %12054  ;;  %24541 = vst [vmem:[#allocation210_spill] sm:$0xff] %v19229_v10  ;;  %v19232_v50 = vsel %vm428_vm3, %v9711_v14, %v12066_v15  ;;  %v19235_v45 = vsel %vm428_vm3, %v9712_v2, %v12067_v62  ;;  %v19238_v58 = vsel %vm1277_vm14, %v8471_v55, %v8473_v48  ;;  %v24546_v62 = vld [vmem:[#allocation96_spill] sm:$0xff]  ;;  %v12037_v15 = vunpack.i.h.bf16 %v19136_v9  ;;  %v24559_v10 = vld [vmem:[#allocation107_spill] sm:$0xff] }
 0x8e9   : > { %24540 = vst [vmem:[#allocation209_spill] sm:$0xff] %v19224_v22  ;;  %24542 = vst [vmem:[#allocation211_spill] sm:$0xff] %v19238_v58  ;;  %v12085_v27 = vpop.permute.xlu0 %12084  ;;  %12354 = vrot.lane.b32.xlu1 %v18429_v18, %s12986_s11  ;;  %v7969_v46 = vrot.slane %v7614_v33, 7  ;;  %v19244_v56 = vpack.i.bf16 %v19211_v53, %v19208_v61  ;;  %v19247_v0 = vsel %vm1277_vm14, %v8473_v48, %v8475_v26  ;;  %v12036_v18 = vunpack.i.l.bf16 %v19136_v9  ;;  %v24547_v48 = vld [vmem:[#allocation31_spill] sm:$0xff]  ;;  %v24551_v61 = vld [vmem:[#allocation56_spill] sm:$0xff] }
 0x8ea   : > { %24544 = vst [vmem:[#allocation213_spill] sm:$0xff] %v19247_v0  ;;  %v9964_v2 = vsel %vm420_vm13, %v24545_v41, %v12062_v13  ;;  %v9963_v55 = vsel %vm420_vm13, %v24546_v62, %v12061_v21  ;;  %v12082_v3 = vunpack.i.h.bf16 %v12080_v63  ;;  %v12081_v33 = vunpack.i.l.bf16 %v12080_v63  ;;  %v24550_v63 = vld [vmem:[#allocation188_spill] sm:$0xff] }
 0x8eb   : > { %24543 = vst [vmem:[#allocation212_spill] sm:$0xff] %v19244_v56  ;;  %12379 = vrot.lane.b32.xlu0 %v18593_v38, %s12981_s17  ;;  %v24548_v26 = vunpack.i.l.bf16 %v24547_v48  ;;  %v24549_v13 = vunpack.i.h.bf16 %v24547_v48  ;;  %v12087_v41 = vunpack.i.h.bf16 %v12085_v27  ;;  %v12086_v62 = vunpack.i.l.bf16 %v12085_v27  ;;  %v24557_v22 = vld [vmem:[#allocation24_spill] sm:$0xff] }
 0x8ec   : > { %v12070_v39 = vpop.permute.xlu1 %12069  ;;  %v24552_v43 = vunpack.i.l.bf16 %v24551_v61  ;;  %v24555_v56 = vunpack.i.l.bf16 %v24554_v28  ;;  %v24558_v40 = vld [vmem:[#allocation68_spill] sm:$0xff]  ;;  %v24588_v20 = vunpack.i.l.bf16 %v24587_v29 }
 0x8ed   : > { %v9839_v37 = vsel %vm721_vm1, %v19232_v50, %v24548_v26  ;;  %v9840_v21 = vsel %vm721_vm1, %v19235_v45, %v24549_v13  ;;  %v12072_v14 = vunpack.i.h.bf16 %v12070_v39  ;;  %v12071_v9 = vunpack.i.l.bf16 %v12070_v39  ;;  %v19266_v53 = vpop.permute.xlu0 %12104  ;;  %12359 = vrot.lane.b32.xlu1 %v24550_v63, %s12986_s11 }
 0x8ee   : > { %v10027_v49 = vsel %vm428_vm3, %v9963_v55, %v24552_v43  ;;  %v24553_v26 = vunpack.i.h.bf16 %v24551_v61  ;;  %v19279_v13 = vsel %vm428_vm3, %v9963_v55, %v24555_v56  ;;  %v24556_v39 = vunpack.i.h.bf16 %v24554_v28  ;;  %v24560_v55 = vld [vmem:[#allocation105_spill] sm:$0xff] }
 0x8ef   : > { %v19288_v63 = vsel %vm420_vm13, %v24557_v22, %v12037_v15  ;;  %v19292_v43 = vsel %vm420_vm13, %v24558_v40, %v12036_v18  ;;  %v10151_v61 = vsel %vm721_vm1, %v10027_v49, %v12071_v9  ;;  %v9724_v56 = vsel %vm420_vm13, %v24559_v10, %v12082_v3  ;;  %v24564_v10 = vld [vmem:[#allocation101_spill] sm:$0xff] }
 0x8f0   : > { %v10028_v48 = vsel %vm428_vm3, %v9964_v2, %v24553_v26  ;;  %v19284_v27 = vsel %vm428_vm3, %v9964_v2, %v24556_v39  ;;  %v9723_v11 = vsel %vm420_vm13, %v24560_v55, %v12081_v33  ;;  %v24561_v2 = vld [vmem:[#allocation167_spill] sm:$0xff]  ;;  %v12075_v39 = vpop.permute.xlu1 %12074  ;;  %v19302_v15 = vpack.c.bf16 %v9840_v21, %v9839_v37 }
 0x8f1   : > { %v10152_v26 = vsel %vm721_vm1, %v10028_v48, %v12072_v14  ;;  %12384 = vrot.lane.b32.xlu0 %v24561_v2, %s12981_s17  ;;  %v19305_v40 = vsel %vm428_vm3, %v9723_v11, %v12086_v62  ;;  %v19308_v49 = vsel %vm428_vm3, %v9724_v56, %v12087_v41  ;;  %v12077_v14 = vunpack.i.h.bf16 %v12075_v39  ;;  %v12110_v9 = vpop.permute.xlu0 %12109  ;;  %12364 = vrot.lane.b32.xlu1 %v24564_v10, %s12986_s11  ;;  %v24568_v41 = vld [vmem:[#allocation124_spill] sm:$0xff]  ;;  %v24569_v48 = vld [vmem:[#allocation133_spill] sm:$0xff]  ;;  %v24572_v55 = vld [vmem:[#allocation51_spill] sm:$0xff] }
 0x8f2   : > { %v10276_v22 = vpack.c.bf16 %v10152_v26, %v10151_v61  ;;  %24562 = vst [vmem:[#allocation98_spill] sm:$0xff] %v19305_v40  ;;  %24563 = vst [vmem:[#allocation96_spill] sm:$0xff] %v19308_v49  ;;  %v12076_v18 = vunpack.i.l.bf16 %v12075_v39  ;;  %v24565_v3 = vrot.slane %v24475_v34, 7  ;;  %v19319_v37 = vsel %vm264_vm0, %v7969_v46, %v19077_v6 }
 0x8f3   : > { %v19323_v11 = vpack.i.bf16 %v19247_v0, %v19238_v58  ;;  %v19328_v62 = vsel %vm420_vm13, %v24568_v41, %v12077_v14  ;;  %v12112_v61 = vunpack.i.h.bf16 %v12110_v9  ;;  %v12111_v26 = vunpack.i.l.bf16 %v12110_v9  ;;  %v24581_v0 = vld [vmem:[#allocation60_spill] sm:$0xff]  ;;  %v24582_v58 = vld [vmem:[#allocation114_spill] sm:$0xff] }
 0x8f4   : > { %10549 = vmatprep.subr.bf16.mxu1 %v10276_v22  ;;  %v19315_v33 = vsel %vm264_vm0, %v24565_v3, %v7969_v46  ;;  %v19332_v34 = vsel %vm420_vm13, %v24569_v48, %v12076_v18  ;;  %v24570_v46 = vld [vmem:[#allocation111_spill] sm:$0xff]  ;;  %v19338_v56 = vpop.permute.xlu1 %12089  ;;  %v24573_v2 = vunpack.i.l.bf16 %v24572_v55  ;;  %v24574_v22 = vunpack.i.h.bf16 %v24572_v55  ;;  %v24579_v48 = vld [vmem:[#allocation82_spill] sm:$0xff] }
 0x8f5   : > { %24566 = vst [vmem:[#allocation31_spill] sm:$0xff] %v19315_v33  ;;  %24567 = vst [vmem:[#allocation188_spill] sm:$0xff] %v19323_v11  ;;  %10550 = vmatpush1.bf16.xpose.msra.mxu1 %v19302_v15  ;;  %12389 = vrot.lane.b32.xlu0 %v24570_v46, %s12981_s17  ;;  %v24575_v18 = vrot.slane %v18811_v5, 1  ;;  %v24576_v9 = vrot.slane %v18786_v42, 1  ;;  %v24578_v3 = vld [vmem:[#allocation143_spill] sm:$0xff]  ;;  %v19361_v21 = vsel %vm420_vm13, %v24579_v48, %v12111_v26  ;;  %v8249_v48 = vrot.slane %v19319_v37, 1 }
 0x8f6   : > { %24571 = vst [vmem:[#allocation56_spill] sm:$0xff] %v19338_v56  ;;  %v9867_v39 = vsel %vm721_vm1, %v19305_v40, %v24573_v2  ;;  %v9868_v14 = vsel %vm721_vm1, %v19308_v49, %v24574_v22  ;;  %v19357_v41 = vsel %vm420_vm13, %v24578_v3, %v12112_v61  ;;  %v19365_v22 = vpop.permute.xlu0 %12124  ;;  %12369 = vrot.lane.b32.xlu1 %v24581_v0, %s12983_s19  ;;  %v24584_v61 = vunpack.i.h.bf16 %v24582_v58 }
 0x8f7   : > { %v19353_v10 = vsel %vm1260_vm9, %v24576_v9, %v24575_v18  ;;  %24580 = vst [vmem:[#allocation24_spill] sm:$0xff] %v19365_v22  ;;  %v24583_v18 = vunpack.i.l.bf16 %v24582_v58  ;;  %v8247_v3 = vrot.slane %v19315_v33, 1  ;;  %v24585_v42 = vunpack.i.l.bf16 %v19338_v56 }
 0x8f8   : > { %24577 = vst [vmem:[#allocation22_spill] sm:$0xff] %v19353_v10  ;;  %v10060_v26 = vsel %vm428_vm3, %v19328_v62, %v24584_v61  ;;  %v24586_v40 = vunpack.i.h.bf16 %v19338_v56  ;;  %v12095_v61 = vpop.permute.xlu1 %12094  ;;  %v10315_v11 = vpack.c.bf16 %v9868_v14, %v9867_v39  ;;  %v10061_v2 = vsel %vm428_vm3, %v19361_v21, %v24588_v20  ;;  %v24592_v20 = vld [vmem:[#allocation14_spill] sm:$0xff] }
 0x8f9   : > { %v10059_v9 = vsel %vm428_vm3, %v19332_v34, %v24583_v18  ;;  %12394 = vrot.lane.b32.xlu0 %v18524_v25, %s12981_s17  ;;  %v24589_v6 = vunpack.i.h.bf16 %v24587_v29  ;;  %v12096_v56 = vunpack.i.l.bf16 %v12095_v61  ;;  %v24591_v25 = vunpack.i.h.bf16 %v19365_v22 }
 0x8fa   : > { %v10183_v49 = vsel %vm721_vm1, %v10059_v9, %v24585_v42  ;;  %v10184_v18 = vsel %vm721_vm1, %v10060_v26, %v24586_v40  ;;  %v12097_v9 = vunpack.i.h.bf16 %v12095_v61  ;;  %v24590_v40 = vunpack.i.l.bf16 %v19365_v22  ;;  %v12135_v14 = vpop.permute.xlu0 %12134  ;;  %12404 = vrot.lane.b32.xlu1 %v24592_v20, %s12986_s11  ;;  %v24595_v22 = vld [vmem:[#allocation62_spill] sm:$0xff]  ;;  %v24603_v20 = vld [vmem:[#allocation25_spill] sm:$0xff] }
 0x8fb   : > { %v10316_v58 = vpack.c.bf16 %v10184_v18, %v10183_v49  ;;  %v10062_v42 = vsel %vm428_vm3, %v19357_v41, %v24589_v6  ;;  %v12046_v39 = vunpack.i.l.bf16 %v19177_v16  ;;  %v24593_v6 = vunpack.i.l.bf16 %v18872_v4 }
 0x8fc   : > { %v10185_v26 = vsel %vm721_vm1, %v10061_v2, %v24590_v40  ;;  %v10186_v49 = vsel %vm721_vm1, %v10062_v42, %v24591_v25  ;;  %v24594_v2 = vunpack.i.h.bf16 %v18872_v4  ;;  %v12057_v42 = vunpack.i.h.bf16 %v19220_v36 }
 0x8fd   : > { %10635 = vmatprep.subr.bf16.mxu0 %v10316_v58  ;;  %v10318_v18 = vpack.c.bf16 %v10186_v49, %v10185_v26  ;;  %v19410_v61 = vsel %vm721_vm1, %v19232_v50, %v24593_v6  ;;  %v12056_v25 = vunpack.i.l.bf16 %v19220_v36  ;;  %v19422_v58 = vsel %vm420_vm13, %v24595_v22, %v12097_v9  ;;  %v24596_v26 = vld [vmem:[#allocation36_spill] sm:$0xff]  ;;  %12399 = vrot.lane.b32.xlu0 %v18593_v38, %s12983_s19 }
 0x8fe   : > { %v19416_v40 = vsel %vm721_vm1, %v19235_v45, %v24594_v2  ;;  %v19426_v49 = vsel %vm420_vm13, %v24596_v26, %v12096_v56  ;;  %10636 = vmatpush1.bf16.xpose.msra.mxu0 %v10315_v11  ;;  %v12107_v50 = vunpack.i.h.bf16 %v19266_v53  ;;  %v12106_v6 = vunpack.i.l.bf16 %v19266_v53  ;;  %v12100_v45 = vpop.permute.xlu1 %12099  ;;  %v24597_v2 = vld [vmem:[#allocation184_spill] sm:$0xff]  ;;  %v12140_v4 = vpop.permute.xlu0 %12139  ;;  %12409 = vrot.lane.b32.xlu1 %v24603_v20, %s12983_s19 }
 0x8ff   : > { %10637 = vmatprep.subr.bf16.mxu0 %v10318_v18  ;;  %v24598_v36 = vunpack.i.l.bf16 %v24597_v2  ;;  %v24599_v9 = vunpack.i.h.bf16 %v24597_v2  ;;  %v12102_v11 = vunpack.i.h.bf16 %v12100_v45  ;;  %v12101_v26 = vunpack.i.l.bf16 %v12100_v45 }
 0x900   : > { %v24600_v29 = vrot.slane %v18963_v30, 1  ;;  %v19446_v38 = vsel %vm1260_vm9, %v8247_v3, %v8249_v48  ;;  %v12137_v18 = vunpack.i.h.bf16 %v12135_v14  ;;  %v12136_v45 = vunpack.i.l.bf16 %v12135_v14 }
 0x901   : > { %v10029_v22 = vsel %vm428_vm3, %v19426_v49, %v24598_v36  ;;  %v10030_v56 = vsel %vm428_vm3, %v19422_v58, %v24599_v9  ;;  %24602 = vst [vmem:[#allocation107_spill] sm:$0xff] %v19446_v38  ;;  %v8455_v9 = vrot.slane %v19315_v33, 2  ;;  %v19455_v19 = vsel %vm428_vm3, %v19288_v63, %v12102_v11  ;;  %12414 = vrot.lane.b32.xlu0 %v18555_v52, %s12981_s17  ;;  %v24608_v11 = vld [vmem:[#allocation59_spill] sm:$0xff] }
 0x902   : > { %v19443_v53 = vsel %vm1260_vm9, %v24600_v29, %v8247_v3  ;;  %v10153_v2 = vsel %vm721_vm1, %v10029_v22, %v12106_v6  ;;  %v10154_v36 = vsel %vm721_vm1, %v10030_v56, %v12107_v50  ;;  %v19459_v29 = vsel %vm428_vm3, %v19292_v43, %v12101_v26  ;;  %v12115_v24 = vpop.permute.xlu1 %12114  ;;  %v24604_v22 = vld [vmem:[#allocation185_spill] sm:$0xff]  ;;  %v24609_v26 = vld [vmem:[#allocation95_spill] sm:$0xff] }
 0x903   : > { %24601 = vst [vmem:[#allocation68_spill] sm:$0xff] %v19443_v53  ;;  %v12142_v3 = vunpack.i.h.bf16 %v12140_v4  ;;  %v12141_v48 = vunpack.i.l.bf16 %v12140_v4  ;;  %v10279_v6 = vpack.c.bf16 %v10154_v36, %v10153_v2  ;;  %v24605_v50 = vunpack.i.l.bf16 %v24604_v22  ;;  %v24616_v2 = vld [vmem:[#allocation16_spill] sm:$0xff] }
 0x904   : > { %v24606_v56 = vunpack.i.h.bf16 %v24604_v22  ;;  %v24607_v43 = vunpack.i.h.bf16 %v19177_v16  ;;  %v19479_v52 = vsel %vm420_vm13, %v24609_v26, %v12046_v39  ;;  %v8457_v36 = vrot.slane %v19319_v37, 2  ;;  %v19488_v16 = vpop.permute.xlu0 %12154  ;;  %v24614_v39 = vld [vmem:[#allocation37_spill] sm:$0xff] }
 0x905   : > { %v9841_v14 = vsel %vm721_vm1, %v19459_v29, %v24605_v50  ;;  %24610 = vst [vmem:[#allocation105_spill] sm:$0xff] %v19479_v52  ;;  %v24611_v50 = vld [vmem:[#allocation102_spill] sm:$0xff]  ;;  %v12116_v33 = vunpack.i.l.bf16 %v12115_v24  ;;  %10551 = vmatprep.subr.bf16.mxu1 %v10279_v6  ;;  %v19496_v26 = vsel %vm420_vm13, %v24614_v39, %v12056_v25  ;;  %v9728_v37 = vsel %vm420_vm13, %v24616_v2, %v12137_v18  ;;  %v24617_v52 = vld [vmem:[#allocation17_spill] sm:$0xff] }
 0x906   : > { %v9842_v63 = vsel %vm721_vm1, %v19455_v19, %v24606_v56  ;;  %v19475_v4 = vsel %vm420_vm13, %v24608_v11, %v24607_v43  ;;  %v19486_v22 = vsel %vm420_vm13, %v24611_v50, %v12057_v42  ;;  %v12117_v56 = vunpack.i.h.bf16 %v12115_v24  ;;  %v24613_v43 = vld [vmem:[#allocation54_spill] sm:$0xff]  ;;  %24615 = vst [vmem:[#allocation101_spill] sm:$0xff] %v19496_v26  ;;  %12419 = vrot.lane.b32.xlu0 %v24570_v46, %s12983_s19  ;;  %v12120_v18 = vpop.permute.xlu1 %12119 }
 0x907   : > { %24612 = vst [vmem:[#allocation167_spill] sm:$0xff] %v19486_v22  ;;  %12424 = vrot.lane.b32.xlu1 %v24613_v43, %s12986_s11  ;;  %v19492_v11 = vpack.c.bf16 %v9842_v63, %v9841_v14  ;;  %v9727_v42 = vsel %vm420_vm13, %v24617_v52, %v12136_v45  ;;  %v19504_v24 = vpack.i.bf16 %v19446_v38, %v19443_v53  ;;  %v12949_v6 = vld [vmem:[%s22491_s5 + $0x4] ss:$12 sps:$4 sm:$0xff]   ;;  %v24619_v45 = vrot.slane %v18963_v30, 2  ;;  %v24646_v43 = vld [vmem:[#allocation13_spill] sm:$0xff] }
 0x908   : > { %v19510_v14 = vsel %vm428_vm3, %v9727_v42, %v12141_v48  ;;  %v19513_v25 = vsel %vm428_vm3, %v9728_v37, %v12142_v3  ;;  %v12122_v2 = vunpack.i.h.bf16 %v12120_v18  ;;  %v12121_v50 = vunpack.i.l.bf16 %v12120_v18  ;;  %10581 = vmatprep.mubr.bf16.mxu1 %v12949_v6  ;;  %10667 = vmatprep.mubr.bf16.mxu0 %v12949_v6  ;;  %v24625_v37 = vld [vmem:[#allocation128_spill] sm:$0xff]  ;;  %v12160_v53 = vpop.permute.xlu0 %12159 }
 0x909   : > { %24618 = vst [vmem:[#allocation124_spill] sm:$0xff] %v19504_v24  ;;  %10552 = vmatpush1.bf16.xpose.msra.mxu1 %v19492_v11  ;;  %v19521_v63 = vsel %vm1277_vm14, %v24619_v45, %v8455_v9  ;;  %v19525_v48 = vsel %vm1277_vm14, %v8455_v9, %v8457_v36  ;;  %v24622_v3 = vrot.slane %v18726_v8, 1  ;;  %v24623_v39 = vrot.slane %v18811_v5, 1  ;;  %v24626_v45 = vld [vmem:[#allocation119_spill] sm:$0xff] }
 0x90a   : > { %24620 = vst [vmem:[#allocation133_spill] sm:$0xff] %v19521_v63  ;;  %24621 = vst [vmem:[#allocation111_spill] sm:$0xff] %v19525_v48  ;;  %v9726_v42 = vsel %vm420_vm13, %v24625_v37, %v12117_v56  ;;  %v9725_v52 = vsel %vm420_vm13, %v24626_v45, %v12116_v33  ;;  %v24627_v9 = vld [vmem:[#allocation103_spill] sm:$0xff]  ;;  %v24632_v33 = vunpack.i.l.bf16 %v24572_v55  ;;  %v24633_v37 = vunpack.i.h.bf16 %v24572_v55 }
 0x90b   : > { %v19532_v46 = vsel %vm1260_vm9, %v24623_v39, %v24622_v3  ;;  %12429 = vrot.lane.b32.xlu1 %v24581_v0, %s12986_s11  ;;  %v24628_v36 = vunpack.i.l.bf16 %v24627_v9  ;;  %v24629_v3 = vunpack.i.h.bf16 %v24627_v9  ;;  %v19549_v39 = vsel %vm428_vm3, %v9725_v52, %v12121_v50  ;;  %v24634_v52 = vld [vmem:[#allocation147_spill] sm:$0xff]  ;;  %v12130_v50 = vpop.permute.xlu1 %12129 }
 0x90c   : > { %24624 = vst [vmem:[#allocation51_spill] sm:$0xff] %v19532_v46  ;;  %24630 = vst [vmem:[#allocation143_spill] sm:$0xff] %v19549_v39  ;;  %v19552_v56 = vsel %vm428_vm3, %v9726_v42, %v12122_v2  ;;  %v19558_v0 = vsel %vm721_vm1, %v19510_v14, %v24632_v33  ;;  %12434 = vrot.lane.b32.xlu0 %v24634_v52, %s12983_s19  ;;  %v24635_v2 = vld [vmem:[#allocation187_spill] sm:$0xff]  ;;  %v12131_v38 = vunpack.i.l.bf16 %v12130_v50  ;;  %v24639_v5 = vunpack.i.l.bf16 %v18808_v17 }
 0x90d   : > { %v10063_v18 = vsel %vm428_vm3, %v19332_v34, %v24628_v36  ;;  %v10064_v6 = vsel %vm428_vm3, %v19328_v62, %v24629_v3  ;;  %24631 = vst [vmem:[#allocation82_spill] sm:$0xff] %v19552_v56  ;;  %v19564_v34 = vsel %vm721_vm1, %v19513_v25, %v24633_v37  ;;  %v12157_v62 = vunpack.i.h.bf16 %v19488_v16 }
 0x90e   : > { %v24636_v42 = vunpack.i.l.bf16 %v24635_v2  ;;  %v24637_v36 = vunpack.i.h.bf16 %v24635_v2  ;;  %v24638_v3 = vunpack.i.l.bf16 %v18823_v7  ;;  %v12132_v37 = vunpack.i.h.bf16 %v12130_v50 }
 0x90f   : > { %v10033_v30 = vsel %vm428_vm3, %v19426_v49, %v24639_v5  ;;  %12439 = vrot.lane.b32.xlu1 %v24634_v52, %s12986_s11  ;;  %v10319_v50 = vpack.c.bf16 %v19564_v34, %v19558_v0  ;;  %v24643_v0 = vld [vmem:[#allocation149_spill] sm:$0xff]  ;;  %v12145_v34 = vpop.permute.xlu1 %12144 }
 0x910   : > { %v9869_v45 = vsel %vm721_vm1, %v19549_v39, %v24636_v42  ;;  %v9870_v55 = vsel %vm721_vm1, %v19552_v56, %v24637_v36  ;;  %v19581_v33 = vsel %vm428_vm3, %v19361_v21, %v24638_v3  ;;  %v24640_v42 = vunpack.i.h.bf16 %v18823_v7  ;;  %v12185_v56 = vpop.permute.xlu0 %12184  ;;  %12449 = vrot.lane.b32.xlu0 %v24643_v0, %s12983_s19 }
 0x911   : > { %v12156_v36 = vunpack.i.l.bf16 %v19488_v16  ;;  %v10317_v21 = vpack.c.bf16 %v9870_v55, %v9869_v45  ;;  %v24641_v3 = vunpack.i.h.bf16 %v18808_v17  ;;  %v12187_v49 = vunpack.i.h.bf16 %v12185_v56 }
 0x912   : > { %v19591_v39 = vsel %vm428_vm3, %v19357_v41, %v24640_v42  ;;  %v12186_v26 = vunpack.i.l.bf16 %v12185_v56  ;;  %v10155_v41 = vsel %vm721_vm1, %v19279_v13, %v12131_v38  ;;  %v10156_v16 = vsel %vm721_vm1, %v19284_v27, %v12132_v37  ;;  %v24642_v42 = vld [vmem:[#allocation140_spill] sm:$0xff] }
 0x913   : > { %v10034_v5 = vsel %vm428_vm3, %v19422_v58, %v24641_v3  ;;  %v9730_v52 = vsel %vm420_vm13, %v24642_v42, %v12157_v62  ;;  %v12162_v45 = vunpack.i.h.bf16 %v12160_v53  ;;  %v12161_v55 = vunpack.i.l.bf16 %v12160_v53  ;;  %10638 = vmatpush1.bf16.xpose.msra.mxu0 %v10317_v21  ;;  %v24644_v58 = vld [vmem:[#allocation131_spill] sm:$0xff]  ;;  %v24645_v3 = vld [vmem:[#allocation53_spill] sm:$0xff]  ;;  %12444 = vrot.lane.b32.xlu1 %v24603_v20, %s12986_s11 }
 0x914   : > { %v10281_v22 = vpack.c.bf16 %v10156_v16, %v10155_v41  ;;  %v19612_v56 = vsel %vm420_vm13, %v24644_v58, %v12187_v49  ;;  %v19616_v13 = vsel %vm420_vm13, %v24645_v3, %v12186_v26  ;;  %v12147_v27 = vunpack.i.h.bf16 %v12145_v34  ;;  %v12190_v53 = vpop.permute.xlu0 %12189  ;;  %v19642_v58 = vpop.permute.xlu1 %12149 }
 0x915   : > { %v12146_v24 = vunpack.i.l.bf16 %v12145_v34  ;;  %v9729_v62 = vsel %vm420_vm13, %v24646_v43, %v12156_v36  ;;  %v24647_v21 = vunpack.i.l.bf16 %v24554_v28  ;;  %v24648_v41 = vunpack.i.h.bf16 %v24554_v28  ;;  %v24649_v28 = vld [vmem:[#allocation69_spill] sm:$0xff] }
 0x916   : > { %10553 = vmatprep.subr.bf16.mxu1 %v10281_v22  ;;  %v8261_v16 = vrot.slane %v18826_v47, 1  ;;  %v12192_v42 = vunpack.i.h.bf16 %v12190_v53  ;;  %v12191_v34 = vunpack.i.l.bf16 %v12190_v53  ;;  %v10188_v20 = vsel %vm721_vm1, %v10064_v6, %v12147_v27  ;;  %12519 = vrot.lane.b32.xlu0 %v24649_v28, %s12981_s17 }
 0x917   : > { %v10035_v49 = vsel %vm428_vm3, %v19616_v13, %v24647_v21  ;;  %v10036_v26 = vsel %vm428_vm3, %v19612_v56, %v24648_v41  ;;  %10554 = vmatpush1.bf16.xpose.msra.mxu1 %v19302_v15  ;;  %v10187_v43 = vsel %vm721_vm1, %v10063_v18, %v12146_v24  ;;  %v19635_v22 = vsel %vm428_vm3, %v9729_v62, %v12161_v55  ;;  %v24650_v21 = vld [vmem:[#allocation28_spill] sm:$0xff]  ;;  %v24651_v18 = vld [vmem:[#allocation47_spill] sm:$0xff] }
 0x918   : > { %v19638_v36 = vsel %vm428_vm3, %v9730_v52, %v12162_v45  ;;  %v10320_v3 = vpack.c.bf16 %v10188_v20, %v10187_v43  ;;  %v10159_v53 = vsel %vm721_vm1, %v10035_v49, %v12131_v38  ;;  %v19647_v15 = vsel %vm420_vm13, %v24650_v21, %v12192_v42  ;;  %v12195_v45 = vpop.permute.xlu0 %12194  ;;  %12454 = vrot.lane.b32.xlu1 %v24643_v0, %s12986_s11 }
 0x919   : > { %v19651_v6 = vsel %vm420_vm13, %v24651_v18, %v12191_v34  ;;  %v12152_v55 = vunpack.i.h.bf16 %v19642_v58  ;;  %v12151_v52 = vunpack.i.l.bf16 %v19642_v58  ;;  %v10160_v62 = vsel %vm721_vm1, %v10036_v26, %v12132_v37  ;;  %v24654_v37 = vld [vmem:[#allocation150_spill] sm:$0xff]  ;;  %v19671_v26 = vpop.permute.xlu1 %12164 }
 0x91a   : > { %10639 = vmatprep.subr.bf16.mxu0 %v10320_v3  ;;  %v24652_v38 = vunpack.i.l.bf16 %v24627_v9  ;;  %v24653_v41 = vunpack.i.h.bf16 %v24627_v9  ;;  %v12197_v43 = vunpack.i.h.bf16 %v12195_v45  ;;  %v12196_v20 = vunpack.i.l.bf16 %v12195_v45  ;;  %12524 = vrot.lane.b32.xlu0 %v24654_v37, %s12981_s17 }
 0x91b   : > { %v10157_v58 = vsel %vm721_vm1, %v10033_v30, %v12151_v52  ;;  %v10158_v0 = vsel %vm721_vm1, %v10034_v5, %v12152_v55  ;;  %10640 = vmatpush1.bf16.xpose.msra.mxu0 %v10319_v50  ;;  %v24655_v9 = vunpack.i.l.bf16 %v24635_v2  ;;  %v24656_v18 = vunpack.i.h.bf16 %v24635_v2  ;;  %v24657_v5 = vld [vmem:[#allocation80_spill] sm:$0xff] }
 0x91c   : > { %v10067_v49 = vsel %vm428_vm3, %v19651_v6, %v24652_v38  ;;  %v10068_v42 = vsel %vm428_vm3, %v19647_v15, %v24653_v41  ;;  %v10283_v3 = vpack.c.bf16 %v10158_v0, %v10157_v58  ;;  %v8229_v30 = vrot.slane %v18898_v12, 1  ;;  %v24658_v50 = vld [vmem:[#allocation132_spill] sm:$0xff] }
 0x91d   : > { %v9873_v21 = vsel %vm721_vm1, %v19635_v22, %v24655_v9  ;;  %v9874_v45 = vsel %vm721_vm1, %v19638_v36, %v24656_v18  ;;  %v19684_v38 = vsel %vm420_vm13, %v24657_v5, %v12197_v43  ;;  %v19688_v41 = vsel %vm420_vm13, %v24658_v50, %v12196_v20  ;;  %v12200_v9 = vpop.permute.xlu0 %12199  ;;  %v24659_v2 = vld [vmem:[#allocation180_spill] sm:$0xff] }
 0x91e   : > { %v12167_v58 = vunpack.i.h.bf16 %v19671_v26  ;;  %v12166_v0 = vunpack.i.l.bf16 %v19671_v26  ;;  %12459 = vrot.lane.b32.xlu1 %v24659_v2, %s12983_s19  ;;  %10555 = vmatprep.subr.bf16.mxu1 %v10283_v3  ;;  %v10286_v18 = vpack.c.bf16 %v10160_v62, %v10159_v53  ;;  %v10191_v34 = vsel %vm721_vm1, %v10067_v49, %v12146_v24  ;;  %v24660_v53 = vld [vmem:[#allocation179_spill] sm:$0xff]  ;;  %v19705_v24 = vpop.permute.xlu1 %12169 }
 0x91f   : > { %v10192_v12 = vsel %vm721_vm1, %v10068_v42, %v12147_v27  ;;  %v8231_v43 = vrot.slane %v19144_v44, 1  ;;  %v12202_v5 = vunpack.i.h.bf16 %v12200_v9  ;;  %v12201_v47 = vunpack.i.l.bf16 %v12200_v9  ;;  %10556 = vmatpush1.bf16.xpose.msra.mxu1 %v19492_v11  ;;  %12539 = vrot.lane.b32.xlu0 %v24660_v53, %s12986_s11 }
 0x920   : > { %v10189_v20 = vsel %vm721_vm1, %v19581_v33, %v12166_v0  ;;  %v10190_v26 = vsel %vm721_vm1, %v19591_v39, %v12167_v58  ;;  %10557 = vmatprep.subr.bf16.mxu1 %v10286_v18  ;;  %v24661_v44 = vunpack.i.l.bf16 %v18808_v17  ;;  %v24662_v62 = vunpack.i.h.bf16 %v18808_v17 }
 0x921   : > { %v10323_v27 = vpack.c.bf16 %v10190_v26, %v10189_v20  ;;  %v19717_v39 = vpack.i.bf16 %v19525_v48, %v19521_v63  ;;  %v24663_v49 = vrot.slane %v18850_v1, 1  ;;  %v24665_v3 = vrot.slane %v18781_v23, 1  ;;  %v24669_v26 = vld [vmem:[#allocation157_spill] sm:$0xff]  ;;  %v19743_v50 = vpop.permute.xlu0 %12209 }
 0x922   : > { %v10037_v11 = vsel %vm428_vm3, %v19688_v41, %v24661_v44  ;;  %v10038_v33 = vsel %vm428_vm3, %v19684_v38, %v24662_v62  ;;  %v24667_v18 = vrot.slane %v18726_v8, 1  ;;  %v19737_v44 = vsel %vm420_vm13, %v24669_v26, %v12202_v5  ;;  %v24670_v62 = vld [vmem:[#allocation176_spill] sm:$0xff]  ;;  %v19755_v26 = vpop.permute.xlu1 %12174  ;;  %v24697_v8 = vld [vmem:[#allocation117_spill] sm:$0xff] }
 0x923   : > { %v19722_v42 = vsel %vm1260_vm9, %v24663_v49, %v8261_v16  ;;  %v19727_v9 = vsel %vm1260_vm9, %v8261_v16, %v24665_v3  ;;  %v19741_v49 = vsel %vm420_vm13, %v24670_v62, %v12201_v47  ;;  %v24671_v16 = vld [vmem:[#allocation91_spill] sm:$0xff]  ;;  %10641 = vmatprep.subr.bf16.mxu0 %v10323_v27  ;;  %v10322_v3 = vpack.c.bf16 %v9874_v45, %v9873_v21  ;;  %v24673_v47 = vld [vmem:[#allocation41_spill] sm:$0xff] }
 0x924   : > { %24664 = vst [vmem:[#allocation60_spill] sm:$0xff] %v19722_v42  ;;  %24666 = vst [vmem:[#allocation62_spill] sm:$0xff] %v19727_v9  ;;  %v19732_v17 = vsel %vm1260_vm9, %v24667_v18, %v8229_v30  ;;  %12464 = vrot.lane.b32.xlu1 %v24671_v16, %s12983_s19  ;;  %v10326_v48 = vpack.c.bf16 %v10192_v12, %v10191_v34  ;;  %v10161_v18 = vsel %vm721_vm1, %v10037_v11, %v12151_v52  ;;  %v24699_v1 = vld [vmem:[#allocation205_spill] sm:$0xff] }
 0x925   : > { %24668 = vst [vmem:[#allocation36_spill] sm:$0xff] %v19732_v17  ;;  %v10162_v20 = vsel %vm721_vm1, %v10038_v33, %v12152_v55  ;;  %v19750_v63 = vsel %vm1260_vm9, %v8229_v30, %v8231_v43  ;;  %12544 = vrot.lane.b32.xlu0 %v24673_v47, %s12981_s17  ;;  %10642 = vmatpush1.bf16.xpose.msra.mxu0 %v10322_v3  ;;  %v24674_v12 = vunpack.i.l.bf16 %v18823_v7  ;;  %v24675_v52 = vunpack.i.h.bf16 %v18823_v7  ;;  %v19771_v30 = vpop.permute.xlu0 %12224  ;;  %v24676_v43 = vld [vmem:[#allocation142_spill] sm:$0xff] }
 0x926   : > { %24672 = vst [vmem:[#allocation184_spill] sm:$0xff] %v19750_v63  ;;  %v19759_v27 = vpack.i.bf16 %v19532_v46, %v19353_v10  ;;  %10643 = vmatprep.subr.bf16.mxu0 %v10326_v48  ;;  %v8265_v21 = vrot.slane %v18986_v54, 1  ;;  %v8267_v45 = vrot.slane %v19172_v59, 1  ;;  %v10288_v48 = vpack.c.bf16 %v10162_v20, %v10161_v18  ;;  %v19802_v5 = vpop.permute.xlu1 %12179  ;;  %v24940_v46 = vld [vmem:[#allocation175_spill] sm:$0xff] }
 0x927   : > { %v10069_v55 = vsel %vm428_vm3, %v19741_v49, %v24674_v12  ;;  %v10070_v34 = vsel %vm428_vm3, %v19737_v44, %v24675_v52  ;;  %v24677_v11 = vunpack.i.l.bf16 %v18979_v35  ;;  %v19781_v7 = vpack.i.bf16 %v19727_v9, %v19722_v42 }
 0x928   : > { %12469 = vrot.lane.b32.xlu1 %v24676_v43, %s12983_s19  ;;  %v19785_v62 = vpack.i.bf16 %v19750_v63, %v19732_v17  ;;  %v24678_v20 = vpack.c.bf16 %v19416_v40, %v19410_v61  ;;  %v24679_v18 = vunpack.i.l.bf16 %v18924_v51  ;;  %v24680_v12 = vunpack.i.h.bf16 %v18924_v51 }
 0x929   : > { %v9845_v33 = vsel %vm721_vm1, %v19459_v29, %v24677_v11  ;;  %v24681_v11 = vld [vmem:[#allocation106_spill] sm:$0xff]  ;;  %v10193_v59 = vsel %vm721_vm1, %v10069_v55, %v12166_v0  ;;  %v10194_v61 = vsel %vm721_vm1, %v10070_v34, %v12167_v58  ;;  %v24682_v40 = vunpack.i.h.bf16 %v18979_v35  ;;  %v19820_v0 = vpop.permute.xlu0 %12229  ;;  %v24687_v34 = vld [vmem:[#allocation135_spill] sm:$0xff] }
 0x92a   : > { %10558 = vmatpush1.bf16.xpose.msra.mxu1 %v24678_v20  ;;  %v9875_v29 = vsel %vm721_vm1, %v19510_v14, %v24679_v18  ;;  %v9876_v52 = vsel %vm721_vm1, %v19513_v25, %v24680_v12  ;;  %12549 = vrot.lane.b32.xlu0 %v24681_v11, %s12981_s17  ;;  %v24683_v18 = vrot.slane %v18781_v23, 1  ;;  %v19817_v12 = vsel %vm1260_vm9, %v8265_v21, %v8267_v45  ;;  %v24686_v58 = vld [vmem:[#allocation26_spill] sm:$0xff] }
 0x92b   : > { %10559 = vmatprep.subr.bf16.mxu1 %v10288_v48  ;;  %v9846_v14 = vsel %vm721_vm1, %v19455_v19, %v24682_v40  ;;  %24685 = vst [vmem:[#allocation185_spill] sm:$0xff] %v19817_v12  ;;  %v10325_v55 = vpack.c.bf16 %v9876_v52, %v9875_v29  ;;  %v24688_v19 = vunpack.i.l.bf16 %v24687_v34  ;;  %v24689_v20 = vunpack.i.h.bf16 %v24687_v34 }
 0x92c   : > { %v19814_v25 = vsel %vm1260_vm9, %v24683_v18, %v8265_v21  ;;  %12474 = vrot.lane.b32.xlu1 %v24686_v58, %s12983_s19  ;;  %v24690_v21 = vld [vmem:[#allocation57_spill] sm:$0xff]  ;;  %v10328_v3 = vpack.c.bf16 %v10194_v61, %v10193_v59  ;;  %v10287_v48 = vpack.c.bf16 %v9846_v14, %v9845_v33  ;;  %v24691_v23 = vunpack.i.l.bf16 %v19743_v50 }
 0x92d   : > { %24684 = vst [vmem:[#allocation25_spill] sm:$0xff] %v19814_v25  ;;  %v10039_v40 = vsel %vm428_vm3, %v19616_v13, %v24688_v19  ;;  %v10040_v18 = vsel %vm428_vm3, %v19612_v56, %v24689_v20  ;;  %v24692_v29 = vunpack.i.h.bf16 %v19743_v50  ;;  %v24693_v19 = vld [vmem:[#allocation164_spill] sm:$0xff]  ;;  %10644 = vmatpush1.bf16.xpose.msra.mxu0 %v10325_v55  ;;  %v12205_v56 = vpop.permute.xlu1 %12204  ;;  %v24694_v20 = vld [vmem:[#allocation38_spill] sm:$0xff] }
 0x92e   : > { %v10163_v54 = vsel %vm721_vm1, %v10039_v40, %v24691_v23  ;;  %12564 = vrot.lane.b32.xlu0 %v24693_v19, %s12986_s11  ;;  %v24695_v59 = vunpack.i.l.bf16 %v24694_v20  ;;  %v19849_v23 = vpack.i.bf16 %v19817_v12, %v19814_v25  ;;  %v12207_v61 = vunpack.i.h.bf16 %v12205_v56  ;;  %10645 = vmatprep.subr.bf16.mxu0 %v10328_v3  ;;  %v24698_v3 = vld [vmem:[#allocation206_spill] sm:$0xff] }
 0x92f   : > { %v10164_v52 = vsel %vm721_vm1, %v10040_v18, %v24692_v29  ;;  %v12206_v14 = vunpack.i.l.bf16 %v12205_v56  ;;  %v24696_v40 = vunpack.i.h.bf16 %v24694_v20  ;;  %v19856_v29 = vpop.permute.xlu0 %12239  ;;  %v12232_v56 = vunpack.i.h.bf16 %v19820_v0  ;;  %v24707_v12 = vld [vmem:[#allocation154_spill] sm:$0xff] }
 0x930   : > { %v9877_v33 = vsel %vm721_vm1, %v19635_v22, %v24695_v59  ;;  %12479 = vrot.lane.b32.xlu1 %v24659_v2, %s12986_s11  ;;  %v10290_v22 = vpack.c.bf16 %v10164_v52, %v10163_v54  ;;  %v12241_v25 = vunpack.i.l.bf16 %v19856_v29  ;;  %v24714_v59 = vld [vmem:[#allocation92_spill] sm:$0xff] }
 0x931   : > { %v9878_v18 = vsel %vm721_vm1, %v19638_v36, %v24696_v40  ;;  %v19865_v13 = vsel %vm428_vm3, %v24698_v3, %v12206_v14  ;;  %v19869_v36 = vsel %vm428_vm3, %v24699_v1, %v12207_v61  ;;  %v24700_v40 = vld [vmem:[#allocation151_spill] sm:$0xff]  ;;  %v24703_v14 = vld [vmem:[#allocation14_spill] sm:$0xff]  ;;  %v12215_v3 = vpop.permute.xlu1 %12214  ;;  %v24704_v1 = vunpack.i.l.bf16 %v19771_v30 }
 0x932   : > { %10560 = vmatpush1.bf16.xpose.msra.mxu1 %v10287_v48  ;;  %v24701_v55 = vunpack.i.l.bf16 %v24700_v40  ;;  %v24702_v2 = vunpack.i.h.bf16 %v24700_v40  ;;  %12569 = vrot.lane.b32.xlu0 %v24703_v14, %s12981_s17  ;;  %v24705_v61 = vunpack.i.h.bf16 %v19771_v30  ;;  %v12217_v14 = vunpack.i.h.bf16 %v12215_v3 }
 0x933   : > { %10561 = vmatprep.subr.bf16.mxu1 %v10290_v22  ;;  %v12216_v17 = vunpack.i.l.bf16 %v12215_v3  ;;  %v12245_v22 = vpop.permute.xlu0 %12244 }
 0x934   : > { %v10071_v54 = vsel %vm428_vm3, %v19651_v6, %v24701_v55  ;;  %v10072_v52 = vsel %vm428_vm3, %v19647_v15, %v24702_v2  ;;  %v24706_v55 = vld [vmem:[#allocation190_spill] sm:$0xff]  ;;  %v12231_v15 = vunpack.i.l.bf16 %v19820_v0  ;;  %v10327_v2 = vpack.c.bf16 %v9878_v18, %v9877_v33  ;;  %12484 = vrot.lane.b32.xlu1 %v24671_v16, %s12986_s11  ;;  %v24713_v18 = vld [vmem:[#allocation105_spill] sm:$0xff] }
 0x935   : > { %v10195_v48 = vsel %vm721_vm1, %v10071_v54, %v24704_v1  ;;  %v10196_v6 = vsel %vm721_vm1, %v10072_v52, %v24705_v61  ;;  %v24708_v54 = vld [vmem:[#allocation116_spill] sm:$0xff]  ;;  %v19908_v16 = vsel %vm428_vm3, %v19475_v4, %v12232_v56 }
 0x936   : > { %v24709_v1 = vunpack.i.l.bf16 %v24708_v54  ;;  %v24710_v61 = vunpack.i.h.bf16 %v24708_v54  ;;  %v10330_v33 = vpack.c.bf16 %v10196_v6, %v10195_v48  ;;  %12574 = vrot.lane.b32.xlu0 %v24649_v28, %s12983_s19  ;;  %10646 = vmatpush1.bf16.xpose.msra.mxu0 %v10327_v2  ;;  %v12220_v54 = vpop.permute.xlu1 %12219  ;;  %v24712_v6 = vunpack.i.h.bf16 %v19051_v60 }
 0x937   : > { %v19922_v3 = vsel %vm428_vm3, %v24713_v18, %v12231_v15  ;;  %v12222_v4 = vunpack.i.h.bf16 %v12220_v54  ;;  %v12221_v56 = vunpack.i.l.bf16 %v12220_v54  ;;  %v12242_v2 = vunpack.i.h.bf16 %v19856_v29  ;;  %v19930_v63 = vpop.permute.xlu0 %12259 }
 0x938   : > { %v9847_v52 = vsel %vm721_vm1, %v19865_v13, %v24709_v1  ;;  %v9848_v45 = vsel %vm721_vm1, %v19869_v36, %v24710_v61  ;;  %v24711_v1 = vunpack.i.l.bf16 %v19051_v60  ;;  %v10042_v61 = vsel %vm428_vm3, %v19684_v38, %v24712_v6  ;;  %10647 = vmatprep.subr.bf16.mxu0 %v10330_v33  ;;  %12489 = vrot.lane.b32.xlu1 %v24676_v43, %s12986_s11 }
 0x939   : > { %v10289_v28 = vpack.c.bf16 %v9848_v45, %v9847_v52  ;;  %v12247_v38 = vunpack.i.h.bf16 %v12245_v22  ;;  %v12246_v15 = vunpack.i.l.bf16 %v12245_v22  ;;  %v24717_v43 = vunpack.i.h.bf16 %v18924_v51 }
 0x93a   : > { %v10041_v48 = vsel %vm428_vm3, %v19688_v41, %v24711_v1  ;;  %v9732_v41 = vsel %vm420_vm13, %v24714_v59, %v12217_v14  ;;  %v24715_v1 = vld [vmem:[#allocation93_spill] sm:$0xff]  ;;  %12584 = vrot.lane.b32.xlu0 %v24660_v53, %s12981_s17  ;;  %v19942_v29 = vpop.permute.xlu1 %12234  ;;  %v24718_v22 = vunpack.i.l.bf16 %v19090_v32 }
 0x93b   : > { %v9731_v0 = vsel %vm420_vm13, %v24715_v1, %v12216_v17  ;;  %v19938_v45 = vsel %vm428_vm3, %v9732_v41, %v12222_v4  ;;  %10562 = vmatpush1.bf16.xpose.msra.mxu1 %v10289_v28  ;;  %v24716_v17 = vunpack.i.l.bf16 %v18924_v51  ;;  %v12237_v18 = vunpack.i.h.bf16 %v19942_v29  ;;  %v24720_v4 = vld [vmem:[#allocation97_spill] sm:$0xff]  ;;  %v19966_v41 = vpop.permute.xlu0 %12264 }
 0x93c   : > { %v19935_v33 = vsel %vm428_vm3, %v9731_v0, %v12221_v56  ;;  %v9880_v14 = vsel %vm721_vm1, %v19938_v45, %v24717_v43  ;;  %v10073_v52 = vsel %vm428_vm3, %v19741_v49, %v24718_v22  ;;  %v24719_v0 = vunpack.i.h.bf16 %v19090_v32  ;;  %v24721_v56 = vld [vmem:[#allocation94_spill] sm:$0xff]  ;;  %12494 = vrot.lane.b32.xlu1 %v24686_v58, %s12986_s11 }
 0x93d   : > { %v9879_v59 = vsel %vm721_vm1, %v19935_v33, %v24716_v17  ;;  %v12236_v54 = vunpack.i.l.bf16 %v19942_v29  ;;  %v9734_v51 = vsel %vm420_vm13, %v24720_v4, %v12242_v2  ;;  %v9733_v28 = vsel %vm420_vm13, %v24721_v56, %v12241_v25  ;;  %v24724_v4 = vld [vmem:[#allocation192_spill] sm:$0xff] }
 0x93e   : > { %v10074_v53 = vsel %vm428_vm3, %v19737_v44, %v24719_v0  ;;  %v10329_v6 = vpack.c.bf16 %v9880_v14, %v9879_v59  ;;  %v24722_v49 = vunpack.i.l.bf16 %v18979_v35  ;;  %v24723_v1 = vunpack.i.h.bf16 %v18979_v35  ;;  %12589 = vrot.lane.b32.xlu0 %v24654_v37, %s12983_s19  ;;  %v19993_v35 = vpop.permute.xlu1 %12249 }
 0x93f   : > { %v19979_v2 = vsel %vm428_vm3, %v9733_v28, %v12246_v15  ;;  %v19982_v25 = vsel %vm428_vm3, %v9734_v51, %v12247_v38  ;;  %v10165_v58 = vsel %vm721_vm1, %v10041_v48, %v12236_v54  ;;  %v10166_v59 = vsel %vm721_vm1, %v10042_v61, %v12237_v18  ;;  %v12280_v0 = vpop.permute.xlu0 %12279 }
 0x940   : > { %v9849_v44 = vsel %vm721_vm1, %v19922_v3, %v24722_v49  ;;  %v9850_v17 = vsel %vm721_vm1, %v19908_v16, %v24723_v1  ;;  %v23117_v43 = vunpack.i.h.bf16 %v19802_v5  ;;  %10648 = vmatpush1.bf16.xpose.msra.mxu0 %v10329_v6  ;;  %v10293_v15 = vpack.c.bf16 %v10166_v59, %v10165_v58  ;;  %12499 = vrot.lane.b32.xlu1 %v24724_v4, %s12983_s19  ;;  %v24727_v1 = vld [vmem:[#allocation54_spill] sm:$0xff]  ;;  %v24728_v58 = vld [vmem:[#allocation104_spill] sm:$0xff] }
 0x941   : > { %v12252_v38 = vunpack.i.h.bf16 %v19993_v35  ;;  %v12251_v14 = vunpack.i.l.bf16 %v19993_v35  ;;  %v10292_v22 = vpack.c.bf16 %v9850_v17, %v9849_v44  ;;  %v23118_v48 = vunpack.i.l.bf16 %v19802_v5 }
 0x942   : > { %10563 = vmatprep.subr.bf16.mxu1 %v10293_v15  ;;  %v24725_v61 = vunpack.i.l.bf16 %v24694_v20  ;;  %v24726_v6 = vunpack.i.h.bf16 %v24694_v20  ;;  %v12282_v56 = vunpack.i.h.bf16 %v12280_v0  ;;  %v12281_v28 = vunpack.i.l.bf16 %v12280_v0  ;;  %12599 = vrot.lane.b32.xlu0 %v24727_v1, %s12981_s17  ;;  %v20016_v17 = vpop.permute.xlu1 %12254  ;;  %v24729_v15 = vld [vmem:[#allocation122_spill] sm:$0xff] }
 0x943   : > { %10564 = vmatpush1.bf16.xpose.msra.mxu1 %v10292_v22  ;;  %v10197_v49 = vsel %vm721_vm1, %v10073_v52, %v12251_v14  ;;  %v10198_v44 = vsel %vm721_vm1, %v10074_v53, %v12252_v38  ;;  %v24730_v52 = vunpack.i.l.bf16 %v19705_v24  ;;  %v24731_v53 = vunpack.i.h.bf16 %v19705_v24 }
 0x944   : > { %v9881_v37 = vsel %vm721_vm1, %v19979_v2, %v24725_v61  ;;  %v9882_v51 = vsel %vm721_vm1, %v19982_v25, %v24726_v6  ;;  %v10333_v20 = vpack.c.bf16 %v10198_v44, %v10197_v49  ;;  %v20020_v59 = vsel %vm420_vm13, %v24728_v58, %v12282_v56  ;;  %v12285_v49 = vpop.permute.xlu0 %12284  ;;  %v24732_v56 = vld [vmem:[#allocation193_spill] sm:$0xff] }
 0x945   : > { %v20024_v22 = vsel %vm420_vm13, %v24729_v15, %v12281_v28  ;;  %v9851_v0 = vsel %vm721_vm1, %v19865_v13, %v24730_v52  ;;  %v9852_v61 = vsel %vm721_vm1, %v19869_v36, %v24731_v53  ;;  %v12176_v6 = vunpack.i.l.bf16 %v19755_v26  ;;  %12504 = vrot.lane.b32.xlu1 %v24732_v56, %s12983_s19 }
 0x946   : > { %10649 = vmatprep.subr.bf16.mxu0 %v10333_v20  ;;  %v10332_v44 = vpack.c.bf16 %v9882_v51, %v9881_v37  ;;  %v24733_v28 = vunpack.i.l.bf16 %v24687_v34  ;;  %v24734_v13 = vunpack.i.h.bf16 %v24687_v34  ;;  %v12287_v15 = vunpack.i.h.bf16 %v12285_v49  ;;  %12604 = vrot.lane.b32.xlu0 %v24673_v47, %s12983_s19  ;;  %v20053_v37 = vpop.permute.xlu1 %12269  ;;  %v24737_v47 = vld [vmem:[#allocation183_spill] sm:$0xff] }
 0x947   : > { %v12286_v36 = vunpack.i.l.bf16 %v12285_v49  ;;  %v20049_v52 = vsel %vm721_vm1, %v19922_v3, %v23118_v48  ;;  %v24735_v51 = vunpack.i.l.bf16 %v19743_v50  ;;  %v24736_v20 = vunpack.i.h.bf16 %v19743_v50 }
 0x948   : > { %v10043_v1 = vsel %vm428_vm3, %v20024_v22, %v24733_v28  ;;  %v10044_v58 = vsel %vm428_vm3, %v20020_v59, %v24734_v13  ;;  %10650 = vmatpush1.bf16.xpose.msra.mxu0 %v10332_v44  ;;  %v20065_v3 = vsel %vm721_vm1, %v19908_v16, %v23117_v43  ;;  %v20070_v44 = vsel %vm420_vm13, %v24737_v47, %v12287_v15  ;;  %v24738_v28 = vld [vmem:[#allocation129_spill] sm:$0xff]  ;;  %v24739_v16 = vld [vmem:[#allocation195_spill] sm:$0xff] }
 0x949   : > { %v10167_v34 = vsel %vm721_vm1, %v10043_v1, %v24735_v51  ;;  %v10168_v53 = vsel %vm721_vm1, %v10044_v58, %v24736_v20  ;;  %v20074_v13 = vsel %vm420_vm13, %v24738_v28, %v12286_v36  ;;  %v10295_v1 = vpack.c.bf16 %v9852_v61, %v9851_v0  ;;  %v12290_v58 = vpop.permute.xlu0 %12289  ;;  %12509 = vrot.lane.b32.xlu1 %v24739_v16, %s12983_s19 }
 0x94a   : > { %v9883_v50 = vsel %vm721_vm1, %v19935_v33, %v12176_v6  ;;  %v10296_v51 = vpack.c.bf16 %v10168_v53, %v10167_v34  ;;  %v24740_v20 = vunpack.i.l.bf16 %v24700_v40  ;;  %v24741_v47 = vunpack.i.h.bf16 %v24700_v40  ;;  %12614 = vrot.lane.b32.xlu0 %v24693_v19, %s12981_s17  ;;  %v24751_v19 = vld [vmem:[#allocation43_spill] sm:$0xff] }
 0x94b   : > { %v24742_v61 = vunpack.i.h.bf16 %v19755_v26  ;;  %v12292_v36 = vunpack.i.h.bf16 %v12290_v58  ;;  %v12291_v34 = vunpack.i.l.bf16 %v12290_v58  ;;  %v24743_v53 = vunpack.i.l.bf16 %v19771_v30 }
 0x94c   : > { %v10075_v15 = vsel %vm428_vm3, %v20074_v13, %v24740_v20  ;;  %v10076_v0 = vsel %vm428_vm3, %v20070_v44, %v24741_v47  ;;  %v24744_v49 = vunpack.i.h.bf16 %v19771_v30  ;;  %v23120_v40 = vunpack.i.l.bf16 %v20016_v17  ;;  %10565 = vmatprep.subr.bf16.mxu1 %v10296_v51  ;;  %v20103_v47 = vpop.permute.xlu1 %12274 }
 0x94d   : > { %v9884_v33 = vsel %vm721_vm1, %v19938_v45, %v24742_v61  ;;  %v10199_v28 = vsel %vm721_vm1, %v10075_v15, %v24743_v53  ;;  %v24745_v45 = vrot.slane %v19014_v31, 1  ;;  %v24746_v58 = vrot.slane %v19036_v57, 1  ;;  %v24752_v53 = vld [vmem:[#allocation29_spill] sm:$0xff]  ;;  %10566 = vmatpush1.bf16.xpose.msra.mxu1 %v10295_v1 }
 0x94e   : > { %v10200_v20 = vsel %vm721_vm1, %v10076_v0, %v24744_v49  ;;  %v24748_v30 = vrot.slane %v24690_v21, 1  ;;  %v23125_v51 = vunpack.i.h.bf16 %v19930_v63  ;;  %v20122_v0 = vsel %vm420_vm13, %v24751_v19, %v12292_v36  ;;  %12619 = vrot.lane.b32.xlu0 %v24681_v11, %s12983_s19 }
 0x94f   : > { %v10336_v43 = vpack.c.bf16 %v10200_v20, %v10199_v28  ;;  %v20110_v61 = vsel %vm1260_vm9, %v24746_v58, %v24745_v45  ;;  %v24749_v49 = vmov %v24745_v45  ;;  %v20126_v28 = vsel %vm420_vm13, %v24752_v53, %v12291_v34  ;;  %v12295_v58 = vpop.permute.xlu0 %12294 }
 0x950   : > { %24747 = vst [vmem:[#allocation59_spill] sm:$0xff] %v20110_v61  ;;  %v20117_v15 = vsel %vm1260_vm9, %v24749_v49, %v24748_v30  ;;  %v10297_v20 = vpack.c.bf16 %v20065_v3, %v20049_v52  ;;  %v23119_v45 = vunpack.i.h.bf16 %v20016_v17  ;;  %v24753_v30 = vld [vmem:[#allocation198_spill] sm:$0xff]  ;;  %v10335_v49 = vpack.c.bf16 %v9884_v33, %v9883_v50 }
 0x951   : > { %24750 = vst [vmem:[#allocation95_spill] sm:$0xff] %v20117_v15  ;;  %10651 = vmatprep.subr.bf16.mxu0 %v10336_v43  ;;  %12514 = vrot.lane.b32.xlu1 %v24753_v30, %s12983_s19  ;;  %v24754_v48 = vunpack.i.l.bf16 %v19051_v60  ;;  %v24755_v34 = vunpack.i.h.bf16 %v19051_v60  ;;  %v12297_v19 = vunpack.i.h.bf16 %v12295_v58  ;;  %v12296_v52 = vunpack.i.l.bf16 %v12295_v58 }
 0x952   : > { %v23121_v50 = vunpack.i.l.bf16 %v19930_v63  ;;  %v23131_v33 = vunpack.i.h.bf16 %v19966_v41  ;;  %v9885_v60 = vsel %vm721_vm1, %v19979_v2, %v23120_v40  ;;  %10652 = vmatpush1.bf16.xpose.msra.mxu0 %v10335_v49  ;;  %v9886_v11 = vsel %vm721_vm1, %v19982_v25, %v23119_v45  ;;  %v24758_v49 = vld [vmem:[#allocation156_spill] sm:$0xff]  ;;  %v24763_v40 = vld [vmem:[#allocation201_spill] sm:$0xff] }
 0x953   : > { %v10045_v36 = vsel %vm428_vm3, %v20126_v28, %v24754_v48  ;;  %v10046_v1 = vsel %vm428_vm3, %v20122_v0, %v24755_v34  ;;  %v12300_v48 = vpop.permute.xlu1 %12299  ;;  %v20168_v2 = vpop.permute.xlu0 %12304  ;;  %v24762_v25 = vld [vmem:[#allocation208_spill] sm:$0xff]  ;;  %12649 = vrot.lane.b32.xlu0 %v24763_v40, %s12981_s17  ;;  %v24764_v35 = vunpack.i.l.bf16 %v19705_v24 }
 0x954   : > { %v10169_v43 = vsel %vm721_vm1, %v10045_v36, %v12236_v54  ;;  %v10170_v3 = vsel %vm721_vm1, %v10046_v1, %v12237_v18  ;;  %v24756_v54 = vld [vmem:[#allocation18_spill] sm:$0xff]  ;;  %v12302_v36 = vunpack.i.h.bf16 %v12300_v48  ;;  %v12301_v34 = vunpack.i.l.bf16 %v12300_v48 }
 0x955   : > { %v10298_v53 = vpack.c.bf16 %v10170_v3, %v10169_v43  ;;  %v20157_v29 = vsel %vm420_vm13, %v24756_v54, %v12297_v19  ;;  %v24757_v18 = vld [vmem:[#allocation46_spill] sm:$0xff]  ;;  %v23122_v1 = vunpack.i.l.bf16 %v19966_v41  ;;  %12529 = vrot.lane.b32.xlu1 %v24758_v49, %s12981_s17  ;;  %v24759_v19 = vunpack.i.l.bf16 %v19090_v32 }
 0x956   : > { %v20161_v58 = vsel %vm420_vm13, %v24757_v18, %v12296_v52  ;;  %v24760_v43 = vunpack.i.h.bf16 %v19090_v32  ;;  %v24761_v48 = vld [vmem:[#allocation210_spill] sm:$0xff]  ;;  %v23123_v18 = vunpack.i.h.bf16 %v20168_v2  ;;  %v23124_v45 = vunpack.i.l.bf16 %v20168_v2 }
 0x957   : > { %10567 = vmatprep.subr.bf16.mxu1 %v10298_v53  ;;  %v10077_v52 = vsel %vm428_vm3, %v20161_v58, %v24759_v19  ;;  %v20182_v54 = vsel %vm428_vm3, %v24761_v48, %v12301_v34  ;;  %v20186_v53 = vsel %vm428_vm3, %v24762_v25, %v12302_v36  ;;  %v12310_v19 = vpop.permute.xlu1 %12309  ;;  %v10047_v36 = vsel %vm428_vm3, %v20024_v22, %v23121_v50  ;;  %v20217_v50 = vpop.permute.xlu0 %12319 }
 0x958   : > { %v10078_v3 = vsel %vm428_vm3, %v20157_v29, %v24760_v43  ;;  %v10201_v32 = vsel %vm721_vm1, %v10077_v52, %v12251_v14  ;;  %v10048_v43 = vsel %vm428_vm3, %v20020_v59, %v23125_v51  ;;  %10568 = vmatpush1.bf16.xpose.msra.mxu1 %v10297_v20  ;;  %v10171_v14 = vsel %vm721_vm1, %v10047_v36, %v23124_v45  ;;  %v24766_v59 = vld [vmem:[#allocation202_spill] sm:$0xff]  ;;  %v24772_v51 = vld [vmem:[#allocation39_spill] sm:$0xff] }
 0x959   : > { %v10202_v34 = vsel %vm721_vm1, %v10078_v3, %v12252_v38  ;;  %v9855_v38 = vsel %vm721_vm1, %v20182_v54, %v24764_v35  ;;  %v24765_v52 = vunpack.i.h.bf16 %v19705_v24  ;;  %v12312_v3 = vunpack.i.h.bf16 %v12310_v19  ;;  %12534 = vrot.lane.b32.xlu1 %v24766_v59, %s12983_s19 }
 0x95a   : > { %v10338_v48 = vpack.c.bf16 %v10202_v34, %v10201_v32  ;;  %v12311_v25 = vunpack.i.l.bf16 %v12310_v19  ;;  %v10172_v20 = vsel %vm721_vm1, %v10048_v43, %v23123_v18  ;;  %v10337_v32 = vpack.c.bf16 %v9886_v11, %v9885_v60  ;;  %v24770_v60 = vld [vmem:[#allocation209_spill] sm:$0xff] }
 0x95b   : > { %v9856_v22 = vsel %vm721_vm1, %v20186_v53, %v24765_v52  ;;  %v23126_v34 = vunpack.i.h.bf16 %v20217_v50  ;;  %v23127_v36 = vunpack.i.l.bf16 %v20217_v50  ;;  %v10079_v24 = vsel %vm428_vm3, %v20074_v13, %v23122_v1  ;;  %12654 = vrot.lane.b32.xlu0 %v24770_v60, %s12981_s17 }
 0x95c   : > { %10653 = vmatprep.subr.bf16.mxu0 %v10338_v48  ;;  %v24767_v19 = vrot.slane %v19014_v31, 2  ;;  %v24768_v35 = vrot.slane %v19036_v57, 2  ;;  %v10300_v11 = vpack.c.bf16 %v10172_v20, %v10171_v14  ;;  %v12315_v48 = vpop.permute.xlu1 %12314  ;;  %v10080_v13 = vsel %vm428_vm3, %v20070_v44, %v23131_v33  ;;  %v24771_v20 = vld [vmem:[#allocation100_spill] sm:$0xff]  ;;  %v12325_v44 = vpop.permute.xlu0 %12324 }
 0x95d   : > { %10654 = vmatpush1.bf16.xpose.msra.mxu0 %v10337_v32  ;;  %v10299_v1 = vpack.c.bf16 %v9856_v22, %v9855_v38  ;;  %v12317_v18 = vunpack.i.h.bf16 %v12315_v48  ;;  %v12316_v45 = vunpack.i.l.bf16 %v12315_v48  ;;  %v23128_v14 = vunpack.i.l.bf16 %v20053_v37  ;;  %v24773_v38 = vld [vmem:[#allocation124_spill] sm:$0xff] }
 0x95e   : > { %v20235_v52 = vsel %vm1277_vm14, %v24768_v35, %v24767_v19  ;;  %v10203_v19 = vsel %vm721_vm1, %v10079_v24, %v23127_v36  ;;  %v10204_v35 = vsel %vm721_vm1, %v10080_v13, %v23126_v34  ;;  %v9736_v32 = vsel %vm420_vm13, %v24771_v20, %v12312_v3  ;;  %10569 = vmatprep.subr.bf16.mxu1 %v10300_v11  ;;  %v24774_v3 = vld [vmem:[#allocation212_spill] sm:$0xff] }
 0x95f   : > { %24769 = vst [vmem:[#allocation102_spill] sm:$0xff] %v20235_v52  ;;  %v9735_v43 = vsel %vm420_vm13, %v24772_v51, %v12311_v25  ;;  %12554 = vrot.lane.b32.xlu1 %v24773_v38, %s12981_s17  ;;  %v10340_v22 = vpack.c.bf16 %v10204_v35, %v10203_v19  ;;  %v20261_v48 = vsel %vm428_vm3, %v9736_v32, %v12317_v18  ;;  %v12327_v13 = vunpack.i.h.bf16 %v12325_v44  ;;  %v24779_v35 = vld [vmem:[#allocation167_spill] sm:$0xff]  ;;  %v24780_v32 = vld [vmem:[#allocation101_spill] sm:$0xff] }
 0x960   : > { %v20258_v24 = vsel %vm428_vm3, %v9735_v43, %v12316_v45  ;;  %v12326_v34 = vunpack.i.l.bf16 %v12325_v44  ;;  %12659 = vrot.lane.b32.xlu0 %v24774_v3, %s12981_s17  ;;  %v20266_v51 = vpop.permute.xlu1 %12329  ;;  %v24775_v45 = vunpack.i.h.bf16 %v19755_v26  ;;  %v24776_v43 = vrot.slane %v24690_v21, 2  ;;  %10570 = vmatpush1.bf16.xpose.msra.mxu1 %v10299_v1 }
 0x961   : > { %10655 = vmatprep.subr.bf16.mxu0 %v10340_v22  ;;  %v9887_v25 = vsel %vm721_vm1, %v20258_v24, %v12176_v6  ;;  %v24777_v11 = vrot.slane %v19014_v31, 2  ;;  %v20285_v20 = vsel %vm428_vm3, %v24779_v35, %v12327_v13  ;;  %v23130_v26 = vunpack.i.h.bf16 %v20266_v51 }
 0x962   : > { %v9888_v18 = vsel %vm721_vm1, %v20261_v48, %v24775_v45  ;;  %v20289_v44 = vsel %vm428_vm3, %v24780_v32, %v12326_v34  ;;  %v23129_v6 = vunpack.i.l.bf16 %v20266_v51  ;;  %v23135_v22 = vunpack.i.l.bf16 %v20103_v47  ;;  %v12335_v45 = vpop.permute.xlu0 %12334 }
 0x963   : > { %v20281_v19 = vsel %vm1277_vm14, %v24777_v11, %v24776_v43  ;;  %12559 = vrot.lane.b32.xlu1 %v19717_v39, %s12983_s19  ;;  %v10339_v43 = vpack.c.bf16 %v9888_v18, %v9887_v25  ;;  %v10049_v13 = vsel %vm428_vm3, %v20126_v28, %v23128_v14  ;;  %v24781_v34 = vunpack.i.h.bf16 %v20053_v37 }
 0x964   : > { %24778 = vst [vmem:[#allocation37_spill] sm:$0xff] %v20281_v19  ;;  %v10173_v11 = vsel %vm721_vm1, %v10049_v13, %v23129_v6  ;;  %v24782_v25 = vunpack.i.l.bf16 %v19802_v5  ;;  %v24783_v28 = vunpack.i.h.bf16 %v19802_v5  ;;  %v12337_v14 = vunpack.i.h.bf16 %v12335_v45  ;;  %v20320_v13 = vpop.permute.xlu1 %12344 }
 0x965   : > { %v10050_v1 = vsel %vm428_vm3, %v20122_v0, %v24781_v34  ;;  %v12336_v0 = vunpack.i.l.bf16 %v12335_v45  ;;  %v24784_v34 = vld [vmem:[#allocation188_spill] sm:$0xff]  ;;  %10656 = vmatpush1.bf16.xpose.msra.mxu0 %v10339_v43  ;;  %v24788_v45 = vrot.slane %v24707_v12, 1  ;;  %v10081_v5 = vsel %vm428_vm3, %v20161_v58, %v23135_v22  ;;  %v24799_v22 = vld [vmem:[#allocation79_spill] sm:$0xff] }
 0x966   : > { %v10174_v35 = vsel %vm721_vm1, %v10050_v1, %v23130_v26  ;;  %v9857_v18 = vsel %vm721_vm1, %v20289_v44, %v24782_v25  ;;  %v9858_v32 = vsel %vm721_vm1, %v20285_v20, %v24783_v28  ;;  %12664 = vrot.lane.b32.xlu0 %v24784_v34, %s12981_s17  ;;  %v24785_v1 = vrot.slane %v24706_v55, 1  ;;  %v24795_v28 = vld [vmem:[#allocation194_spill] sm:$0xff] }
 0x967   : > { %v10303_v6 = vpack.c.bf16 %v10174_v35, %v10173_v11  ;;  %v24786_v26 = vrot.slane %v24697_v8, 1  ;;  %v24791_v11 = vrot.slane %v24706_v55, 2  ;;  %v24792_v35 = vrot.slane %v24697_v8, 2  ;;  %12579 = vrot.lane.b32.xlu1 %v19759_v27, %s12986_s11 }
 0x968   : > { %v24789_v33 = vmov %v24785_v1  ;;  %v8238_v8 = vrot.slane %v24795_v28, 1  ;;  %v24796_v57 = vunpack.i.l.bf16 %v20320_v13  ;;  %v9737_v42 = vsel %vm420_vm13, %v24799_v22, %v12336_v0 }
 0x969   : > { %v20327_v25 = vsel %vm1260_vm9, %v24786_v26, %v24785_v1  ;;  %v20336_v43 = vsel %vm1260_vm9, %v24789_v33, %v24788_v45  ;;  %v20343_v36 = vsel %vm1277_vm14, %v24792_v35, %v24791_v11  ;;  %v12340_v26 = vpop.permute.xlu0 %12339  ;;  %10571 = vmatprep.subr.bf16.mxu1 %v10303_v6  ;;  %v10302_v1 = vpack.c.bf16 %v9858_v32, %v9857_v18  ;;  %v24798_v32 = vld [vmem:[#allocation81_spill] sm:$0xff] }
 0x96a   : > { %24787 = vst [vmem:[#allocation16_spill] sm:$0xff] %v20327_v25  ;;  %24790 = vst [vmem:[#allocation17_spill] sm:$0xff] %v20336_v43  ;;  %v24794_v33 = vunpack.i.h.bf16 %v20103_v47  ;;  %v12342_v11 = vunpack.i.h.bf16 %v12340_v26  ;;  %v12341_v35 = vunpack.i.l.bf16 %v12340_v26  ;;  %v10205_v31 = vsel %vm721_vm1, %v10081_v5, %v24796_v57  ;;  %12669 = vrot.lane.b32.xlu0 %v19759_v27, %s12981_s17 }
 0x96b   : > { %24793 = vst [vmem:[#allocation128_spill] sm:$0xff] %v20343_v36  ;;  %v24797_v6 = vunpack.i.h.bf16 %v20320_v13  ;;  %v9738_v58 = vsel %vm420_vm13, %v24798_v32, %v12337_v14  ;;  %v24801_v57 = vrot.slane %v24706_v55, 2  ;;  %10572 = vmatpush1.bf16.xpose.msra.mxu1 %v10302_v1  ;;  %v20385_v27 = vpack.i.bf16 %v20117_v15, %v20110_v61  ;;  %12594 = vrot.lane.b32.xlu1 %v19781_v7, %s12986_s11  ;;  %v24819_v55 = vld [vmem:[#allocation19_spill] sm:$0xff]  ;;  %v24938_v61 = vld [vmem:[#allocation76_spill] sm:$0xff] }
 0x96c   : > { %v10082_v45 = vsel %vm428_vm3, %v20157_v29, %v24794_v33  ;;  %v20368_v29 = vpop.permute.xlu1 %12349  ;;  %v24800_v33 = vrot.slane %v24707_v12, 2  ;;  %v20381_v14 = vsel %vm428_vm3, %v9738_v58, %v12342_v11  ;;  %v24804_v1 = vunpack.i.h.bf16 %v20016_v17 }
 0x96d   : > { %v10206_v18 = vsel %vm721_vm1, %v10082_v45, %v24797_v6  ;;  %v20378_v45 = vsel %vm428_vm3, %v9737_v42, %v12341_v35  ;;  %v12375_v22 = vpop.permute.xlu0 %12374  ;;  %v24803_v42 = vunpack.i.l.bf16 %v20016_v17  ;;  %v24805_v35 = vld [vmem:[#allocation174_spill] sm:$0xff]  ;;  %v24806_v6 = vld [vmem:[#allocation65_spill] sm:$0xff]  ;;  %v8446_v58 = vrot.slane %v24795_v28, 2 }
 0x96e   : > { %v10343_v26 = vpack.c.bf16 %v10206_v18, %v10205_v31  ;;  %v20375_v5 = vsel %vm1277_vm14, %v24801_v57, %v24800_v33  ;;  %v20389_v31 = vpack.i.bf16 %v20281_v19, %v20235_v52  ;;  %v9890_v11 = vsel %vm721_vm1, %v20381_v14, %v24804_v1  ;;  %12674 = vrot.lane.b32.xlu0 %v24763_v40, %s12983_s19  ;;  %v24811_v28 = vld [vmem:[#allocation49_spill] sm:$0xff] }
 0x96f   : > { %24802 = vst [vmem:[#allocation119_spill] sm:$0xff] %v20375_v5  ;;  %v9889_v0 = vsel %vm721_vm1, %v20378_v45, %v24803_v42  ;;  %v24807_v18 = vrot.slane %v24806_v6, 7  ;;  %v20410_v57 = vpack.i.bf16 %v20336_v43, %v20327_v25  ;;  %v20414_v17 = vpack.i.bf16 %v20375_v5, %v20343_v36  ;;  %v24810_v36 = vld [vmem:[#allocation30_spill] sm:$0xff]  ;;  %12609 = vrot.lane.b32.xlu1 %v19785_v62, %s12986_s11 }
 0x970   : > { %10657 = vmatprep.subr.bf16.mxu0 %v10343_v26  ;;  %v12377_v42 = vunpack.i.h.bf16 %v12375_v22  ;;  %v12376_v1 = vunpack.i.l.bf16 %v12375_v22  ;;  %v20418_v6 = vpop.permute.xlu1 %12354  ;;  %v24814_v26 = vunpack.i.l.bf16 %v20368_v29 }
 0x971   : > { %v8105_v32 = vsel %vm264_vm0, %v24807_v18, %v24805_v35  ;;  %v10342_v35 = vpack.c.bf16 %v9890_v11, %v9889_v0  ;;  %v24808_v18 = vrot.slane %v24690_v21, 1  ;;  %v23144_v19 = vunpack.i.l.bf16 %v20418_v6  ;;  %v12380_v0 = vpop.permute.xlu0 %12379 }
 0x972   : > { %v8240_v52 = vrot.slane %v8105_v32, 1  ;;  %v8448_v5 = vrot.slane %v8105_v32, 2  ;;  %v9976_v22 = vsel %vm420_vm13, %v24810_v36, %v12377_v42  ;;  %v9975_v40 = vsel %vm420_vm13, %v24811_v28, %v12376_v1  ;;  %12684 = vrot.lane.b32.xlu0 %v19781_v7, %s12981_s17 }
 0x973   : > { %v20423_v33 = vsel %vm1260_vm9, %v24808_v18, %v8238_v8  ;;  %10658 = vmatpush1.bf16.xpose.msra.mxu0 %v10342_v35  ;;  %v24812_v11 = vrot.slane %v24690_v21, 2  ;;  %v9859_v32 = vsel %vm721_vm1, %v20182_v54, %v24814_v26  ;;  %v24815_v36 = vunpack.i.h.bf16 %v20368_v29  ;;  %12624 = vrot.lane.b32.xlu1 %v19849_v23, %s12986_s11 }
 0x974   : > { %24809 = vst [vmem:[#allocation103_spill] sm:$0xff] %v20423_v33  ;;  %v12382_v42 = vunpack.i.h.bf16 %v12380_v0  ;;  %v12381_v1 = vunpack.i.l.bf16 %v12380_v0  ;;  %v9891_v35 = vsel %vm721_vm1, %v20258_v24, %v23144_v19  ;;  %v20456_v54 = vpop.permute.xlu1 %12359  ;;  %v24817_v26 = vunpack.i.l.bf16 %v19930_v63  ;;  %v24820_v19 = vld [vmem:[#allocation86_spill] sm:$0xff] }
 0x975   : > { %v20436_v18 = vsel %vm1277_vm14, %v24812_v11, %v8446_v58  ;;  %v9860_v28 = vsel %vm721_vm1, %v20186_v53, %v24815_v36  ;;  %v24816_v11 = vunpack.i.h.bf16 %v20418_v6  ;;  %v24818_v0 = vunpack.i.h.bf16 %v19930_v63  ;;  %v12385_v25 = vpop.permute.xlu0 %12384 }
 0x976   : > { %24813 = vst [vmem:[#allocation147_spill] sm:$0xff] %v20436_v18  ;;  %v10051_v53 = vsel %vm428_vm3, %v9975_v40, %v24817_v26  ;;  %v20466_v24 = vsel %vm420_vm13, %v24819_v55, %v12382_v42  ;;  %v20473_v7 = vsel %vm1260_vm9, %v8238_v8, %v8240_v52  ;;  %v24823_v26 = vunpack.i.l.bf16 %v20168_v2  ;;  %12689 = vrot.lane.b32.xlu0 %v24770_v60, %s12983_s19 }
 0x977   : > { %v9892_v21 = vsel %vm721_vm1, %v20261_v48, %v24816_v11  ;;  %v10052_v36 = vsel %vm428_vm3, %v9976_v22, %v24818_v0  ;;  %v20470_v48 = vsel %vm420_vm13, %v24820_v19, %v12381_v1  ;;  %24821 = vst [vmem:[#allocation187_spill] sm:$0xff] %v20473_v7  ;;  %v20476_v11 = vsel %vm1277_vm14, %v8446_v58, %v8448_v5 }
 0x978   : > { %24822 = vst [vmem:[#allocation140_spill] sm:$0xff] %v20476_v11  ;;  %v10175_v63 = vsel %vm721_vm1, %v10051_v53, %v24823_v26  ;;  %v24824_v0 = vunpack.i.h.bf16 %v20168_v2  ;;  %v24825_v19 = vunpack.i.l.bf16 %v19966_v41  ;;  %v24826_v52 = vunpack.i.h.bf16 %v19966_v41  ;;  %12629 = vrot.lane.b32.xlu1 %v24724_v4, %s12986_s11 }
 0x979   : > { %v10305_v2 = vpack.c.bf16 %v9860_v28, %v9859_v32  ;;  %v10345_v1 = vpack.c.bf16 %v9892_v21, %v9891_v35  ;;  %v12387_v53 = vunpack.i.h.bf16 %v12385_v25  ;;  %v24828_v42 = vunpack.i.h.bf16 %v20217_v50  ;;  %v24829_v32 = vld [vmem:[#allocation114_spill] sm:$0xff]  ;;  %v24831_v35 = vld [vmem:[#allocation159_spill] sm:$0xff] }
 0x97a   : > { %v10176_v55 = vsel %vm721_vm1, %v10052_v36, %v24824_v0  ;;  %v10083_v8 = vsel %vm428_vm3, %v20470_v48, %v24825_v19  ;;  %v10084_v5 = vsel %vm428_vm3, %v20466_v24, %v24826_v52  ;;  %v12386_v36 = vunpack.i.l.bf16 %v12385_v25  ;;  %v20498_v0 = vpop.permute.xlu1 %12364  ;;  %12699 = vrot.lane.b32.xlu0 %v19785_v62, %s12981_s17 }
 0x97b   : > { %v10306_v26 = vpack.c.bf16 %v10176_v55, %v10175_v63  ;;  %v24827_v19 = vunpack.i.l.bf16 %v20217_v50  ;;  %v12367_v52 = vunpack.i.h.bf16 %v20498_v0  ;;  %v12366_v58 = vunpack.i.l.bf16 %v20498_v0  ;;  %v24832_v63 = vld [vmem:[#allocation178_spill] sm:$0xff] }
 0x97c   : > { %v10208_v21 = vsel %vm721_vm1, %v10084_v5, %v24828_v42  ;;  %v24830_v25 = vunpack.i.l.bf16 %v24829_v32  ;;  %v9978_v60 = vsel %vm420_vm13, %v24831_v35, %v12387_v53  ;;  %v9977_v55 = vsel %vm420_vm13, %v24832_v63, %v12386_v36  ;;  %v24838_v35 = vld [vmem:[#allocation170_spill] sm:$0xff]  ;;  %12634 = vrot.lane.b32.xlu1 %v24732_v56, %s12986_s11 }
 0x97d   : > { %v10207_v41 = vsel %vm721_vm1, %v10083_v8, %v24827_v19  ;;  %10573 = vmatprep.subr.bf16.mxu1 %v10306_v26  ;;  %v12390_v8 = vpop.permute.xlu0 %12389  ;;  %v24833_v50 = vunpack.i.l.bf16 %v20456_v54  ;;  %v24834_v42 = vunpack.i.h.bf16 %v20456_v54  ;;  %v24835_v4 = vunpack.i.l.bf16 %v20053_v37 }
 0x97e   : > { %v10055_v28 = vsel %vm428_vm3, %v9975_v40, %v24830_v25  ;;  %v10346_v19 = vpack.c.bf16 %v10208_v21, %v10207_v41  ;;  %10574 = vmatpush1.bf16.xpose.msra.mxu1 %v10305_v2  ;;  %v12392_v53 = vunpack.i.h.bf16 %v12390_v8  ;;  %v12391_v25 = vunpack.i.l.bf16 %v12390_v8  ;;  %v20527_v36 = vpop.permute.xlu1 %12369  ;;  %12704 = vrot.lane.b32.xlu0 %v24774_v3, %s12983_s19 }
 0x97f   : > { %v9861_v5 = vsel %vm721_vm1, %v20289_v44, %v24833_v50  ;;  %v9862_v40 = vsel %vm721_vm1, %v20285_v20, %v24834_v42  ;;  %v10053_v26 = vsel %vm428_vm3, %v9977_v55, %v24835_v4  ;;  %v24836_v44 = vunpack.i.h.bf16 %v20053_v37  ;;  %v24839_v37 = vld [vmem:[#allocation146_spill] sm:$0xff] }
 0x980   : > { %10659 = vmatprep.subr.bf16.mxu0 %v10346_v19  ;;  %v24837_v21 = vunpack.i.h.bf16 %v24829_v32  ;;  %v9893_v2 = vsel %vm721_vm1, %v20378_v45, %v12366_v58  ;;  %v9894_v62 = vsel %vm721_vm1, %v20381_v14, %v12367_v52  ;;  %v20548_v63 = vsel %vm420_vm13, %v24838_v35, %v12392_v53  ;;  %v24842_v14 = vld [vmem:[#allocation56_spill] sm:$0xff]  ;;  %12639 = vrot.lane.b32.xlu1 %v24739_v16, %s12986_s11 }
 0x981   : > { %v10054_v41 = vsel %vm428_vm3, %v9978_v60, %v24836_v44  ;;  %v20552_v8 = vsel %vm420_vm13, %v24839_v37, %v12391_v25  ;;  %10660 = vmatpush1.bf16.xpose.msra.mxu0 %v10345_v1  ;;  %v24840_v32 = vunpack.i.l.bf16 %v20266_v51  ;;  %v24841_v45 = vunpack.i.h.bf16 %v20266_v51  ;;  %v24846_v44 = vld [vmem:[#allocation98_spill] sm:$0xff] }
 0x982   : > { %v10056_v20 = vsel %vm428_vm3, %v9976_v22, %v24837_v21  ;;  %v12395_v22 = vpop.permute.xlu0 %12394  ;;  %v24843_v42 = vunpack.i.l.bf16 %v24842_v14  ;;  %v24844_v25 = vunpack.i.h.bf16 %v24842_v14  ;;  %v24845_v4 = vunpack.i.l.bf16 %v20368_v29  ;;  %12714 = vrot.lane.b32.xlu0 %v19849_v23, %s12981_s17 }
 0x983   : > { %v10177_v19 = vsel %vm721_vm1, %v10053_v26, %v24840_v32  ;;  %v10178_v50 = vsel %vm721_vm1, %v10054_v41, %v24841_v45  ;;  %v24847_v51 = vunpack.i.h.bf16 %v20368_v29  ;;  %v24848_v41 = vld [vmem:[#allocation96_spill] sm:$0xff]  ;;  %v10307_v35 = vpack.c.bf16 %v9862_v40, %v9861_v5 }
 0x984   : > { %v10179_v53 = vsel %vm721_vm1, %v10055_v28, %v24843_v42  ;;  %v10180_v1 = vsel %vm721_vm1, %v10056_v20, %v24844_v25  ;;  %v20572_v26 = vsel %vm721_vm1, %v24846_v44, %v24845_v4  ;;  %v10308_v56 = vpack.c.bf16 %v10178_v50, %v10177_v19  ;;  %v20582_v20 = vpop.permute.xlu1 %12404  ;;  %12644 = vrot.lane.b32.xlu1 %v24753_v30, %s12986_s11  ;;  %v24862_v30 = vld [vmem:[#allocation181_spill] sm:$0xff] }
 0x985   : > { %v20578_v21 = vsel %vm721_vm1, %v24848_v41, %v24847_v51  ;;  %v12397_v37 = vunpack.i.h.bf16 %v12395_v22  ;;  %v12396_v28 = vunpack.i.l.bf16 %v12395_v22  ;;  %v24849_v32 = vunpack.i.l.bf16 %v20103_v47 }
 0x986   : > { %v24850_v29 = vunpack.i.h.bf16 %v20103_v47  ;;  %v23156_v19 = vunpack.i.h.bf16 %v20527_v36  ;;  %v23157_v5 = vunpack.i.l.bf16 %v20527_v36  ;;  %10575 = vmatprep.subr.bf16.mxu1 %v10308_v56  ;;  %v10310_v40 = vpack.c.bf16 %v10180_v1, %v10179_v53  ;;  %v12400_v42 = vpop.permute.xlu0 %12399  ;;  %v24855_v56 = vld [vmem:[#allocation40_spill] sm:$0xff]  ;;  %12719 = vrot.lane.b32.xlu0 %v24784_v34, %s12983_s19 }
 0x987   : > { %v10085_v45 = vsel %vm428_vm3, %v20552_v8, %v24849_v32  ;;  %v10347_v22 = vpack.c.bf16 %v9894_v62, %v9893_v2  ;;  %v23152_v3 = vunpack.i.h.bf16 %v20582_v20  ;;  %v23153_v50 = vunpack.i.l.bf16 %v20582_v20  ;;  %10576 = vmatpush1.bf16.xpose.msra.mxu1 %v10307_v35  ;;  %v24853_v62 = vld [vmem:[#allocation84_spill] sm:$0xff] }
 0x988   : > { %v10086_v14 = vsel %vm428_vm3, %v20548_v63, %v24850_v29  ;;  %v24851_v25 = vunpack.i.l.bf16 %v20320_v13  ;;  %v24852_v47 = vunpack.i.h.bf16 %v20320_v13  ;;  %v12402_v51 = vunpack.i.h.bf16 %v12400_v42  ;;  %v24856_v29 = vld [vmem:[#allocation110_spill] sm:$0xff]  ;;  %10577 = vmatprep.subr.bf16.mxu1 %v10310_v40  ;;  %v20613_v13 = vpop.permute.xlu1 %12409  ;;  %12679 = vrot.lane.b32.xlu1 %v20385_v27, %s12986_s11 }
 0x989   : > { %v12401_v53 = vunpack.i.l.bf16 %v12400_v42  ;;  %v24854_v1 = vunpack.i.l.bf16 %v24853_v62  ;;  %v9740_v32 = vsel %vm420_vm13, %v24855_v56, %v12397_v37  ;;  %v24857_v16 = vunpack.i.h.bf16 %v24853_v62 }
 0x98a   : > { %v10209_v4 = vsel %vm721_vm1, %v10085_v45, %v24851_v25  ;;  %v10210_v44 = vsel %vm721_vm1, %v10086_v14, %v24852_v47  ;;  %v9739_v45 = vsel %vm420_vm13, %v24856_v29, %v12396_v28  ;;  %v24858_v14 = vld [vmem:[#allocation121_spill] sm:$0xff]  ;;  %v9804_v25 = vsel %vm428_vm3, %v9740_v32, %v12402_v51  ;;  %v12415_v40 = vpop.permute.xlu0 %12414  ;;  %v24866_v32 = vld [vmem:[#allocation143_spill] sm:$0xff]  ;;  %12749 = vrot.lane.b32.xlu0 %v20389_v31, %s12981_s17 }
 0x98b   : > { %v10348_v2 = vpack.c.bf16 %v10210_v44, %v10209_v4  ;;  %v10057_v41 = vsel %vm428_vm3, %v9977_v55, %v24854_v1  ;;  %v10058_v35 = vsel %vm428_vm3, %v9978_v60, %v24857_v16  ;;  %v8274_v42 = vrot.slane %v24858_v14, 1 }
 0x98c   : > { %v9803_v55 = vsel %vm428_vm3, %v9739_v45, %v12401_v53  ;;  %v10087_v37 = vsel %vm428_vm3, %v20470_v48, %v23157_v5  ;;  %v10088_v23 = vsel %vm428_vm3, %v20466_v24, %v23156_v19  ;;  %v23150_v60 = vunpack.i.h.bf16 %v20613_v13  ;;  %12694 = vrot.lane.b32.xlu1 %v20410_v57, %s12986_s11 }
 0x98d   : > { %10661 = vmatprep.subr.bf16.mxu0 %v10348_v2  ;;  %v23151_v28 = vunpack.i.l.bf16 %v20613_v13  ;;  %v10211_v4 = vsel %vm721_vm1, %v10087_v37, %v23153_v50  ;;  %v10212_v48 = vsel %vm721_vm1, %v10088_v23, %v23152_v3  ;;  %v10309_v24 = vpack.c.bf16 %v20578_v21, %v20572_v26  ;;  %v24863_v2 = vld [vmem:[#allocation161_spill] sm:$0xff]  ;;  %v24910_v50 = vld [vmem:[#allocation126_spill] sm:$0xff] }
 0x98e   : > { %10662 = vmatpush1.bf16.xpose.msra.mxu0 %v10347_v22  ;;  %v24859_v22 = vld [vmem:[#allocation24_spill] sm:$0xff]  ;;  %v24864_v62 = vrot.slane %v24863_v2, 7  ;;  %v24865_v56 = vunpack.i.l.bf16 %v20456_v54  ;;  %v12417_v26 = vunpack.i.h.bf16 %v12415_v40  ;;  %v10350_v21 = vpack.c.bf16 %v10212_v48, %v10211_v4  ;;  %12754 = vrot.lane.b32.xlu0 %v20414_v17, %s12981_s17 }
 0x98f   : > { %v24860_v47 = vunpack.i.l.bf16 %v24859_v22  ;;  %v24861_v51 = vunpack.i.h.bf16 %v24859_v22  ;;  %v24867_v45 = vunpack.i.l.bf16 %v20418_v6  ;;  %v24868_v22 = vunpack.i.h.bf16 %v20418_v6  ;;  %10578 = vmatpush1.bf16.xpose.msra.mxu1 %v10309_v24 }
 0x990   : > { %v20651_v1 = vsel %vm264_vm0, %v24864_v62, %v24862_v30  ;;  %v9865_v29 = vsel %vm721_vm1, %v24866_v32, %v24865_v56  ;;  %v10089_v34 = vsel %vm428_vm3, %v20552_v8, %v23151_v28  ;;  %v10090_v4 = vsel %vm428_vm3, %v20548_v63, %v23150_v60  ;;  %10663 = vmatprep.subr.bf16.mxu0 %v10350_v21  ;;  %v24869_v63 = vld [vmem:[#allocation169_spill] sm:$0xff]  ;;  %v24871_v32 = vld [vmem:[#allocation87_spill] sm:$0xff] }
 0x991   : > { %v10181_v44 = vsel %vm721_vm1, %v10057_v41, %v24860_v47  ;;  %v10182_v53 = vsel %vm721_vm1, %v10058_v35, %v24861_v51  ;;  %v20659_v41 = vpop.permute.xlu1 %12424  ;;  %v9895_v16 = vsel %vm721_vm1, %v9803_v55, %v24867_v45  ;;  %v12416_v35 = vunpack.i.l.bf16 %v12415_v40  ;;  %v12420_v40 = vpop.permute.xlu0 %12419  ;;  %v12947_v28 = vld [vmem:[%s22491_s5] ss:$12 sps:$4 sm:$0xff]  }
 0x992   : > { %v23148_v37 = vunpack.i.h.bf16 %v20659_v41  ;;  %v23149_v23 = vunpack.i.l.bf16 %v20659_v41  ;;  %v9896_v47 = vsel %vm721_vm1, %v9804_v25, %v24868_v22  ;;  %v10313_v48 = vpack.c.bf16 %v10182_v53, %v10181_v44 }
 0x993   : > { %v8482_v6 = vrot.slane %v24858_v14, 2  ;;  %v12422_v51 = vunpack.i.h.bf16 %v12420_v40  ;;  %v12421_v30 = vunpack.i.l.bf16 %v12420_v40  ;;  %v9742_v44 = vsel %vm420_vm13, %v24869_v63, %v12417_v26  ;;  %v24874_v26 = vld [vmem:[#allocation182_spill] sm:$0xff] }
 0x994   : > { %v10213_v8 = vsel %vm721_vm1, %v10089_v34, %v23149_v23  ;;  %v10214_v2 = vsel %vm721_vm1, %v10090_v4, %v23148_v37  ;;  %10579 = vmatprep.subr.bf16.mxu1 %v10313_v48  ;;  %v10349_v53 = vpack.c.bf16 %v9896_v47, %v9895_v16  ;;  %v8276_v56 = vrot.slane %v20651_v1, 1  ;;  %v24872_v34 = vld [vmem:[#allocation2_spill] sm:$0xff]  ;;  %v24891_v37 = vld [vmem:[#allocation5_spill] sm:$0xff] }
 0x995   : > { %v20690_v62 = vpop.permute.xlu1 %12429  ;;  %v10353_v24 = vpack.c.bf16 %v10214_v2, %v10213_v8  ;;  %v9741_v21 = vsel %vm420_vm13, %v24871_v32, %v12416_v35  ;;  %v24873_v4 = vld [vmem:[#allocation162_spill] sm:$0xff]  ;;  %v24876_v47 = vunpack.i.h.bf16 %v20456_v54  ;;  %v9806_v2 = vsel %vm428_vm3, %v9742_v44, %v12422_v51  ;;  %v20707_v35 = vpop.permute.xlu0 %12434  ;;  %v24880_v51 = vld [vmem:[#allocation15_spill] sm:$0xff] }
 0x996   : > { %24870 = vst [vmem:[#allocation149_spill] sm:$0xff] %v20690_v62  ;;  %v23146_v45 = vunpack.i.h.bf16 %v20690_v62  ;;  %v23147_v22 = vunpack.i.l.bf16 %v20690_v62  ;;  %v24875_v48 = vcombine.low %v24873_v4, %v24874_v26  ;;  %v24877_v40 = vld [vmem:[#allocation82_spill] sm:$0xff]  ;;  %v9805_v8 = vsel %vm428_vm3, %v9741_v21, %v12421_v30  ;;  %10664 = vmatpush1.bf16.xpose.msra.mxu0 %v10349_v53  ;;  %v24881_v30 = vld [vmem:[#allocation108_spill] sm:$0xff]  ;;  %v24883_v21 = vld [vmem:[#allocation21_spill] sm:$0xff] }
 0x997   : > { %v9866_v63 = vsel %vm721_vm1, %v24877_v40, %v24876_v47  ;;  %v8484_v32 = vrot.slane %v20651_v1, 2  ;;  %10665 = vmatprep.subr.bf16.mxu0 %v10353_v24  ;;  %v24882_v44 = vcombine.low %v24880_v51, %v24881_v30  ;;  %v7844_v26 = vrot.slane %v24883_v21, %v24872_v34  ;;  %v24887_v21 = vld [vmem:[#allocation12_spill] sm:$0xff] }
 0x998   : > { %v7851_v16 = vrot.slane %v24875_v48, %v24872_v34  ;;  %v20715_v4 = vsel %vm721_vm1, %v9803_v55, %v23147_v22  ;;  %v20720_v54 = vsel %vm721_vm1, %v9804_v25, %v23146_v45  ;;  %v20736_v25 = vpack.i.bf16 %v20473_v7, %v20423_v33  ;;  %v24889_v22 = vld [vmem:[#allocation3_spill] sm:$0xff] }
 0x999   : > { %24878 = vst [vmem:[#allocation131_spill] sm:$0xff] %v20715_v4  ;;  %24879 = vst [vmem:[#allocation53_spill] sm:$0xff] %v20720_v54  ;;  %v7834_v53 = vrot.slane %v24882_v44, %v24872_v34  ;;  %v20732_v55 = vpop.permute.xlu1 %12439  ;;  %v24884_v24 = vrot.slane %v24707_v12, 1  ;;  %v20748_v47 = vsel %vm1260_vm9, %v8274_v42, %v8276_v56  ;;  %v10312_v40 = vpack.c.bf16 %v9866_v63, %v9865_v29  ;;  %v24893_v29 = vld [vmem:[#allocation166_spill] sm:$0xff]  ;;  %v24894_v63 = vld [vmem:[#allocation35_spill] sm:$0xff] }
 0x99a   : > { %24886 = vst [vmem:[#allocation69_spill] sm:$0xff] %v20748_v47  ;;  %v9897_v51 = vsel %vm721_vm1, %v9805_v8, %v12366_v58  ;;  %v9898_v30 = vsel %vm721_vm1, %v9806_v2, %v12367_v52  ;;  %v7852_v44 = vcombine.low %v7844_v26, %v7851_v16  ;;  %v7861_v45 = vrot.slane %v24887_v21, %v24872_v34  ;;  %v20768_v58 = vpop.permute.xlu0 %12449  ;;  %v24896_v52 = vld [vmem:[#allocation144_spill] sm:$0xff]  ;;  %v24901_v21 = vld [vmem:[#allocation165_spill] sm:$0xff]  ;;  %v24934_v33 = vld [vmem:[#allocation75_spill] sm:$0xff] }
 0x99b   : > { %v20743_v48 = vsel %vm1260_vm9, %v24884_v24, %v8274_v42  ;;  %v24888_v24 = vld [vmem:[#allocation4_spill] sm:$0xff]  ;;  %v24892_v42 = vrot.slane %v24891_v37, %v24889_v22  ;;  %v20766_v23 = vpack.c.bf16 %v24894_v63, %v24893_v29  ;;  %24895 = vst [vmem:[#allocation28_spill] sm:$0xff] %v20768_v58  ;;  %12709 = vrot.lane.b32.xlu1 %v20736_v25, %s12986_s11  ;;  %v24898_v37 = vrot.slane %v24707_v12, 2 }
 0x99c   : > { %24885 = vst [vmem:[#allocation13_spill] sm:$0xff] %v20743_v48  ;;  %v24890_v1 = vrot.slane %v24888_v24, %v24889_v22  ;;  %v20774_v0 = vpack.i.bf16 %v20476_v11, %v20436_v18  ;;  %10580 = vmatpush1.bf16.xpose.msra.mxu1 %v10312_v40  ;;  %v24897_v16 = vld [vmem:[#allocation168_spill] sm:$0xff]  ;;  %v24902_v24 = vrot.slane %v24901_v21, %v24872_v34  ;;  %v7993_v21 = vrot.slane %v7852_v44, 7 }
 0x99d   : > { %v20778_v26 = vpack.c.bf16 %v24897_v16, %v24896_v52  ;;  %v20783_v22 = vsel %vm1277_vm14, %v24898_v37, %v8482_v6  ;;  %11555 = vmatprep.subr.msk.bf16.mxu1 %vm420_vm13, %v20766_v23  ;;  %v10352_v40 = vpack.c.bf16 %v9898_v30, %v9897_v51  ;;  %v20795_v29 = vpop.permute.xlu1 %12444  ;;  %v20799_v63 = vpack.i.bf16 %v20748_v47, %v20743_v48  ;;  %v24907_v51 = vld [vmem:[#allocation11_spill] sm:$0xff]  ;;  %v24908_v30 = vld [vmem:[#allocation9_spill] sm:$0xff]  ;;  %v24933_v47 = vld [vmem:[#allocation74_spill] sm:$0xff] }
 0x99e   : > { %v7870_v56 = vcombine.low %v24892_v42, %v24890_v1  ;;  %24899 = vst [vmem:[#allocation47_spill] sm:$0xff] %v20783_v22  ;;  %v20786_v1 = vsel %vm1277_vm14, %v8482_v6, %v8484_v32  ;;  %v7835_v42 = vcombine.low %v24902_v24, %v7834_v53  ;;  %12759 = vrot.lane.b32.xlu0 %v20774_v0, %s12981_s17  ;;  %24903 = vst [vmem:[#allocation80_spill] sm:$0xff] %v20795_v29  ;;  %v24904_v6 = vld [vmem:[#allocation10_spill] sm:$0xff]  ;;  %v24905_v32 = vld [vmem:[#allocation8_spill] sm:$0xff]  ;;  %v20814_v3 = vpop.permute.xlu0 %12519 }
 0x99f   : > { %24900 = vst [vmem:[#allocation150_spill] sm:$0xff] %v20786_v1  ;;  %v24906_v52 = vcombine.low %v24904_v6, %v24905_v32  ;;  %v23155_v53 = vunpack.i.h.bf16 %v20795_v29  ;;  %v23154_v37 = vunpack.i.l.bf16 %v20795_v29  ;;  %v24909_v24 = vcombine.low %v24907_v51, %v24908_v30  ;;  %10666 = vmatpush1.bf16.xpose.msra.mxu0 %v10352_v40  ;;  %v24911_v6 = vld [vmem:[#allocation73_spill] sm:$0xff]  ;;  %12724 = vrot.lane.b32.xlu1 %v20799_v63, %s12986_s11 }
 0x9a0   : > { %v10277_v32 = vpack.c.bf16 %v24911_v6, %v24910_v50  ;;  %v20822_v44 = vpack.i.bf16 %v20786_v1, %v20783_v22  ;;  %11563 = vmatprep.subr.msk.bf16.mxu0 %vm420_vm13, %v20778_v26  ;;  %v7992_v51 = vrot.slane %v7835_v42, 7  ;;  %v24915_v6 = vld [vmem:[#allocation83_spill] sm:$0xff]  ;;  %v24919_v1 = vld [vmem:[#allocation130_spill] sm:$0xff]  ;;  %v20921_v7 = vpack.c.bf16 %v24934_v33, %v24933_v47  ;;  %v24935_v47 = vld [vmem:[#allocation44_spill] sm:$0xff] }
 0x9a1   : > { %v7868_v16 = vrot.slane %v24906_v52, %v24872_v34  ;;  %v7885_v60 = vrot.slane %v24909_v24, %v24872_v34  ;;  %v20829_v40 = vsel %vm721_vm1, %v9805_v8, %v23154_v37  ;;  %v20834_v50 = vsel %vm721_vm1, %v9806_v2, %v23155_v53  ;;  %v20846_v8 = vpop.permute.xlu1 %12454  ;;  %v24916_v37 = vld [vmem:[#allocation191_spill] sm:$0xff]  ;;  %v24917_v53 = vld [vmem:[#allocation85_spill] sm:$0xff]  ;;  %v24920_v22 = vld [vmem:[#allocation186_spill] sm:$0xff] }
 0x9a2   : > { %24912 = vst [vmem:[#allocation132_spill] sm:$0xff] %v20829_v40  ;;  %24913 = vst [vmem:[#allocation180_spill] sm:$0xff] %v20834_v50  ;;  %v7878_v24 = vrot.slane %v7870_v56, %v24872_v34  ;;  %12764 = vrot.lane.b32.xlu0 %v20822_v44, %s12981_s17  ;;  %v20850_v2 = vpack.i.bf16 %v24916_v37, %v24915_v6  ;;  %v24918_v34 = vld [vmem:[#allocation42_spill] sm:$0xff]  ;;  %v20857_v19 = vsel %vm264_vm0, %v7992_v51, %v7993_v21  ;;  %v20864_v18 = vpop.permute.xlu0 %12524  ;;  %v24943_v50 = vld [vmem:[#allocation160_spill] sm:$0xff] }
 0x9a3   : > { %v7869_v52 = vcombine.low %v7861_v45, %v7868_v16  ;;  %v20840_v45 = vld [vmem:[%s22491_s5 + $0x8] ss:$12 sps:$4 sm:$0xff]   ;;  %v20854_v56 = vpack.c.bf16 %v24918_v34, %v24917_v53  ;;  %10582 = vmatmul.mubr.bf16.vlgmr.msra.gmra.mrb[80].mxu1 %v12947_v28  ;;  %v10454_v16 = vsel %vm420_vm13, %v10277_v32, 0  ;;  %v20862_v11 = vpack.c.bf16 %v24920_v22, %v24919_v1 }
 0x9a4   : > { %24914 = vst [vmem:[#allocation179_spill] sm:$0xff] %v20840_v45  ;;  %v7886_v5 = vcombine.low %v7878_v24, %v7885_v60  ;;  %12729 = vrot.lane.b32.xlu1 %v20850_v2, %s12983_s19  ;;  %11398 = vmatpush3.bf16.xpose.msra.mxu1 %v10454_v16  ;;  %v24922_v53 = vld [vmem:[#allocation118_spill] sm:$0xff]  ;;  %v24925_v32 = vld [vmem:[#allocation145_spill] sm:$0xff]  ;;  %v12522_v29 = vunpack.i.h.bf16 %v20814_v3  ;;  %v12521_v10 = vunpack.i.l.bf16 %v20814_v3 }
 0x9a5   : > { %v7995_v42 = vrot.slane %v7869_v52, 7  ;;  %v20873_v34 = vsel %vm264_vm0, %v24922_v53, %v7992_v51  ;;  %11413 = vmatprep.mubr.msk.bf16.mxu1 %vm420_vm13, %v20840_v45  ;;  %11556 = vmatprep.subr.msk.bf16.mxu1 %vm420_vm13, %v20862_v11  ;;  %v20881_v60 = vpop.permute.xlu1 %12459  ;;  %v10478_v1 = vsel %vm420_vm13, %v20854_v56, 0  ;;  %v24926_v53 = vld [vmem:[#allocation123_spill] sm:$0xff]  ;;  %v24961_v6 = vld [vmem:[#allocation137_spill] sm:$0xff] }
 0x9a6   : > { %24923 = vst [vmem:[#allocation176_spill] sm:$0xff] %v20873_v34  ;;  %12769 = vrot.lane.b32.xlu0 %v20385_v27, %s12981_s17  ;;  %v20885_v22 = vpack.i.bf16 %v20857_v19, %v20873_v34  ;;  %10668 = vmatmul.mubr.bf16.vlgmr.msra.gmra.mrb[52].mxu0 %v12947_v28  ;;  %v7997_v24 = vrot.slane %v7886_v5, 7  ;;  %v20893_v16 = vpop.permute.xlu0 %12539  ;;  %v24927_v27 = vld [vmem:[#allocation120_spill] sm:$0xff]  ;;  %v24928_v5 = vld [vmem:[#allocation71_spill] sm:$0xff] }
 0x9a7   : > { %v20869_v52 = vsel %vm264_vm0, %v7993_v21, %v7995_v42  ;;  %v24924_v21 = vld [vmem:[#allocation134_spill] sm:$0xff]  ;;  %11416 = vmatpush3.bf16.xpose.msra.mxu0 %v10478_v1  ;;  %v10280_v12 = vpack.c.bf16 %v24927_v27, %v24926_v53  ;;  %11431 = vmatprep.mubr.msk.bf16.mxu0 %vm420_vm13, %v20840_v45  ;;  %v24929_v1 = vld [vmem:[#allocation31_spill] sm:$0xff] }
 0x9a8   : > { %24921 = vst [vmem:[#allocation157_spill] sm:$0xff] %v20869_v52  ;;  %v20891_v51 = vpack.c.bf16 %v24925_v32, %v24924_v21  ;;  %12734 = vrot.lane.b32.xlu1 %v20885_v22, %s12983_s19  ;;  %v20909_v21 = vpack.i.bf16 %v24929_v1, %v24928_v5  ;;  %v24930_v32 = vld [vmem:[#allocation78_spill] sm:$0xff]  ;;  %v24931_v53 = vld [vmem:[#allocation67_spill] sm:$0xff]  ;;  %v20916_v14 = vsel %vm264_vm0, %v7995_v42, %v7997_v24  ;;  %v24936_v42 = vld [vmem:[#allocation136_spill] sm:$0xff]  ;;  %v8281_v43 = vrot.slane %v20869_v52, 1 }
 0x9a9   : > { %v20905_v28 = vpop.permute.xlu1 %12464  ;;  %v20913_v27 = vpack.c.bf16 %v24931_v53, %v24930_v32  ;;  %24932 = vst [vmem:[#allocation91_spill] sm:$0xff] %v20916_v14  ;;  %v10457_v48 = vsel %vm420_vm13, %v10280_v12, 0  ;;  %v20933_v12 = vpack.i.bf16 %v20916_v14, %v20869_v52  ;;  %v20939_v53 = vpack.c.bf16 %v24936_v42, %v24935_v47  ;;  %v24939_v42 = vld [vmem:[#allocation63_spill] sm:$0xff]  ;;  %v24944_v5 = vld [vmem:[#allocation77_spill] sm:$0xff] }
 0x9aa   : > { %11564 = vmatprep.subr.msk.bf16.mxu0 %vm420_vm13, %v20891_v51  ;;  %12774 = vrot.lane.b32.xlu0 %v20389_v31, %s12983_s19  ;;  %v12545_v31 = vpop.permute.xlu0 %12544  ;;  %v8278_v47 = vrot.slane %v20873_v34, 1  ;;  %v20969_v1 = vpack.c.bf16 %v24944_v5, %v24943_v50  ;;  %v8283_v4 = vrot.slane %v20916_v14, 1 }
 0x9ab   : > { %v10481_v33 = vsel %vm420_vm13, %v20913_v27, 0  ;;  %v12547_v50 = vunpack.i.h.bf16 %v12545_v31 }
 0x9ac   : > { %12739 = vrot.lane.b32.xlu1 %v20909_v21, %s12983_s19  ;;  %11400 = vmatpush3.bf16.xpose.msra.mxu1 %v10457_v48  ;;  %v8279_v48 = vrot.slane %v20857_v19, 1 }
 0x9ad   : > { %11557 = vmatprep.subr.msk.bf16.mxu1 %vm420_vm13, %v20921_v7  ;;  %v20929_v32 = vpop.permute.xlu1 %12469 }
 0x9ae   : > { %12784 = vrot.lane.b32.xlu0 %v20410_v57, %s12981_s17  ;;  %v20943_v15 = vpop.permute.xlu0 %12549  ;;  %v24937_v57 = vld [vmem:[#allocation45_spill] sm:$0xff]  ;;  %v20964_v40 = vsel %vm1260_vm9, %v8279_v48, %v8281_v43 }
 0x9af   : > { %11418 = vmatpush3.bf16.xpose.msra.mxu0 %v10481_v33  ;;  %v10282_v9 = vpack.c.bf16 %v24938_v61, %v24937_v57  ;;  %v10321_v61 = vpack.c.bf16 %v24940_v46, %v24939_v42  ;;  %v20961_v57 = vsel %vm1260_vm9, %v8278_v47, %v8279_v48  ;;  %24942 = vst [vmem:[#allocation142_spill] sm:$0xff] %v20964_v40  ;;  %v24947_v48 = vld [vmem:[#allocation158_spill] sm:$0xff]  ;;  %v12546_v42 = vunpack.i.l.bf16 %v12545_v31 }
 0x9b0   : > { %12744 = vrot.lane.b32.xlu1 %v20933_v12, %s12983_s19  ;;  %11565 = vmatprep.subr.msk.bf16.mxu0 %vm420_vm13, %v20939_v53  ;;  %24941 = vst [vmem:[#allocation41_spill] sm:$0xff] %v20961_v57  ;;  %v20977_v46 = vsel %vm264_vm0, %v7997_v24, %v24908_v30  ;;  %v24949_v24 = vld [vmem:[#allocation64_spill] sm:$0xff] }
 0x9b1   : > { %v20956_v33 = vpop.permute.xlu1 %12474  ;;  %v10460_v3 = vsel %vm420_vm13, %v10282_v9, 0  ;;  %v20985_v9 = vsel %vm420_vm13, %v24947_v48, %v12521_v10  ;;  %v24950_v10 = vld [vmem:[#allocation99_spill] sm:$0xff]  ;;  %v24952_v48 = vld [vmem:[#allocation109_spill] sm:$0xff]  ;;  %v8285_v54 = vrot.slane %v20977_v46, 1 }
 0x9b2   : > { %12789 = vrot.lane.b32.xlu0 %v20414_v17, %s12983_s19  ;;  %v20971_v62 = vpop.permute.xlu0 %12564  ;;  %v24946_v17 = vld [vmem:[#allocation177_spill] sm:$0xff]  ;;  %v10344_v5 = vpack.c.bf16 %v24950_v10, %v24949_v24  ;;  %v24954_v24 = vunpack.i.h.bf16 %v20527_v36 }
 0x9b3   : > { %24945 = vst [vmem:[#allocation106_spill] sm:$0xff] %v20971_v62  ;;  %v20981_v47 = vsel %vm420_vm13, %v24946_v17, %v12522_v29  ;;  %v20996_v29 = vpack.i.bf16 %v20964_v40, %v20961_v57  ;;  %v24951_v17 = vld [vmem:[#allocation155_spill] sm:$0xff] }
 0x9b4   : > { %12779 = vrot.lane.b32.xlu1 %v24758_v49, %s12986_s11  ;;  %11402 = vmatpush3.bf16.xpose.msra.mxu1 %v10460_v3  ;;  %v10484_v49 = vsel %vm420_vm13, %v10321_v61, 0  ;;  %v10284_v31 = vpack.c.bf16 %v24952_v48, %v24951_v17  ;;  %v10092_v10 = vsel %vm428_vm3, %v20981_v47, %v24954_v24  ;;  %v24955_v17 = vld [vmem:[#allocation20_spill] sm:$0xff]  ;;  %v24956_v40 = vld [vmem:[#allocation115_spill] sm:$0xff]  ;;  %v24959_v24 = vunpack.i.h.bf16 %v20582_v20 }
 0x9b5   : > { %11558 = vmatprep.subr.msk.bf16.mxu1 %vm420_vm13, %v20969_v1  ;;  %v20992_v30 = vpop.permute.xlu1 %12479  ;;  %v21018_v48 = vsel %vm420_vm13, %v24955_v17, %v12546_v42  ;;  %v21023_v45 = vsel %vm420_vm13, %v24956_v40, %v12547_v50  ;;  %v24960_v17 = vld [vmem:[#allocation50_spill] sm:$0xff]  ;;  %v21042_v40 = vsel %vm1260_vm9, %v8281_v43, %v8283_v4  ;;  %v24963_v43 = vunpack.i.h.bf16 %v20613_v13 }
 0x9b6   : > { %12799 = vrot.lane.b32.xlu0 %v20736_v25, %s12981_s17  ;;  %24948 = vst [vmem:[#allocation26_spill] sm:$0xff] %v20992_v30  ;;  %v21004_v61 = vpop.permute.xlu0 %12569  ;;  %v24953_v25 = vunpack.i.l.bf16 %v20527_v36  ;;  %v24958_v36 = vunpack.i.l.bf16 %v20582_v20  ;;  %v21037_v42 = vsel %vm721_vm1, %v10092_v10, %v24959_v24  ;;  %v10324_v37 = vpack.c.bf16 %v24961_v6, %v24960_v17  ;;  %v24971_v24 = vld [vmem:[#allocation112_spill] sm:$0xff]  ;;  %v24973_v20 = vld [vmem:[#allocation173_spill] sm:$0xff] }
 0x9b7   : > { %11420 = vmatpush3.bf16.xpose.msra.mxu0 %v10484_v49  ;;  %v10463_v50 = vsel %vm420_vm13, %v10284_v31, 0  ;;  %v24964_v31 = vunpack.i.l.bf16 %v20659_v41  ;;  %v8487_v17 = vrot.slane %v20857_v19, 2 }
 0x9b8   : > { %12794 = vrot.lane.b32.xlu1 %v20996_v29, %s12986_s11  ;;  %v10091_v57 = vsel %vm428_vm3, %v20985_v9, %v24953_v25  ;;  %11566 = vmatprep.subr.msk.bf16.mxu0 %vm420_vm13, %v10344_v5 }
 0x9b9   : > { %v21027_v30 = vpop.permute.xlu1 %12484  ;;  %v21032_v25 = vsel %vm721_vm1, %v10091_v57, %v24958_v36  ;;  %v24962_v57 = vunpack.i.l.bf16 %v20613_v13  ;;  %v24965_v13 = vunpack.i.h.bf16 %v20659_v41  ;;  %v8489_v41 = vrot.slane %v20869_v52, 2 }
 0x9ba   : > { %12804 = vrot.lane.b32.xlu0 %v20774_v0, %s12983_s19  ;;  %24957 = vst [vmem:[#allocation135_spill] sm:$0xff] %v21027_v30  ;;  %v21045_v0 = vsel %vm1260_vm9, %v8283_v4, %v8285_v54  ;;  %v21048_v30 = vpop.permute.xlu0 %12574  ;;  %v10094_v4 = vsel %vm428_vm3, %v21023_v45, %v24963_v43 }
 0x9bb   : > { %v10093_v6 = vsel %vm428_vm3, %v21018_v48, %v24962_v57  ;;  %v21070_v54 = vpack.i.bf16 %v21045_v0, %v21042_v40  ;;  %v21080_v36 = vsel %vm721_vm1, %v10094_v4, %v24965_v13  ;;  %v8486_v57 = vrot.slane %v20873_v34, 2  ;;  %v25011_v34 = vld [vmem:[#allocation71_spill] sm:$0xff] }
 0x9bc   : > { %12809 = vrot.lane.b32.xlu1 %v24773_v38, %s12986_s11  ;;  %11404 = vmatpush3.bf16.xpose.msra.mxu1 %v10463_v50  ;;  %v21075_v10 = vsel %vm721_vm1, %v10093_v6, %v24964_v31  ;;  %v8491_v4 = vrot.slane %v20916_v14, 2  ;;  %v8493_v31 = vrot.slane %v20977_v46, 2 }
 0x9bd   : > { %11559 = vmatprep.subr.msk.bf16.mxu1 %vm420_vm13, %v20921_v7  ;;  %v21066_v38 = vpop.permute.xlu1 %12489  ;;  %v10487_v7 = vsel %vm420_vm13, %v10324_v37, 0  ;;  %v8488_v43 = vsel %vm1277_vm14, %v8486_v57, %v8487_v17  ;;  %v24990_v52 = vld [vmem:[#allocation26_spill] sm:$0xff] }
 0x9be   : > { %12814 = vrot.lane.b32.xlu0 %v20799_v63, %s12981_s17  ;;  %v21083_v63 = vpop.permute.xlu0 %12584  ;;  %v8494_v46 = vsel %vm1277_vm14, %v8491_v4, %v8493_v31 }
 0x9bf   : > { %11422 = vmatpush3.bf16.xpose.msra.mxu0 %v10487_v7  ;;  %v12586_v14 = vunpack.i.l.bf16 %v21083_v63 }
 0x9c0   : > { %12824 = vrot.lane.b32.xlu1 %v21070_v54, %s12986_s11  ;;  %11567 = vmatprep.subr.msk.bf16.mxu0 %vm420_vm13, %v20939_v53  ;;  %v8490_v53 = vsel %vm1277_vm14, %v8487_v17, %v8489_v41 }
 0x9c1   : > { %v21095_v37 = vpop.permute.xlu1 %12494 }
 0x9c2   : > { %12819 = vrot.lane.b32.xlu0 %v20822_v44, %s12983_s19  ;;  %v21098_v6 = vpop.permute.xlu0 %12589 }
 0x9c4   : > { %12829 = vrot.lane.b32.xlu1 %v20850_v2, %s12986_s11  ;;  %11406 = vmatpush3.bf16.xpose.msra.mxu1 %v10460_v3  ;;  %v12848_v2 = vpack.i.bf16 %v8490_v53, %v8488_v43  ;;  %v8492_v3 = vsel %vm1277_vm14, %v8489_v41, %v8491_v4  ;;  %v24969_v41 = vld [vmem:[#allocation48_spill] sm:$0xff] }
 0x9c5   : > { %11560 = vmatprep.subr.msk.bf16.mxu1 %vm420_vm13, %v20969_v1  ;;  %v21110_v44 = vpop.permute.xlu1 %12499 }
 0x9c6   : > { %12844 = vrot.lane.b32.xlu0 %v24766_v59, %s12981_s17  ;;  %v21112_v13 = vpop.permute.xlu0 %12599  ;;  %v21122_v59 = vpack.c.bf16 %v8490_v53, %v8488_v43  ;;  %v24972_v53 = vld [vmem:[#allocation88_spill] sm:$0xff] }
 0x9c7   : > { %11424 = vmatpush3.bf16.xpose.msra.mxu0 %v10484_v49  ;;  %v21128_v49 = vpack.c.bf16 %v8494_v46, %v8492_v3 }
 0x9c8   : > { %12834 = vrot.lane.b32.xlu1 %v20885_v22, %s12986_s11  ;;  %11568 = vmatprep.subr.msk.bf16.mxu0 %vm420_vm13, %v10344_v5  ;;  %24966 = vst [vmem:[#allocation164_spill] sm:$0xff] %v21122_v59  ;;  %v24968_v5 = vld [vmem:[#allocation90_spill] sm:$0xff] }
 0x9c9   : > { %v21120_v1 = vpop.permute.xlu1 %12504  ;;  %24967 = vst [vmem:[#allocation38_spill] sm:$0xff] %v21128_v49  ;;  %v21138_v57 = vpack.c.bf16 %v24969_v41, %v24968_v5  ;;  %v23189_v5 = vunpack.i.h.bf16 %v20881_v60 }
 0x9ca   : > { %12849 = vrot.lane.b32.xlu0 %v12848_v2, %s12981_s17  ;;  %v21124_v17 = vpop.permute.xlu0 %12604 }
 0x9cb   : > { %24970 = vst [vmem:[#allocation206_spill] sm:$0xff] %v21138_v57 }
 0x9cc   : > { %12839 = vrot.lane.b32.xlu1 %v20909_v21, %s12986_s11  ;;  %11408 = vmatpush3.bf16.xpose.msra.mxu1 %v10463_v50  ;;  %v12858_v21 = vpack.i.bf16 %v8494_v46, %v8492_v3  ;;  %v10469_v50 = vsel %vm420_vm13, %v20862_v11, 0  ;;  %v12526_v11 = vunpack.i.l.bf16 %v20864_v18  ;;  %v23190_v3 = vunpack.i.l.bf16 %v20881_v60 }
 0x9cd   : > { %11561 = vmatprep.subr.msk.bf16.mxu1 %vm420_vm13, %v20854_v56  ;;  %v21134_v22 = vpop.permute.xlu1 %12509  ;;  %v10466_v56 = vsel %vm420_vm13, %v20766_v23, 0  ;;  %v12551_v46 = vunpack.i.l.bf16 %v20943_v15 }
 0x9ce   : > { %12854 = vrot.lane.b32.xlu0 %v19717_v39, %s12981_s17  ;;  %v21140_v43 = vpop.permute.xlu0 %12614  ;;  %v10490_v39 = vsel %vm420_vm13, %v20778_v26, 0  ;;  %v12527_v26 = vunpack.i.h.bf16 %v20864_v18  ;;  %v23188_v18 = vunpack.i.l.bf16 %v20905_v28 }
 0x9cf   : > { %11426 = vmatpush3.bf16.xpose.msra.mxu0 %v10487_v7  ;;  %v21154_v7 = vsel %vm420_vm13, %v20891_v51, 0  ;;  %v24974_v51 = vld [vmem:[#allocation189_spill] sm:$0xff] }
 0x9d0   : > { %12864 = vrot.lane.b32.xlu1 %v20933_v12, %s12986_s11  ;;  %11569 = vmatprep.subr.msk.bf16.mxu0 %vm420_vm13, %v21138_v57  ;;  %v10012_v4 = vsel %vm420_vm13, %v24971_v24, %v12527_v26  ;;  %v10011_v12 = vsel %vm420_vm13, %v24972_v53, %v12526_v11  ;;  %v21195_v23 = vpack.c.bf16 %v24974_v51, %v24973_v20  ;;  %v24976_v20 = vunpack.i.h.bf16 %v20905_v28 }
 0x9d1   : > { %v21160_v31 = vpop.permute.xlu1 %12514  ;;  %v24978_v51 = vunpack.i.h.bf16 %v20929_v32  ;;  %v24981_v24 = vunpack.i.h.bf16 %v20707_v35 }
 0x9d2   : > { %12859 = vrot.lane.b32.xlu0 %v12858_v21, %s12981_s17  ;;  %v21169_v41 = vpop.permute.xlu0 %12619  ;;  %24975 = vst [vmem:[#allocation205_spill] sm:$0xff] %v21195_v23  ;;  %v21216_v26 = vsel %vm428_vm3, %v10012_v4, %v24976_v20  ;;  %v24979_v20 = vld [vmem:[#allocation70_spill] sm:$0xff] }
 0x9d4   : > { %12874 = vrot.lane.b32.xlu1 %v12848_v2, %s12983_s19  ;;  %11410 = vmatpush3.bf16.xpose.msra.mxu1 %v10466_v56  ;;  %v21191_v56 = vsel %vm428_vm3, %v20985_v9, %v23190_v3  ;;  %v21211_v9 = vsel %vm428_vm3, %v10011_v12, %v23188_v18  ;;  %v21232_v18 = vsel %vm428_vm3, %v21023_v45, %v24978_v51 }
 0x9d5   : > { %11562 = vmatprep.subr.msk.bf16.mxu1 %vm420_vm13, %v20913_v27  ;;  %v12530_v2 = vpop.permute.xlu1 %12529  ;;  %v21201_v27 = vsel %vm428_vm3, %v20981_v47, %v23189_v5  ;;  %v12552_v47 = vunpack.i.h.bf16 %v20943_v15  ;;  %v10013_v15 = vsel %vm420_vm13, %v24979_v20, %v12551_v46  ;;  %v10124_v45 = vsel %vm428_vm3, %v10012_v4, %v24981_v24  ;;  %v24984_v5 = vld [vmem:[#allocation23_spill] sm:$0xff] }
 0x9d6   : > { %12869 = vrot.lane.b32.xlu0 %v20996_v29, %s12981_s17  ;;  %v21205_v53 = vpop.permute.xlu0 %12649  ;;  %v12532_v11 = vunpack.i.h.bf16 %v12530_v2  ;;  %v12531_v29 = vunpack.i.l.bf16 %v12530_v2  ;;  %v24982_v46 = vunpack.i.l.bf16 %v20893_v16  ;;  %v12572_v4 = vunpack.i.h.bf16 %v21004_v61  ;;  %v24989_v24 = vld [vmem:[#allocation83_spill] sm:$0xff] }
 0x9d7   : > { %11428 = vmatpush3.bf16.xpose.msra.mxu0 %v10490_v39  ;;  %v24977_v39 = vunpack.i.l.bf16 %v20929_v32 }
 0x9d8   : > { %12884 = vrot.lane.b32.xlu1 %v12858_v21, %s12983_s19  ;;  %11570 = vmatprep.subr.msk.bf16.mxu0 %vm420_vm13, %v21195_v23  ;;  %v10014_v23 = vsel %vm420_vm13, %v24984_v5, %v12552_v47  ;;  %v24986_v5 = vpack.c.bf16 %v21037_v42, %v21032_v25 }
 0x9d9   : > { %v21226_v21 = vsel %vm428_vm3, %v21018_v48, %v24977_v39  ;;  %v12535_v3 = vpop.permute.xlu1 %12534  ;;  %v24980_v48 = vunpack.i.l.bf16 %v20707_v35 }
 0x9da   : > { %12879 = vrot.lane.b32.xlu0 %v21070_v54, %s12981_s17  ;;  %v12537_v51 = vunpack.i.h.bf16 %v12535_v3  ;;  %v12536_v49 = vunpack.i.l.bf16 %v12535_v3  ;;  %v21245_v59 = vpop.permute.xlu0 %12654  ;;  %v24983_v54 = vunpack.i.h.bf16 %v20893_v16  ;;  %v12571_v3 = vunpack.i.l.bf16 %v21004_v61  ;;  %v24988_v61 = vld [vmem:[#allocation191_spill] sm:$0xff] }
 0x9db   : > { %v10123_v39 = vsel %vm428_vm3, %v10011_v12, %v24980_v48  ;;  %v24985_v12 = vunpack.i.l.bf16 %v20956_v33 }
 0x9dc   : > { %v10247_v20 = vsel %vm721_vm1, %v10123_v39, %v24982_v46  ;;  %v10248_v2 = vsel %vm721_vm1, %v10124_v45, %v24983_v54  ;;  %11412 = vmatpush3.bf16.xpose.msra.mxu1 %v10469_v50  ;;  %v12577_v46 = vunpack.i.h.bf16 %v21048_v30  ;;  %v12576_v45 = vunpack.i.l.bf16 %v21048_v30  ;;  %v25004_v30 = vld [vmem:[#allocation131_spill] sm:$0xff] }
 0x9dd   : > { %v21258_v48 = vsel %vm428_vm3, %v10013_v15, %v24985_v12  ;;  %10721 = vmatprep.subr.bf16.mxu1 %v24986_v5  ;;  %v12555_v47 = vpop.permute.xlu1 %12554  ;;  %v24987_v54 = vunpack.i.h.bf16 %v20956_v33  ;;  %v9756_v50 = vsel %vm420_vm13, %v24988_v61, %v12532_v11  ;;  %v9755_v39 = vsel %vm420_vm13, %v24989_v24, %v12531_v29  ;;  %v24994_v61 = vld [vmem:[#allocation61_spill] sm:$0xff] }
 0x9de   : > { %v10396_v57 = vpack.c.bf16 %v10248_v2, %v10247_v20  ;;  %v21281_v25 = vsel %vm428_vm3, %v9755_v39, %v12536_v49  ;;  %v21284_v42 = vsel %vm428_vm3, %v9756_v50, %v12537_v51  ;;  %v21287_v5 = vpop.permute.xlu0 %12659  ;;  %v9743_v29 = vsel %vm420_vm13, %v24994_v61, %v12571_v3 }
 0x9df   : > { %v21272_v12 = vsel %vm428_vm3, %v10014_v23, %v24987_v54  ;;  %24991 = vst [vmem:[#allocation151_spill] sm:$0xff] %v21281_v25  ;;  %24992 = vst [vmem:[#allocation14_spill] sm:$0xff] %v21284_v42  ;;  %11430 = vmatpush3.bf16.xpose.msra.mxu0 %v21154_v7  ;;  %v24993_v54 = vld [vmem:[#allocation125_spill] sm:$0xff]  ;;  %v24995_v20 = vunpack.i.l.bf16 %v20768_v58  ;;  %v24996_v49 = vunpack.i.h.bf16 %v20768_v58  ;;  %v9807_v24 = vsel %vm428_vm3, %v9743_v29, %v12576_v45 }
 0x9e0   : > { %v9744_v11 = vsel %vm420_vm13, %v24993_v54, %v12572_v4  ;;  %10807 = vmatprep.subr.bf16.mxu0 %v10396_v57  ;;  %v24997_v50 = vunpack.i.l.bf16 %v20971_v62  ;;  %v24998_v3 = vunpack.i.h.bf16 %v20971_v62  ;;  %v12557_v54 = vunpack.i.h.bf16 %v12555_v47 }
 0x9e1   : > { %v10125_v2 = vsel %vm428_vm3, %v10013_v15, %v24995_v20  ;;  %v10126_v51 = vsel %vm428_vm3, %v10014_v23, %v24996_v49  ;;  %v9808_v7 = vsel %vm428_vm3, %v9744_v11, %v12577_v46  ;;  %v12560_v39 = vpop.permute.xlu1 %12559  ;;  %v12556_v61 = vunpack.i.l.bf16 %v12555_v47  ;;  %v25001_v11 = vld [vmem:[#allocation135_spill] sm:$0xff]  ;;  %v12963_v20 = vld [vmem:[%s22491_s5 + $0x4] ss:$12 sps:$4 sm:$0xff]  }
 0x9e2   : > { %v10249_v4 = vsel %vm721_vm1, %v10125_v2, %v24997_v50  ;;  %v10250_v57 = vsel %vm721_vm1, %v10126_v51, %v24998_v3  ;;  %v24999_v15 = vunpack.i.l.bf16 %v20732_v55  ;;  %v25000_v45 = vunpack.i.h.bf16 %v20732_v55  ;;  %v25002_v2 = vld [vmem:[#allocation179_spill] sm:$0xff]  ;;  %v21319_v47 = vpop.permute.xlu0 %12664 }
 0x9e3   : > { %11414 = vmatmul.mubr.msk.bf16.vlgmr.msra.gmra.mrb[80].mxu1 %vm420_vm13, %v25002_v2  ;;  %v12562_v49 = vunpack.i.h.bf16 %v12560_v39  ;;  %v12561_v51 = vunpack.i.l.bf16 %v12560_v39  ;;  %v25006_v39 = vpack.c.bf16 %v21080_v36, %v21075_v10  ;;  %v10398_v62 = vpack.c.bf16 %v10250_v57, %v10249_v4 }
 0x9e4   : > { %v9931_v23 = vsel %vm721_vm1, %v21281_v25, %v24999_v15  ;;  %v9932_v46 = vsel %vm721_vm1, %v21284_v42, %v25000_v45  ;;  %v12587_v15 = vunpack.i.h.bf16 %v21083_v63  ;;  %v25003_v45 = vld [vmem:[#allocation53_spill] sm:$0xff]  ;;  %10753 = vmatprep.mubr.bf16.mxu1 %v12963_v20  ;;  %v9757_v10 = vsel %vm420_vm13, %v25011_v34, %v12556_v61 }
 0x9e5   : > { %v25005_v29 = vpack.c.bf16 %v25003_v45, %v25004_v30  ;;  %v10395_v50 = vpack.c.bf16 %v9932_v46, %v9931_v23  ;;  %v21334_v3 = vpop.permute.xlu1 %12579  ;;  %v25007_v42 = vld [vmem:[#allocation149_spill] sm:$0xff]  ;;  %v25010_v45 = vld [vmem:[#allocation31_spill] sm:$0xff]  ;;  %v25012_v34 = vunpack.i.l.bf16 %v24990_v52  ;;  %v12592_v23 = vunpack.i.h.bf16 %v21098_v6 }
 0x9e6   : > { %v25008_v25 = vunpack.i.l.bf16 %v25007_v42  ;;  %v25009_v30 = vunpack.i.h.bf16 %v25007_v42  ;;  %v9758_v58 = vsel %vm420_vm13, %v25010_v45, %v12557_v54  ;;  %11432 = vmatmul.mubr.msk.bf16.vlgmr.msra.gmra.mrb[52].mxu0 %vm420_vm13, %v25002_v2  ;;  %v23209_v36 = vunpack.i.h.bf16 %v21334_v3  ;;  %v21361_v54 = vpop.permute.xlu0 %12669 }
 0x9e7   : > { %10722 = vmatpush1.bf16.xpose.msra.mxu1 %v25005_v29  ;;  %v12581_v4 = vunpack.i.l.bf16 %v21334_v3  ;;  %v21356_v42 = vsel %vm428_vm3, %v9757_v10, %v12561_v51  ;;  %v21359_v57 = vsel %vm428_vm3, %v9758_v58, %v12562_v49  ;;  %10808 = vmatpush1.bf16.xpose.msra.mxu0 %v10395_v50  ;;  %v21366_v61 = vsel %vm721_vm1, %v9807_v24, %v25012_v34  ;;  %v25022_v50 = vld [vmem:[#allocation33_spill] sm:$0xff] }
 0x9e8   : > { %10723 = vmatprep.subr.bf16.mxu1 %v25006_v39  ;;  %v21339_v63 = vsel %vm721_vm1, %v9807_v24, %v25008_v25  ;;  %v21344_v29 = vsel %vm721_vm1, %v9808_v7, %v25009_v30  ;;  %v12591_v25 = vunpack.i.l.bf16 %v21098_v6  ;;  %10809 = vmatprep.subr.bf16.mxu0 %v10398_v62  ;;  %v10220_v58 = vsel %vm721_vm1, %v21201_v27, %v23209_v36  ;;  %v25014_v24 = vld [vmem:[#allocation148_spill] sm:$0xff]  ;;  %v25015_v62 = vld [vmem:[#allocation171_spill] sm:$0xff] }
 0x9e9   : > { %v10219_v46 = vsel %vm721_vm1, %v21191_v56, %v12581_v4  ;;  %v25013_v2 = vunpack.i.h.bf16 %v24990_v52  ;;  %10839 = vmatprep.mubr.bf16.mxu0 %v12963_v20  ;;  %v9760_v6 = vsel %vm420_vm13, %v25014_v24, %v12587_v15  ;;  %v9759_v51 = vsel %vm420_vm13, %v25015_v62, %v12586_v14  ;;  %v21387_v56 = vpop.permute.xlu1 %12594  ;;  %v25018_v24 = vld [vmem:[#allocation180_spill] sm:$0xff] }
 0x9ea   : > { %v10360_v39 = vpack.c.bf16 %v10220_v58, %v10219_v46  ;;  %v23206_v30 = vunpack.i.h.bf16 %v21387_v56  ;;  %v23208_v27 = vunpack.i.l.bf16 %v21387_v56  ;;  %v25016_v45 = vunpack.i.l.bf16 %v20846_v8  ;;  %v21404_v46 = vpop.permute.xlu0 %12674  ;;  %v25019_v62 = vld [vmem:[#allocation132_spill] sm:$0xff] }
 0x9eb   : > { %v21380_v49 = vsel %vm721_vm1, %v9808_v7, %v25013_v2  ;;  %v25017_v20 = vunpack.i.h.bf16 %v20846_v8  ;;  %v21401_v10 = vsel %vm428_vm3, %v9759_v51, %v12591_v25  ;;  %v12602_v34 = vunpack.i.h.bf16 %v21112_v13 }
 0x9ec   : > { %v9933_v7 = vsel %vm721_vm1, %v21356_v42, %v25016_v45  ;;  %v10359_v58 = vpack.c.bf16 %v21344_v29, %v21339_v63  ;;  %v21409_v2 = vsel %vm428_vm3, %v9760_v6, %v12592_v23  ;;  %v25020_v45 = vpack.c.bf16 %v25018_v24, %v25019_v62 }
 0x9ed   : > { %v9934_v15 = vsel %vm721_vm1, %v21359_v57, %v25017_v20  ;;  %v10251_v25 = vsel %vm721_vm1, %v21211_v9, %v23208_v27  ;;  %v10252_v51 = vsel %vm721_vm1, %v21216_v26, %v23206_v30  ;;  %v12601_v23 = vunpack.i.l.bf16 %v21112_v13  ;;  %v21426_v20 = vpop.permute.xlu1 %12609  ;;  %v25025_v30 = vld [vmem:[#allocation51_spill] sm:$0xff] }
 0x9ee   : > { %v10397_v6 = vpack.c.bf16 %v9934_v15, %v9933_v7  ;;  %v10400_v24 = vpack.c.bf16 %v10252_v51, %v10251_v25  ;;  %v23205_v9 = vunpack.i.h.bf16 %v21426_v20  ;;  %v25021_v26 = vunpack.i.l.bf16 %v20732_v55  ;;  %v21439_v7 = vpop.permute.xlu0 %12684 }
 0x9ef   : > { %10724 = vmatpush1.bf16.xpose.msra.mxu1 %v25020_v45  ;;  %v23204_v45 = vunpack.i.l.bf16 %v21426_v20  ;;  %v9746_v29 = vsel %vm420_vm13, %v25022_v50, %v12602_v34  ;;  %v12607_v13 = vunpack.i.h.bf16 %v21124_v17  ;;  %v25023_v15 = vunpack.i.h.bf16 %v20732_v55  ;;  %v25024_v34 = vld [vmem:[#allocation138_spill] sm:$0xff] }
 0x9f0   : > { %10725 = vmatprep.subr.bf16.mxu1 %v10360_v39  ;;  %v9935_v63 = vsel %vm721_vm1, %v21401_v10, %v25021_v26  ;;  %v12606_v39 = vunpack.i.l.bf16 %v21124_v17  ;;  %10810 = vmatpush1.bf16.xpose.msra.mxu0 %v10397_v6  ;;  %v12652_v51 = vunpack.i.h.bf16 %v21205_v53  ;;  %v12651_v62 = vunpack.i.l.bf16 %v21205_v53 }
 0x9f1   : > { %v9936_v25 = vsel %vm721_vm1, %v21409_v2, %v25023_v15  ;;  %10811 = vmatprep.subr.bf16.mxu0 %v10400_v24  ;;  %v10221_v50 = vsel %vm721_vm1, %v21226_v21, %v23204_v45  ;;  %v10222_v17 = vsel %vm721_vm1, %v21232_v18, %v23205_v9  ;;  %v9745_v55 = vsel %vm420_vm13, %v25024_v34, %v12601_v23  ;;  %v21459_v15 = vpop.permute.xlu1 %12624 }
 0x9f2   : > { %v12617_v6 = vunpack.i.h.bf16 %v21140_v43  ;;  %v12616_v26 = vunpack.i.l.bf16 %v21140_v43  ;;  %v10363_v53 = vpack.c.bf16 %v10222_v17, %v10221_v50  ;;  %v12622_v24 = vunpack.i.h.bf16 %v21169_v41  ;;  %v21469_v43 = vpop.permute.xlu0 %12689  ;;  %v25026_v17 = vld [vmem:[#allocation22_spill] sm:$0xff] }
 0x9f3   : > { %v12621_v14 = vunpack.i.l.bf16 %v21169_v41  ;;  %v12627_v21 = vunpack.i.h.bf16 %v21459_v15  ;;  %v23207_v45 = vunpack.i.l.bf16 %v21459_v15  ;;  %v9809_v18 = vsel %vm428_vm3, %v9745_v55, %v12606_v39 }
 0x9f4   : > { %v9810_v9 = vsel %vm428_vm3, %v9746_v29, %v12607_v13  ;;  %v12657_v23 = vunpack.i.h.bf16 %v21245_v59  ;;  %v12656_v34 = vunpack.i.l.bf16 %v21245_v59  ;;  %v21473_v50 = vsel %vm420_vm13, %v25025_v30, %v12652_v51  ;;  %v25027_v13 = vld [vmem:[#allocation34_spill] sm:$0xff]  ;;  %v25028_v30 = vld [vmem:[#allocation89_spill] sm:$0xff] }
 0x9f5   : > { %v21477_v41 = vsel %vm420_vm13, %v25026_v17, %v12651_v62  ;;  %v10253_v29 = vsel %vm721_vm1, %v21258_v48, %v23207_v45  ;;  %v10254_v59 = vsel %vm721_vm1, %v21272_v12, %v12627_v21  ;;  %v9762_v39 = vsel %vm420_vm13, %v25027_v13, %v12617_v6  ;;  %v21491_v62 = vpop.permute.xlu1 %12629  ;;  %v25029_v45 = vld [vmem:[#allocation80_spill] sm:$0xff]  ;;  %v25032_v13 = vld [vmem:[#allocation62_spill] sm:$0xff] }
 0x9f6   : > { %v9761_v51 = vsel %vm420_vm13, %v25028_v30, %v12616_v26  ;;  %v10399_v55 = vpack.c.bf16 %v9936_v25, %v9935_v63  ;;  %v9826_v48 = vsel %vm428_vm3, %v9762_v39, %v12622_v24  ;;  %v25030_v27 = vunpack.i.l.bf16 %v25029_v45  ;;  %v25033_v63 = vld [vmem:[#allocation60_spill] sm:$0xff] }
 0x9f7   : > { %10726 = vmatpush1.bf16.xpose.msra.mxu1 %v10359_v58  ;;  %v10403_v58 = vpack.c.bf16 %v10254_v59, %v10253_v29  ;;  %v9825_v17 = vsel %vm428_vm3, %v9761_v51, %v12621_v14  ;;  %v25031_v12 = vunpack.i.h.bf16 %v25029_v45  ;;  %v21503_v26 = vsel %vm420_vm13, %v25032_v13, %v12657_v23  ;;  %v21509_v14 = vpop.permute.xlu0 %12699 }
 0x9f8   : > { %10727 = vmatprep.subr.bf16.mxu1 %v10363_v53  ;;  %v9905_v36 = vsel %vm721_vm1, %v9809_v18, %v25030_v27  ;;  %v21507_v25 = vsel %vm420_vm13, %v25033_v63, %v12656_v34  ;;  %10812 = vmatpush1.bf16.xpose.msra.mxu0 %v10399_v55  ;;  %v25034_v53 = vunpack.i.l.bf16 %v20881_v60  ;;  %v25035_v45 = vunpack.i.h.bf16 %v20881_v60 }
 0x9f9   : > { %v9906_v6 = vsel %vm721_vm1, %v9810_v9, %v25031_v12  ;;  %v12662_v23 = vunpack.i.h.bf16 %v21287_v5  ;;  %v12661_v29 = vunpack.i.l.bf16 %v21287_v5  ;;  %v25036_v59 = vunpack.i.h.bf16 %v21334_v3  ;;  %10813 = vmatprep.subr.bf16.mxu0 %v10403_v58  ;;  %v21527_v51 = vpop.permute.xlu1 %12634 }
 0x9fa   : > { %v10099_v27 = vsel %vm428_vm3, %v21477_v41, %v25034_v53  ;;  %v10100_v24 = vsel %vm428_vm3, %v21473_v50, %v25035_v45  ;;  %v10362_v30 = vpack.c.bf16 %v9906_v6, %v9905_v36  ;;  %v25037_v60 = vunpack.i.l.bf16 %v20846_v8 }
 0x9fb   : > { %v10223_v34 = vsel %vm721_vm1, %v10099_v27, %v12581_v4  ;;  %v10224_v39 = vsel %vm721_vm1, %v10100_v24, %v25036_v59  ;;  %v25038_v12 = vunpack.i.l.bf16 %v25001_v11  ;;  %v25039_v4 = vunpack.i.h.bf16 %v25001_v11  ;;  %v21557_v45 = vpop.permute.xlu0 %12704 }
 0x9fc   : > { %v9937_v55 = vsel %vm721_vm1, %v9825_v17, %v25037_v60  ;;  %v12666_v36 = vunpack.i.l.bf16 %v21319_v47  ;;  %v25040_v58 = vunpack.i.h.bf16 %v20846_v8  ;;  %v25041_v13 = vunpack.i.l.bf16 %v20905_v28 }
 0x9fd   : > { %v21536_v5 = vsel %vm721_vm1, %v21401_v10, %v25038_v12  ;;  %v21542_v3 = vsel %vm721_vm1, %v21409_v2, %v25039_v4  ;;  %v25042_v10 = vunpack.i.h.bf16 %v20905_v28  ;;  %v12667_v27 = vunpack.i.h.bf16 %v21319_v47  ;;  %v25045_v12 = vld [vmem:[#allocation184_spill] sm:$0xff] }
 0x9fe   : > { %v9938_v6 = vsel %vm721_vm1, %v9826_v48, %v25040_v58  ;;  %v10131_v63 = vsel %vm428_vm3, %v21507_v25, %v25041_v13  ;;  %v10366_v2 = vpack.c.bf16 %v10224_v39, %v10223_v34  ;;  %v25043_v24 = vunpack.i.l.bf16 %v21387_v56  ;;  %v25046_v28 = vld [vmem:[#allocation36_spill] sm:$0xff] }
 0x9ff   : > { %v10132_v53 = vsel %vm428_vm3, %v21503_v26, %v25042_v10  ;;  %v25044_v59 = vunpack.i.h.bf16 %v21387_v56  ;;  %v21567_v4 = vsel %vm420_vm13, %v25045_v12, %v12662_v23  ;;  %v21571_v58 = vsel %vm420_vm13, %v25046_v28, %v12661_v29  ;;  %10728 = vmatpush1.bf16.xpose.msra.mxu1 %v10362_v30  ;;  %v21585_v10 = vpop.permute.xlu1 %12639 }
 0xa00   : > { %v10255_v8 = vsel %vm721_vm1, %v10131_v63, %v25043_v24  ;;  %v25047_v47 = vunpack.i.l.bf16 %v21066_v38  ;;  %v25048_v39 = vunpack.i.h.bf16 %v21066_v38  ;;  %v12507_v13 = vunpack.i.h.bf16 %v21120_v1  ;;  %10729 = vmatprep.subr.bf16.mxu1 %v10366_v2  ;;  %v21597_v2 = vpop.permute.xlu0 %12714 }
 0xa01   : > { %v10256_v60 = vsel %vm721_vm1, %v10132_v53, %v25044_v59  ;;  %v12506_v23 = vunpack.i.l.bf16 %v21120_v1  ;;  %v10402_v63 = vpack.c.bf16 %v9938_v6, %v9937_v55  ;;  %v10405_v29 = vpack.c.bf16 %v21542_v3, %v21536_v5  ;;  %v25049_v53 = vld [vmem:[#allocation25_spill] sm:$0xff] }
 0xa02   : > { %v21576_v34 = vsel %vm721_vm1, %v9809_v18, %v25047_v47  ;;  %v21581_v56 = vsel %vm721_vm1, %v9810_v9, %v25048_v39  ;;  %v23211_v30 = vunpack.i.h.bf16 %v21134_v22  ;;  %v12511_v18 = vunpack.i.l.bf16 %v21134_v22  ;;  %v25050_v59 = vld [vmem:[#allocation185_spill] sm:$0xff] }
 0xa03   : > { %v10017_v24 = vsel %vm420_vm13, %v25049_v53, %v12666_v36  ;;  %v10406_v9 = vpack.c.bf16 %v10256_v60, %v10255_v8  ;;  %v21595_v12 = vsel %vm420_vm13, %v25050_v59, %v12667_v27  ;;  %10814 = vmatpush1.bf16.xpose.msra.mxu0 %v10402_v63  ;;  %v25051_v55 = vunpack.i.l.bf16 %v20929_v32  ;;  %v21618_v63 = vpop.permute.xlu1 %12644 }
 0xa04   : > { %v25052_v3 = vunpack.i.h.bf16 %v20929_v32  ;;  %v10367_v36 = vpack.c.bf16 %v21581_v56, %v21576_v34  ;;  %v23212_v8 = vunpack.i.h.bf16 %v21160_v31  ;;  %v23210_v27 = vunpack.i.l.bf16 %v21160_v31 }
 0xa05   : > { %v10101_v5 = vsel %vm428_vm3, %v21571_v58, %v25051_v55  ;;  %10815 = vmatprep.subr.bf16.mxu0 %v10406_v9  ;;  %v25053_v60 = vunpack.i.l.bf16 %v21426_v20  ;;  %v25054_v47 = vunpack.i.h.bf16 %v21426_v20  ;;  %v12672_v32 = vunpack.i.h.bf16 %v21361_v54 }
 0xa06   : > { %v10102_v6 = vsel %vm428_vm3, %v21567_v4, %v25052_v3  ;;  %v25055_v53 = vunpack.i.l.bf16 %v20956_v33  ;;  %v25056_v56 = vunpack.i.l.bf16 %v21095_v37  ;;  %v25057_v59 = vunpack.i.h.bf16 %v21095_v37 }
 0xa07   : > { %v10225_v28 = vsel %vm721_vm1, %v10101_v5, %v25053_v60  ;;  %v10226_v39 = vsel %vm721_vm1, %v10102_v6, %v25054_v47  ;;  %v12671_v20 = vunpack.i.l.bf16 %v21361_v54  ;;  %v12677_v5 = vunpack.i.h.bf16 %v21404_v46 }
 0xa08   : > { %v10133_v34 = vsel %vm428_vm3, %v10017_v24, %v25055_v53  ;;  %v21626_v9 = vsel %vm721_vm1, %v9825_v17, %v25056_v56  ;;  %v21631_v55 = vsel %vm721_vm1, %v9826_v48, %v25057_v59  ;;  %v12676_v3 = vunpack.i.l.bf16 %v21404_v46  ;;  %v21641_v53 = vpop.permute.xlu0 %12719 }
 0xa09   : > { %v25058_v6 = vunpack.i.h.bf16 %v20956_v33  ;;  %v12686_v47 = vunpack.i.l.bf16 %v21439_v7  ;;  %v10368_v17 = vpack.c.bf16 %v10226_v39, %v10225_v28  ;;  %v25059_v56 = vunpack.i.l.bf16 %v21459_v15 }
 0xa0a   : > { %v12687_v46 = vunpack.i.h.bf16 %v21439_v7  ;;  %v12691_v33 = vunpack.i.l.bf16 %v21469_v43  ;;  %v25060_v59 = vpack.c.bf16 %v21380_v49, %v21366_v61  ;;  %v10407_v28 = vpack.c.bf16 %v21631_v55, %v21626_v9  ;;  %v21663_v7 = vpop.permute.xlu1 %12679  ;;  %v25064_v9 = vld [vmem:[#allocation163_spill] sm:$0xff] }
 0xa0b   : > { %v10134_v60 = vsel %vm428_vm3, %v21595_v12, %v25058_v6  ;;  %v10257_v48 = vsel %vm721_vm1, %v10133_v34, %v25059_v56  ;;  %v25061_v39 = vunpack.i.l.bf16 %v21110_v44  ;;  %v25062_v6 = vld [vmem:[#allocation152_spill] sm:$0xff]  ;;  %v10135_v49 = vsel %vm428_vm3, %v21507_v25, %v12506_v23  ;;  %10816 = vmatpush1.bf16.xpose.msra.mxu0 %v10405_v29 }
 0xa0c   : > { %v10258_v54 = vsel %vm721_vm1, %v10134_v60, %v12627_v21  ;;  %10730 = vmatpush1.bf16.xpose.msra.mxu1 %v25060_v59  ;;  %v9748_v15 = vsel %vm420_vm13, %v25062_v6, %v12672_v32  ;;  %v12692_v21 = vunpack.i.h.bf16 %v21469_v43  ;;  %v25063_v60 = vunpack.i.h.bf16 %v21110_v44 }
 0xa0d   : > { %v10103_v34 = vsel %vm428_vm3, %v21477_v41, %v25061_v39  ;;  %10731 = vmatprep.subr.bf16.mxu1 %v10368_v17  ;;  %v9747_v41 = vsel %vm420_vm13, %v25064_v9, %v12671_v20  ;;  %v10408_v55 = vpack.c.bf16 %v10258_v54, %v10257_v48  ;;  %v12682_v32 = vunpack.i.h.bf16 %v21663_v7  ;;  %v12750_v39 = vpop.permute.xlu0 %12749  ;;  %v25066_v20 = vld [vmem:[#allocation27_spill] sm:$0xff] }
 0xa0e   : > { %v10104_v61 = vsel %vm428_vm3, %v21473_v50, %v25063_v60  ;;  %v12681_v43 = vunpack.i.l.bf16 %v21663_v7  ;;  %v21678_v17 = vsel %vm428_vm3, %v9747_v41, %v12676_v3  ;;  %v21681_v56 = vsel %vm428_vm3, %v9748_v15, %v12677_v5  ;;  %v25065_v50 = vld [vmem:[#allocation141_spill] sm:$0xff] }
 0xa0f   : > { %v9763_v59 = vsel %vm420_vm13, %v25065_v50, %v12686_v47  ;;  %v10136_v25 = vsel %vm428_vm3, %v21503_v26, %v12507_v13  ;;  %v9764_v48 = vsel %vm420_vm13, %v25066_v20, %v12687_v46  ;;  %10817 = vmatprep.subr.bf16.mxu0 %v10408_v55  ;;  %v10228_v29 = vsel %vm721_vm1, %v10104_v61, %v12682_v32  ;;  %v21703_v47 = vpop.permute.xlu1 %12694 }
 0xa10   : > { %v21692_v54 = vsel %vm428_vm3, %v9763_v59, %v12691_v33  ;;  %v10227_v5 = vsel %vm721_vm1, %v10103_v34, %v12681_v43  ;;  %v21701_v3 = vsel %vm428_vm3, %v9764_v48, %v12692_v21  ;;  %v10105_v46 = vsel %vm428_vm3, %v21571_v58, %v12511_v18 }
 0xa11   : > { %v10370_v26 = vpack.c.bf16 %v10228_v29, %v10227_v5  ;;  %v10106_v33 = vsel %vm428_vm3, %v21567_v4, %v23211_v30  ;;  %v12697_v34 = vunpack.i.h.bf16 %v21703_v47  ;;  %v12696_v6 = vunpack.i.l.bf16 %v21703_v47  ;;  %v12755_v9 = vpop.permute.xlu0 %12754  ;;  %v25073_v30 = vld [vmem:[#allocation59_spill] sm:$0xff]  ;;  %v25089_v47 = vld [vmem:[#allocation13_spill] sm:$0xff] }
 0xa12   : > { %v25067_v15 = vunpack.i.l.bf16 %v24990_v52  ;;  %v10137_v60 = vsel %vm428_vm3, %v10017_v24, %v23210_v27  ;;  %v12702_v58 = vunpack.i.h.bf16 %v21509_v14  ;;  %v12701_v61 = vunpack.i.l.bf16 %v21509_v14 }
 0xa13   : > { %v25068_v4 = vunpack.i.h.bf16 %v24990_v52  ;;  %v25069_v55 = vunpack.i.l.bf16 %v25001_v11  ;;  %v12751_v59 = vunpack.i.l.bf16 %v12750_v39  ;;  %v10259_v24 = vsel %vm721_vm1, %v10135_v49, %v12696_v6  ;;  %v21743_v29 = vpop.permute.xlu1 %12709  ;;  %10818 = vmatpush1.bf16.xpose.msra.mxu0 %v10407_v28 }
 0xa14   : > { %v9911_v21 = vsel %vm721_vm1, %v21678_v17, %v25067_v15  ;;  %10732 = vmatpush1.bf16.xpose.msra.mxu1 %v10367_v36  ;;  %v10260_v14 = vsel %vm721_vm1, %v10136_v25, %v12697_v34  ;;  %v25070_v52 = vunpack.i.h.bf16 %v25001_v11  ;;  %v12706_v48 = vunpack.i.l.bf16 %v21557_v45 }
 0xa15   : > { %v9912_v41 = vsel %vm721_vm1, %v21681_v56, %v25068_v4  ;;  %v9943_v50 = vsel %vm721_vm1, %v21692_v54, %v25069_v55  ;;  %v12752_v5 = vunpack.i.h.bf16 %v12750_v39  ;;  %10733 = vmatprep.subr.bf16.mxu1 %v10370_v26  ;;  %v10410_v36 = vpack.c.bf16 %v10260_v14, %v10259_v24  ;;  %v25071_v55 = vld [vmem:[#allocation153_spill] sm:$0xff]  ;;  %v25072_v39 = vld [vmem:[#allocation52_spill] sm:$0xff]  ;;  %v12760_v14 = vpop.permute.xlu0 %12759 }
 0xa16   : > { %v9944_v20 = vsel %vm721_vm1, %v21701_v3, %v25070_v52  ;;  %v10138_v49 = vsel %vm428_vm3, %v21595_v12, %v23212_v8  ;;  %v12632_v15 = vunpack.i.h.bf16 %v21491_v62  ;;  %v23213_v25 = vunpack.i.h.bf16 %v21743_v29 }
 0xa17   : > { %v12711_v11 = vunpack.i.l.bf16 %v21743_v29  ;;  %v10369_v4 = vpack.c.bf16 %v9912_v41, %v9911_v21  ;;  %v9750_v52 = vsel %vm420_vm13, %v25071_v55, %v12702_v58  ;;  %v9749_v26 = vsel %vm420_vm13, %v25072_v39, %v12701_v61  ;;  %10819 = vmatprep.subr.bf16.mxu0 %v10410_v36 }
 0xa18   : > { %v12707_v24 = vunpack.i.h.bf16 %v21557_v45  ;;  %v10409_v27 = vpack.c.bf16 %v9944_v20, %v9943_v50  ;;  %v21759_v12 = vsel %vm420_vm13, %v25073_v30, %v12751_v59  ;;  %v12757_v8 = vunpack.i.h.bf16 %v12755_v9  ;;  %v25074_v45 = vld [vmem:[#allocation95_spill] sm:$0xff]  ;;  %v21774_v30 = vpop.permute.xlu1 %12724 }
 0xa19   : > { %v10229_v21 = vsel %vm721_vm1, %v10105_v46, %v12711_v11  ;;  %v10230_v58 = vsel %vm721_vm1, %v10106_v33, %v23213_v25  ;;  %v21768_v61 = vsel %vm428_vm3, %v9749_v26, %v12706_v48  ;;  %v21772_v28 = vsel %vm420_vm13, %v25074_v45, %v12752_v5  ;;  %v12765_v55 = vpop.permute.xlu0 %12764  ;;  %v25076_v26 = vld [vmem:[#allocation17_spill] sm:$0xff]  ;;  %v25079_v25 = vld [vmem:[#allocation55_spill] sm:$0xff] }
 0xa1a   : > { %v12756_v41 = vunpack.i.l.bf16 %v12755_v9  ;;  %v10373_v50 = vpack.c.bf16 %v10230_v58, %v10229_v21  ;;  %v12717_v59 = vunpack.i.h.bf16 %v21597_v2  ;;  %v12716_v20 = vunpack.i.l.bf16 %v21597_v2  ;;  %v25078_v58 = vld [vmem:[#allocation16_spill] sm:$0xff] }
 0xa1b   : > { %v23215_v46 = vunpack.i.h.bf16 %v21774_v30  ;;  %v23214_v36 = vunpack.i.l.bf16 %v21774_v30  ;;  %v21781_v33 = vsel %vm428_vm3, %v9750_v52, %v12707_v24  ;;  %v12722_v48 = vunpack.i.h.bf16 %v21641_v53  ;;  %10820 = vmatpush1.bf16.xpose.msra.mxu0 %v10409_v27 }
 0xa1c   : > { %v12721_v5 = vunpack.i.l.bf16 %v21641_v53  ;;  %v25075_v9 = vunpack.i.l.bf16 %v21110_v44  ;;  %v21791_v2 = vsel %vm420_vm13, %v25076_v26, %v12757_v8  ;;  %10734 = vmatpush1.bf16.xpose.msra.mxu1 %v10369_v4  ;;  %v25077_v21 = vunpack.i.h.bf16 %v21110_v44  ;;  %v21807_v4 = vpop.permute.xlu1 %12729 }
 0xa1d   : > { %v10261_v53 = vsel %vm721_vm1, %v10137_v60, %v23214_v36  ;;  %v10262_v24 = vsel %vm721_vm1, %v10138_v49, %v23215_v46  ;;  %v21805_v45 = vsel %vm420_vm13, %v25078_v58, %v12756_v41  ;;  %v12762_v8 = vunpack.i.h.bf16 %v12760_v14  ;;  %10735 = vmatprep.subr.bf16.mxu1 %v10373_v50  ;;  %v25080_v36 = vld [vmem:[#allocation172_spill] sm:$0xff] }
 0xa1e   : > { %v10107_v39 = vsel %vm428_vm3, %v21759_v12, %v25075_v9  ;;  %v10108_v52 = vsel %vm428_vm3, %v21772_v28, %v25077_v21  ;;  %v12761_v9 = vunpack.i.l.bf16 %v12760_v14  ;;  %v10413_v44 = vpack.c.bf16 %v10262_v24, %v10261_v53  ;;  %v21821_v14 = vpop.permute.xlu0 %12769 }
 0xa1f   : > { %v12631_v26 = vunpack.i.l.bf16 %v21491_v62  ;;  %v12637_v21 = vunpack.i.h.bf16 %v21527_v51  ;;  %v9766_v60 = vsel %vm420_vm13, %v25079_v25, %v12717_v59  ;;  %v9765_v49 = vsel %vm420_vm13, %v25080_v36, %v12716_v20  ;;  %v25083_v36 = vld [vmem:[#allocation187_spill] sm:$0xff] }
 0xa20   : > { %v21816_v46 = vsel %vm428_vm3, %v9765_v49, %v12721_v5  ;;  %v21819_v41 = vsel %vm428_vm3, %v9766_v60, %v12722_v48  ;;  %v25081_v50 = vunpack.i.l.bf16 %v21066_v38  ;;  %v25082_v24 = vunpack.i.h.bf16 %v21066_v38  ;;  %10821 = vmatprep.subr.bf16.mxu0 %v10413_v44 }
 0xa21   : > { %v10231_v59 = vsel %vm721_vm1, %v10107_v39, %v12681_v43  ;;  %v10232_v27 = vsel %vm721_vm1, %v10108_v52, %v12682_v32  ;;  %v10139_v20 = vsel %vm428_vm3, %v21805_v45, %v12506_v23  ;;  %v10140_v38 = vsel %vm428_vm3, %v21791_v2, %v12507_v13  ;;  %v25084_v43 = vld [vmem:[#allocation103_spill] sm:$0xff]  ;;  %v21853_v39 = vpop.permute.xlu1 %12734 }
 0xa22   : > { %v9913_v53 = vsel %vm721_vm1, %v21768_v61, %v25081_v50  ;;  %v9914_v25 = vsel %vm721_vm1, %v21781_v33, %v25082_v24  ;;  %v21847_v48 = vsel %vm420_vm13, %v25083_v36, %v12762_v8  ;;  %v21851_v7 = vsel %vm420_vm13, %v25084_v43, %v12761_v9  ;;  %v12775_v60 = vpop.permute.xlu0 %12774 }
 0xa23   : > { %v12767_v32 = vunpack.i.h.bf16 %v12765_v55  ;;  %v12766_v5 = vunpack.i.l.bf16 %v12765_v55  ;;  %v12636_v52 = vunpack.i.l.bf16 %v21527_v51  ;;  %v10372_v23 = vpack.c.bf16 %v9914_v25, %v9913_v53  ;;  %v25088_v25 = vld [vmem:[#allocation69_spill] sm:$0xff] }
 0xa24   : > { %v25085_v1 = vunpack.i.l.bf16 %v21095_v37  ;;  %v25086_v58 = vunpack.i.h.bf16 %v21095_v37  ;;  %v12641_v9 = vunpack.i.l.bf16 %v21585_v10  ;;  %v10376_v44 = vpack.c.bf16 %v10232_v27, %v10231_v59 }
 0xa25   : > { %v10263_v55 = vsel %vm721_vm1, %v10139_v20, %v12696_v6  ;;  %v10264_v49 = vsel %vm721_vm1, %v10140_v38, %v12697_v34  ;;  %10736 = vmatpush1.bf16.xpose.msra.mxu1 %v10372_v23  ;;  %v10109_v37 = vsel %vm428_vm3, %v21851_v7, %v12511_v18  ;;  %v25087_v50 = vunpack.i.h.bf16 %v21134_v22  ;;  %v21888_v27 = vpop.permute.xlu1 %12739 }
 0xa26   : > { %v9945_v13 = vsel %vm721_vm1, %v21816_v46, %v25085_v1  ;;  %v9946_v8 = vsel %vm721_vm1, %v21819_v41, %v25086_v58  ;;  %v12642_v24 = vunpack.i.h.bf16 %v21585_v10  ;;  %v21882_v6 = vsel %vm420_vm13, %v25088_v25, %v12767_v32  ;;  %10737 = vmatprep.subr.bf16.mxu1 %v10376_v44  ;;  %v21912_v43 = vpop.permute.xlu0 %12784 }
 0xa27   : > { %v10110_v53 = vsel %vm428_vm3, %v21847_v48, %v25087_v50  ;;  %v21886_v34 = vsel %vm420_vm13, %v25089_v47, %v12766_v5  ;;  %v10412_v59 = vpack.c.bf16 %v9946_v8, %v9945_v13  ;;  %v9915_v22 = vsel %vm721_vm1, %v21678_v17, %v12631_v26 }
 0xa28   : > { %v9916_v18 = vsel %vm721_vm1, %v21681_v56, %v12632_v15  ;;  %v9947_v20 = vsel %vm721_vm1, %v21692_v54, %v12636_v52  ;;  %v10416_v38 = vpack.c.bf16 %v10264_v49, %v10263_v55  ;;  %v9948_v36 = vsel %vm721_vm1, %v21701_v3, %v12637_v21 }
 0xa29   : > { %v21910_v17 = vsel %vm721_vm1, %v21768_v61, %v12641_v9  ;;  %10822 = vmatpush1.bf16.xpose.msra.mxu0 %v10412_v59  ;;  %v10233_v56 = vsel %vm721_vm1, %v10109_v37, %v12711_v11  ;;  %v25090_v54 = vunpack.i.h.bf16 %v21743_v29  ;;  %v12647_v5 = vunpack.i.h.bf16 %v21618_v63  ;;  %v21937_v44 = vpop.permute.xlu1 %12744 }
 0xa2a   : > { %v12646_v3 = vunpack.i.l.bf16 %v21618_v63  ;;  %10823 = vmatprep.subr.bf16.mxu0 %v10416_v38  ;;  %v25091_v23 = vunpack.i.l.bf16 %v21160_v31  ;;  %v25092_v1 = vunpack.i.h.bf16 %v21160_v31  ;;  %v9918_v29 = vsel %vm721_vm1, %v21781_v33, %v12642_v24 }
 0xa2b   : > { %v10234_v32 = vsel %vm721_vm1, %v10110_v53, %v25090_v54  ;;  %v12732_v11 = vunpack.i.h.bf16 %v21807_v4  ;;  %v12731_v58 = vunpack.i.l.bf16 %v21807_v4  ;;  %v12772_v8 = vunpack.i.h.bf16 %v21821_v14  ;;  %v12790_v53 = vpop.permute.xlu0 %12789 }
 0xa2c   : > { %v10141_v61 = vsel %vm428_vm3, %v21886_v34, %v25091_v23  ;;  %v10142_v13 = vsel %vm428_vm3, %v21882_v6, %v25092_v1  ;;  %v10375_v55 = vpack.c.bf16 %v9916_v18, %v9915_v22  ;;  %v12771_v49 = vunpack.i.l.bf16 %v21821_v14  ;;  %v25095_v18 = vld [vmem:[#allocation127_spill] sm:$0xff] }
 0xa2d   : > { %v10378_v31 = vpack.c.bf16 %v10234_v32, %v10233_v56  ;;  %v12777_v37 = vunpack.i.h.bf16 %v12775_v60  ;;  %v12776_v50 = vunpack.i.l.bf16 %v12775_v60  ;;  %v25093_v25 = vunpack.i.l.bf16 %v21774_v30 }
 0xa2e   : > { %v25094_v33 = vunpack.i.h.bf16 %v21774_v30  ;;  %v10415_v38 = vpack.c.bf16 %v9948_v36, %v9947_v20  ;;  %v10377_v54 = vpack.c.bf16 %v9918_v29, %v21910_v17  ;;  %10738 = vmatpush1.bf16.xpose.msra.mxu1 %v10375_v55  ;;  %v9949_v14 = vsel %vm721_vm1, %v21816_v46, %v12646_v3  ;;  %v21966_v36 = vpop.permute.xlu1 %12779  ;;  %v25096_v17 = vld [vmem:[#allocation113_spill] sm:$0xff] }
 0xa2f   : > { %v10265_v47 = vsel %vm721_vm1, %v10141_v61, %v25093_v25  ;;  %v9950_v60 = vsel %vm721_vm1, %v21819_v41, %v12647_v5  ;;  %v10111_v30 = vsel %vm428_vm3, %v21759_v12, %v12731_v58  ;;  %v10112_v22 = vsel %vm428_vm3, %v21772_v28, %v12732_v11  ;;  %10739 = vmatprep.subr.bf16.mxu1 %v10378_v31 }
 0xa30   : > { %v10266_v59 = vsel %vm721_vm1, %v10142_v13, %v25094_v33  ;;  %v9752_v20 = vsel %vm420_vm13, %v25095_v18, %v12772_v8  ;;  %v12736_v46 = vunpack.i.l.bf16 %v21853_v39  ;;  %v9751_v41 = vsel %vm420_vm13, %v25096_v17, %v12771_v49  ;;  %v12800_v13 = vpop.permute.xlu0 %12799 }
 0xa31   : > { %v10418_v56 = vpack.c.bf16 %v10266_v59, %v10265_v47  ;;  %v12782_v32 = vunpack.i.h.bf16 %v21966_v36  ;;  %v12781_v12 = vunpack.i.l.bf16 %v21966_v36  ;;  %v12737_v23 = vunpack.i.h.bf16 %v21853_v39  ;;  %10824 = vmatpush1.bf16.xpose.msra.mxu0 %v10415_v38 }
 0xa32   : > { %v21974_v28 = vsel %vm428_vm3, %v9751_v41, %v12776_v50  ;;  %v21977_v61 = vsel %vm428_vm3, %v9752_v20, %v12777_v37  ;;  %v12741_v1 = vunpack.i.l.bf16 %v21888_v27  ;;  %v12787_v29 = vunpack.i.h.bf16 %v21912_v43  ;;  %v21992_v50 = vpop.permute.xlu1 %12794 }
 0xa33   : > { %v12786_v8 = vunpack.i.l.bf16 %v21912_v43  ;;  %10825 = vmatprep.subr.bf16.mxu0 %v10418_v56  ;;  %v10235_v55 = vsel %vm721_vm1, %v10111_v30, %v12781_v12  ;;  %v10236_v49 = vsel %vm721_vm1, %v10112_v22, %v12782_v32  ;;  %v10143_v31 = vsel %vm428_vm3, %v21805_v45, %v12736_v46 }
 0xa34   : > { %v12791_v37 = vunpack.i.l.bf16 %v12790_v53  ;;  %v10417_v25 = vpack.c.bf16 %v9950_v60, %v9949_v14  ;;  %v10380_v47 = vpack.c.bf16 %v10236_v49, %v10235_v55  ;;  %v12742_v43 = vunpack.i.h.bf16 %v21888_v27  ;;  %v12805_v22 = vpop.permute.xlu0 %12804  ;;  %v25097_v60 = vld [vmem:[#allocation190_spill] sm:$0xff] }
 0xa35   : > { %v12792_v33 = vunpack.i.h.bf16 %v12790_v53  ;;  %v12797_v59 = vunpack.i.h.bf16 %v21992_v50  ;;  %v12796_v38 = vunpack.i.l.bf16 %v21992_v50  ;;  %v10144_v30 = vsel %vm428_vm3, %v21791_v2, %v12737_v23  ;;  %v25098_v2 = vld [vmem:[#allocation117_spill] sm:$0xff] }
 0xa36   : > { %v10113_v45 = vsel %vm428_vm3, %v21851_v7, %v12741_v1  ;;  %v9919_v53 = vsel %vm721_vm1, %v21974_v28, %v12631_v26  ;;  %v9920_v14 = vsel %vm721_vm1, %v21977_v61, %v12632_v15  ;;  %v9768_v18 = vsel %vm420_vm13, %v25097_v60, %v12787_v29  ;;  %10740 = vmatpush1.bf16.xpose.msra.mxu1 %v10377_v54  ;;  %v22026_v41 = vpop.permute.xlu1 %12809 }
 0xa37   : > { %v9767_v20 = vsel %vm420_vm13, %v25098_v2, %v12786_v8  ;;  %v10267_v7 = vsel %vm721_vm1, %v10143_v31, %v12796_v38  ;;  %v10268_v26 = vsel %vm721_vm1, %v10144_v30, %v12797_v59  ;;  %v12802_v17 = vunpack.i.h.bf16 %v12800_v13  ;;  %10741 = vmatprep.subr.bf16.mxu1 %v10380_v47 }
 0xa38   : > { %v22024_v62 = vsel %vm428_vm3, %v9767_v20, %v12791_v37  ;;  %v12801_v15 = vunpack.i.l.bf16 %v12800_v13  ;;  %v10420_v56 = vpack.c.bf16 %v10268_v26, %v10267_v7  ;;  %v10114_v54 = vsel %vm428_vm3, %v21847_v48, %v12742_v43  ;;  %v12815_v47 = vpop.permute.xlu0 %12814 }
 0xa39   : > { %v22033_v29 = vsel %vm428_vm3, %v9768_v18, %v12792_v33  ;;  %v12812_v8 = vunpack.i.h.bf16 %v22026_v41  ;;  %v12811_v55 = vunpack.i.l.bf16 %v22026_v41  ;;  %v12747_v49 = vunpack.i.h.bf16 %v21937_v44  ;;  %10826 = vmatpush1.bf16.xpose.msra.mxu0 %v10417_v25  ;;  %v25099_v18 = vld [vmem:[#allocation194_spill] sm:$0xff]  ;;  %v25100_v25 = vld [vmem:[#allocation57_spill] sm:$0xff] }
 0xa3a   : > { %v12746_v13 = vunpack.i.l.bf16 %v21937_v44  ;;  %v12807_v31 = vunpack.i.h.bf16 %v12805_v22  ;;  %v12806_v37 = vunpack.i.l.bf16 %v12805_v22  ;;  %v10379_v30 = vpack.c.bf16 %v9920_v14, %v9919_v53  ;;  %10827 = vmatprep.subr.bf16.mxu0 %v10420_v56  ;;  %v22053_v14 = vpop.permute.xlu1 %12824 }
 0xa3b   : > { %v9951_v48 = vsel %vm721_vm1, %v22024_v62, %v12636_v52  ;;  %v10237_v33 = vsel %vm721_vm1, %v10113_v45, %v12811_v55  ;;  %v10238_v60 = vsel %vm721_vm1, %v10114_v54, %v12812_v8  ;;  %v9754_v22 = vsel %vm420_vm13, %v25099_v18, %v12802_v17  ;;  %v25101_v18 = vld [vmem:[#allocation121_spill] sm:$0xff] }
 0xa3c   : > { %v9753_v53 = vsel %vm420_vm13, %v25100_v25, %v12801_v15  ;;  %v9952_v52 = vsel %vm721_vm1, %v22033_v29, %v12637_v21  ;;  %v10383_v2 = vpack.c.bf16 %v10238_v60, %v10237_v33  ;;  %v12817_v20 = vunpack.i.h.bf16 %v12815_v47  ;;  %v12820_v56 = vpop.permute.xlu0 %12819 }
 0xa3d   : > { %v12816_v45 = vunpack.i.l.bf16 %v12815_v47  ;;  %v12827_v7 = vunpack.i.h.bf16 %v22053_v14  ;;  %v12826_v26 = vunpack.i.l.bf16 %v22053_v14  ;;  %v10145_v17 = vsel %vm428_vm3, %v21886_v34, %v12746_v13 }
 0xa3e   : > { %v10146_v51 = vsel %vm428_vm3, %v21882_v6, %v12747_v49  ;;  %v22070_v15 = vsel %vm428_vm3, %v9753_v53, %v12806_v37  ;;  %v22073_v21 = vsel %vm428_vm3, %v9754_v22, %v12807_v31  ;;  %10742 = vmatpush1.bf16.xpose.msra.mxu1 %v10379_v30  ;;  %v12822_v54 = vunpack.i.h.bf16 %v12820_v56  ;;  %v22081_v6 = vpop.permute.xlu1 %12829  ;;  %v25102_v22 = vld [vmem:[#allocation154_spill] sm:$0xff] }
 0xa3f   : > { %v12821_v47 = vunpack.i.l.bf16 %v12820_v56  ;;  %v10269_v33 = vsel %vm721_vm1, %v10145_v17, %v12826_v26  ;;  %v10270_v34 = vsel %vm721_vm1, %v10146_v51, %v12827_v7  ;;  %v10419_v60 = vpack.c.bf16 %v9952_v52, %v9951_v48  ;;  %10743 = vmatprep.subr.bf16.mxu1 %v10383_v2 }
 0xa40   : > { %v10423_v37 = vpack.c.bf16 %v10270_v34, %v10269_v33  ;;  %v9770_v31 = vsel %vm420_vm13, %v25101_v18, %v12817_v20  ;;  %v9769_v30 = vsel %vm420_vm13, %v25102_v22, %v12816_v45  ;;  %v12845_v17 = vpop.permute.xlu0 %12844  ;;  %v9921_v48 = vsel %vm721_vm1, %v22070_v15, %v12641_v9 }
 0xa41   : > { %v22088_v25 = vsel %vm428_vm3, %v9769_v30, %v12821_v47  ;;  %v22091_v53 = vsel %vm428_vm3, %v9770_v31, %v12822_v54  ;;  %10828 = vmatpush1.bf16.xpose.msra.mxu0 %v10419_v60  ;;  %v9922_v52 = vsel %vm721_vm1, %v22073_v21, %v12642_v24  ;;  %v12847_v2 = vunpack.i.h.bf16 %v12845_v17  ;;  %v25103_v54 = vld [vmem:[#allocation197_spill] sm:$0xff]  ;;  %v25104_v47 = vld [vmem:[#allocation196_spill] sm:$0xff] }
 0xa42   : > { %10829 = vmatprep.subr.bf16.mxu0 %v10423_v37  ;;  %v12846_v20 = vunpack.i.l.bf16 %v12845_v17  ;;  %v22101_v45 = vpop.permute.xlu1 %12834  ;;  %v10382_v51 = vpack.c.bf16 %v9922_v52, %v9921_v48  ;;  %v9953_v56 = vsel %vm721_vm1, %v22088_v25, %v12646_v3  ;;  %v9954_v9 = vsel %vm721_vm1, %v22091_v53, %v12647_v5  ;;  %v25105_v17 = vld [vmem:[#allocation142_spill] sm:$0xff]  ;;  %v25106_v52 = vld [vmem:[#allocation41_spill] sm:$0xff] }
 0xa43   : > { %v12832_v10 = vunpack.i.h.bf16 %v22081_v6  ;;  %v10008_v24 = vsel %vm420_vm13, %v25103_v54, %v12847_v2  ;;  %v12831_v60 = vunpack.i.l.bf16 %v22081_v6  ;;  %v12837_v37 = vunpack.i.h.bf16 %v22101_v45 }
 0xa44   : > { %v10007_v33 = vsel %vm420_vm13, %v25104_v47, %v12846_v20  ;;  %v12850_v34 = vpop.permute.xlu0 %12849  ;;  %v12836_v63 = vunpack.i.l.bf16 %v22101_v45  ;;  %v10422_v31 = vpack.c.bf16 %v9954_v9, %v9953_v56  ;;  %v10116_v30 = vsel %vm428_vm3, %v10008_v24, %v12732_v11  ;;  %v25107_v47 = vld [vmem:[#allocation107_spill] sm:$0xff] }
 0xa45   : > { %v12852_v3 = vunpack.i.h.bf16 %v12850_v34  ;;  %v12851_v18 = vunpack.i.l.bf16 %v12850_v34  ;;  %v10115_v22 = vsel %vm428_vm3, %v10007_v33, %v12731_v58  ;;  %v10240_v58 = vsel %vm721_vm1, %v10116_v30, %v12782_v32  ;;  %v25108_v34 = vld [vmem:[#allocation68_spill] sm:$0xff] }
 0xa46   : > { %10744 = vmatpush1.bf16.xpose.msra.mxu1 %v10382_v51  ;;  %v22119_v5 = vpop.permute.xlu1 %12839  ;;  %v10239_v51 = vsel %vm721_vm1, %v10115_v22, %v12781_v12  ;;  %v9923_v11 = vsel %vm721_vm1, %v21974_v28, %v12831_v60  ;;  %v9924_v56 = vsel %vm721_vm1, %v21977_v61, %v12832_v10  ;;  %v9955_v32 = vsel %vm721_vm1, %v22024_v62, %v12836_v63 }
 0xa47   : > { %v10024_v48 = vsel %vm420_vm13, %v25105_v17, %v12852_v3  ;;  %v10023_v2 = vsel %vm420_vm13, %v25106_v52, %v12851_v18  ;;  %v12842_v9 = vunpack.i.h.bf16 %v22119_v5  ;;  %v12841_v61 = vunpack.i.l.bf16 %v22119_v5  ;;  %v25125_v5 = vld [vmem:[#allocation37_spill] sm:$0xff] }
 0xa48   : > { %v12855_v20 = vpop.permute.xlu0 %12854  ;;  %v10147_v4 = vsel %vm428_vm3, %v10023_v2, %v12736_v46  ;;  %v10148_v36 = vsel %vm428_vm3, %v10024_v48, %v12737_v23  ;;  %v9956_v46 = vsel %vm721_vm1, %v22033_v29, %v12837_v37  ;;  %v10386_v54 = vpack.c.bf16 %v10240_v58, %v10239_v51 }
 0xa49   : > { %10830 = vmatpush1.bf16.xpose.msra.mxu0 %v10422_v31  ;;  %v12857_v12 = vunpack.i.h.bf16 %v12855_v20  ;;  %v12856_v28 = vunpack.i.l.bf16 %v12855_v20  ;;  %v10271_v39 = vsel %vm721_vm1, %v10147_v4, %v12796_v38  ;;  %v10385_v23 = vpack.c.bf16 %v9924_v56, %v9923_v11 }
 0xa4a   : > { %v22168_v18 = vpop.permute.xlu1 %12864  ;;  %v10272_v31 = vsel %vm721_vm1, %v10148_v36, %v12797_v59  ;;  %v10425_v22 = vpack.c.bf16 %v9956_v46, %v9955_v32  ;;  %10745 = vmatprep.subr.bf16.mxu1 %v10386_v54  ;;  %v25109_v38 = vunpack.i.l.bf16 %v20707_v35  ;;  %v25110_v59 = vunpack.i.h.bf16 %v20707_v35 }
 0xa4b   : > { %v10010_v62 = vsel %vm420_vm13, %v25107_v47, %v12857_v12  ;;  %v10009_v3 = vsel %vm420_vm13, %v25108_v34, %v12856_v28  ;;  %v10426_v52 = vpack.c.bf16 %v10272_v31, %v10271_v39  ;;  %v9925_v51 = vsel %vm721_vm1, %v22070_v15, %v12841_v61  ;;  %v25113_v39 = vld [vmem:[#allocation176_spill] sm:$0xff]  ;;  %v25117_v31 = vld [vmem:[#allocation151_spill] sm:$0xff] }
 0xa4c   : > { %v12860_v29 = vpop.permute.xlu0 %12859  ;;  %v10119_v48 = vsel %vm428_vm3, %v10007_v33, %v25109_v38  ;;  %v10117_v2 = vsel %vm428_vm3, %v10009_v3, %v12741_v1  ;;  %v10118_v50 = vsel %vm428_vm3, %v10010_v62, %v12742_v43  ;;  %v10120_v20 = vsel %vm428_vm3, %v10008_v24, %v25110_v59 }
 0xa4d   : > { %v12862_v30 = vunpack.i.h.bf16 %v12860_v29  ;;  %v12861_v17 = vunpack.i.l.bf16 %v12860_v29  ;;  %v9926_v33 = vsel %vm721_vm1, %v22073_v21, %v12842_v9  ;;  %v12867_v35 = vunpack.i.h.bf16 %v22168_v18  ;;  %10831 = vmatprep.subr.bf16.mxu0 %v10426_v52 }
 0xa4e   : > { %10746 = vmatpush1.bf16.xpose.msra.mxu1 %v10385_v23  ;;  %v12866_v43 = vunpack.i.l.bf16 %v22168_v18  ;;  %v10241_v15 = vsel %vm721_vm1, %v10117_v2, %v12811_v55  ;;  %v10242_v21 = vsel %vm721_vm1, %v10118_v50, %v12812_v8  ;;  %v25112_v4 = vunpack.i.h.bf16 %v20893_v16  ;;  %v12875_v56 = vpop.permute.xlu1 %12874  ;;  %v12964_v18 = vld [vmem:[%s22491_s5] ss:$12 sps:$4 sm:$0xff]  }
 0xa4f   : > { %v10026_v1 = vsel %vm420_vm13, %v21045_v0, %v12862_v30  ;;  %v10025_v27 = vsel %vm420_vm13, %v21042_v40, %v12861_v17  ;;  %v10388_v58 = vpack.c.bf16 %v10242_v21, %v10241_v15  ;;  %v25111_v0 = vunpack.i.l.bf16 %v20893_v16  ;;  %v25123_v15 = vld [vmem:[#allocation157_spill] sm:$0xff] }
 0xa50   : > { %v12870_v24 = vpop.permute.xlu0 %12869  ;;  %v10244_v11 = vsel %vm721_vm1, %v10120_v20, %v25112_v4  ;;  %v10149_v55 = vsel %vm428_vm3, %v10025_v27, %v12746_v13  ;;  %v10150_v41 = vsel %vm428_vm3, %v10026_v1, %v12747_v49  ;;  %v10387_v8 = vpack.c.bf16 %v9926_v33, %v9925_v51  ;;  %v25122_v27 = vld [vmem:[#allocation91_spill] sm:$0xff] }
 0xa51   : > { %10832 = vmatpush1.bf16.xpose.msra.mxu0 %v10425_v22  ;;  %v10243_v40 = vsel %vm721_vm1, %v10119_v48, %v25111_v0  ;;  %v12872_v36 = vunpack.i.h.bf16 %v12870_v24  ;;  %v12871_v32 = vunpack.i.l.bf16 %v12870_v24  ;;  %10747 = vmatprep.subr.bf16.mxu1 %v10388_v58  ;;  %v9957_v16 = vsel %vm721_vm1, %v22088_v25, %v12866_v43  ;;  %v25118_v22 = vld [vmem:[#allocation14_spill] sm:$0xff] }
 0xa52   : > { %v9958_v46 = vsel %vm721_vm1, %v22091_v53, %v12867_v35  ;;  %v10273_v13 = vsel %vm721_vm1, %v10149_v55, %v12826_v26  ;;  %v10274_v44 = vsel %vm721_vm1, %v10150_v41, %v12827_v7  ;;  %v12877_v49 = vunpack.i.h.bf16 %v12875_v56  ;;  %v25114_v26 = vld [vmem:[#allocation28_spill] sm:$0xff]  ;;  %v25129_v55 = vld [vmem:[#allocation66_spill] sm:$0xff] }
 0xa53   : > { %v12876_v12 = vunpack.i.l.bf16 %v12875_v56  ;;  %v10390_v28 = vpack.c.bf16 %v10244_v11, %v10243_v40  ;;  %v10428_v54 = vpack.c.bf16 %v10274_v44, %v10273_v13  ;;  %v9772_v25 = vsel %vm420_vm13, %v20857_v19, %v12872_v36  ;;  %v25127_v56 = vld [vmem:[#allocation119_spill] sm:$0xff]  ;;  %v12965_v13 = vld [vmem:[%s22491_s5 + $0x8] ss:$12 sps:$4 sm:$0xff]  }
 0xa54   : > { %v9771_v23 = vsel %vm420_vm13, %v25113_v39, %v12871_v32  ;;  %v10427_v53 = vpack.c.bf16 %v9958_v46, %v9957_v16  ;;  %v12880_v47 = vpop.permute.xlu0 %12879  ;;  %v25115_v34 = vunpack.i.l.bf16 %v25114_v26  ;;  %v25116_v7 = vunpack.i.h.bf16 %v25114_v26  ;;  %v25128_v32 = vld [vmem:[#allocation139_spill] sm:$0xff]  ;;  %v25132_v16 = vld [vmem:[#allocation140_spill] sm:$0xff] }
 0xa55   : > { %10833 = vmatprep.subr.bf16.mxu0 %v10428_v54  ;;  %v9927_v19 = vsel %vm721_vm1, %v25117_v31, %v12831_v60  ;;  %v9928_v30 = vsel %vm721_vm1, %v25118_v22, %v12832_v10  ;;  %v9836_v17 = vsel %vm428_vm3, %v9772_v25, %v12877_v49  ;;  %v9835_v38 = vsel %vm428_vm3, %v9771_v23, %v12876_v12  ;;  %v25133_v49 = vld [vmem:[#allocation47_spill] sm:$0xff]  ;;  %v25134_v12 = vld [vmem:[#allocation150_spill] sm:$0xff]  ;;  %v25137_v23 = vld [vmem:[#allocation205_spill] sm:$0xff] }
 0xa56   : > { %10748 = vmatpush1.bf16.xpose.msra.mxu1 %v10387_v8  ;;  %v10121_v14 = vsel %vm428_vm3, %v10009_v3, %v25115_v34  ;;  %v10122_v29 = vsel %vm428_vm3, %v10010_v62, %v25116_v7  ;;  %v12885_v3 = vpop.permute.xlu1 %12884  ;;  %v12882_v48 = vunpack.i.h.bf16 %v12880_v47  ;;  %v12881_v2 = vunpack.i.l.bf16 %v12880_v47  ;;  %v25119_v62 = vld [vmem:[#allocation106_spill] sm:$0xff]  ;;  %v25131_v8 = vld [vmem:[#allocation147_spill] sm:$0xff]  ;;  %v25139_v26 = vld [vmem:[#allocation200_spill] sm:$0xff] }
 0xa57   : > { %10749 = vmatprep.subr.bf16.mxu1 %v10390_v28  ;;  %v25120_v50 = vunpack.i.l.bf16 %v25119_v62  ;;  %v25121_v60 = vunpack.i.h.bf16 %v25119_v62  ;;  %v10389_v20 = vpack.c.bf16 %v9928_v30, %v9927_v19  ;;  %v9959_v10 = vsel %vm721_vm1, %v9835_v38, %v12836_v63  ;;  %v25136_v25 = vld [vmem:[#allocation58_spill] sm:$0xff]  ;;  %v25138_v47 = vld [vmem:[#allocation7_spill] sm:$0xff]  ;;  %v25142_v19 = vld [vmem:[#allocation164_spill] sm:$0xff] }
 0xa58   : > { %v9960_v51 = vsel %vm721_vm1, %v9836_v17, %v12837_v37  ;;  %v12887_v33 = vunpack.i.h.bf16 %v12885_v3  ;;  %v12886_v1 = vunpack.i.l.bf16 %v12885_v3  ;;  %v9774_v24 = vsel %vm420_vm13, %v25122_v27, %v12882_v48  ;;  %v25140_v7 = vld [vmem:[#allocation6_spill] sm:$0xff]  ;;  %v25143_v22 = vld [vmem:[#allocation203_spill] sm:$0xff]  ;;  %v25144_v30 = vld [vmem:[#allocation204_spill] sm:$0xff] }
 0xa59   : > { %10834 = vmatpush1.bf16.xpose.msra.mxu0 %v10427_v53  ;;  %v10245_v59 = vsel %vm721_vm1, %v10121_v14, %v25120_v50  ;;  %v10246_v6 = vsel %vm721_vm1, %v10122_v29, %v25121_v60  ;;  %v9773_v21 = vsel %vm420_vm13, %v25123_v15, %v12881_v2  ;;  %v10429_v58 = vpack.c.bf16 %v9960_v51, %v9959_v10  ;;  %v25141_v29 = vld [vmem:[#allocation199_spill] sm:$0xff]  ;;  %v25145_v3 = vld [vmem:[#allocation133_spill] sm:$0xff]  ;;  %v25147_v50 = vld [vmem:[#allocation32_spill] sm:$0xff] }
 0xa5a   : > { %10835 = vmatprep.subr.bf16.mxu0 %v10426_v52  ;;  %v10393_v52 = vpack.c.bf16 %v10246_v6, %v10245_v59  ;;  %v9929_v63 = vsel %vm721_vm1, %v21356_v42, %v12841_v61  ;;  %v9930_v45 = vsel %vm721_vm1, %v21359_v57, %v12842_v9  ;;  %v9838_v37 = vsel %vm428_vm3, %v9774_v24, %v12887_v33  ;;  %v25124_v61 = vld [vmem:[#allocation102_spill] sm:$0xff]  ;;  %v25126_v9 = vld [vmem:[#allocation128_spill] sm:$0xff]  ;;  %v25146_v48 = vld [vmem:[#allocation111_spill] sm:$0xff] }
 0xa5b   : > { %v9837_v0 = vsel %vm428_vm3, %v9773_v21, %v12886_v1  ;;  %v10392_v40 = vpack.c.bf16 %v9930_v45, %v9929_v63  ;;  %v9962_v42 = vsel %vm721_vm1, %v9838_v37, %v12867_v35  ;;  %v10371_v11 = vpack.c.bf16 %v25125_v5, %v25124_v61  ;;  %v25130_v35 = vld [vmem:[#allocation206_spill] sm:$0xff]  ;;  %v25148_v59 = vld [vmem:[#allocation207_spill] sm:$0xff]  ;;  %v25151_v10 = vld [vmem:[#allocation213_spill] sm:$0xff] }
 0xa5c   : > { %v9961_v4 = vsel %vm721_vm1, %v9837_v0, %v12866_v43  ;;  %v10411_v36 = vpack.c.bf16 %v25127_v56, %v25126_v9  ;;  %v10391_v43 = vpack.c.bf16 %v25129_v55, %v25128_v32  ;;  %v10502_v41 = vsel %vm420_vm13, %v25130_v35, 0  ;;  %v25149_v6 = vld [vmem:[#allocation38_spill] sm:$0xff] }
 0xa5d   : > { %v10430_v57 = vpack.c.bf16 %v9962_v42, %v9961_v4  ;;  %v10374_v46 = vpack.c.bf16 %v25132_v16, %v25131_v8  ;;  %v10414_v28 = vpack.c.bf16 %v25134_v12, %v25133_v49  ;;  %v10505_v53 = vsel %vm420_vm13, %v25137_v23, 0 }
 0xa5e   : > { %10750 = vmatpush1.bf16.xpose.msra.mxu1 %v10389_v20  ;;  %v10526_v44 = vsel %vm420_vm13, %v10391_v43, 0  ;;  %v10381_v34 = vpack.c.bf16 %v25139_v26, %v25138_v47  ;;  %v10361_v31 = vpack.c.bf16 %v25141_v29, %v25140_v7  ;;  %v10401_v17 = vpack.c.bf16 %v25144_v30, %v25143_v22  ;;  %v25150_v20 = vld [vmem:[#allocation211_spill] sm:$0xff] }
 0xa5f   : > { %10751 = vmatprep.subr.bf16.mxu1 %v10393_v52  ;;  %v10384_v2 = vpack.c.bf16 %v25146_v48, %v25145_v3  ;;  %v10364_v60 = vpack.c.bf16 %v25148_v59, %v25147_v50  ;;  %v10404_v51 = vpack.c.bf16 %v25151_v10, %v25150_v20  ;;  %v10514_v52 = vsel %vm420_vm13, %v10371_v11, 0 }
 0xa60   : > { %v10508_v38 = vsel %vm420_vm13, %v10361_v31, 0  ;;  %v10532_v62 = vsel %vm420_vm13, %v10401_v17, 0  ;;  %v10538_v27 = vsel %vm420_vm13, %v10411_v36, 0  ;;  %v10517_v24 = vsel %vm420_vm13, %v10374_v46, 0 }
 0xa61   : > { %10836 = vmatpush1.bf16.xpose.msra.mxu0 %v10429_v58  ;;  %v10511_v33 = vsel %vm420_vm13, %v10364_v60, 0  ;;  %v10535_v1 = vsel %vm420_vm13, %v10404_v51, 0  ;;  %v10541_v15 = vsel %vm420_vm13, %v10414_v28, 0 }
 0xa62   : > { %10837 = vmatprep.subr.bf16.mxu0 %v10428_v54  ;;  %v25135_v54 = vld [vmem:[#allocation72_spill] sm:$0xff] }
 0xa63   : > { %v10394_v39 = vpack.c.bf16 %v25136_v25, %v25135_v54 }
 0xa65   : > { %v10529_v14 = vsel %vm420_vm13, %v10394_v39, 0 }
 0xa66   : > { %10752 = vmatpush1.bf16.xpose.msra.mxu1 %v10392_v40 }
 0xa67   : > { %11571 = vmatprep.subr.msk.bf16.mxu1 %vm420_vm13, %v10371_v11 }
 0xa69   : > { %10838 = vmatpush1.bf16.xpose.msra.mxu0 %v10430_v57 }
 0xa6a   : > { %11579 = vmatprep.subr.msk.bf16.mxu0 %vm420_vm13, %v10411_v36 }
 0xa6d   : > { %10754 = vmatmul.mubr.bf16.vlgmr.msra.gmra.mrb[84].mxu1 %v12964_v18 }
 0xa6e   : > { %11434 = vmatpush3.bf16.xpose.msra.mxu1 %v10502_v41  ;;  %11449 = vmatprep.mubr.msk.bf16.mxu1 %vm420_vm13, %v12965_v13 }
 0xa6f   : > { %11572 = vmatprep.subr.msk.bf16.mxu1 %vm420_vm13, %v10374_v46 }
 0xa70   : > { %10840 = vmatmul.mubr.bf16.vlgmr.msra.gmra.mrb[56].mxu0 %v12964_v18 }
 0xa71   : > { %11452 = vmatpush3.bf16.xpose.msra.mxu0 %v10526_v44  ;;  %11467 = vmatprep.mubr.msk.bf16.mxu0 %vm420_vm13, %v12965_v13 }
 0xa72   : > { %11580 = vmatprep.subr.msk.bf16.mxu0 %vm420_vm13, %v10414_v28 }
 0xa76   : > { %11436 = vmatpush3.bf16.xpose.msra.mxu1 %v10505_v53 }
 0xa77   : > { %11573 = vmatprep.subr.msk.bf16.mxu1 %vm420_vm13, %v10381_v34 }
 0xa79   : > { %11454 = vmatpush3.bf16.xpose.msra.mxu0 %v10529_v14 }
 0xa7a   : > { %11581 = vmatprep.subr.msk.bf16.mxu0 %vm420_vm13, %v25142_v19 }
 0xa7e   : > { %11438 = vmatpush3.bf16.xpose.msra.mxu1 %v10508_v38 }
 0xa7f   : > { %11574 = vmatprep.subr.msk.bf16.mxu1 %vm420_vm13, %v10384_v2 }
 0xa81   : > { %11456 = vmatpush3.bf16.xpose.msra.mxu0 %v10532_v62 }
 0xa82   : > { %11582 = vmatprep.subr.msk.bf16.mxu0 %vm420_vm13, %v25149_v6 }
 0xa86   : > { %11440 = vmatpush3.bf16.xpose.msra.mxu1 %v10511_v33 }
 0xa87   : > { %11575 = vmatprep.subr.msk.bf16.mxu1 %vm420_vm13, %v10381_v34 }
 0xa89   : > { %11458 = vmatpush3.bf16.xpose.msra.mxu0 %v10535_v1 }
 0xa8a   : > { %11583 = vmatprep.subr.msk.bf16.mxu0 %vm420_vm13, %v25142_v19 }
 0xa8e   : > { %11442 = vmatpush3.bf16.xpose.msra.mxu1 %v10508_v38 }
 0xa8f   : > { %11576 = vmatprep.subr.msk.bf16.mxu1 %vm420_vm13, %v10384_v2 }
 0xa91   : > { %11460 = vmatpush3.bf16.xpose.msra.mxu0 %v10532_v62 }
 0xa92   : > { %11584 = vmatprep.subr.msk.bf16.mxu0 %vm420_vm13, %v25149_v6 }
 0xa96   : > { %11444 = vmatpush3.bf16.xpose.msra.mxu1 %v10511_v33 }
 0xa97   : > { %11577 = vmatprep.subr.msk.bf16.mxu1 %vm420_vm13, %v10391_v43 }
 0xa99   : > { %11462 = vmatpush3.bf16.xpose.msra.mxu0 %v10535_v1 }
 0xa9a   : > { %11585 = vmatprep.subr.msk.bf16.mxu0 %vm420_vm13, %v25142_v19 }
 0xa9e   : > { %11446 = vmatpush3.bf16.xpose.msra.mxu1 %v10514_v52 }
 0xa9f   : > { %11578 = vmatprep.subr.msk.bf16.mxu1 %vm420_vm13, %v10394_v39 }
 0xaa1   : > { %11464 = vmatpush3.bf16.xpose.msra.mxu0 %v10538_v27 }
 0xaa2   : > { %11586 = vmatprep.subr.msk.bf16.mxu0 %vm420_vm13, %v25149_v6 }
 0xaa6   : > { %11448 = vmatpush3.bf16.xpose.msra.mxu1 %v10517_v24 }
 0xaa9   : > { %11466 = vmatpush3.bf16.xpose.msra.mxu0 %v10541_v15 }
 0xaad   : > { %11450 = vmatmul.mubr.msk.bf16.vlgmr.msra.gmra.mrb[84].mxu1 %vm420_vm13, %v12965_v13 }
 0xab0   : > { %11468 = vmatmul.mubr.msk.bf16.vlgmr.msra.gmra.mrb[56].mxu0 %vm420_vm13, %v12965_v13 }
 0xab6   : > { %v22353_v21 = vpop.f32.mrb[80].mxu1 }
 0xab7   : > { %v10914_v58 = vmul.f32 %v22353_v21, %v22353_v21  ;;  %v22357_v63 = vpop.f32.mrb[81].mxu1 }
 0xab8   : > { %v10893_v45 = vadd.f32 %v22357_v63, %v22353_v21  ;;  %v10915_v37 = vmul.f32 %v22357_v63, %v22357_v63  ;;  %v22363_v0 = vpop.f32.mrb[82].mxu1 }
 0xab9   : > { %v10922_v40 = vmul.f32 %v22363_v0, %v22363_v0  ;;  %v22367_v4 = vpop.f32.mrb[83].mxu1  ;;  %v22369_v42 = vpop.f32.mrb[52].mxu0 }
 0xaba   : > { %v10930_v61 = vadd.f32 %v10915_v37, %v10914_v58  ;;  %v10902_v5 = vadd.f32 %v22367_v4, %v22363_v0  ;;  %v10923_v11 = vmul.f32 %v22367_v4, %v22367_v4  ;;  %v10894_v57 = vadd.f32 %v10893_v45, %v22369_v42  ;;  %v22376_v9 = vpop.f32.mrb[53].mxu0 }
 0xabb   : > { %v10916_v56 = vmul.f32 %v22369_v42, %v22369_v42  ;;  %v10917_v36 = vmul.f32 %v22376_v9, %v22376_v9  ;;  %v22382_v32 = vpop.f32.mrb[54].mxu0 }
 0xabc   : > { %v10939_v55 = vadd.f32 %v10923_v11, %v10922_v40  ;;  %v10895_v43 = vadd.f32 %v10894_v57, %v22376_v9  ;;  %v10903_v18 = vadd.f32 %v10902_v5, %v22382_v32  ;;  %v10924_v35 = vmul.f32 %v22382_v32, %v22382_v32  ;;  %v22388_v41 = vpop.f32.mrb[55].mxu0 }
 0xabd   : > { %v10931_v8 = vadd.f32 %v10930_v61, %v10916_v56  ;;  %v10925_v16 = vmul.f32 %v22388_v41, %v22388_v41 }
 0xabe   : > { %v10940_v46 = vadd.f32 %v10939_v55, %v10924_v35  ;;  %v10904_v13 = vadd.f32 %v10903_v18, %v22388_v41 }
 0xabf   : > { %v10932_v44 = vadd.f32 %v10931_v8, %v10917_v36 }
 0xac0   : > { %v10941_v49 = vadd.f32 %v10940_v46, %v10925_v16 }
 0xb80   : > { %v22393_v12 = vpop.f32.mrb[84].mxu1 }
 0xb81   : > { %v10896_v28 = vadd.f32 %v10895_v43, %v22393_v12  ;;  %v10918_v54 = vmul.f32 %v22393_v12, %v22393_v12  ;;  %v22398_v25 = vpop.f32.mrb[85].mxu1 }
 0xb82   : > { %v10919_v39 = vmul.f32 %v22398_v25, %v22398_v25  ;;  %v22402_v23 = vpop.f32.mrb[86].mxu1 }
 0xb83   : > { %v10933_v53 = vadd.f32 %v10932_v44, %v10918_v54  ;;  %v10897_v47 = vadd.f32 %v10896_v28, %v22398_v25  ;;  %v10905_v26 = vadd.f32 %v10904_v13, %v22402_v23  ;;  %v10926_v34 = vmul.f32 %v22402_v23, %v22402_v23  ;;  %v22408_v14 = vpop.f32.mrb[87].mxu1  ;;  %v22410_v7 = vpop.f32.mrb[56].mxu0 }
 0xb84   : > { %v10927_v29 = vmul.f32 %v22408_v14, %v22408_v14  ;;  %v10920_v31 = vmul.f32 %v22410_v7, %v22410_v7  ;;  %v22416_v19 = vpop.f32.mrb[57].mxu0 }
 0xb85   : > { %v10934_v22 = vadd.f32 %v10933_v53, %v10919_v39  ;;  %v10942_v30 = vadd.f32 %v10941_v49, %v10926_v34  ;;  %v10906_v17 = vadd.f32 %v10905_v26, %v22408_v14  ;;  %v10898_v38 = vadd.f32 %v10897_v47, %v22410_v7  ;;  %v22420_v3 = vpop.f32.mrb[58].mxu0 }
 0xb86   : > { %v10921_v48 = vmul.f32 %v22416_v19, %v22416_v19  ;;  %v10928_v2 = vmul.f32 %v22420_v3, %v22420_v3  ;;  %v22426_v62 = vpop.f32.mrb[59].mxu0 }
 0xb87   : > { %v10943_v50 = vadd.f32 %v10942_v30, %v10927_v29  ;;  %v10935_v59 = vadd.f32 %v10934_v22, %v10920_v31  ;;  %v10899_v60 = vadd.f32 %v10898_v38, %v22416_v19  ;;  %v10907_v6 = vadd.f32 %v10906_v17, %v22420_v3 }
 0xb88   : > { %v10929_v20 = vmul.f32 %v22426_v62, %v22426_v62 }
 0xb89   : > { %v10944_v10 = vadd.f32 %v10943_v50, %v10928_v2  ;;  %v10908_v51 = vadd.f32 %v10907_v6, %v22426_v62  ;;  %10900 = vadd.xlane.f32.xlu0 %v10899_v60  ;;  %v10936_v33 = vadd.f32 %v10935_v59, %v10921_v48 }
 0xb8b   : > { %v10945_v1 = vadd.f32 %v10944_v10, %v10929_v20  ;;  %10909 = vadd.xlane.f32.xlu1 %v10908_v51 }
 0xb8d   : > { %10937 = vadd.xlane.f32.xlu0 %v10936_v33 }
 0xb91   : > { %10946 = vadd.xlane.f32.xlu0 %v10945_v1 }
 0xc16   : > { %v10901_v52 = vpop.xlane.xlu0 %10900 }
 0xc17   : > { %v10912_v24 = vmul.f32 0.0009765625, %v10901_v52 }
 0xc18   : > { %v10910_v27 = vpop.xlane.xlu1 %10909 }
 0xc19   : > { %v22433_v58 = vmul.f32 0.0009765625, %v10910_v27  ;;  %v10950_v37 = vmul.f32 %v10912_v24, %v10912_v24  ;;  %v10956_v18 = vsub.f32 %v22353_v21, %v10912_v24  ;;  %v10957_v35 = vsub.f32 %v22357_v63, %v10912_v24 }
 0xc1a   : > { %v10938_v15 = vpop.xlane.xlu0 %10937  ;;  %v10958_v8 = vsub.f32 %v22369_v42, %v10912_v24  ;;  %v10959_v16 = vsub.f32 %v22376_v9, %v10912_v24  ;;  %v10960_v46 = vsub.f32 %v22393_v12, %v10912_v24  ;;  %v10961_v13 = vsub.f32 %v22398_v25, %v10912_v24 }
 0xc1b   : > { %v10948_v45 = vmul.f32 0.0009765625, %v10938_v15  ;;  %v10951_v11 = vmul.f32 %v22433_v58, %v22433_v58  ;;  %v10962_v44 = vsub.f32 %v22410_v7, %v10912_v24  ;;  %v10963_v49 = vsub.f32 %v22416_v19, %v10912_v24 }
 0xc1c   : > { %v10964_v28 = vsub.f32 %v22363_v0, %v22433_v58  ;;  %v10965_v21 = vsub.f32 %v22367_v4, %v22433_v58  ;;  %v10966_v63 = vsub.f32 %v22382_v32, %v22433_v58  ;;  %v10967_v42 = vsub.f32 %v22388_v41, %v22433_v58 }
 0xc1d   : > { %v10952_v61 = vsub.f32 %v10948_v45, %v10950_v37  ;;  %v10968_v12 = vsub.f32 %v22402_v23, %v22433_v58  ;;  %v10969_v54 = vsub.f32 %v22408_v14, %v22433_v58  ;;  %v10970_v25 = vsub.f32 %v22420_v3, %v22433_v58 }
 0xc1e   : > { %v10947_v40 = vpop.xlane.xlu0 %10946  ;;  %v10971_v0 = vsub.f32 %v22426_v62, %v22433_v58 }
 0xc1f   : > { %v10949_v5 = vmul.f32 0.0009765625, %v10947_v40  ;;  %v10954_v57 = vmax.f32 %v10952_v61, 0.0 }
 0xc21   : > { %v10953_v56 = vsub.f32 %v10949_v5, %v10951_v11  ;;  %v10972_v36 = vadd.f32 1e-05, %v10954_v57 }
 0xc23   : > { %v10955_v55 = vmax.f32 %v10953_v56, 0.0  ;;  %12959 = vrsqrt.f32 %v10972_v36 }
 0xc25   : > { %v10973_v43 = vadd.f32 1e-05, %v10955_v55 }
 0xc27   : > { %12961 = vrsqrt.f32 %v10973_v43 }
 0xc2d   : > { %v12960_v9 = vpop.eup %12959 }
 0xc2e   : > { %v10976_v4 = vmul.f32 %v12960_v9, %v10956_v18  ;;  %v10977_v39 = vmul.f32 %v12960_v9, %v10957_v35  ;;  %v10978_v53 = vmul.f32 %v12960_v9, %v10958_v8  ;;  %v10979_v32 = vmul.f32 %v12960_v9, %v10959_v16 }
 0xc2f   : > { %v10980_v41 = vmul.f32 %v12960_v9, %v10960_v46  ;;  %v10981_v23 = vmul.f32 %v12960_v9, %v10961_v13  ;;  %v10982_v26 = vmul.f32 %v12960_v9, %v10962_v44  ;;  %v10983_v34 = vmul.f32 %v12960_v9, %v10963_v49 }
 0xc30   : > { %v10992_v14 = vmax.f32 %v10976_v4, 0.0  ;;  %v10993_v7 = vmax.f32 %v10977_v39, 0.0  ;;  %v10994_v29 = vmax.f32 %v10978_v53, 0.0  ;;  %v10995_v31 = vmax.f32 %v10979_v32, 0.0 }
 0xc31   : > { %v12962_v47 = vpop.eup %12961  ;;  %v10996_v19 = vmax.f32 %v10980_v41, 0.0  ;;  %v10997_v22 = vmax.f32 %v10981_v23, 0.0  ;;  %v10998_v30 = vmax.f32 %v10982_v26, 0.0  ;;  %v10999_v17 = vmax.f32 %v10983_v34, 0.0 }
 0xc32   : > { %11008 = vst [vmem:[%s22465_s27] sm:$0xff] %v10992_v14  ;;  %11009 = vst [vmem:[%s22465_s27 + $0x8] sm:$0xff] %v10993_v7  ;;  %v10984_v38 = vmul.f32 %v12962_v47, %v10964_v28  ;;  %v10985_v3 = vmul.f32 %v12962_v47, %v10965_v21  ;;  %v10986_v48 = vmul.f32 %v12962_v47, %v10966_v63 }
 0xc33   : > { %11010 = vst [vmem:[%s22465_s27 + $0x10] sm:$0xff] %v10994_v29  ;;  %11011 = vst [vmem:[%s22465_s27 + $0x18] sm:$0xff] %v10995_v31  ;;  %v10987_v2 = vmul.f32 %v12962_v47, %v10967_v42  ;;  %v10988_v62 = vmul.f32 %v12962_v47, %v10968_v12  ;;  %v10989_v50 = vmul.f32 %v12962_v47, %v10969_v54 }
 0xc34   : > { %11012 = vst [vmem:[%s22465_s27 + $0x20] sm:$0xff] %v10996_v19  ;;  %11013 = vst [vmem:[%s22465_s27 + $0x28] sm:$0xff] %v10997_v22  ;;  %v10990_v59 = vmul.f32 %v12962_v47, %v10970_v25  ;;  %v10991_v60 = vmul.f32 %v12962_v47, %v10971_v0  ;;  %v11000_v6 = vmax.f32 %v10984_v38, 0.0  ;;  %v11001_v20 = vmax.f32 %v10985_v3, 0.0 }
 0xc35   : > { %11014 = vst [vmem:[%s22465_s27 + $0x30] sm:$0xff] %v10998_v30  ;;  %11015 = vst [vmem:[%s22465_s27 + $0x38] sm:$0xff] %v10999_v17  ;;  %v11002_v10 = vmax.f32 %v10986_v48, 0.0  ;;  %v11003_v51 = vmax.f32 %v10987_v2, 0.0  ;;  %v11004_v33 = vmax.f32 %v10988_v62, 0.0  ;;  %v11005_v1 = vmax.f32 %v10989_v50, 0.0 }
 0xc36   : > { %v11006_v52 = vmax.f32 %v10990_v59, 0.0  ;;  %v11007_v27 = vmax.f32 %v10991_v60, 0.0  ;;  %11016 = vst [vmem:[%s22465_s27 + $0x40] sm:$0xff] %v11000_v6  ;;  %11017 = vst [vmem:[%s22465_s27 + $0x48] sm:$0xff] %v11001_v20 }
 0xc37   : > { %11018 = vst [vmem:[%s22465_s27 + $0x50] sm:$0xff] %v11002_v10  ;;  %11019 = vst [vmem:[%s22465_s27 + $0x58] sm:$0xff] %v11003_v51 }
 0xc38   : > { %11020 = vst [vmem:[%s22465_s27 + $0x60] sm:$0xff] %v11004_v33  ;;  %11021 = vst [vmem:[%s22465_s27 + $0x68] sm:$0xff] %v11005_v1 }
 0xc39   : > { %11022 = vst [vmem:[%s22465_s27 + $0x70] sm:$0xff] %v11006_v52  ;;  %11023 = vst [vmem:[%s22465_s27 + $0x78] sm:$0xff] %v11007_v27 }
 0xc3a PF: > { %s16_s21 = sadd.s32 1, %s12972_s21  }
 0xc3b   : > { %p13_p4 = scmp.ge.s32.totalorder %s16_s21, 4  }
 0xc3d   :  { %15 = sbr.rel (!%p13_p4) target bundleno = 1 (0x1), region = 74 }

</bundles_post_ra>
